<compile_context>
chip_gen: v5e
topology: v5e:2x2
jax: 0.10.0
libtpu: 0.0.40
codegen_flags: <defaults>
</compile_context>

<pallas_src>
import functools

import jax
import jax.numpy as jnp
from jax.experimental import pallas as pl
from jax.experimental.pallas import tpu as pltpu


def _round_up(n, m):
    return (n + m - 1) // m * m


# ------------------------------ Pallas kernels ------------------------------

def _matmul_bias_relu_kernel(x_ref, w_ref, b_ref, o_ref):
    y = jnp.dot(x_ref[...], w_ref[...], preferred_element_type=jnp.float32)
    y = jnp.maximum(y + b_ref[...], 0.0)
    o_ref[...] = y.astype(o_ref.dtype)


def matmul_bias_relu(x, w, b, *, out_dtype, tm=512):
    """relu(x @ w + b), gridded over rows of x (double-buffered pipeline, parallel axis)."""
    M, K = x.shape
    K2, N = w.shape
    assert K == K2
    m_pad = _round_up(M, 8)
    if m_pad <= tm:
        tm = m_pad                      # single full block
    else:
        m_pad = _round_up(M, tm)        # pad to a whole number of tiles
    if m_pad != M:
        x = jnp.pad(x, ((0, m_pad - M), (0, 0)))

    out = pl.pallas_call(
        _matmul_bias_relu_kernel,
        out_shape=jax.ShapeDtypeStruct((m_pad, N), out_dtype),
        grid_spec=pltpu.PrefetchScalarGridSpec(
            num_scalar_prefetch=0,
            grid=(m_pad // tm,),
            in_specs=[pl.BlockSpec((tm, K), lambda i: (i, 0)),   # row tile of patches
                      pl.BlockSpec((K, N), lambda i: (0, 0)),    # whole weight, resident
                      pl.BlockSpec((1, N), lambda i: (0, 0))],   # bias
            out_specs=pl.BlockSpec((tm, N), lambda i: (i, 0)),
        ),
        compiler_params=pltpu.CompilerParams(dimension_semantics=("parallel",)),
    )(x, w, b.reshape(1, N))
    return out if m_pad == M else out[:M]


def _fc1_dueling_kernel(x_ref, w1_ref, b1_ref, wva_ref, bva_ref, q_ref):
    # fc1 + ReLU (f32 accumulate), h stays in VMEM/vregs.
    h = jnp.dot(x_ref[...], w1_ref[...], preferred_element_type=jnp.float32)
    h = jnp.maximum(h + b1_ref[...], 0.0)
    # Fused value/advantage matmul: wva = concat([wv, wa], axis=1) -> (512, 1 + A).
    head = jnp.dot(h.astype(jnp.bfloat16), wva_ref[...],
                   preferred_element_type=jnp.float32) + bva_ref[...]
    value = head[:, :1]
    adv = head[:, 1:]
    # Exact PyTorch dueling combine: Q = V + (A - mean(A, axis=1)).
    q_ref[...] = value + (adv - jnp.mean(adv, axis=1, keepdims=True))


def fc1_dueling(flat, w1, b1, wva, bva, *, tm=256):
    M, K = flat.shape
    N1 = w1.shape[1]
    NH = wva.shape[1]
    A = NH - 1
    m_pad = _round_up(M, 8)
    if m_pad <= tm:
        tm = m_pad
    else:
        m_pad = _round_up(M, tm)
    if m_pad != M:
        flat = jnp.pad(flat, ((0, m_pad - M), (0, 0)))

    q = pl.pallas_call(
        _fc1_dueling_kernel,
        out_shape=jax.ShapeDtypeStruct((m_pad, A), jnp.float32),
        grid_spec=pltpu.PrefetchScalarGridSpec(
            num_scalar_prefetch=0,
            grid=(m_pad // tm,),
            in_specs=[pl.BlockSpec((tm, K), lambda i: (i, 0)),   # fc1 input rows
                      pl.BlockSpec((K, N1), lambda i: (0, 0)),   # fc1 weight (3.2 MiB bf16)
                      pl.BlockSpec((1, N1), lambda i: (0, 0)),   # fc1 bias
                      pl.BlockSpec((N1, NH), lambda i: (0, 0)),  # fused V/A weight
                      pl.BlockSpec((1, NH), lambda i: (0, 0))],  # fused V/A bias
            out_specs=pl.BlockSpec((tm, A), lambda i: (i, 0)),
        ),
        compiler_params=pltpu.CompilerParams(dimension_semantics=("parallel",)),
    )(flat, w1, b1.reshape(1, N1), wva, bva.reshape(1, NH))
    return q if m_pad == M else q[:M]


# --------------------------- plain-JAX glue (NHWC) ---------------------------

def extract_patches_nhwc(x, kh, kw, stride):
    """Patches of an NHWC tensor in (kh, kw, Cin) order -> (B*OH*OW, kh*kw*Cin)."""
    B, H, W, C = x.shape
    OH = (H - kh) // stride + 1
    OW = (W - kw) // stride + 1
    slabs = []
    for i in range(kh):
        for j in range(kw):
            slabs.append(x[:, i:i + stride * OH:stride, j:j + stride * OW:stride, :])
    p = jnp.concatenate(slabs, axis=-1)          # (B, OH, OW, kh*kw*C), no transposes
    return p.reshape(B * OH * OW, kh * kw * C), OH, OW


def conv2d_relu_nhwc(x_nhwc, w2d, b, stride, kh, kw):
    """Conv + ReLU on NHWC activations via im2col + Pallas matmul kernel."""
    B = x_nhwc.shape[0]
    cout = w2d.shape[1]
    patches, OH, OW = extract_patches_nhwc(x_nhwc, kh, kw, stride)
    y = matmul_bias_relu(patches, w2d, b, out_dtype=x_nhwc.dtype)
    return y.reshape(B, OH, OW, cout)            # stays NHWC


# ------------------------------- parameters ---------------------------------

def init_params(key, in_channels, num_actions):
    """PyTorch-layout params, U(-1/sqrt(fan_in), 1/sqrt(fan_in)) like nn.Conv2d/Linear."""
    def u(k, fan_in, shape):
        bound = 1.0 / float(fan_in) ** 0.5
        return jax.random.uniform(k, shape, jnp.float32, -bound, bound)

    ks = jax.random.split(key, 12)
    return {
        "conv1_w": u(ks[0], in_channels * 8 * 8, (32, in_channels, 8, 8)),
        "conv1_b": u(ks[1], in_channels * 8 * 8, (32,)),
        "conv2_w": u(ks[2], 32 * 4 * 4, (64, 32, 4, 4)),
        "conv2_b": u(ks[3], 32 * 4 * 4, (64,)),
        "conv3_w": u(ks[4], 64 * 3 * 3, (64, 64, 3, 3)),
        "conv3_b": u(ks[5], 64 * 3 * 3, (64,)),
        "fc1_w":   u(ks[6], 64 * 7 * 7, (64 * 7 * 7, 512)),   # rows in NCHW (C,H,W) order
        "fc1_b":   u(ks[7], 64 * 7 * 7, (512,)),
        "value_w": u(ks[8], 512, (512, 1)),
        "value_b": u(ks[9], 512, (1,)),
        "adv_w":   u(ks[10], 512, (512, num_actions)),
        "adv_b":   u(ks[11], 512, (num_actions,)),
    }


def prepare_params(p):
    """One-time prep: NHWC-ordered, matmul-ready, bf16 weights (f32 biases)."""
    def conv_w(w_oihw):
        cout, cin, kh, kw = w_oihw.shape
        # (Cout, Cin, KH, KW) -> (KH, KW, Cin, Cout) -> (KH*KW*Cin, Cout)
        return (jnp.transpose(w_oihw, (2, 3, 1, 0))
                .reshape(kh * kw * cin, cout).astype(jnp.bfloat16))

    # fc1 rows are (C,H,W)-ordered for the PyTorch NCHW flatten; reorder to (H,W,C)
    # so they match the NHWC flatten used here.
    fc1_w = (p["fc1_w"].reshape(64, 7, 7, 512)
             .transpose(1, 2, 0, 3).reshape(64 * 7 * 7, 512).astype(jnp.bfloat16))
    head_w = jnp.concatenate([p["value_w"], p["adv_w"]], axis=1).astype(jnp.bfloat16)
    head_b = jnp.concatenate([p["value_b"], p["adv_b"]], axis=0)
    return {
        "conv1_w": conv_w(p["conv1_w"]), "conv1_b": p["conv1_b"],
        "conv2_w": conv_w(p["conv2_w"]), "conv2_b": p["conv2_b"],
        "conv3_w": conv_w(p["conv3_w"]), "conv3_b": p["conv3_b"],
        "fc1_w": fc1_w, "fc1_b": p["fc1_b"],
        "head_w": head_w, "head_b": head_b,
    }


# -------------------------------- forward -----------------------------------

def dueling_dqn_forward(prepped, x_nchw):
    # x: (B, C, 84, 84) f32 NCHW (same interface as the PyTorch module).
    x = jnp.transpose(x_nchw, (0, 2, 3, 1)).astype(jnp.bfloat16)             # NHWC, bf16
    h = conv2d_relu_nhwc(x, prepped["conv1_w"], prepped["conv1_b"], 4, 8, 8)  # (B,20,20,32)
    h = conv2d_relu_nhwc(h, prepped["conv2_w"], prepped["conv2_b"], 2, 4, 4)  # (B, 9, 9,64)
    h = conv2d_relu_nhwc(h, prepped["conv3_w"], prepped["conv3_b"], 1, 3, 3)  # (B, 7, 7,64)
    B = h.shape[0]
    flat = h.reshape(B, 7 * 7 * 64)   # NHWC flatten; fc1_w rows were permuted to match
    return fc1_dueling(flat, prepped["fc1_w"], prepped["fc1_b"],
                       prepped["head_w"], prepped["head_b"])                  # (B, A) f32


if __name__ == "__main__":
    key = jax.random.PRNGKey(0)
    k_x, k_p = jax.random.split(key)
    batch, channels, num_actions = 2, 4, 6
    # The module hard-codes Linear(64*7*7, 512), which implies 84x84 spatial inputs.
    x = jax.random.uniform(k_x, (batch, channels, 84, 84), jnp.float32)
    params = init_params(k_p, channels, num_actions)
    prepped = prepare_params(params)

    q = jax.jit(dueling_dqn_forward)(prepped, x)
    q = jax.block_until_ready(q)
    assert q.shape == (batch, num_actions) and q.dtype == jnp.float32
    print("KERNEL_OK")
</pallas_src>

<mosaic_0001>
module attributes {stable_mosaic.version = 11 : i64} {
  func.func @_matmul_bias_relu_kernel(%arg0: i32, %arg1: memref<512x256xbf16, #tpu.memory_space<vmem>>, %arg2: memref<256x32xbf16, #tpu.memory_space<vmem>>, %arg3: memref<1x32xf32, #tpu.memory_space<vmem>>, %arg4: memref<512x32xbf16, #tpu.memory_space<vmem>>) attributes {dimension_semantics = [#tpu.dimension_semantics<parallel>], iteration_bounds = array<i64: 2>, scalar_prefetch = 0 : i64, scratch_operands = 0 : i64, tpu.core_type = #tpu.core_type<tc>, window_params = [{transform_indices = @transform_0, window_bounds = array<i64: 512, 256>}, {pipeline_mode = #tpu.pipeline_mode<synchronous>, transform_indices = @transform_1, window_bounds = array<i64: 256, 32>}, {pipeline_mode = #tpu.pipeline_mode<synchronous>, transform_indices = @transform_2, window_bounds = array<i64: 1, 32>}, {transform_indices = @transform_3, window_bounds = array<i64: 512, 32>}]} {
    %c0 = arith.constant 0 : index
    %c0_0 = arith.constant 0 : index
    %0 = vector.load %arg1[%c0, %c0_0] : memref<512x256xbf16, #tpu.memory_space<vmem>>, vector<512x256xbf16>
    %c0_1 = arith.constant 0 : index
    %c0_2 = arith.constant 0 : index
    %1 = vector.load %arg2[%c0_1, %c0_2] : memref<256x32xbf16, #tpu.memory_space<vmem>>, vector<256x32xbf16>
    %cst = arith.constant dense<0.000000e+00> : vector<512x32xf32>
    %2 = tpu.matmul %0, %1, %cst {dimension_numbers = #tpu.dot_dimension_numbers<[1], [0], [0], [1], [0, 0, 1, 1], [], []>} : vector<512x256xbf16>, vector<256x32xbf16>, vector<512x32xf32> -> vector<512x32xf32>
    %c0_3 = arith.constant 0 : index
    %c0_4 = arith.constant 0 : index
    %3 = vector.load %arg3[%c0_3, %c0_4] : memref<1x32xf32, #tpu.memory_space<vmem>>, vector<1x32xf32>
    %4 = vector.broadcast %3 : vector<1x32xf32> to vector<512x32xf32>
    %5 = arith.addf %2, %4 : vector<512x32xf32>
    %cst_5 = arith.constant 0.000000e+00 : f32
    %6 = vector.broadcast %cst_5 : f32 to vector<512x32xf32>
    %7 = arith.maximumf %5, %6 : vector<512x32xf32>
    %8 = arith.truncf %7 : vector<512x32xf32> to vector<512x32xbf16>
    %c0_6 = arith.constant 0 : index
    %c0_7 = arith.constant 0 : index
    %9 = vector.load %arg4[%c0_6, %c0_7] : memref<512x32xbf16, #tpu.memory_space<vmem>>, vector<512x32xbf16>
    tpu.vector_store %arg4[%c0_6, %c0_7], %8 {strides = array<i32>} : memref<512x32xbf16, #tpu.memory_space<vmem>>, vector<512x32xbf16>,
    return
  }
  func.func @transform_0(%arg0: i32) -> (i32, i32) {
    %c0_i32 = arith.constant 0 : i32
    %c0_i32_0 = arith.constant 0 : i32
    return %arg0, %c0_i32 : i32, i32
  }
  func.func @transform_1(%arg0: i32) -> (i32, i32) {
    %c0_i32 = arith.constant 0 : i32
    %c0_i32_0 = arith.constant 0 : i32
    %c0_i32_1 = arith.constant 0 : i32
    return %c0_i32, %c0_i32_0 : i32, i32
  }
  func.func @transform_2(%arg0: i32) -> (i32, i32) {
    %c0_i32 = arith.constant 0 : i32
    %c0_i32_0 = arith.constant 0 : i32
    %c0_i32_1 = arith.constant 0 : i32
    return %c0_i32, %c0_i32_0 : i32, i32
  }
  func.func @transform_3(%arg0: i32) -> (i32, i32) {
    %c0_i32 = arith.constant 0 : i32
    %c0_i32_0 = arith.constant 0 : i32
    return %arg0, %c0_i32 : i32, i32
  }
}

module attributes {stable_mosaic.version = 11 : i64} {
  func.func @_matmul_bias_relu_kernel(%arg0: i32, %arg1: memref<168x512xbf16, #tpu.memory_space<vmem>>, %arg2: memref<512x64xbf16, #tpu.memory_space<vmem>>, %arg3: memref<1x64xf32, #tpu.memory_space<vmem>>, %arg4: memref<168x64xbf16, #tpu.memory_space<vmem>>) attributes {dimension_semantics = [#tpu.dimension_semantics<parallel>], iteration_bounds = array<i64: 1>, scalar_prefetch = 0 : i64, scratch_operands = 0 : i64, tpu.core_type = #tpu.core_type<tc>, window_params = [{transform_indices = @transform_0, window_bounds = array<i64: 168, 512>}, {pipeline_mode = #tpu.pipeline_mode<synchronous>, transform_indices = @transform_1, window_bounds = array<i64: 512, 64>}, {pipeline_mode = #tpu.pipeline_mode<synchronous>, transform_indices = @transform_2, window_bounds = array<i64: 1, 64>}, {transform_indices = @transform_3, window_bounds = array<i64: 168, 64>}]} {
    %c0 = arith.constant 0 : index
    %c0_0 = arith.constant 0 : index
    %0 = vector.load %arg1[%c0, %c0_0] : memref<168x512xbf16, #tpu.memory_space<vmem>>, vector<168x512xbf16>
    %c0_1 = arith.constant 0 : index
    %c0_2 = arith.constant 0 : index
    %1 = vector.load %arg2[%c0_1, %c0_2] : memref<512x64xbf16, #tpu.memory_space<vmem>>, vector<512x64xbf16>
    %cst = arith.constant dense<0.000000e+00> : vector<168x64xf32>
    %2 = tpu.matmul %0, %1, %cst {dimension_numbers = #tpu.dot_dimension_numbers<[1], [0], [0], [1], [0, 0, 1, 1], [], []>} : vector<168x512xbf16>, vector<512x64xbf16>, vector<168x64xf32> -> vector<168x64xf32>
    %c0_3 = arith.constant 0 : index
    %c0_4 = arith.constant 0 : index
    %3 = vector.load %arg3[%c0_3, %c0_4] : memref<1x64xf32, #tpu.memory_space<vmem>>, vector<1x64xf32>
    %4 = vector.broadcast %3 : vector<1x64xf32> to vector<168x64xf32>
    %5 = arith.addf %2, %4 : vector<168x64xf32>
    %cst_5 = arith.constant 0.000000e+00 : f32
    %6 = vector.broadcast %cst_5 : f32 to vector<168x64xf32>
    %7 = arith.maximumf %5, %6 : vector<168x64xf32>
    %8 = arith.truncf %7 : vector<168x64xf32> to vector<168x64xbf16>
    %c0_6 = arith.constant 0 : index
    %c0_7 = arith.constant 0 : index
    %9 = vector.load %arg4[%c0_6, %c0_7] : memref<168x64xbf16, #tpu.memory_space<vmem>>, vector<168x64xbf16>
    tpu.vector_store %arg4[%c0_6, %c0_7], %8 {strides = array<i32>} : memref<168x64xbf16, #tpu.memory_space<vmem>>, vector<168x64xbf16>,
    return
  }
  func.func @transform_0(%arg0: i32) -> (i32, i32) {
    %c0_i32 = arith.constant 0 : i32
    %c0_i32_0 = arith.constant 0 : i32
    return %arg0, %c0_i32 : i32, i32
  }
  func.func @transform_1(%arg0: i32) -> (i32, i32) {
    %c0_i32 = arith.constant 0 : i32
    %c0_i32_0 = arith.constant 0 : i32
    %c0_i32_1 = arith.constant 0 : i32
    return %c0_i32, %c0_i32_0 : i32, i32
  }
  func.func @transform_2(%arg0: i32) -> (i32, i32) {
    %c0_i32 = arith.constant 0 : i32
    %c0_i32_0 = arith.constant 0 : i32
    %c0_i32_1 = arith.constant 0 : i32
    return %c0_i32, %c0_i32_0 : i32, i32
  }
  func.func @transform_3(%arg0: i32) -> (i32, i32) {
    %c0_i32 = arith.constant 0 : i32
    %c0_i32_0 = arith.constant 0 : i32
    return %arg0, %c0_i32 : i32, i32
  }
}

module attributes {stable_mosaic.version = 11 : i64} {
  func.func @_matmul_bias_relu_kernel(%arg0: i32, %arg1: memref<104x576xbf16, #tpu.memory_space<vmem>>, %arg2: memref<576x64xbf16, #tpu.memory_space<vmem>>, %arg3: memref<1x64xf32, #tpu.memory_space<vmem>>, %arg4: memref<104x64xbf16, #tpu.memory_space<vmem>>) attributes {dimension_semantics = [#tpu.dimension_semantics<parallel>], iteration_bounds = array<i64: 1>, scalar_prefetch = 0 : i64, scratch_operands = 0 : i64, tpu.core_type = #tpu.core_type<tc>, window_params = [{transform_indices = @transform_0, window_bounds = array<i64: 104, 576>}, {pipeline_mode = #tpu.pipeline_mode<synchronous>, transform_indices = @transform_1, window_bounds = array<i64: 576, 64>}, {pipeline_mode = #tpu.pipeline_mode<synchronous>, transform_indices = @transform_2, window_bounds = array<i64: 1, 64>}, {transform_indices = @transform_3, window_bounds = array<i64: 104, 64>}]} {
    %c0 = arith.constant 0 : index
    %c0_0 = arith.constant 0 : index
    %0 = vector.load %arg1[%c0, %c0_0] : memref<104x576xbf16, #tpu.memory_space<vmem>>, vector<104x576xbf16>
    %c0_1 = arith.constant 0 : index
    %c0_2 = arith.constant 0 : index
    %1 = vector.load %arg2[%c0_1, %c0_2] : memref<576x64xbf16, #tpu.memory_space<vmem>>, vector<576x64xbf16>
    %cst = arith.constant dense<0.000000e+00> : vector<104x64xf32>
    %2 = tpu.matmul %0, %1, %cst {dimension_numbers = #tpu.dot_dimension_numbers<[1], [0], [0], [1], [0, 0, 1, 1], [], []>} : vector<104x576xbf16>, vector<576x64xbf16>, vector<104x64xf32> -> vector<104x64xf32>
    %c0_3 = arith.constant 0 : index
    %c0_4 = arith.constant 0 : index
    %3 = vector.load %arg3[%c0_3, %c0_4] : memref<1x64xf32, #tpu.memory_space<vmem>>, vector<1x64xf32>
    %4 = vector.broadcast %3 : vector<1x64xf32> to vector<104x64xf32>
    %5 = arith.addf %2, %4 : vector<104x64xf32>
    %cst_5 = arith.constant 0.000000e+00 : f32
    %6 = vector.broadcast %cst_5 : f32 to vector<104x64xf32>
    %7 = arith.maximumf %5, %6 : vector<104x64xf32>
    %8 = arith.truncf %7 : vector<104x64xf32> to vector<104x64xbf16>
    %c0_6 = arith.constant 0 : index
    %c0_7 = arith.constant 0 : index
    %9 = vector.load %arg4[%c0_6, %c0_7] : memref<104x64xbf16, #tpu.memory_space<vmem>>, vector<104x64xbf16>
    tpu.vector_store %arg4[%c0_6, %c0_7], %8 {strides = array<i32>} : memref<104x64xbf16, #tpu.memory_space<vmem>>, vector<104x64xbf16>,
    return
  }
  func.func @transform_0(%arg0: i32) -> (i32, i32) {
    %c0_i32 = arith.constant 0 : i32
    %c0_i32_0 = arith.constant 0 : i32
    return %arg0, %c0_i32 : i32, i32
  }
  func.func @transform_1(%arg0: i32) -> (i32, i32) {
    %c0_i32 = arith.constant 0 : i32
    %c0_i32_0 = arith.constant 0 : i32
    %c0_i32_1 = arith.constant 0 : i32
    return %c0_i32, %c0_i32_0 : i32, i32
  }
  func.func @transform_2(%arg0: i32) -> (i32, i32) {
    %c0_i32 = arith.constant 0 : i32
    %c0_i32_0 = arith.constant 0 : i32
    %c0_i32_1 = arith.constant 0 : i32
    return %c0_i32, %c0_i32_0 : i32, i32
  }
  func.func @transform_3(%arg0: i32) -> (i32, i32) {
    %c0_i32 = arith.constant 0 : i32
    %c0_i32_0 = arith.constant 0 : i32
    return %arg0, %c0_i32 : i32, i32
  }
}

module attributes {stable_mosaic.version = 11 : i64} {
  func.func @_fc1_dueling_kernel(%arg0: i32, %arg1: memref<8x3136xbf16, #tpu.memory_space<vmem>>, %arg2: memref<3136x512xbf16, #tpu.memory_space<vmem>>, %arg3: memref<1x512xf32, #tpu.memory_space<vmem>>, %arg4: memref<512x7xbf16, #tpu.memory_space<vmem>>, %arg5: memref<1x7xf32, #tpu.memory_space<vmem>>, %arg6: memref<8x6xf32, #tpu.memory_space<vmem>>) attributes {dimension_semantics = [#tpu.dimension_semantics<parallel>], iteration_bounds = array<i64: 1>, scalar_prefetch = 0 : i64, scratch_operands = 0 : i64, tpu.core_type = #tpu.core_type<tc>, window_params = [{transform_indices = @transform_0, window_bounds = array<i64: 8, 3136>}, {pipeline_mode = #tpu.pipeline_mode<synchronous>, transform_indices = @transform_1, window_bounds = array<i64: 3136, 512>}, {pipeline_mode = #tpu.pipeline_mode<synchronous>, transform_indices = @transform_2, window_bounds = array<i64: 1, 512>}, {pipeline_mode = #tpu.pipeline_mode<synchronous>, transform_indices = @transform_3, window_bounds = array<i64: 512, 7>}, {pipeline_mode = #tpu.pipeline_mode<synchronous>, transform_indices = @transform_4, window_bounds = array<i64: 1, 7>}, {transform_indices = @transform_5, window_bounds = array<i64: 8, 6>}]} {
    %c0 = arith.constant 0 : index
    %c0_0 = arith.constant 0 : index
    %0 = vector.load %arg1[%c0, %c0_0] : memref<8x3136xbf16, #tpu.memory_space<vmem>>, vector<8x3136xbf16>
    %c0_1 = arith.constant 0 : index
    %c0_2 = arith.constant 0 : index
    %1 = vector.load %arg2[%c0_1, %c0_2] : memref<3136x512xbf16, #tpu.memory_space<vmem>>, vector<3136x512xbf16>
    %cst = arith.constant dense<0.000000e+00> : vector<8x512xf32>
    %2 = tpu.matmul %0, %1, %cst {dimension_numbers = #tpu.dot_dimension_numbers<[1], [0], [0], [1], [0, 0, 1, 1], [], []>} : vector<8x3136xbf16>, vector<3136x512xbf16>, vector<8x512xf32> -> vector<8x512xf32>
    %c0_3 = arith.constant 0 : index
    %c0_4 = arith.constant 0 : index
    %3 = vector.load %arg3[%c0_3, %c0_4] : memref<1x512xf32, #tpu.memory_space<vmem>>, vector<1x512xf32>
    %4 = vector.broadcast %3 : vector<1x512xf32> to vector<8x512xf32>
    %5 = arith.addf %2, %4 : vector<8x512xf32>
    %cst_5 = arith.constant 0.000000e+00 : f32
    %6 = vector.broadcast %cst_5 : f32 to vector<8x512xf32>
    %7 = arith.maximumf %5, %6 : vector<8x512xf32>
    %8 = arith.truncf %7 : vector<8x512xf32> to vector<8x512xbf16>
    %c0_6 = arith.constant 0 : index
    %c0_7 = arith.constant 0 : index
    %9 = vector.load %arg4[%c0_6, %c0_7] : memref<512x7xbf16, #tpu.memory_space<vmem>>, vector<512x7xbf16>
    %cst_8 = arith.constant dense<0.000000e+00> : vector<8x7xf32>
    %10 = tpu.matmul %8, %9, %cst_8 {dimension_numbers = #tpu.dot_dimension_numbers<[1], [0], [0], [1], [0, 0, 1, 1], [], []>} : vector<8x512xbf16>, vector<512x7xbf16>, vector<8x7xf32> -> vector<8x7xf32>
    %c0_9 = arith.constant 0 : index
    %c0_10 = arith.constant 0 : index
    %11 = vector.load %arg5[%c0_9, %c0_10] : memref<1x7xf32, #tpu.memory_space<vmem>>, vector<1x7xf32>
    %12 = vector.broadcast %11 : vector<1x7xf32> to vector<8x7xf32>
    %13 = arith.addf %10, %12 : vector<8x7xf32>
    %14 = vector.extract_strided_slice %13 {offsets = [0, 0], sizes = [8, 1], strides = [1, 1]} : vector<8x7xf32> to vector<8x1xf32>
    %15 = vector.extract_strided_slice %13 {offsets = [0, 1], sizes = [8, 6], strides = [1, 1]} : vector<8x7xf32> to vector<8x6xf32>
    %cst_11 = arith.constant dense<0.000000e+00> : vector<8xf32>
    %16 = vector.multi_reduction <add>, %15, %cst_11 [1] : vector<8x6xf32> to vector<8xf32>
    %17 = vector.shape_cast %16 : vector<8xf32> to vector<8x1xf32>
    %cst_12 = arith.constant 6.000000e+00 : f32
    %18 = vector.broadcast %cst_12 : f32 to vector<8x1xf32>
    %19 = arith.divf %17, %18 : vector<8x1xf32>
    %20 = vector.broadcast %19 : vector<8x1xf32> to vector<8x6xf32>
    %21 = arith.subf %15, %20 : vector<8x6xf32>
    %22 = vector.broadcast %14 : vector<8x1xf32> to vector<8x6xf32>
    %23 = arith.addf %22, %21 : vector<8x6xf32>
    %c0_13 = arith.constant 0 : index
    %c0_14 = arith.constant 0 : index
    %24 = vector.load %arg6[%c0_13, %c0_14] : memref<8x6xf32, #tpu.memory_space<vmem>>, vector<8x6xf32>
    tpu.vector_store %arg6[%c0_13, %c0_14], %23 {strides = array<i32>} : memref<8x6xf32, #tpu.memory_space<vmem>>, vector<8x6xf32>,
    return
  }
  func.func @transform_0(%arg0: i32) -> (i32, i32) {
    %c0_i32 = arith.constant 0 : i32
    %c0_i32_0 = arith.constant 0 : i32
    return %arg0, %c0_i32 : i32, i32
  }
  func.func @transform_1(%arg0: i32) -> (i32, i32) {
    %c0_i32 = arith.constant 0 : i32
    %c0_i32_0 = arith.constant 0 : i32
    %c0_i32_1 = arith.constant 0 : i32
    return %c0_i32, %c0_i32_0 : i32, i32
  }
  func.func @transform_2(%arg0: i32) -> (i32, i32) {
    %c0_i32 = arith.constant 0 : i32
    %c0_i32_0 = arith.constant 0 : i32
    %c0_i32_1 = arith.constant 0 : i32
    return %c0_i32, %c0_i32_0 : i32, i32
  }
  func.func @transform_3(%arg0: i32) -> (i32, i32) {
    %c0_i32 = arith.constant 0 : i32
    %c0_i32_0 = arith.constant 0 : i32
    %c0_i32_1 = arith.constant 0 : i32
    return %c0_i32, %c0_i32_0 : i32, i32
  }
  func.func @transform_4(%arg0: i32) -> (i32, i32) {
    %c0_i32 = arith.constant 0 : i32
    %c0_i32_0 = arith.constant 0 : i32
    %c0_i32_1 = arith.constant 0 : i32
    return %c0_i32, %c0_i32_0 : i32, i32
  }
  func.func @transform_5(%arg0: i32) -> (i32, i32) {
    %c0_i32 = arith.constant 0 : i32
    %c0_i32_0 = arith.constant 0 : i32
    return %arg0, %c0_i32 : i32, i32
  }
}

</mosaic_0001>

<bundles_post_ra>
// kernel: dueling_dqn_forward.4
= control target key start
LH: loop header
LB: loop body
LE: loop exit
PB: predicated region body
PF: predicated region fallthrough
CT: control target
= control target key end

     0   :  { %s1747_s12 = smov 0   ;;  %s2139_s0 = inlined_call_operand.vmem [shape: bf16[1024,256], index: 0, kind: input, shape index: {}]   ;;  %s2140_s1 = inlined_call_operand.vmem [shape: bf16[256,32], index: 1, kind: input, shape index: {}]   ;;  %s2141_s2 = inlined_call_operand.vmem [shape: f32[1,32], index: 2, kind: input, shape index: {}]   ;;  %s2142_s3 = inlined_call_operand.vmem [shape: bf16[1024,32], index: 3, kind: output, shape index: {}]  }
   0x1 LB: > { %s1280_s13 = sadd.s32 4294967295, %s1725_s12   ;;  %p1284_p0 = scmp.ge.s32.totalorder %s1725_s12, 1  ;;  %s1725_s12 = sphi %s1747_s12, %s13_s12  }
   0x2   : > { %p139_p1 = scmp.lt.s32.totalorder %s1725_s12, 3 }
   0x4   : > { %p140_p2 = pnand %p1284_p0, %p139_p1 }
   0x5   : > { %s1285_s26 = sshll.u32 (!%p140_p2), %s1280_s13, 6 }
   0x6   : > { %143 = sbr.rel (%p140_p2) target bundleno = 432 (0x1b0), region = 32  ;;  %p165_p3 = scmp.lt.s32.totalorder (!%p140_p2), %s1285_s26, 127 }
   0xb   : > { %v1684_v0 = vld [vmem:[%s2140_s1 + $0x38] sm:$0xff]  ;;  %v1683_v2 = vld [vmem:[%s2140_s1 + $0x30] sm:$0xff]  ;;  %v1682_v4 = vld [vmem:[%s2140_s1 + $0x28] sm:$0xff]  ;;  %s2144_s26 = smov (!%p165_p3, %s1285_s26), 127  ;;  %vm1159_vm0 = vcmask 257024  }
   0xc   : > { %v1692_v1 = vld [vmem:[%s2140_s1 + $0x78] sm:$0xff]  ;;  %693 = vmatpush.bf16.msra.mxu0 %v1684_v0  ;;  %1693 = vmatpush.bf16.msra.mxu2 %v1684_v0  ;;  %v1691_v3 = vld [vmem:[%s2140_s1 + $0x70] sm:$0xff]  ;;  %v1690_v5 = vld [vmem:[%s2140_s1 + $0x68] sm:$0xff]  ;;  %s1612_s13 = sshll.u32 %s2144_s26, 3  ;;  %s1289_s28 = sshll.u32 %s2144_s26, 2 }
   0xd   : > { %862 = vmatpush.bf16.msra.mxu1 %v1692_v1  ;;  %1701 = vmatpush.bf16.msra.mxu3 %v1692_v1  ;;  %v1681_v6 = vld [vmem:[%s2140_s1 + $0x20] sm:$0xff]  ;;  %v1680_v8 = vld [vmem:[%s2140_s1 + $0x18] sm:$0xff]  ;;  %v1679_v10 = vld [vmem:[%s2140_s1 + $0x10] sm:$0xff]  ;;  %s1800_s18 = scalar_lea.vmem %s2139_s0, %s1612_s13  ;;  %s1893_s4 = scalar_lea.vmem %s2142_s3, %s1289_s28 }
   0xe   : > { %v1689_v7 = vld [vmem:[%s2140_s1 + $0x60] sm:$0xff]  ;;  %v1688_v9 = vld [vmem:[%s2140_s1 + $0x58] sm:$0xff]  ;;  %v1687_v11 = vld [vmem:[%s2140_s1 + $0x50] sm:$0xff] }
   0xf   : > { %v1678_v12 = vld [vmem:[%s2140_s1 + $0x8] sm:$0xff]  ;;  %v1677_v14 = vld [vmem:[%s2140_s1] sm:$0xff]  ;;  %v1300_v28 = vld [vmem:[%s1800_s18 + $0x10] sm:$0xf] }
  0x10   : > { %694 = vmatpush.bf16.msra.mxu0 %v1683_v2  ;;  %1694 = vmatpush.bf16.msra.mxu2 %v1683_v2  ;;  %v1686_v13 = vld [vmem:[%s2140_s1 + $0x48] sm:$0xff]  ;;  %v1685_v15 = vld [vmem:[%s2140_s1 + $0x40] sm:$0xff]  ;;  %v1616_v29 = vld [vmem:[%s1800_s18 + $0x14] sm:$0xf0] }
  0x11   : > { %863 = vmatpush.bf16.msra.mxu1 %v1691_v3  ;;  %1702 = vmatpush.bf16.msra.mxu3 %v1691_v3  ;;  %v1292_v16 = vld [vmem:[%s1800_s18] sm:$0xf]  ;;  %v1614_v17 = vld [vmem:[%s1800_s18 + $0x4] sm:$0xf0]  ;;  %v1613_v20 = vld [vmem:[%s1800_s18 + $0x4] sm:$0xf]  ;;  %v1301_v36 = vor.u32 %v1616_v29, %v1300_v28 }
  0x12   : > { %v1420_v18 = vld [vmem:[%s1800_s18 + $0x100] sm:$0xf]  ;;  %v1646_v19 = vld [vmem:[%s1800_s18 + $0x104] sm:$0xf0]  ;;  %v1294_v21 = vld [vmem:[%s1800_s18 + $0x8] sm:$0xf0]  ;;  %v1293_v24 = vor.u32 %v1614_v17, %v1292_v16 }
  0x13   : > { %v1645_v22 = vld [vmem:[%s1800_s18 + $0x104] sm:$0xf]  ;;  %v1422_v23 = vld [vmem:[%s1800_s18 + $0x108] sm:$0xf0]  ;;  %v1421_v25 = vor.u32 %v1646_v19, %v1420_v18  ;;  %v1297_v26 = vor.u32 %v1613_v20, %v1294_v21  ;;  %v1428_v30 = vld [vmem:[%s1800_s18 + $0x110] sm:$0xf] }
  0x14   : > { %695 = vmatpush.bf16.msra.mxu0 %v1682_v4  ;;  %1695 = vmatpush.bf16.msra.mxu2 %v1682_v4  ;;  %v1425_v27 = vor.u32 %v1645_v22, %v1422_v23  ;;  %v1648_v31 = vld [vmem:[%s1800_s18 + $0x114] sm:$0xf0]  ;;  %v1615_v32 = vld [vmem:[%s1800_s18 + $0x14] sm:$0xf]  ;;  %v1302_v33 = vld [vmem:[%s1800_s18 + $0x18] sm:$0xf0] }
  0x15   : > { %864 = vmatpush.bf16.msra.mxu1 %v1690_v5  ;;  %1703 = vmatpush.bf16.msra.mxu3 %v1690_v5  ;;  %v1647_v34 = vld [vmem:[%s1800_s18 + $0x114] sm:$0xf]  ;;  %v1430_v35 = vld [vmem:[%s1800_s18 + $0x118] sm:$0xf0]  ;;  %v1429_v37 = vor.u32 %v1648_v31, %v1428_v30  ;;  %v1305_v38 = vor.u32 %v1615_v32, %v1302_v33  ;;  %v1308_v40 = vld [vmem:[%s1800_s18 + $0x20] sm:$0xf] }
  0x16   : > { %v1433_v39 = vor.u32 %v1647_v34, %v1430_v35  ;;  %v1618_v41 = vld [vmem:[%s1800_s18 + $0x24] sm:$0xf0]  ;;  %v1436_v42 = vld [vmem:[%s1800_s18 + $0x120] sm:$0xf]  ;;  %v1617_v44 = vld [vmem:[%s1800_s18 + $0x24] sm:$0xf] }
  0x17   : > { %v1650_v43 = vld [vmem:[%s1800_s18 + $0x124] sm:$0xf0]  ;;  %v1310_v45 = vld [vmem:[%s1800_s18 + $0x28] sm:$0xf0]  ;;  %v1649_v46 = vld [vmem:[%s1800_s18 + $0x124] sm:$0xf]  ;;  %v1309_v48 = vor.u32 %v1618_v41, %v1308_v40 }
  0x18   : > { %696 = vmatpush.bf16.msra.mxu0 %v1681_v6  ;;  %1696 = vmatpush.bf16.msra.mxu2 %v1681_v6  ;;  %v1438_v47 = vld [vmem:[%s1800_s18 + $0x128] sm:$0xf0]  ;;  %v1437_v49 = vor.u32 %v1650_v43, %v1436_v42  ;;  %v1313_v50 = vor.u32 %v1617_v44, %v1310_v45  ;;  %v1316_v52 = vld [vmem:[%s1800_s18 + $0x30] sm:$0xf]  ;;  %v1620_v53 = vld [vmem:[%s1800_s18 + $0x34] sm:$0xf0] }
  0x19   : > { %865 = vmatpush.bf16.msra.mxu1 %v1689_v7  ;;  %1704 = vmatpush.bf16.msra.mxu3 %v1689_v7  ;;  %v1441_v51 = vor.u32 %v1649_v46, %v1438_v47  ;;  %v1444_v54 = vld [vmem:[%s1800_s18 + $0x130] sm:$0xf]  ;;  %v1652_v55 = vld [vmem:[%s1800_s18 + $0x134] sm:$0xf0]  ;;  %v1619_v56 = vld [vmem:[%s1800_s18 + $0x34] sm:$0xf]  ;;  %v1317_v60 = vor.u32 %v1620_v53, %v1316_v52 }
  0x1a   : > { %v1318_v57 = vld [vmem:[%s1800_s18 + $0x38] sm:$0xf0]  ;;  %v1651_v58 = vld [vmem:[%s1800_s18 + $0x134] sm:$0xf]  ;;  %v1445_v61 = vor.u32 %v1652_v55, %v1444_v54  ;;  %v1324_v0 = vld [vmem:[%s1800_s18 + $0x40] sm:$0xf] }
  0x1b   : > { %v1446_v59 = vld [vmem:[%s1800_s18 + $0x138] sm:$0xf0]  ;;  %v1321_v62 = vor.u32 %v1619_v56, %v1318_v57  ;;  %v1622_v1 = vld [vmem:[%s1800_s18 + $0x44] sm:$0xf0]  ;;  %v1452_v2 = vld [vmem:[%s1800_s18 + $0x140] sm:$0xf] }
  0x1c   : > { %697 = vmatpush.bf16.msra.mxu0 %v1680_v8  ;;  %1697 = vmatpush.bf16.msra.mxu2 %v1680_v8  ;;  %v1449_v63 = vor.u32 %v1651_v58, %v1446_v59  ;;  %v1654_v3 = vld [vmem:[%s1800_s18 + $0x144] sm:$0xf0]  ;;  %v1621_v4 = vld [vmem:[%s1800_s18 + $0x44] sm:$0xf]  ;;  %v1326_v5 = vld [vmem:[%s1800_s18 + $0x48] sm:$0xf0]  ;;  %v1325_v8 = vor.u32 %v1622_v1, %v1324_v0 }
  0x1d   : > { %866 = vmatpush.bf16.msra.mxu1 %v1688_v9  ;;  %1705 = vmatpush.bf16.msra.mxu3 %v1688_v9  ;;  %v1653_v6 = vld [vmem:[%s1800_s18 + $0x144] sm:$0xf]  ;;  %v1454_v7 = vld [vmem:[%s1800_s18 + $0x148] sm:$0xf0]  ;;  %v1453_v9 = vor.u32 %v1654_v3, %v1452_v2  ;;  %v1623_v16 = vld [vmem:[%s1800_s18 + $0x54] sm:$0xf] }
  0x1e   : > { %v1334_v17 = vld [vmem:[%s1800_s18 + $0x58] sm:$0xf0]  ;;  %v1655_v18 = vld [vmem:[%s1800_s18 + $0x154] sm:$0xf]  ;;  %v1625_v28 = vld [vmem:[%s1800_s18 + $0x64] sm:$0xf] }
  0x1f   : > { %v1462_v19 = vld [vmem:[%s1800_s18 + $0x158] sm:$0xf0]  ;;  %v1337_v22 = vor.u32 %v1623_v16, %v1334_v17  ;;  %v1342_v29 = vld [vmem:[%s1800_s18 + $0x68] sm:$0xf0]  ;;  %v1657_v30 = vld [vmem:[%s1800_s18 + $0x164] sm:$0xf] }
  0x20   : > { %698 = vmatpush.bf16.msra.mxu0 %v1679_v10  ;;  %1698 = vmatpush.bf16.msra.mxu2 %v1679_v10  ;;  %v1329_v10 = vor.u32 %v1621_v4, %v1326_v5  ;;  %v1465_v23 = vor.u32 %v1655_v18, %v1462_v19  ;;  %v1470_v31 = vld [vmem:[%s1800_s18 + $0x168] sm:$0xf0]  ;;  %v1345_v34 = vor.u32 %v1625_v28, %v1342_v29  ;;  %v1627_v40 = vld [vmem:[%s1800_s18 + $0x74] sm:$0xf]  ;;  %v1350_v41 = vld [vmem:[%s1800_s18 + $0x78] sm:$0xf0] }
  0x21   : > { %867 = vmatpush.bf16.msra.mxu1 %v1687_v11  ;;  %1706 = vmatpush.bf16.msra.mxu3 %v1687_v11  ;;  %v1457_v11 = vor.u32 %v1653_v6, %v1454_v7  ;;  %v1473_v35 = vor.u32 %v1657_v30, %v1470_v31  ;;  %v1659_v42 = vld [vmem:[%s1800_s18 + $0x174] sm:$0xf]  ;;  %v1478_v43 = vld [vmem:[%s1800_s18 + $0x178] sm:$0xf0]  ;;  %v1353_v46 = vor.u32 %v1627_v40, %v1350_v41  ;;  %v1662_v52 = vld [vmem:[%s1800_s18 + $0x184] sm:$0xf0] }
  0x22   : > { %v1481_v47 = vor.u32 %v1659_v42, %v1478_v43  ;;  %v1629_v53 = vld [vmem:[%s1800_s18 + $0x84] sm:$0xf]  ;;  %v1358_v54 = vld [vmem:[%s1800_s18 + $0x88] sm:$0xf0]  ;;  %v1631_v16 = vld [vmem:[%s1800_s18 + $0x94] sm:$0xf] }
  0x23   : > { %v1661_v55 = vld [vmem:[%s1800_s18 + $0x184] sm:$0xf]  ;;  %v1486_v56 = vld [vmem:[%s1800_s18 + $0x188] sm:$0xf0]  ;;  %v1366_v17 = vld [vmem:[%s1800_s18 + $0x98] sm:$0xf0] }
  0x24   : > { %699 = vmatpush.bf16.msra.mxu0 %v1678_v12  ;;  %1699 = vmatpush.bf16.msra.mxu2 %v1678_v12  ;;  %v1332_v12 = vld [vmem:[%s1800_s18 + $0x50] sm:$0xf]  ;;  %v1369_v29 = vor.u32 %v1631_v16, %v1366_v17 }
  0x25   : > { %868 = vmatpush.bf16.msra.mxu1 %v1686_v13  ;;  %1707 = vmatpush.bf16.msra.mxu3 %v1686_v13  ;;  %v1624_v13 = vld [vmem:[%s1800_s18 + $0x54] sm:$0xf0] }
  0x26   : > { %v1333_v20 = vor.u32 %v1624_v13, %v1332_v12  ;;  %v1632_v13 = vld [vmem:[%s1800_s18 + $0x94] sm:$0xf0] }
  0x28   : > { %700 = vmatpush.bf16.msra.mxu0 %v1677_v14  ;;  %1700 = vmatpush.bf16.msra.mxu2 %v1677_v14  ;;  %v1460_v14 = vld [vmem:[%s1800_s18 + $0x150] sm:$0xf] }
  0x29   : > { %869 = vmatpush.bf16.msra.mxu1 %v1685_v15  ;;  %1708 = vmatpush.bf16.msra.mxu3 %v1685_v15  ;;  %v1656_v15 = vld [vmem:[%s1800_s18 + $0x154] sm:$0xf0] }
  0x2a   : > { %v1461_v21 = vor.u32 %v1656_v15, %v1460_v14  ;;  %v1492_v14 = vld [vmem:[%s1800_s18 + $0x190] sm:$0xf]  ;;  %v1664_v15 = vld [vmem:[%s1800_s18 + $0x194] sm:$0xf0] }
  0x2b   : > { %701 = vmatmul.bf16.vlgmr.msra.gmra.mxu0 %v1293_v24  ;;  %781 = vmatmul.bf16.vlgmr.msra.gmra.mxu2 %v1421_v25  ;;  %v1340_v24 = vld [vmem:[%s1800_s18 + $0x60] sm:$0xf]  ;;  %v1626_v25 = vld [vmem:[%s1800_s18 + $0x64] sm:$0xf0] }
  0x2c   : > { %870 = vmatmul.bf16.vlgmr.msra.gmra.mxu1 %v1297_v26  ;;  %950 = vmatmul.bf16.vlgmr.msra.gmra.mxu3 %v1425_v27  ;;  %v1468_v26 = vld [vmem:[%s1800_s18 + $0x160] sm:$0xf]  ;;  %v1658_v27 = vld [vmem:[%s1800_s18 + $0x164] sm:$0xf0]  ;;  %v1341_v32 = vor.u32 %v1626_v25, %v1340_v24 }
  0x2d   : > { %v1469_v33 = vor.u32 %v1658_v27, %v1468_v26  ;;  %v1493_v27 = vor.u32 %v1664_v15, %v1492_v14 }
  0x3b   : > { %706 = vmatmul.bf16.gmra.mxu0 %v1301_v36  ;;  %786 = vmatmul.bf16.gmra.mxu2 %v1429_v37  ;;  %v1348_v36 = vld [vmem:[%s1800_s18 + $0x70] sm:$0xf]  ;;  %v1628_v37 = vld [vmem:[%s1800_s18 + $0x74] sm:$0xf0] }
  0x3c   : > { %875 = vmatmul.bf16.gmra.mxu1 %v1305_v38  ;;  %955 = vmatmul.bf16.gmra.mxu3 %v1433_v39  ;;  %v1476_v38 = vld [vmem:[%s1800_s18 + $0x170] sm:$0xf]  ;;  %v1660_v39 = vld [vmem:[%s1800_s18 + $0x174] sm:$0xf0]  ;;  %v1349_v44 = vor.u32 %v1628_v37, %v1348_v36 }
  0x3d   : > { %v1477_v45 = vor.u32 %v1660_v39, %v1476_v38 }
  0x4b   : > { %711 = vmatmul.bf16.gmra.mxu0 %v1309_v48  ;;  %791 = vmatmul.bf16.gmra.mxu2 %v1437_v49  ;;  %v1878_v48 = vld [vmem:[%s2141_s2] ss:$0 sm:$0xff] }
  0x4c   : > { %880 = vmatmul.bf16.gmra.mxu1 %v1313_v50  ;;  %960 = vmatmul.bf16.gmra.mxu3 %v1441_v51  ;;  %v1356_v49 = vld [vmem:[%s1800_s18 + $0x80] sm:$0xf]  ;;  %v1630_v50 = vld [vmem:[%s1800_s18 + $0x84] sm:$0xf0] }
  0x4d   : > { %v1484_v51 = vld [vmem:[%s1800_s18 + $0x180] sm:$0xf]  ;;  %v1357_v57 = vor.u32 %v1630_v50, %v1356_v49  ;;  %v1634_v50 = vld [vmem:[%s1800_s18 + $0xa4] sm:$0xf0] }
  0x4e   : > { %v1485_v58 = vor.u32 %v1662_v52, %v1484_v51  ;;  %v1500_v51 = vld [vmem:[%s1800_s18 + $0x1a0] sm:$0xf]  ;;  %v1666_v52 = vld [vmem:[%s1800_s18 + $0x1a4] sm:$0xf0] }
  0x5b   : > { %716 = vmatmul.bf16.gmra.mxu0 %v1317_v60  ;;  %796 = vmatmul.bf16.gmra.mxu2 %v1445_v61  ;;  %v1361_v60 = vor.u32 %v1629_v53, %v1358_v54  ;;  %v1489_v61 = vor.u32 %v1661_v55, %v1486_v56  ;;  %v1633_v53 = vld [vmem:[%s1800_s18 + $0xa4] sm:$0xf]  ;;  %v1374_v54 = vld [vmem:[%s1800_s18 + $0xa8] sm:$0xf0] }
  0x5c   : > { %885 = vmatmul.bf16.gmra.mxu1 %v1321_v62  ;;  %965 = vmatmul.bf16.gmra.mxu3 %v1449_v63 }
  0x6b   : > { %721 = vmatmul.bf16.gmra.mxu0 %v1325_v8  ;;  %801 = vmatmul.bf16.gmra.mxu2 %v1453_v9 }
  0x6c   : > { %890 = vmatmul.bf16.gmra.mxu1 %v1329_v10  ;;  %970 = vmatmul.bf16.gmra.mxu3 %v1457_v11  ;;  %v1364_v10 = vld [vmem:[%s1800_s18 + $0x90] sm:$0xf] }
  0x6d   : > { %v1365_v26 = vor.u32 %v1632_v13, %v1364_v10 }
  0x7b   : > { %726 = vmatmul.bf16.gmra.mxu0 %v1333_v20  ;;  %806 = vmatmul.bf16.gmra.mxu2 %v1461_v21  ;;  %v1663_v20 = vld [vmem:[%s1800_s18 + $0x194] sm:$0xf]  ;;  %v1494_v21 = vld [vmem:[%s1800_s18 + $0x198] sm:$0xf0] }
  0x7c   : > { %895 = vmatmul.bf16.gmra.mxu1 %v1337_v22  ;;  %975 = vmatmul.bf16.gmra.mxu3 %v1465_v23  ;;  %v1497_v30 = vor.u32 %v1663_v20, %v1494_v21 }
  0x8b   : > { %731 = vmatmul.bf16.gmra.mxu0 %v1341_v32  ;;  %811 = vmatmul.bf16.gmra.mxu2 %v1469_v33 }
  0x8c   : > { %900 = vmatmul.bf16.gmra.mxu1 %v1345_v34  ;;  %980 = vmatmul.bf16.gmra.mxu3 %v1473_v35 }
  0x9b   : > { %736 = vmatmul.bf16.gmra.mxu0 %v1349_v44  ;;  %816 = vmatmul.bf16.gmra.mxu2 %v1477_v45 }
  0x9c   : > { %905 = vmatmul.bf16.gmra.mxu1 %v1353_v46  ;;  %985 = vmatmul.bf16.gmra.mxu3 %v1481_v47  ;;  %v1372_v46 = vld [vmem:[%s1800_s18 + $0xa0] sm:$0xf] }
  0xa8   : > { %v702_v59 = vpop.f32.mrf.mxu0 }
  0xa9   : > { %v703_v62 = vadd.f32 %v1878_v48, %v702_v59  ;;  %v871_v63 = vpop.f32.mrf.mxu1 }
  0xab   : > { %v872_v0 = vadd.f32 %v871_v63, %v703_v62  ;;  %741 = vmatmul.bf16.gmra.mxu0 %v1357_v57  ;;  %821 = vmatmul.bf16.gmra.mxu2 %v1485_v58  ;;  %v1665_v57 = vld [vmem:[%s1800_s18 + $0x1a4] sm:$0xf]  ;;  %v1502_v58 = vld [vmem:[%s1800_s18 + $0x1a8] sm:$0xf0]  ;;  %v1373_v63 = vor.u32 %v1634_v50, %v1372_v46 }
  0xac   : > { %910 = vmatmul.bf16.gmra.mxu1 %v1361_v60  ;;  %990 = vmatmul.bf16.gmra.mxu3 %v1489_v61 }
  0xad   : > { %v1031_v1 = vmax.f32 %v872_v0, 0.0  ;;  %v1501_v0 = vor.u32 %v1666_v52, %v1500_v51 }
  0xae   : > { %v782_v2 = vpop.f32.mrf.mxu2 }
  0xaf   : > { %v1095_v3 = vpack.c.bf16 %v1031_v1, %v1031_v1  ;;  %v783_v4 = vadd.f32 %v1878_v48, %v782_v2  ;;  %v951_v5 = vpop.f32.mrf.mxu3  ;;  %v1377_v2 = vor.u32 %v1633_v53, %v1374_v54 }
  0xb0   : > { %v704_v6 = vpop.f32.mrf.mxu0 }
  0xb1   : > { %1160 = vst.msk [vmem:[%s1893_s4] sm:$0xf] %vm1159_vm0, %v1095_v3  ;;  %v952_v7 = vadd.f32 %v951_v5, %v783_v4  ;;  %v705_v8 = vadd.f32 %v1878_v48, %v704_v6  ;;  %v873_v9 = vpop.f32.mrf.mxu1  ;;  %v1505_v3 = vor.u32 %v1665_v57, %v1502_v58 }
  0xb3   : > { %v1063_v11 = vmax.f32 %v952_v7, 0.0  ;;  %v874_v12 = vadd.f32 %v873_v9, %v705_v8 }
  0xb5   : > { %v1127_v18 = vpack.c.bf16 %v1063_v11, %v1063_v11  ;;  %v1032_v19 = vmax.f32 %v874_v12, 0.0 }
  0xb6   : > { %v784_v22 = vpop.f32.mrf.mxu2 }
  0xb7   : > { %1192 = vst.msk [vmem:[%s1893_s4 + $0x80] sm:$0xf] %vm1159_vm0, %v1127_v18  ;;  %v1096_v23 = vpack.c.bf16 %v1032_v19, %v1032_v19  ;;  %v785_v24 = vadd.f32 %v1878_v48, %v784_v22  ;;  %v953_v25 = vpop.f32.mrf.mxu3  ;;  %v1380_v19 = vld [vmem:[%s1800_s18 + $0xb0] sm:$0xf]  ;;  %v1636_v22 = vld [vmem:[%s1800_s18 + $0xb4] sm:$0xf0] }
  0xb8   : > { %v707_v28 = vpop.f32.mrf.mxu0 }
  0xb9   : > { %1161 = vst.msk [vmem:[%s1893_s4 + $0x4] sm:$0xf] %vm1159_vm0, %v1096_v23  ;;  %v954_v31 = vadd.f32 %v953_v25, %v785_v24  ;;  %v708_v32 = vadd.f32 %v1878_v48, %v707_v28  ;;  %v876_v33 = vpop.f32.mrf.mxu1  ;;  %v1508_v23 = vld [vmem:[%s1800_s18 + $0x1b0] sm:$0xf]  ;;  %v1668_v24 = vld [vmem:[%s1800_s18 + $0x1b4] sm:$0xf0] }
  0xba   : > { %v1635_v25 = vld [vmem:[%s1800_s18 + $0xb4] sm:$0xf] }
  0xbb   : > { %v1064_v34 = vmax.f32 %v954_v31, 0.0  ;;  %v877_v35 = vadd.f32 %v876_v33, %v708_v32  ;;  %746 = vmatmul.bf16.gmra.mxu0 %v1365_v26  ;;  %826 = vmatmul.bf16.gmra.mxu2 %v1493_v27  ;;  %v1382_v26 = vld [vmem:[%s1800_s18 + $0xb8] sm:$0xf0] }
  0xbc   : > { %915 = vmatmul.bf16.gmra.mxu1 %v1369_v29  ;;  %995 = vmatmul.bf16.gmra.mxu3 %v1497_v30  ;;  %v1667_v29 = vld [vmem:[%s1800_s18 + $0x1b4] sm:$0xf]  ;;  %v1510_v30 = vld [vmem:[%s1800_s18 + $0x1b8] sm:$0xf0] }
  0xbd   : > { %v1128_v36 = vpack.c.bf16 %v1064_v34, %v1064_v34  ;;  %v1033_v37 = vmax.f32 %v877_v35, 0.0  ;;  %v1381_v35 = vor.u32 %v1636_v22, %v1380_v19 }
  0xbe   : > { %v787_v38 = vpop.f32.mrf.mxu2 }
  0xbf   : > { %1193 = vst.msk [vmem:[%s1893_s4 + $0x84] sm:$0xf] %vm1159_vm0, %v1128_v36  ;;  %v1097_v39 = vpack.c.bf16 %v1033_v37, %v1033_v37  ;;  %v788_v40 = vadd.f32 %v1878_v48, %v787_v38  ;;  %v956_v41 = vpop.f32.mrf.mxu3  ;;  %v1509_v36 = vor.u32 %v1668_v24, %v1508_v23  ;;  %v1385_v38 = vor.u32 %v1635_v25, %v1382_v26 }
  0xc0   : > { %v709_v42 = vpop.f32.mrf.mxu0 }
  0xc1   : > { %1162 = vst.msk [vmem:[%s1893_s4 + $0x8] sm:$0xf] %vm1159_vm0, %v1097_v39  ;;  %v957_v43 = vadd.f32 %v956_v41, %v788_v40  ;;  %v710_v44 = vadd.f32 %v1878_v48, %v709_v42  ;;  %v878_v45 = vpop.f32.mrf.mxu1  ;;  %v1513_v39 = vor.u32 %v1667_v29, %v1510_v30 }
  0xc3   : > { %v1065_v47 = vmax.f32 %v957_v43, 0.0  ;;  %v879_v49 = vadd.f32 %v878_v45, %v710_v44 }
  0xc5   : > { %v1129_v55 = vpack.c.bf16 %v1065_v47, %v1065_v47  ;;  %v1034_v56 = vmax.f32 %v879_v49, 0.0 }
  0xc6   : > { %v789_v59 = vpop.f32.mrf.mxu2 }
  0xc7   : > { %1194 = vst.msk [vmem:[%s1893_s4 + $0x88] sm:$0xf] %vm1159_vm0, %v1129_v55  ;;  %v1098_v60 = vpack.c.bf16 %v1034_v56, %v1034_v56  ;;  %v790_v61 = vadd.f32 %v1878_v48, %v789_v59  ;;  %v958_v62 = vpop.f32.mrf.mxu3  ;;  %v1388_v56 = vld [vmem:[%s1800_s18 + $0xc0] sm:$0xf]  ;;  %v1638_v59 = vld [vmem:[%s1800_s18 + $0xc4] sm:$0xf0] }
  0xc8   : > { %v712_v1 = vpop.f32.mrf.mxu0 }
  0xc9   : > { %1163 = vst.msk [vmem:[%s1893_s4 + $0xc] sm:$0xf] %vm1159_vm0, %v1098_v60  ;;  %v959_v4 = vadd.f32 %v958_v62, %v790_v61  ;;  %v713_v5 = vadd.f32 %v1878_v48, %v712_v1  ;;  %v881_v6 = vpop.f32.mrf.mxu1  ;;  %v1516_v60 = vld [vmem:[%s1800_s18 + $0x1c0] sm:$0xf]  ;;  %v1670_v61 = vld [vmem:[%s1800_s18 + $0x1c4] sm:$0xf0] }
  0xca   : > { %v1637_v62 = vld [vmem:[%s1800_s18 + $0xc4] sm:$0xf] }
  0xcb   : > { %v1066_v7 = vmax.f32 %v959_v4, 0.0  ;;  %v882_v8 = vadd.f32 %v881_v6, %v713_v5  ;;  %751 = vmatmul.bf16.gmra.mxu0 %v1373_v63  ;;  %831 = vmatmul.bf16.gmra.mxu2 %v1501_v0  ;;  %v1390_v63 = vld [vmem:[%s1800_s18 + $0xc8] sm:$0xf0] }
  0xcc   : > { %920 = vmatmul.bf16.gmra.mxu1 %v1377_v2  ;;  %1000 = vmatmul.bf16.gmra.mxu3 %v1505_v3  ;;  %v1669_v2 = vld [vmem:[%s1800_s18 + $0x1c4] sm:$0xf]  ;;  %v1518_v3 = vld [vmem:[%s1800_s18 + $0x1c8] sm:$0xf0] }
  0xcd   : > { %v1130_v9 = vpack.c.bf16 %v1066_v7, %v1066_v7  ;;  %v1035_v10 = vmax.f32 %v882_v8, 0.0  ;;  %v1389_v8 = vor.u32 %v1638_v59, %v1388_v56 }
  0xce   : > { %v792_v11 = vpop.f32.mrf.mxu2 }
  0xcf   : > { %1195 = vst.msk [vmem:[%s1893_s4 + $0x8c] sm:$0xf] %vm1159_vm0, %v1130_v9  ;;  %v1099_v12 = vpack.c.bf16 %v1035_v10, %v1035_v10  ;;  %v793_v13 = vadd.f32 %v1878_v48, %v792_v11  ;;  %v961_v14 = vpop.f32.mrf.mxu3  ;;  %v1517_v9 = vor.u32 %v1670_v61, %v1516_v60  ;;  %v1393_v11 = vor.u32 %v1637_v62, %v1390_v63 }
  0xd0   : > { %v714_v15 = vpop.f32.mrf.mxu0 }
  0xd1   : > { %1164 = vst.msk [vmem:[%s1893_s4 + $0x10] sm:$0xf] %vm1159_vm0, %v1099_v12  ;;  %v962_v16 = vadd.f32 %v961_v14, %v793_v13  ;;  %v715_v17 = vadd.f32 %v1878_v48, %v714_v15  ;;  %v883_v18 = vpop.f32.mrf.mxu1  ;;  %v1521_v12 = vor.u32 %v1669_v2, %v1518_v3 }
  0xd3   : > { %v1067_v20 = vmax.f32 %v962_v16, 0.0  ;;  %v884_v21 = vadd.f32 %v883_v18, %v715_v17 }
  0xd5   : > { %v1131_v27 = vpack.c.bf16 %v1067_v20, %v1067_v20  ;;  %v1036_v28 = vmax.f32 %v884_v21, 0.0 }
  0xd6   : > { %v794_v31 = vpop.f32.mrf.mxu2 }
  0xd7   : > { %1196 = vst.msk [vmem:[%s1893_s4 + $0x90] sm:$0xf] %vm1159_vm0, %v1131_v27  ;;  %v1100_v32 = vpack.c.bf16 %v1036_v28, %v1036_v28  ;;  %v795_v33 = vadd.f32 %v1878_v48, %v794_v31  ;;  %v963_v34 = vpop.f32.mrf.mxu3  ;;  %v1396_v28 = vld [vmem:[%s1800_s18 + $0xd0] sm:$0xf]  ;;  %v1640_v31 = vld [vmem:[%s1800_s18 + $0xd4] sm:$0xf0] }
  0xd8   : > { %v717_v37 = vpop.f32.mrf.mxu0 }
  0xd9   : > { %1165 = vst.msk [vmem:[%s1893_s4 + $0x14] sm:$0xf] %vm1159_vm0, %v1100_v32  ;;  %v964_v40 = vadd.f32 %v963_v34, %v795_v33  ;;  %v718_v41 = vadd.f32 %v1878_v48, %v717_v37  ;;  %v886_v42 = vpop.f32.mrf.mxu1  ;;  %v1524_v32 = vld [vmem:[%s1800_s18 + $0x1d0] sm:$0xf]  ;;  %v1672_v33 = vld [vmem:[%s1800_s18 + $0x1d4] sm:$0xf0] }
  0xda   : > { %v1639_v34 = vld [vmem:[%s1800_s18 + $0xd4] sm:$0xf] }
  0xdb   : > { %v1068_v43 = vmax.f32 %v964_v40, 0.0  ;;  %v887_v44 = vadd.f32 %v886_v42, %v718_v41  ;;  %756 = vmatmul.bf16.gmra.mxu0 %v1381_v35  ;;  %836 = vmatmul.bf16.gmra.mxu2 %v1509_v36  ;;  %v1398_v35 = vld [vmem:[%s1800_s18 + $0xd8] sm:$0xf0] }
  0xdc   : > { %925 = vmatmul.bf16.gmra.mxu1 %v1385_v38  ;;  %1005 = vmatmul.bf16.gmra.mxu3 %v1513_v39  ;;  %v1671_v38 = vld [vmem:[%s1800_s18 + $0x1d4] sm:$0xf]  ;;  %v1526_v39 = vld [vmem:[%s1800_s18 + $0x1d8] sm:$0xf0] }
  0xdd   : > { %v1132_v45 = vpack.c.bf16 %v1068_v43, %v1068_v43  ;;  %v1037_v46 = vmax.f32 %v887_v44, 0.0  ;;  %v1397_v44 = vor.u32 %v1640_v31, %v1396_v28 }
  0xde   : > { %v797_v47 = vpop.f32.mrf.mxu2 }
  0xdf   : > { %1197 = vst.msk [vmem:[%s1893_s4 + $0x94] sm:$0xf] %vm1159_vm0, %v1132_v45  ;;  %v1101_v49 = vpack.c.bf16 %v1037_v46, %v1037_v46  ;;  %v798_v50 = vadd.f32 %v1878_v48, %v797_v47  ;;  %v966_v51 = vpop.f32.mrf.mxu3  ;;  %v1525_v45 = vor.u32 %v1672_v33, %v1524_v32  ;;  %v1401_v47 = vor.u32 %v1639_v34, %v1398_v35 }
  0xe0   : > { %v719_v52 = vpop.f32.mrf.mxu0 }
  0xe1   : > { %1166 = vst.msk [vmem:[%s1893_s4 + $0x18] sm:$0xf] %vm1159_vm0, %v1101_v49  ;;  %v967_v53 = vadd.f32 %v966_v51, %v798_v50  ;;  %v720_v54 = vadd.f32 %v1878_v48, %v719_v52  ;;  %v888_v55 = vpop.f32.mrf.mxu1  ;;  %v1529_v49 = vor.u32 %v1671_v38, %v1526_v39 }
  0xe3   : > { %v1069_v57 = vmax.f32 %v967_v53, 0.0  ;;  %v889_v58 = vadd.f32 %v888_v55, %v720_v54 }
  0xe5   : > { %v1133_v0 = vpack.c.bf16 %v1069_v57, %v1069_v57  ;;  %v1038_v1 = vmax.f32 %v889_v58, 0.0 }
  0xe6   : > { %v799_v4 = vpop.f32.mrf.mxu2 }
  0xe7   : > { %1198 = vst.msk [vmem:[%s1893_s4 + $0x98] sm:$0xf] %vm1159_vm0, %v1133_v0  ;;  %v1102_v5 = vpack.c.bf16 %v1038_v1, %v1038_v1  ;;  %v800_v6 = vadd.f32 %v1878_v48, %v799_v4  ;;  %v968_v7 = vpop.f32.mrf.mxu3  ;;  %v1404_v1 = vld [vmem:[%s1800_s18 + $0xe0] sm:$0xf]  ;;  %v1642_v4 = vld [vmem:[%s1800_s18 + $0xe4] sm:$0xf0] }
  0xe8   : > { %v722_v10 = vpop.f32.mrf.mxu0 }
  0xe9   : > { %1167 = vst.msk [vmem:[%s1893_s4 + $0x1c] sm:$0xf] %vm1159_vm0, %v1102_v5  ;;  %v969_v13 = vadd.f32 %v968_v7, %v800_v6  ;;  %v723_v14 = vadd.f32 %v1878_v48, %v722_v10  ;;  %v891_v15 = vpop.f32.mrf.mxu1  ;;  %v1532_v5 = vld [vmem:[%s1800_s18 + $0x1e0] sm:$0xf]  ;;  %v1674_v6 = vld [vmem:[%s1800_s18 + $0x1e4] sm:$0xf0] }
  0xea   : > { %v1641_v7 = vld [vmem:[%s1800_s18 + $0xe4] sm:$0xf] }
  0xeb   : > { %v1070_v16 = vmax.f32 %v969_v13, 0.0  ;;  %v892_v17 = vadd.f32 %v891_v15, %v723_v14  ;;  %761 = vmatmul.bf16.gmra.mxu0 %v1389_v8  ;;  %841 = vmatmul.bf16.gmra.mxu2 %v1517_v9  ;;  %v1406_v8 = vld [vmem:[%s1800_s18 + $0xe8] sm:$0xf0] }
  0xec   : > { %930 = vmatmul.bf16.gmra.mxu1 %v1393_v11  ;;  %1010 = vmatmul.bf16.gmra.mxu3 %v1521_v12  ;;  %v1673_v11 = vld [vmem:[%s1800_s18 + $0x1e4] sm:$0xf]  ;;  %v1534_v12 = vld [vmem:[%s1800_s18 + $0x1e8] sm:$0xf0] }
  0xed   : > { %v1134_v18 = vpack.c.bf16 %v1070_v16, %v1070_v16  ;;  %v1039_v19 = vmax.f32 %v892_v17, 0.0  ;;  %v1405_v17 = vor.u32 %v1642_v4, %v1404_v1 }
  0xee   : > { %v802_v20 = vpop.f32.mrf.mxu2 }
  0xef   : > { %1199 = vst.msk [vmem:[%s1893_s4 + $0x9c] sm:$0xf] %vm1159_vm0, %v1134_v18  ;;  %v1103_v21 = vpack.c.bf16 %v1039_v19, %v1039_v19  ;;  %v803_v22 = vadd.f32 %v1878_v48, %v802_v20  ;;  %v971_v23 = vpop.f32.mrf.mxu3  ;;  %v1533_v18 = vor.u32 %v1674_v6, %v1532_v5  ;;  %v1409_v20 = vor.u32 %v1641_v7, %v1406_v8 }
  0xf0   : > { %v724_v24 = vpop.f32.mrf.mxu0 }
  0xf1   : > { %1168 = vst.msk [vmem:[%s1893_s4 + $0x20] sm:$0xf] %vm1159_vm0, %v1103_v21  ;;  %v972_v25 = vadd.f32 %v971_v23, %v803_v22  ;;  %v725_v26 = vadd.f32 %v1878_v48, %v724_v24  ;;  %v893_v27 = vpop.f32.mrf.mxu1  ;;  %v1537_v21 = vor.u32 %v1673_v11, %v1534_v12 }
  0xf3   : > { %v1071_v29 = vmax.f32 %v972_v25, 0.0  ;;  %v894_v30 = vadd.f32 %v893_v27, %v725_v26 }
  0xf5   : > { %v1135_v36 = vpack.c.bf16 %v1071_v29, %v1071_v29  ;;  %v1040_v37 = vmax.f32 %v894_v30, 0.0 }
  0xf6   : > { %v804_v40 = vpop.f32.mrf.mxu2 }
  0xf7   : > { %1200 = vst.msk [vmem:[%s1893_s4 + $0xa0] sm:$0xf] %vm1159_vm0, %v1135_v36  ;;  %v1104_v41 = vpack.c.bf16 %v1040_v37, %v1040_v37  ;;  %v805_v42 = vadd.f32 %v1878_v48, %v804_v40  ;;  %v973_v43 = vpop.f32.mrf.mxu3  ;;  %v1412_v37 = vld [vmem:[%s1800_s18 + $0xf0] sm:$0xf]  ;;  %v1644_v40 = vld [vmem:[%s1800_s18 + $0xf4] sm:$0xf0] }
  0xf8   : > { %v727_v46 = vpop.f32.mrf.mxu0 }
  0xf9   : > { %1169 = vst.msk [vmem:[%s1893_s4 + $0x24] sm:$0xf] %vm1159_vm0, %v1104_v41  ;;  %v974_v50 = vadd.f32 %v973_v43, %v805_v42  ;;  %v728_v51 = vadd.f32 %v1878_v48, %v727_v46  ;;  %v896_v52 = vpop.f32.mrf.mxu1  ;;  %v1540_v41 = vld [vmem:[%s1800_s18 + $0x1f0] sm:$0xf]  ;;  %v1676_v42 = vld [vmem:[%s1800_s18 + $0x1f4] sm:$0xf0] }
  0xfa   : > { %v1643_v43 = vld [vmem:[%s1800_s18 + $0xf4] sm:$0xf] }
  0xfb   : > { %v1072_v53 = vmax.f32 %v974_v50, 0.0  ;;  %v897_v54 = vadd.f32 %v896_v52, %v728_v51  ;;  %766 = vmatmul.bf16.gmra.mxu0 %v1397_v44  ;;  %846 = vmatmul.bf16.gmra.mxu2 %v1525_v45  ;;  %v1414_v44 = vld [vmem:[%s1800_s18 + $0xf8] sm:$0xf0] }
  0xfc   : > { %935 = vmatmul.bf16.gmra.mxu1 %v1401_v47  ;;  %1015 = vmatmul.bf16.gmra.mxu3 %v1529_v49  ;;  %v1675_v47 = vld [vmem:[%s1800_s18 + $0x1f4] sm:$0xf]  ;;  %v1542_v49 = vld [vmem:[%s1800_s18 + $0x1f8] sm:$0xf0] }
  0xfd   : > { %v1136_v55 = vpack.c.bf16 %v1072_v53, %v1072_v53  ;;  %v1041_v56 = vmax.f32 %v897_v54, 0.0  ;;  %v1413_v54 = vor.u32 %v1644_v40, %v1412_v37 }
  0xfe   : > { %v807_v57 = vpop.f32.mrf.mxu2 }
  0xff   : > { %1201 = vst.msk [vmem:[%s1893_s4 + $0xa4] sm:$0xf] %vm1159_vm0, %v1136_v55  ;;  %v1105_v58 = vpack.c.bf16 %v1041_v56, %v1041_v56  ;;  %v808_v59 = vadd.f32 %v1878_v48, %v807_v57  ;;  %v976_v60 = vpop.f32.mrf.mxu3  ;;  %v1541_v55 = vor.u32 %v1676_v42, %v1540_v41  ;;  %v1417_v57 = vor.u32 %v1643_v43, %v1414_v44 }
 0x100   : > { %v729_v61 = vpop.f32.mrf.mxu0 }
 0x101   : > { %1170 = vst.msk [vmem:[%s1893_s4 + $0x28] sm:$0xf] %vm1159_vm0, %v1105_v58  ;;  %v977_v62 = vadd.f32 %v976_v60, %v808_v59  ;;  %v730_v63 = vadd.f32 %v1878_v48, %v729_v61  ;;  %v898_v0 = vpop.f32.mrf.mxu1  ;;  %v1545_v58 = vor.u32 %v1675_v47, %v1542_v49 }
 0x103   : > { %v1073_v2 = vmax.f32 %v977_v62, 0.0  ;;  %v899_v3 = vadd.f32 %v898_v0, %v730_v63 }
 0x105   : > { %v1137_v9 = vpack.c.bf16 %v1073_v2, %v1073_v2  ;;  %v1042_v10 = vmax.f32 %v899_v3, 0.0 }
 0x106   : > { %v809_v13 = vpop.f32.mrf.mxu2 }
 0x107   : > { %1202 = vst.msk [vmem:[%s1893_s4 + $0xa8] sm:$0xf] %vm1159_vm0, %v1137_v9  ;;  %v1106_v14 = vpack.c.bf16 %v1042_v10, %v1042_v10  ;;  %v810_v15 = vadd.f32 %v1878_v48, %v809_v13  ;;  %v978_v16 = vpop.f32.mrf.mxu3 }
 0x108   : > { %v732_v19 = vpop.f32.mrf.mxu0 }
 0x109   : > { %1171 = vst.msk [vmem:[%s1893_s4 + $0x2c] sm:$0xf] %vm1159_vm0, %v1106_v14  ;;  %v979_v22 = vadd.f32 %v978_v16, %v810_v15  ;;  %v733_v23 = vadd.f32 %v1878_v48, %v732_v19  ;;  %v901_v24 = vpop.f32.mrf.mxu1 }
 0x10b   : > { %v1074_v25 = vmax.f32 %v979_v22, 0.0  ;;  %v902_v26 = vadd.f32 %v901_v24, %v733_v23  ;;  %771 = vmatmul.bf16.gmra.mxu0 %v1405_v17  ;;  %851 = vmatmul.bf16.gmra.mxu2 %v1533_v18 }
 0x10c   : > { %940 = vmatmul.bf16.gmra.mxu1 %v1409_v20  ;;  %1020 = vmatmul.bf16.gmra.mxu3 %v1537_v21 }
 0x10d   : > { %v1138_v27 = vpack.c.bf16 %v1074_v25, %v1074_v25  ;;  %v1043_v28 = vmax.f32 %v902_v26, 0.0 }
 0x10e   : > { %v812_v29 = vpop.f32.mrf.mxu2 }
 0x10f   : > { %1203 = vst.msk [vmem:[%s1893_s4 + $0xac] sm:$0xf] %vm1159_vm0, %v1138_v27  ;;  %v1107_v30 = vpack.c.bf16 %v1043_v28, %v1043_v28  ;;  %v813_v31 = vadd.f32 %v1878_v48, %v812_v29  ;;  %v981_v32 = vpop.f32.mrf.mxu3 }
 0x110   : > { %v734_v33 = vpop.f32.mrf.mxu0 }
 0x111   : > { %1172 = vst.msk [vmem:[%s1893_s4 + $0x30] sm:$0xf] %vm1159_vm0, %v1107_v30  ;;  %v982_v34 = vadd.f32 %v981_v32, %v813_v31  ;;  %v735_v35 = vadd.f32 %v1878_v48, %v734_v33  ;;  %v903_v36 = vpop.f32.mrf.mxu1 }
 0x113   : > { %v1075_v38 = vmax.f32 %v982_v34, 0.0  ;;  %v904_v39 = vadd.f32 %v903_v36, %v735_v35 }
 0x115   : > { %v1139_v45 = vpack.c.bf16 %v1075_v38, %v1075_v38  ;;  %v1044_v46 = vmax.f32 %v904_v39, 0.0 }
 0x116   : > { %v814_v50 = vpop.f32.mrf.mxu2 }
 0x117   : > { %1204 = vst.msk [vmem:[%s1893_s4 + $0xb0] sm:$0xf] %vm1159_vm0, %v1139_v45  ;;  %v1108_v51 = vpack.c.bf16 %v1044_v46, %v1044_v46  ;;  %v815_v52 = vadd.f32 %v1878_v48, %v814_v50  ;;  %v983_v53 = vpop.f32.mrf.mxu3 }
 0x118   : > { %v737_v56 = vpop.f32.mrf.mxu0 }
 0x119   : > { %1173 = vst.msk [vmem:[%s1893_s4 + $0x34] sm:$0xf] %vm1159_vm0, %v1108_v51  ;;  %v984_v59 = vadd.f32 %v983_v53, %v815_v52  ;;  %v738_v60 = vadd.f32 %v1878_v48, %v737_v56  ;;  %v906_v61 = vpop.f32.mrf.mxu1 }
 0x11b   : > { %v1076_v62 = vmax.f32 %v984_v59, 0.0  ;;  %v907_v63 = vadd.f32 %v906_v61, %v738_v60  ;;  %776 = vmatmul.bf16.gmra.mxu0 %v1413_v54  ;;  %856 = vmatmul.bf16.gmra.mxu2 %v1541_v55 }
 0x11c   : > { %945 = vmatmul.bf16.gmra.mxu1 %v1417_v57  ;;  %1025 = vmatmul.bf16.gmra.mxu3 %v1545_v58 }
 0x11d   : > { %v1140_v0 = vpack.c.bf16 %v1076_v62, %v1076_v62  ;;  %v1045_v1 = vmax.f32 %v907_v63, 0.0 }
 0x11e   : > { %v817_v2 = vpop.f32.mrf.mxu2 }
 0x11f   : > { %1205 = vst.msk [vmem:[%s1893_s4 + $0xb4] sm:$0xf] %vm1159_vm0, %v1140_v0  ;;  %v1109_v3 = vpack.c.bf16 %v1045_v1, %v1045_v1  ;;  %v818_v4 = vadd.f32 %v1878_v48, %v817_v2  ;;  %v986_v5 = vpop.f32.mrf.mxu3 }
 0x120   : > { %v739_v6 = vpop.f32.mrf.mxu0 }
 0x121   : > { %1174 = vst.msk [vmem:[%s1893_s4 + $0x38] sm:$0xf] %vm1159_vm0, %v1109_v3  ;;  %v987_v7 = vadd.f32 %v986_v5, %v818_v4  ;;  %v740_v8 = vadd.f32 %v1878_v48, %v739_v6  ;;  %v908_v9 = vpop.f32.mrf.mxu1 }
 0x123   : > { %v1077_v10 = vmax.f32 %v987_v7, 0.0  ;;  %v909_v11 = vadd.f32 %v908_v9, %v740_v8 }
 0x125   : > { %v1141_v12 = vpack.c.bf16 %v1077_v10, %v1077_v10  ;;  %v1046_v13 = vmax.f32 %v909_v11, 0.0 }
 0x126   : > { %v819_v14 = vpop.f32.mrf.mxu2 }
 0x127   : > { %1206 = vst.msk [vmem:[%s1893_s4 + $0xb8] sm:$0xf] %vm1159_vm0, %v1141_v12  ;;  %v1110_v15 = vpack.c.bf16 %v1046_v13, %v1046_v13  ;;  %v820_v16 = vadd.f32 %v1878_v48, %v819_v14  ;;  %v988_v17 = vpop.f32.mrf.mxu3 }
 0x128   : > { %v742_v18 = vpop.f32.mrf.mxu0 }
 0x129   : > { %1175 = vst.msk [vmem:[%s1893_s4 + $0x3c] sm:$0xf] %vm1159_vm0, %v1110_v15  ;;  %v989_v19 = vadd.f32 %v988_v17, %v820_v16  ;;  %v743_v20 = vadd.f32 %v1878_v48, %v742_v18  ;;  %v911_v21 = vpop.f32.mrf.mxu1 }
 0x12b   : > { %v1078_v22 = vmax.f32 %v989_v19, 0.0  ;;  %v912_v23 = vadd.f32 %v911_v21, %v743_v20 }
 0x12d   : > { %v1142_v24 = vpack.c.bf16 %v1078_v22, %v1078_v22  ;;  %v1047_v25 = vmax.f32 %v912_v23, 0.0 }
 0x12e   : > { %v822_v26 = vpop.f32.mrf.mxu2 }
 0x12f   : > { %1207 = vst.msk [vmem:[%s1893_s4 + $0xbc] sm:$0xf] %vm1159_vm0, %v1142_v24  ;;  %v1111_v27 = vpack.c.bf16 %v1047_v25, %v1047_v25  ;;  %v823_v28 = vadd.f32 %v1878_v48, %v822_v26  ;;  %v991_v29 = vpop.f32.mrf.mxu3 }
 0x130   : > { %v744_v30 = vpop.f32.mrf.mxu0 }
 0x131   : > { %1176 = vst.msk [vmem:[%s1893_s4 + $0x40] sm:$0xf] %vm1159_vm0, %v1111_v27  ;;  %v992_v31 = vadd.f32 %v991_v29, %v823_v28  ;;  %v745_v32 = vadd.f32 %v1878_v48, %v744_v30  ;;  %v913_v33 = vpop.f32.mrf.mxu1 }
 0x133   : > { %v1079_v34 = vmax.f32 %v992_v31, 0.0  ;;  %v914_v35 = vadd.f32 %v913_v33, %v745_v32 }
 0x135   : > { %v1143_v36 = vpack.c.bf16 %v1079_v34, %v1079_v34  ;;  %v1048_v37 = vmax.f32 %v914_v35, 0.0 }
 0x136   : > { %v824_v38 = vpop.f32.mrf.mxu2 }
 0x137   : > { %1208 = vst.msk [vmem:[%s1893_s4 + $0xc0] sm:$0xf] %vm1159_vm0, %v1143_v36  ;;  %v1112_v39 = vpack.c.bf16 %v1048_v37, %v1048_v37  ;;  %v825_v40 = vadd.f32 %v1878_v48, %v824_v38  ;;  %v993_v41 = vpop.f32.mrf.mxu3 }
 0x138   : > { %v747_v42 = vpop.f32.mrf.mxu0 }
 0x139   : > { %1177 = vst.msk [vmem:[%s1893_s4 + $0x44] sm:$0xf] %vm1159_vm0, %v1112_v39  ;;  %v994_v43 = vadd.f32 %v993_v41, %v825_v40  ;;  %v748_v44 = vadd.f32 %v1878_v48, %v747_v42  ;;  %v916_v45 = vpop.f32.mrf.mxu1 }
 0x13b   : > { %v1080_v46 = vmax.f32 %v994_v43, 0.0  ;;  %v917_v47 = vadd.f32 %v916_v45, %v748_v44 }
 0x13d   : > { %v1144_v49 = vpack.c.bf16 %v1080_v46, %v1080_v46  ;;  %v1049_v50 = vmax.f32 %v917_v47, 0.0 }
 0x13e   : > { %v827_v51 = vpop.f32.mrf.mxu2 }
 0x13f   : > { %1209 = vst.msk [vmem:[%s1893_s4 + $0xc4] sm:$0xf] %vm1159_vm0, %v1144_v49  ;;  %v1113_v52 = vpack.c.bf16 %v1049_v50, %v1049_v50  ;;  %v828_v53 = vadd.f32 %v1878_v48, %v827_v51  ;;  %v996_v54 = vpop.f32.mrf.mxu3 }
 0x140   : > { %v749_v55 = vpop.f32.mrf.mxu0 }
 0x141   : > { %1178 = vst.msk [vmem:[%s1893_s4 + $0x48] sm:$0xf] %vm1159_vm0, %v1113_v52  ;;  %v997_v56 = vadd.f32 %v996_v54, %v828_v53  ;;  %v750_v57 = vadd.f32 %v1878_v48, %v749_v55  ;;  %v918_v58 = vpop.f32.mrf.mxu1 }
 0x143   : > { %v1081_v59 = vmax.f32 %v997_v56, 0.0  ;;  %v919_v60 = vadd.f32 %v918_v58, %v750_v57 }
 0x145   : > { %v1145_v61 = vpack.c.bf16 %v1081_v59, %v1081_v59  ;;  %v1050_v62 = vmax.f32 %v919_v60, 0.0 }
 0x146   : > { %v829_v63 = vpop.f32.mrf.mxu2 }
 0x147   : > { %1210 = vst.msk [vmem:[%s1893_s4 + $0xc8] sm:$0xf] %vm1159_vm0, %v1145_v61  ;;  %v1114_v0 = vpack.c.bf16 %v1050_v62, %v1050_v62  ;;  %v830_v1 = vadd.f32 %v1878_v48, %v829_v63  ;;  %v998_v2 = vpop.f32.mrf.mxu3 }
 0x148   : > { %v752_v3 = vpop.f32.mrf.mxu0 }
 0x149   : > { %1179 = vst.msk [vmem:[%s1893_s4 + $0x4c] sm:$0xf] %vm1159_vm0, %v1114_v0  ;;  %v999_v4 = vadd.f32 %v998_v2, %v830_v1  ;;  %v753_v5 = vadd.f32 %v1878_v48, %v752_v3  ;;  %v921_v6 = vpop.f32.mrf.mxu1 }
 0x14b   : > { %v1082_v7 = vmax.f32 %v999_v4, 0.0  ;;  %v922_v8 = vadd.f32 %v921_v6, %v753_v5 }
 0x14d   : > { %v1146_v9 = vpack.c.bf16 %v1082_v7, %v1082_v7  ;;  %v1051_v10 = vmax.f32 %v922_v8, 0.0 }
 0x14e   : > { %v832_v11 = vpop.f32.mrf.mxu2 }
 0x14f   : > { %1211 = vst.msk [vmem:[%s1893_s4 + $0xcc] sm:$0xf] %vm1159_vm0, %v1146_v9  ;;  %v1115_v12 = vpack.c.bf16 %v1051_v10, %v1051_v10  ;;  %v833_v13 = vadd.f32 %v1878_v48, %v832_v11  ;;  %v1001_v14 = vpop.f32.mrf.mxu3 }
 0x150   : > { %v754_v15 = vpop.f32.mrf.mxu0 }
 0x151   : > { %1180 = vst.msk [vmem:[%s1893_s4 + $0x50] sm:$0xf] %vm1159_vm0, %v1115_v12  ;;  %v1002_v16 = vadd.f32 %v1001_v14, %v833_v13  ;;  %v755_v17 = vadd.f32 %v1878_v48, %v754_v15  ;;  %v923_v18 = vpop.f32.mrf.mxu1 }
 0x153   : > { %v1083_v19 = vmax.f32 %v1002_v16, 0.0  ;;  %v924_v20 = vadd.f32 %v923_v18, %v755_v17 }
 0x155   : > { %v1147_v21 = vpack.c.bf16 %v1083_v19, %v1083_v19  ;;  %v1052_v22 = vmax.f32 %v924_v20, 0.0 }
 0x156   : > { %v834_v23 = vpop.f32.mrf.mxu2 }
 0x157   : > { %1212 = vst.msk [vmem:[%s1893_s4 + $0xd0] sm:$0xf] %vm1159_vm0, %v1147_v21  ;;  %v1116_v24 = vpack.c.bf16 %v1052_v22, %v1052_v22  ;;  %v835_v25 = vadd.f32 %v1878_v48, %v834_v23  ;;  %v1003_v26 = vpop.f32.mrf.mxu3 }
 0x158   : > { %v757_v27 = vpop.f32.mrf.mxu0 }
 0x159   : > { %1181 = vst.msk [vmem:[%s1893_s4 + $0x54] sm:$0xf] %vm1159_vm0, %v1116_v24  ;;  %v1004_v28 = vadd.f32 %v1003_v26, %v835_v25  ;;  %v758_v29 = vadd.f32 %v1878_v48, %v757_v27  ;;  %v926_v30 = vpop.f32.mrf.mxu1 }
 0x15b   : > { %v1084_v31 = vmax.f32 %v1004_v28, 0.0  ;;  %v927_v32 = vadd.f32 %v926_v30, %v758_v29 }
 0x15d   : > { %v1148_v33 = vpack.c.bf16 %v1084_v31, %v1084_v31  ;;  %v1053_v34 = vmax.f32 %v927_v32, 0.0 }
 0x15e   : > { %v837_v35 = vpop.f32.mrf.mxu2 }
 0x15f   : > { %1213 = vst.msk [vmem:[%s1893_s4 + $0xd4] sm:$0xf] %vm1159_vm0, %v1148_v33  ;;  %v1117_v36 = vpack.c.bf16 %v1053_v34, %v1053_v34  ;;  %v838_v37 = vadd.f32 %v1878_v48, %v837_v35  ;;  %v1006_v38 = vpop.f32.mrf.mxu3  ;;  %v1718_v34 = vld [vmem:[%s2141_s2] ss:$0 sm:$0xff] }
 0x160   : > { %v759_v39 = vpop.f32.mrf.mxu0 }
 0x161   : > { %1182 = vst.msk [vmem:[%s1893_s4 + $0x58] sm:$0xf] %vm1159_vm0, %v1117_v36  ;;  %v1007_v40 = vadd.f32 %v1006_v38, %v838_v37  ;;  %v760_v41 = vadd.f32 %v1878_v48, %v759_v39  ;;  %v928_v42 = vpop.f32.mrf.mxu1 }
 0x163   : > { %v1085_v43 = vmax.f32 %v1007_v40, 0.0  ;;  %v929_v44 = vadd.f32 %v928_v42, %v760_v41 }
 0x165   : > { %v1149_v45 = vpack.c.bf16 %v1085_v43, %v1085_v43  ;;  %v1054_v46 = vmax.f32 %v929_v44, 0.0 }
 0x166   : > { %v839_v47 = vpop.f32.mrf.mxu2 }
 0x167   : > { %1214 = vst.msk [vmem:[%s1893_s4 + $0xd8] sm:$0xf] %vm1159_vm0, %v1149_v45  ;;  %v1118_v49 = vpack.c.bf16 %v1054_v46, %v1054_v46  ;;  %v840_v50 = vadd.f32 %v1878_v48, %v839_v47  ;;  %v1008_v51 = vpop.f32.mrf.mxu3 }
 0x168   : > { %v762_v52 = vpop.f32.mrf.mxu0 }
 0x169   : > { %1183 = vst.msk [vmem:[%s1893_s4 + $0x5c] sm:$0xf] %vm1159_vm0, %v1118_v49  ;;  %v1009_v53 = vadd.f32 %v1008_v51, %v840_v50  ;;  %v763_v54 = vadd.f32 %v1878_v48, %v762_v52  ;;  %v931_v55 = vpop.f32.mrf.mxu1 }
 0x16b   : > { %v1086_v56 = vmax.f32 %v1009_v53, 0.0  ;;  %v932_v57 = vadd.f32 %v931_v55, %v763_v54 }
 0x16d   : > { %v1150_v58 = vpack.c.bf16 %v1086_v56, %v1086_v56  ;;  %v1055_v59 = vmax.f32 %v932_v57, 0.0 }
 0x16e   : > { %v842_v60 = vpop.f32.mrf.mxu2 }
 0x16f   : > { %1215 = vst.msk [vmem:[%s1893_s4 + $0xdc] sm:$0xf] %vm1159_vm0, %v1150_v58  ;;  %v1119_v61 = vpack.c.bf16 %v1055_v59, %v1055_v59  ;;  %v843_v62 = vadd.f32 %v1878_v48, %v842_v60  ;;  %v1011_v63 = vpop.f32.mrf.mxu3 }
 0x170   : > { %v764_v0 = vpop.f32.mrf.mxu0 }
 0x171   : > { %1184 = vst.msk [vmem:[%s1893_s4 + $0x60] sm:$0xf] %vm1159_vm0, %v1119_v61  ;;  %v1012_v1 = vadd.f32 %v1011_v63, %v843_v62  ;;  %v765_v2 = vadd.f32 %v1878_v48, %v764_v0  ;;  %v933_v3 = vpop.f32.mrf.mxu1 }
 0x173   : > { %v1087_v4 = vmax.f32 %v1012_v1, 0.0  ;;  %v934_v5 = vadd.f32 %v933_v3, %v765_v2 }
 0x175   : > { %v1151_v6 = vpack.c.bf16 %v1087_v4, %v1087_v4  ;;  %v1056_v7 = vmax.f32 %v934_v5, 0.0 }
 0x176   : > { %v844_v8 = vpop.f32.mrf.mxu2 }
 0x177   : > { %1216 = vst.msk [vmem:[%s1893_s4 + $0xe0] sm:$0xf] %vm1159_vm0, %v1151_v6  ;;  %v1120_v9 = vpack.c.bf16 %v1056_v7, %v1056_v7  ;;  %v845_v10 = vadd.f32 %v1878_v48, %v844_v8  ;;  %v1013_v11 = vpop.f32.mrf.mxu3 }
 0x178   : > { %v767_v12 = vpop.f32.mrf.mxu0 }
 0x179   : > { %1185 = vst.msk [vmem:[%s1893_s4 + $0x64] sm:$0xf] %vm1159_vm0, %v1120_v9  ;;  %v1014_v13 = vadd.f32 %v1013_v11, %v845_v10  ;;  %v768_v14 = vadd.f32 %v1878_v48, %v767_v12  ;;  %v936_v15 = vpop.f32.mrf.mxu1 }
 0x17b   : > { %v1088_v16 = vmax.f32 %v1014_v13, 0.0  ;;  %v937_v17 = vadd.f32 %v936_v15, %v768_v14 }
 0x17d   : > { %v1152_v18 = vpack.c.bf16 %v1088_v16, %v1088_v16  ;;  %v1057_v19 = vmax.f32 %v937_v17, 0.0 }
 0x17e   : > { %v847_v20 = vpop.f32.mrf.mxu2 }
 0x17f   : > { %1217 = vst.msk [vmem:[%s1893_s4 + $0xe4] sm:$0xf] %vm1159_vm0, %v1152_v18  ;;  %v1121_v21 = vpack.c.bf16 %v1057_v19, %v1057_v19  ;;  %v848_v22 = vadd.f32 %v1878_v48, %v847_v20  ;;  %v1016_v23 = vpop.f32.mrf.mxu3 }
 0x180   : > { %v769_v24 = vpop.f32.mrf.mxu0 }
 0x181   : > { %1186 = vst.msk [vmem:[%s1893_s4 + $0x68] sm:$0xf] %vm1159_vm0, %v1121_v21  ;;  %v1017_v25 = vadd.f32 %v1016_v23, %v848_v22  ;;  %v770_v26 = vadd.f32 %v1878_v48, %v769_v24  ;;  %v938_v27 = vpop.f32.mrf.mxu1 }
 0x183   : > { %v1089_v28 = vmax.f32 %v1017_v25, 0.0  ;;  %v939_v29 = vadd.f32 %v938_v27, %v770_v26 }
 0x185   : > { %v1153_v30 = vpack.c.bf16 %v1089_v28, %v1089_v28  ;;  %v1058_v31 = vmax.f32 %v939_v29, 0.0 }
 0x186   : > { %v849_v32 = vpop.f32.mrf.mxu2 }
 0x187   : > { %1218 = vst.msk [vmem:[%s1893_s4 + $0xe8] sm:$0xf] %vm1159_vm0, %v1153_v30  ;;  %v1122_v33 = vpack.c.bf16 %v1058_v31, %v1058_v31  ;;  %v850_v35 = vadd.f32 %v1718_v34, %v849_v32  ;;  %v1018_v36 = vpop.f32.mrf.mxu3 }
 0x188   : > { %v772_v37 = vpop.f32.mrf.mxu0 }
 0x189   : > { %1187 = vst.msk [vmem:[%s1893_s4 + $0x6c] sm:$0xf] %vm1159_vm0, %v1122_v33  ;;  %v1019_v48 = vadd.f32 %v1018_v36, %v850_v35  ;;  %v773_v38 = vadd.f32 %v1718_v34, %v772_v37  ;;  %v941_v39 = vpop.f32.mrf.mxu1 }
 0x18b   : > { %v1090_v40 = vmax.f32 %v1019_v48, 0.0  ;;  %v942_v41 = vadd.f32 %v941_v39, %v773_v38 }
 0x18d   : > { %v1154_v42 = vpack.c.bf16 %v1090_v40, %v1090_v40  ;;  %v1059_v43 = vmax.f32 %v942_v41, 0.0 }
 0x18e   : > { %v852_v44 = vpop.f32.mrf.mxu2 }
 0x18f   : > { %1219 = vst.msk [vmem:[%s1893_s4 + $0xec] sm:$0xf] %vm1159_vm0, %v1154_v42  ;;  %v1123_v45 = vpack.c.bf16 %v1059_v43, %v1059_v43  ;;  %v853_v46 = vadd.f32 %v1718_v34, %v852_v44  ;;  %v1021_v47 = vpop.f32.mrf.mxu3 }
 0x190   : > { %v774_v49 = vpop.f32.mrf.mxu0 }
 0x191   : > { %1188 = vst.msk [vmem:[%s1893_s4 + $0x70] sm:$0xf] %vm1159_vm0, %v1123_v45  ;;  %v1022_v50 = vadd.f32 %v1021_v47, %v853_v46  ;;  %v775_v51 = vadd.f32 %v1718_v34, %v774_v49  ;;  %v943_v52 = vpop.f32.mrf.mxu1 }
 0x193   : > { %v1091_v53 = vmax.f32 %v1022_v50, 0.0  ;;  %v944_v54 = vadd.f32 %v943_v52, %v775_v51 }
 0x195   : > { %v1155_v55 = vpack.c.bf16 %v1091_v53, %v1091_v53  ;;  %v1060_v56 = vmax.f32 %v944_v54, 0.0 }
 0x196   : > { %v854_v57 = vpop.f32.mrf.mxu2 }
 0x197   : > { %1220 = vst.msk [vmem:[%s1893_s4 + $0xf0] sm:$0xf] %vm1159_vm0, %v1155_v55  ;;  %v1124_v58 = vpack.c.bf16 %v1060_v56, %v1060_v56  ;;  %v855_v59 = vadd.f32 %v1718_v34, %v854_v57  ;;  %v1023_v60 = vpop.f32.mrf.mxu3 }
 0x198   : > { %v777_v61 = vpop.f32.mrf.mxu0 }
 0x199   : > { %1189 = vst.msk [vmem:[%s1893_s4 + $0x74] sm:$0xf] %vm1159_vm0, %v1124_v58  ;;  %v1024_v62 = vadd.f32 %v1023_v60, %v855_v59  ;;  %v778_v63 = vadd.f32 %v1718_v34, %v777_v61  ;;  %v946_v0 = vpop.f32.mrf.mxu1 }
 0x19b   : > { %v1092_v1 = vmax.f32 %v1024_v62, 0.0  ;;  %v947_v2 = vadd.f32 %v946_v0, %v778_v63 }
 0x19d   : > { %v1156_v3 = vpack.c.bf16 %v1092_v1, %v1092_v1  ;;  %v1061_v4 = vmax.f32 %v947_v2, 0.0 }
 0x19e   : > { %v857_v5 = vpop.f32.mrf.mxu2 }
 0x19f   : > { %1221 = vst.msk [vmem:[%s1893_s4 + $0xf4] sm:$0xf] %vm1159_vm0, %v1156_v3  ;;  %v1125_v6 = vpack.c.bf16 %v1061_v4, %v1061_v4  ;;  %v858_v7 = vadd.f32 %v1718_v34, %v857_v5  ;;  %v1026_v8 = vpop.f32.mrf.mxu3 }
 0x1a0   : > { %v779_v9 = vpop.f32.mrf.mxu0 }
 0x1a1   : > { %1190 = vst.msk [vmem:[%s1893_s4 + $0x78] sm:$0xf] %vm1159_vm0, %v1125_v6  ;;  %v1027_v10 = vadd.f32 %v1026_v8, %v858_v7  ;;  %v780_v11 = vadd.f32 %v1718_v34, %v779_v9  ;;  %v948_v12 = vpop.f32.mrf.mxu1 }
 0x1a3   : > { %v1093_v13 = vmax.f32 %v1027_v10, 0.0  ;;  %v949_v14 = vadd.f32 %v948_v12, %v780_v11 }
 0x1a5   : > { %v1157_v15 = vpack.c.bf16 %v1093_v13, %v1093_v13  ;;  %v1062_v16 = vmax.f32 %v949_v14, 0.0 }
 0x1a6   : > { %v859_v17 = vpop.f32.mrf.mxu2 }
 0x1a7   : > { %1222 = vst.msk [vmem:[%s1893_s4 + $0xf8] sm:$0xf] %vm1159_vm0, %v1157_v15  ;;  %v1126_v18 = vpack.c.bf16 %v1062_v16, %v1062_v16  ;;  %v860_v19 = vadd.f32 %v1718_v34, %v859_v17  ;;  %v1028_v20 = vpop.f32.mrf.mxu3 }
 0x1a9   : > { %1191 = vst.msk [vmem:[%s1893_s4 + $0x7c] sm:$0xf] %vm1159_vm0, %v1126_v18  ;;  %v1029_v21 = vadd.f32 %v1028_v20, %v860_v19 }
 0x1ab   : > { %v1094_v22 = vmax.f32 %v1029_v21, 0.0 }
 0x1ad   : > { %v1158_v23 = vpack.c.bf16 %v1094_v22, %v1094_v22 }
 0x1af   : > { %1223 = vst.msk [vmem:[%s1893_s4 + $0xfc] sm:$0xf] %vm1159_vm0, %v1158_v23 }
 0x1b0 PF: > { %s13_s12 = sadd.s32 1, %s1725_s12  }
 0x1b1   : > { %p10_p4 = scmp.ge.s32.totalorder %s13_s12, 4  }
 0x1b3   :  { %12 = sbr.rel (!%p10_p4) target bundleno = 1 (0x1), region = 62 }

// kernel: dueling_dqn_forward.5
= control target key start
LH: loop header
LB: loop body
LE: loop exit
PB: predicated region body
PF: predicated region fallthrough
CT: control target
= control target key end

     0   :  { %vm824_vm0 = vcmask 519168   ;;  %s1683_s1 = inlined_call_operand.vmem [shape: bf16[512,64], index: 1, kind: input, shape index: {}]   ;;  %s1684_s2 = inlined_call_operand.vmem [shape: f32[1,64], index: 2, kind: input, shape index: {}]   ;;  %s1685_s0 = inlined_call_operand.vmem [shape: bf16[168,512], index: 0, kind: input, shape index: {}]   ;;  %s1686_s3 = inlined_call_operand.vmem [shape: bf16[168,64], index: 3, kind: output, shape index: {}]  }
   0x1   :  { %v1185_v0 = vld [vmem:[%s1683_s1 + $0x38] sm:$0xff]  ;;  %v1184_v4 = vld [vmem:[%s1683_s1 + $0x30] sm:$0xff]  ;;  %v1183_v8 = vld [vmem:[%s1683_s1 + $0x28] sm:$0xff] }
   0x2   :  { %v1193_v1 = vld [vmem:[%s1683_s1 + $0x78] sm:$0xff]  ;;  %530 = vmatpush.bf16.msra.mxu0 %v1185_v0  ;;  %v1192_v5 = vld [vmem:[%s1683_s1 + $0x70] sm:$0xff]  ;;  %v1191_v9 = vld [vmem:[%s1683_s1 + $0x68] sm:$0xff] }
   0x3   :  { %v1201_v2 = vld [vmem:[%s1683_s1 + $0xb8] sm:$0xff]  ;;  %593 = vmatpush.bf16.msra.mxu1 %v1193_v1  ;;  %v1200_v6 = vld [vmem:[%s1683_s1 + $0xb0] sm:$0xff]  ;;  %v1199_v10 = vld [vmem:[%s1683_s1 + $0xa8] sm:$0xff] }
   0x4   :  { %v1209_v3 = vld [vmem:[%s1683_s1 + $0xf8] sm:$0xff]  ;;  %656 = vmatpush.bf16.msra.mxu2 %v1201_v2  ;;  %v1208_v7 = vld [vmem:[%s1683_s1 + $0xf0] sm:$0xff]  ;;  %v1207_v11 = vld [vmem:[%s1683_s1 + $0xe8] sm:$0xff] }
   0x5   :  { %719 = vmatpush.bf16.msra.mxu3 %v1209_v3  ;;  %v1182_v12 = vld [vmem:[%s1683_s1 + $0x20] sm:$0xff]  ;;  %v1181_v16 = vld [vmem:[%s1683_s1 + $0x18] sm:$0xff]  ;;  %v1180_v20 = vld [vmem:[%s1683_s1 + $0x10] sm:$0xff] }
   0x6   :  { %531 = vmatpush.bf16.msra.mxu0 %v1184_v4  ;;  %v1190_v13 = vld [vmem:[%s1683_s1 + $0x60] sm:$0xff]  ;;  %v1189_v17 = vld [vmem:[%s1683_s1 + $0x58] sm:$0xff]  ;;  %v1188_v21 = vld [vmem:[%s1683_s1 + $0x50] sm:$0xff] }
   0x7   :  { %594 = vmatpush.bf16.msra.mxu1 %v1192_v5  ;;  %v1198_v14 = vld [vmem:[%s1683_s1 + $0xa0] sm:$0xff]  ;;  %v1197_v18 = vld [vmem:[%s1683_s1 + $0x98] sm:$0xff]  ;;  %v1196_v22 = vld [vmem:[%s1683_s1 + $0x90] sm:$0xff] }
   0x8   :  { %657 = vmatpush.bf16.msra.mxu2 %v1200_v6  ;;  %v1206_v15 = vld [vmem:[%s1683_s1 + $0xe0] sm:$0xff]  ;;  %v1205_v19 = vld [vmem:[%s1683_s1 + $0xd8] sm:$0xff]  ;;  %v1204_v23 = vld [vmem:[%s1683_s1 + $0xd0] sm:$0xff] }
   0x9   :  { %720 = vmatpush.bf16.msra.mxu3 %v1208_v7  ;;  %v1179_v24 = vld [vmem:[%s1683_s1 + $0x8] sm:$0xff]  ;;  %v1178_v28 = vld [vmem:[%s1683_s1] sm:$0xff]  ;;  %v1140_v33 = vld [vmem:[%s1685_s0 + $0xc] sm:$0xf0] }
   0xa   :  { %532 = vmatpush.bf16.msra.mxu0 %v1183_v8  ;;  %v1187_v25 = vld [vmem:[%s1683_s1 + $0x48] sm:$0xff]  ;;  %v1186_v29 = vld [vmem:[%s1683_s1 + $0x40] sm:$0xff]  ;;  %v854_v35 = vld [vmem:[%s1685_s0 + $0x10] sm:$0xf0] }
   0xb   :  { %595 = vmatpush.bf16.msra.mxu1 %v1191_v9  ;;  %v1195_v26 = vld [vmem:[%s1683_s1 + $0x88] sm:$0xff]  ;;  %v1194_v30 = vld [vmem:[%s1683_s1 + $0x80] sm:$0xff]  ;;  %v1141_v37 = vld [vmem:[%s1685_s0 + $0x14] sm:$0xf0] }
   0xc   :  { %658 = vmatpush.bf16.msra.mxu2 %v1199_v10  ;;  %v1203_v27 = vld [vmem:[%s1683_s1 + $0xc8] sm:$0xff]  ;;  %v1202_v31 = vld [vmem:[%s1683_s1 + $0xc0] sm:$0xff]  ;;  %v862_v39 = vld [vmem:[%s1685_s0 + $0x18] sm:$0xf0] }
   0xd   :  { %721 = vmatpush.bf16.msra.mxu3 %v1207_v11  ;;  %v852_v32 = vld [vmem:[%s1685_s0] sm:$0xf]  ;;  %v1138_v34 = vld [vmem:[%s1685_s0 + $0x4] sm:$0xf]  ;;  %v860_v36 = vld [vmem:[%s1685_s0 + $0x8] sm:$0xf] }
   0xe   :  { %533 = vmatpush.bf16.msra.mxu0 %v1182_v12  ;;  %v1139_v38 = vld [vmem:[%s1685_s0 + $0xc] sm:$0xf]  ;;  %v853_v40 = vor.u32 %v1140_v33, %v852_v32  ;;  %v857_v41 = vor.u32 %v1138_v34, %v854_v35  ;;  %v861_v42 = vor.u32 %v1141_v37, %v860_v36  ;;  %v868_v44 = vld [vmem:[%s1685_s0 + $0x20] sm:$0xf]  ;;  %v1144_v45 = vld [vmem:[%s1685_s0 + $0x2c] sm:$0xf0] }
   0xf   :  { %596 = vmatpush.bf16.msra.mxu1 %v1190_v13  ;;  %v865_v43 = vor.u32 %v1139_v38, %v862_v39  ;;  %v1142_v46 = vld [vmem:[%s1685_s0 + $0x24] sm:$0xf]  ;;  %v870_v47 = vld [vmem:[%s1685_s0 + $0x30] sm:$0xf0]  ;;  %v876_v48 = vld [vmem:[%s1685_s0 + $0x28] sm:$0xf]  ;;  %v869_v52 = vor.u32 %v1144_v45, %v868_v44 }
  0x10   :  { %659 = vmatpush.bf16.msra.mxu2 %v1198_v14  ;;  %v1145_v49 = vld [vmem:[%s1685_s0 + $0x34] sm:$0xf0]  ;;  %v1143_v50 = vld [vmem:[%s1685_s0 + $0x2c] sm:$0xf]  ;;  %v878_v51 = vld [vmem:[%s1685_s0 + $0x38] sm:$0xf0]  ;;  %v873_v53 = vor.u32 %v1142_v46, %v870_v47 }
  0x11   :  { %722 = vmatpush.bf16.msra.mxu3 %v1206_v15  ;;  %v877_v54 = vor.u32 %v1145_v49, %v876_v48  ;;  %v881_v55 = vor.u32 %v1143_v50, %v878_v51  ;;  %v884_v56 = vld [vmem:[%s1685_s0 + $0x40] sm:$0xf]  ;;  %v1148_v57 = vld [vmem:[%s1685_s0 + $0x4c] sm:$0xf0]  ;;  %v1146_v58 = vld [vmem:[%s1685_s0 + $0x44] sm:$0xf] }
  0x12   :  { %534 = vmatpush.bf16.msra.mxu0 %v1181_v16  ;;  %v886_v59 = vld [vmem:[%s1685_s0 + $0x50] sm:$0xf0]  ;;  %v892_v60 = vld [vmem:[%s1685_s0 + $0x48] sm:$0xf]  ;;  %v1149_v61 = vld [vmem:[%s1685_s0 + $0x54] sm:$0xf0]  ;;  %v885_v0 = vor.u32 %v1148_v57, %v884_v56 }
  0x13   :  { %597 = vmatpush.bf16.msra.mxu1 %v1189_v17  ;;  %v1147_v62 = vld [vmem:[%s1685_s0 + $0x4c] sm:$0xf]  ;;  %v894_v63 = vld [vmem:[%s1685_s0 + $0x58] sm:$0xf0]  ;;  %v889_v1 = vor.u32 %v1146_v58, %v886_v59  ;;  %v893_v2 = vor.u32 %v1149_v61, %v892_v60  ;;  %v900_v4 = vld [vmem:[%s1685_s0 + $0x60] sm:$0xf] }
  0x14   :  { %660 = vmatpush.bf16.msra.mxu2 %v1197_v18  ;;  %v897_v3 = vor.u32 %v1147_v62, %v894_v63  ;;  %v1152_v5 = vld [vmem:[%s1685_s0 + $0x6c] sm:$0xf0]  ;;  %v1150_v6 = vld [vmem:[%s1685_s0 + $0x64] sm:$0xf]  ;;  %v902_v7 = vld [vmem:[%s1685_s0 + $0x70] sm:$0xf0] }
  0x15   :  { %723 = vmatpush.bf16.msra.mxu3 %v1205_v19  ;;  %v908_v8 = vld [vmem:[%s1685_s0 + $0x68] sm:$0xf]  ;;  %v1153_v9 = vld [vmem:[%s1685_s0 + $0x74] sm:$0xf0]  ;;  %v1151_v10 = vld [vmem:[%s1685_s0 + $0x6c] sm:$0xf]  ;;  %v901_v12 = vor.u32 %v1152_v5, %v900_v4  ;;  %v905_v13 = vor.u32 %v1150_v6, %v902_v7 }
  0x16   :  { %535 = vmatpush.bf16.msra.mxu0 %v1180_v20  ;;  %v910_v11 = vld [vmem:[%s1685_s0 + $0x78] sm:$0xf0]  ;;  %v909_v14 = vor.u32 %v1153_v9, %v908_v8  ;;  %v916_v16 = vld [vmem:[%s1685_s0 + $0x80] sm:$0xf]  ;;  %v1156_v17 = vld [vmem:[%s1685_s0 + $0x8c] sm:$0xf0] }
  0x17   :  { %598 = vmatpush.bf16.msra.mxu1 %v1188_v21  ;;  %v913_v15 = vor.u32 %v1151_v10, %v910_v11  ;;  %v1154_v18 = vld [vmem:[%s1685_s0 + $0x84] sm:$0xf]  ;;  %v918_v19 = vld [vmem:[%s1685_s0 + $0x90] sm:$0xf0]  ;;  %v924_v20 = vld [vmem:[%s1685_s0 + $0x88] sm:$0xf] }
  0x18   :  { %661 = vmatpush.bf16.msra.mxu2 %v1196_v22  ;;  %v1157_v21 = vld [vmem:[%s1685_s0 + $0x94] sm:$0xf0]  ;;  %v1155_v22 = vld [vmem:[%s1685_s0 + $0x8c] sm:$0xf]  ;;  %v940_v32 = vld [vmem:[%s1685_s0 + $0xa8] sm:$0xf] }
  0x19   :  { %724 = vmatpush.bf16.msra.mxu3 %v1204_v23  ;;  %v926_v23 = vld [vmem:[%s1685_s0 + $0x98] sm:$0xf0]  ;;  %v1161_v33 = vld [vmem:[%s1685_s0 + $0xb4] sm:$0xf0]  ;;  %v1159_v34 = vld [vmem:[%s1685_s0 + $0xac] sm:$0xf] }
  0x1a   :  { %536 = vmatpush.bf16.msra.mxu0 %v1179_v24  ;;  %v917_v24 = vor.u32 %v1156_v17, %v916_v16  ;;  %v942_v35 = vld [vmem:[%s1685_s0 + $0xb8] sm:$0xf0]  ;;  %v941_v38 = vor.u32 %v1161_v33, %v940_v32  ;;  %v956_v44 = vld [vmem:[%s1685_s0 + $0xc8] sm:$0xf]  ;;  %v1165_v45 = vld [vmem:[%s1685_s0 + $0xd4] sm:$0xf0] }
  0x1b   :  { %599 = vmatpush.bf16.msra.mxu1 %v1187_v25  ;;  %v921_v25 = vor.u32 %v1154_v18, %v918_v19  ;;  %v945_v39 = vor.u32 %v1159_v34, %v942_v35  ;;  %v1163_v46 = vld [vmem:[%s1685_s0 + $0xcc] sm:$0xf]  ;;  %v958_v47 = vld [vmem:[%s1685_s0 + $0xd8] sm:$0xf0]  ;;  %v957_v50 = vor.u32 %v1165_v45, %v956_v44  ;;  %v972_v56 = vld [vmem:[%s1685_s0 + $0xe8] sm:$0xf] }
  0x1c   :  { %662 = vmatpush.bf16.msra.mxu2 %v1195_v26  ;;  %v925_v26 = vor.u32 %v1157_v21, %v924_v20  ;;  %v961_v51 = vor.u32 %v1163_v46, %v958_v47  ;;  %v1169_v57 = vld [vmem:[%s1685_s0 + $0xf4] sm:$0xf0]  ;;  %v1167_v58 = vld [vmem:[%s1685_s0 + $0xec] sm:$0xf]  ;;  %v974_v59 = vld [vmem:[%s1685_s0 + $0xf8] sm:$0xf0] }
  0x1d   :  { %725 = vmatpush.bf16.msra.mxu3 %v1203_v27  ;;  %v929_v27 = vor.u32 %v1155_v22, %v926_v23  ;;  %v973_v62 = vor.u32 %v1169_v57, %v972_v56  ;;  %v977_v63 = vor.u32 %v1167_v58, %v974_v59  ;;  %v982_v4 = vld [vmem:[%s1685_s0 + $0x110] sm:$0xf0]  ;;  %v988_v5 = vld [vmem:[%s1685_s0 + $0x108] sm:$0xf]  ;;  %v1173_v6 = vld [vmem:[%s1685_s0 + $0x114] sm:$0xf0] }
  0x1e   :  { %537 = vmatpush.bf16.msra.mxu0 %v1178_v28  ;;  %v932_v28 = vld [vmem:[%s1685_s0 + $0xa0] sm:$0xf]  ;;  %v1171_v7 = vld [vmem:[%s1685_s0 + $0x10c] sm:$0xf]  ;;  %v990_v8 = vld [vmem:[%s1685_s0 + $0x118] sm:$0xf0] }
  0x1f   :  { %600 = vmatpush.bf16.msra.mxu1 %v1186_v29  ;;  %v1160_v29 = vld [vmem:[%s1685_s0 + $0xac] sm:$0xf0]  ;;  %v1006_v32 = vld [vmem:[%s1685_s0 + $0x138] sm:$0xf0] }
  0x20   :  { %663 = vmatpush.bf16.msra.mxu2 %v1194_v30  ;;  %v1158_v30 = vld [vmem:[%s1685_s0 + $0xa4] sm:$0xf]  ;;  %v933_v36 = vor.u32 %v1160_v29, %v932_v28  ;;  %v998_v28 = vld [vmem:[%s1685_s0 + $0x130] sm:$0xf0]  ;;  %v1004_v29 = vld [vmem:[%s1685_s0 + $0x128] sm:$0xf] }
  0x21   :  { %726 = vmatpush.bf16.msra.mxu3 %v1202_v31  ;;  %538 = vmatmul.bf16.vlgmr.msra.gmra.mxu0 %v853_v40  ;;  %v934_v31 = vld [vmem:[%s1685_s0 + $0xb0] sm:$0xf0]  ;;  %v948_v40 = vld [vmem:[%s1685_s0 + $0xc0] sm:$0xf] }
  0x22   :  { %601 = vmatmul.bf16.vlgmr.msra.gmra.mxu1 %v857_v41  ;;  %v937_v37 = vor.u32 %v1158_v30, %v934_v31  ;;  %v1164_v41 = vld [vmem:[%s1685_s0 + $0xcc] sm:$0xf0]  ;;  %v1177_v30 = vld [vmem:[%s1685_s0 + $0x134] sm:$0xf0]  ;;  %v1175_v31 = vld [vmem:[%s1685_s0 + $0x12c] sm:$0xf] }
  0x23   :  { %664 = vmatmul.bf16.vlgmr.msra.gmra.mxu2 %v861_v42  ;;  %v1162_v42 = vld [vmem:[%s1685_s0 + $0xc4] sm:$0xf]  ;;  %v949_v48 = vor.u32 %v1164_v41, %v948_v40 }
  0x24   :  { %727 = vmatmul.bf16.vlgmr.msra.gmra.mxu3 %v865_v43  ;;  %v950_v43 = vld [vmem:[%s1685_s0 + $0xd0] sm:$0xf0] }
  0x25   :  { %v953_v49 = vor.u32 %v1162_v42, %v950_v43  ;;  %v1005_v42 = vor.u32 %v1177_v30, %v1004_v29  ;;  %v1009_v43 = vor.u32 %v1175_v31, %v1006_v32 }
  0x31   :  { %543 = vmatmul.bf16.gmra.mxu0 %v869_v52  ;;  %v964_v52 = vld [vmem:[%s1685_s0 + $0xe0] sm:$0xf] }
  0x32   :  { %606 = vmatmul.bf16.gmra.mxu1 %v873_v53  ;;  %v1168_v53 = vld [vmem:[%s1685_s0 + $0xec] sm:$0xf0] }
  0x33   :  { %669 = vmatmul.bf16.gmra.mxu2 %v877_v54  ;;  %v1166_v54 = vld [vmem:[%s1685_s0 + $0xe4] sm:$0xf]  ;;  %v965_v60 = vor.u32 %v1168_v53, %v964_v52 }
  0x34   :  { %732 = vmatmul.bf16.gmra.mxu3 %v881_v55  ;;  %v966_v55 = vld [vmem:[%s1685_s0 + $0xf0] sm:$0xf0] }
  0x35   :  { %v969_v61 = vor.u32 %v1166_v54, %v966_v55  ;;  %v54_v54 = vld [vmem:[%s1685_s0 + $0x140] sm:$0xff]  ;;  %v55_v55 = vld [vmem:[%s1685_s0 + $0x148] sm:$0xff] }
  0x36   :  { %v246_v58 = vunpack.c.l.b16 %v54_v54  ;;  %v247_v59 = vunpack.c.h.b16 %v54_v54 }
  0x41   :  { %548 = vmatmul.bf16.gmra.mxu0 %v885_v0  ;;  %v1522_v0 = vld [vmem:[%s1684_s2] ss:$0 sm:$0xff] }
  0x42   :  { %611 = vmatmul.bf16.gmra.mxu1 %v889_v1  ;;  %v980_v1 = vld [vmem:[%s1685_s0 + $0x100] sm:$0xf] }
  0x43   :  { %674 = vmatmul.bf16.gmra.mxu2 %v893_v2  ;;  %v1172_v2 = vld [vmem:[%s1685_s0 + $0x10c] sm:$0xf0] }
  0x44   :  { %737 = vmatmul.bf16.gmra.mxu3 %v897_v3  ;;  %v1170_v3 = vld [vmem:[%s1685_s0 + $0x104] sm:$0xf]  ;;  %v981_v9 = vor.u32 %v1172_v2, %v980_v1 }
  0x45   :  { %v985_v10 = vor.u32 %v1170_v3, %v982_v4  ;;  %v290_v4 = vpack.c.b16 %v246_v58, %v246_v58 }
  0x51   :  { %553 = vmatmul.bf16.gmra.mxu0 %v901_v12 }
  0x52   :  { %616 = vmatmul.bf16.gmra.mxu1 %v905_v13  ;;  %v989_v13 = vor.u32 %v1173_v6, %v988_v5  ;;  %v291_v5 = vpack.c.b16 %v247_v59, %v247_v59 }
  0x53   :  { %679 = vmatmul.bf16.gmra.mxu2 %v909_v14  ;;  %v993_v14 = vor.u32 %v1171_v7, %v990_v8 }
  0x54   :  { %742 = vmatmul.bf16.gmra.mxu3 %v913_v15 }
  0x61   :  { %558 = vmatmul.bf16.gmra.mxu0 %v917_v24  ;;  %v996_v24 = vld [vmem:[%s1685_s0 + $0x120] sm:$0xf] }
  0x62   :  { %621 = vmatmul.bf16.gmra.mxu1 %v921_v25  ;;  %v1176_v25 = vld [vmem:[%s1685_s0 + $0x12c] sm:$0xf0] }
  0x63   :  { %684 = vmatmul.bf16.gmra.mxu2 %v925_v26  ;;  %v1174_v26 = vld [vmem:[%s1685_s0 + $0x124] sm:$0xf] }
  0x64   :  { %747 = vmatmul.bf16.gmra.mxu3 %v929_v27 }
  0x71   :  { %563 = vmatmul.bf16.gmra.mxu0 %v933_v36 }
  0x72   :  { %626 = vmatmul.bf16.gmra.mxu1 %v937_v37  ;;  %v997_v37 = vor.u32 %v1176_v25, %v996_v24 }
  0x73   :  { %689 = vmatmul.bf16.gmra.mxu2 %v941_v38  ;;  %v1001_v38 = vor.u32 %v1174_v26, %v998_v28 }
  0x74   :  { %752 = vmatmul.bf16.gmra.mxu3 %v945_v39 }
  0x81   :  { %568 = vmatmul.bf16.gmra.mxu0 %v949_v48 }
  0x82   :  { %631 = vmatmul.bf16.gmra.mxu1 %v953_v49 }
  0x83   :  { %694 = vmatmul.bf16.gmra.mxu2 %v957_v50 }
  0x84   :  { %757 = vmatmul.bf16.gmra.mxu3 %v961_v51 }
  0x91   :  { %573 = vmatmul.bf16.gmra.mxu0 %v965_v60 }
  0x92   :  { %636 = vmatmul.bf16.gmra.mxu1 %v969_v61  ;;  %v248_v61 = vunpack.c.l.b16 %v55_v55 }
  0x93   :  { %699 = vmatmul.bf16.gmra.mxu2 %v973_v62  ;;  %v249_v62 = vunpack.c.h.b16 %v55_v55 }
  0x94   :  { %762 = vmatmul.bf16.gmra.mxu3 %v977_v63 }
  0x9e   :  { %v539_v11 = vpop.f32.mrf.mxu0 }
  0x9f   :  { %v602_v12 = vpop.f32.mrf.mxu1  ;;  %v540_v15 = vadd.f32 %v1522_v0, %v539_v11 }
  0xa1   :  { %578 = vmatmul.bf16.gmra.mxu0 %v981_v9  ;;  %v603_v16 = vadd.f32 %v602_v12, %v540_v15  ;;  %v292_v9 = vpack.c.b16 %v248_v61, %v248_v61 }
  0xa2   :  { %641 = vmatmul.bf16.gmra.mxu1 %v985_v10  ;;  %v293_v10 = vpack.c.b16 %v249_v62, %v249_v62 }
  0xa3   :  { %704 = vmatmul.bf16.gmra.mxu2 %v989_v13 }
  0xa4   :  { %767 = vmatmul.bf16.gmra.mxu3 %v993_v14 }
  0xa6   :  { %v665_v17 = vpop.f32.mrf.mxu2  ;;  %v541_v20 = vpop.f32.mrf.mxu0 }
  0xa7   :  { %v728_v18 = vpop.f32.mrf.mxu3  ;;  %v666_v19 = vadd.f32 %v665_v17, %v603_v16  ;;  %v604_v21 = vpop.f32.mrf.mxu1  ;;  %v542_v23 = vadd.f32 %v1522_v0, %v541_v20 }
  0xa9   :  { %v729_v22 = vadd.f32 %v728_v18, %v666_v19  ;;  %v605_v34 = vadd.f32 %v604_v21, %v542_v23 }
  0xab   :  { %v782_v27 = vmax.f32 %v729_v22, 0.0 }
  0xad   :  { %v803_v33 = vpack.c.bf16 %v782_v27, %v782_v27 }
  0xae   :  { %v667_v35 = vpop.f32.mrf.mxu2  ;;  %v544_v40 = vpop.f32.mrf.mxu0 }
  0xaf   :  { %v730_v36 = vpop.f32.mrf.mxu3  ;;  %825 = vst.msk [vmem:[%s1686_s3] sm:$0xf] %vm824_vm0, %v803_v33  ;;  %v668_v39 = vadd.f32 %v667_v35, %v605_v34  ;;  %v607_v41 = vpop.f32.mrf.mxu1  ;;  %v545_v44 = vadd.f32 %v1522_v0, %v544_v40 }
  0xb1   :  { %v731_v45 = vadd.f32 %v730_v36, %v668_v39  ;;  %583 = vmatmul.bf16.gmra.mxu0 %v997_v37  ;;  %v608_v47 = vadd.f32 %v607_v41, %v545_v44 }
  0xb2   :  { %646 = vmatmul.bf16.gmra.mxu1 %v1001_v38 }
  0xb3   :  { %v783_v46 = vmax.f32 %v731_v45, 0.0  ;;  %709 = vmatmul.bf16.gmra.mxu2 %v1005_v42 }
  0xb4   :  { %772 = vmatmul.bf16.gmra.mxu3 %v1009_v43 }
  0xb5   :  { %v804_v48 = vpack.c.bf16 %v783_v46, %v783_v46 }
  0xb6   :  { %v670_v49 = vpop.f32.mrf.mxu2  ;;  %v546_v52 = vpop.f32.mrf.mxu0 }
  0xb7   :  { %v733_v50 = vpop.f32.mrf.mxu3  ;;  %826 = vst.msk [vmem:[%s1686_s3 + $0x4] sm:$0xf] %vm824_vm0, %v804_v48  ;;  %v671_v51 = vadd.f32 %v670_v49, %v608_v47  ;;  %v609_v53 = vpop.f32.mrf.mxu1  ;;  %v547_v57 = vadd.f32 %v1522_v0, %v546_v52 }
  0xb9   :  { %v734_v56 = vadd.f32 %v733_v50, %v671_v51  ;;  %v610_v1 = vadd.f32 %v609_v53, %v547_v57 }
  0xbb   :  { %v784_v60 = vmax.f32 %v734_v56, 0.0 }
  0xbd   :  { %v805_v63 = vpack.c.bf16 %v784_v60, %v784_v60 }
  0xbe   :  { %v672_v2 = vpop.f32.mrf.mxu2  ;;  %v549_v7 = vpop.f32.mrf.mxu0 }
  0xbf   :  { %v735_v3 = vpop.f32.mrf.mxu3  ;;  %827 = vst.msk [vmem:[%s1686_s3 + $0x8] sm:$0xf] %vm824_vm0, %v805_v63  ;;  %v673_v6 = vadd.f32 %v672_v2, %v610_v1  ;;  %v612_v8 = vpop.f32.mrf.mxu1  ;;  %v550_v11 = vadd.f32 %v1522_v0, %v549_v7 }
  0xc1   :  { %v736_v12 = vadd.f32 %v735_v3, %v673_v6  ;;  %588 = vmatmul.bf16.gmra.mxu0 %v290_v4  ;;  %v613_v14 = vadd.f32 %v612_v8, %v550_v11 }
  0xc2   :  { %651 = vmatmul.bf16.gmra.mxu1 %v291_v5 }
  0xc3   :  { %v785_v13 = vmax.f32 %v736_v12, 0.0  ;;  %714 = vmatmul.bf16.gmra.mxu2 %v292_v9 }
  0xc4   :  { %777 = vmatmul.bf16.gmra.mxu3 %v293_v10 }
  0xc5   :  { %v806_v15 = vpack.c.bf16 %v785_v13, %v785_v13 }
  0xc6   :  { %v675_v16 = vpop.f32.mrf.mxu2  ;;  %v551_v19 = vpop.f32.mrf.mxu0 }
  0xc7   :  { %v738_v17 = vpop.f32.mrf.mxu3  ;;  %828 = vst.msk [vmem:[%s1686_s3 + $0xc] sm:$0xf] %vm824_vm0, %v806_v15  ;;  %v676_v18 = vadd.f32 %v675_v16, %v613_v14  ;;  %v614_v20 = vpop.f32.mrf.mxu1  ;;  %v552_v22 = vadd.f32 %v1522_v0, %v551_v19 }
  0xc9   :  { %v739_v21 = vadd.f32 %v738_v17, %v676_v18  ;;  %v615_v25 = vadd.f32 %v614_v20, %v552_v22 }
  0xcb   :  { %v786_v23 = vmax.f32 %v739_v21, 0.0 }
  0xcd   :  { %v807_v24 = vpack.c.bf16 %v786_v23, %v786_v23 }
  0xce   :  { %v677_v26 = vpop.f32.mrf.mxu2  ;;  %v554_v29 = vpop.f32.mrf.mxu0 }
  0xcf   :  { %v740_v27 = vpop.f32.mrf.mxu3  ;;  %829 = vst.msk [vmem:[%s1686_s3 + $0x10] sm:$0xf] %vm824_vm0, %v807_v24  ;;  %v678_v28 = vadd.f32 %v677_v26, %v615_v25  ;;  %v617_v30 = vpop.f32.mrf.mxu1  ;;  %v555_v31 = vadd.f32 %v1522_v0, %v554_v29 }
  0xd1   :  { %v741_v32 = vadd.f32 %v740_v27, %v678_v28  ;;  %v618_v34 = vadd.f32 %v617_v30, %v555_v31 }
  0xd3   :  { %v787_v33 = vmax.f32 %v741_v32, 0.0 }
  0xd5   :  { %v808_v35 = vpack.c.bf16 %v787_v33, %v787_v33 }
  0xd6   :  { %v680_v36 = vpop.f32.mrf.mxu2  ;;  %v556_v39 = vpop.f32.mrf.mxu0 }
  0xd7   :  { %v743_v37 = vpop.f32.mrf.mxu3  ;;  %830 = vst.msk [vmem:[%s1686_s3 + $0x14] sm:$0xf] %vm824_vm0, %v808_v35  ;;  %v681_v38 = vadd.f32 %v680_v36, %v618_v34  ;;  %v619_v40 = vpop.f32.mrf.mxu1  ;;  %v557_v42 = vadd.f32 %v1522_v0, %v556_v39 }
  0xd9   :  { %v744_v41 = vadd.f32 %v743_v37, %v681_v38  ;;  %v620_v45 = vadd.f32 %v619_v40, %v557_v42 }
  0xdb   :  { %v788_v43 = vmax.f32 %v744_v41, 0.0 }
  0xdd   :  { %v809_v44 = vpack.c.bf16 %v788_v43, %v788_v43 }
  0xde   :  { %v682_v46 = vpop.f32.mrf.mxu2  ;;  %v559_v49 = vpop.f32.mrf.mxu0 }
  0xdf   :  { %v745_v47 = vpop.f32.mrf.mxu3  ;;  %831 = vst.msk [vmem:[%s1686_s3 + $0x18] sm:$0xf] %vm824_vm0, %v809_v44  ;;  %v683_v48 = vadd.f32 %v682_v46, %v620_v45  ;;  %v622_v50 = vpop.f32.mrf.mxu1  ;;  %v560_v51 = vadd.f32 %v1522_v0, %v559_v49 }
  0xe1   :  { %v746_v52 = vadd.f32 %v745_v47, %v683_v48  ;;  %v623_v54 = vadd.f32 %v622_v50, %v560_v51 }
  0xe3   :  { %v789_v53 = vmax.f32 %v746_v52, 0.0 }
  0xe5   :  { %v810_v55 = vpack.c.bf16 %v789_v53, %v789_v53 }
  0xe6   :  { %v685_v56 = vpop.f32.mrf.mxu2  ;;  %v561_v59 = vpop.f32.mrf.mxu0 }
  0xe7   :  { %v748_v57 = vpop.f32.mrf.mxu3  ;;  %832 = vst.msk [vmem:[%s1686_s3 + $0x1c] sm:$0xf] %vm824_vm0, %v810_v55  ;;  %v686_v58 = vadd.f32 %v685_v56, %v623_v54  ;;  %v624_v60 = vpop.f32.mrf.mxu1  ;;  %v562_v62 = vadd.f32 %v1522_v0, %v561_v59 }
  0xe9   :  { %v749_v61 = vadd.f32 %v748_v57, %v686_v58  ;;  %v625_v2 = vadd.f32 %v624_v60, %v562_v62 }
  0xeb   :  { %v790_v63 = vmax.f32 %v749_v61, 0.0 }
  0xed   :  { %v811_v1 = vpack.c.bf16 %v790_v63, %v790_v63 }
  0xee   :  { %v687_v3 = vpop.f32.mrf.mxu2  ;;  %v564_v6 = vpop.f32.mrf.mxu0 }
  0xef   :  { %v750_v4 = vpop.f32.mrf.mxu3  ;;  %833 = vst.msk [vmem:[%s1686_s3 + $0x20] sm:$0xf] %vm824_vm0, %v811_v1  ;;  %v688_v5 = vadd.f32 %v687_v3, %v625_v2  ;;  %v627_v7 = vpop.f32.mrf.mxu1  ;;  %v565_v8 = vadd.f32 %v1522_v0, %v564_v6 }
  0xf1   :  { %v751_v9 = vadd.f32 %v750_v4, %v688_v5  ;;  %v628_v11 = vadd.f32 %v627_v7, %v565_v8 }
  0xf3   :  { %v791_v10 = vmax.f32 %v751_v9, 0.0 }
  0xf5   :  { %v812_v12 = vpack.c.bf16 %v791_v10, %v791_v10 }
  0xf6   :  { %v690_v13 = vpop.f32.mrf.mxu2  ;;  %v566_v16 = vpop.f32.mrf.mxu0 }
  0xf7   :  { %v753_v14 = vpop.f32.mrf.mxu3  ;;  %834 = vst.msk [vmem:[%s1686_s3 + $0x24] sm:$0xf] %vm824_vm0, %v812_v12  ;;  %v691_v15 = vadd.f32 %v690_v13, %v628_v11  ;;  %v629_v17 = vpop.f32.mrf.mxu1  ;;  %v567_v19 = vadd.f32 %v1522_v0, %v566_v16 }
  0xf9   :  { %v754_v18 = vadd.f32 %v753_v14, %v691_v15  ;;  %v630_v22 = vadd.f32 %v629_v17, %v567_v19 }
  0xfb   :  { %v792_v20 = vmax.f32 %v754_v18, 0.0 }
  0xfd   :  { %v813_v21 = vpack.c.bf16 %v792_v20, %v792_v20 }
  0xfe   :  { %v692_v23 = vpop.f32.mrf.mxu2  ;;  %v569_v26 = vpop.f32.mrf.mxu0 }
  0xff   :  { %v755_v24 = vpop.f32.mrf.mxu3  ;;  %835 = vst.msk [vmem:[%s1686_s3 + $0x28] sm:$0xf] %vm824_vm0, %v813_v21  ;;  %v693_v25 = vadd.f32 %v692_v23, %v630_v22  ;;  %v632_v27 = vpop.f32.mrf.mxu1  ;;  %v570_v28 = vadd.f32 %v1522_v0, %v569_v26 }
 0x101   :  { %v756_v29 = vadd.f32 %v755_v24, %v693_v25  ;;  %v633_v31 = vadd.f32 %v632_v27, %v570_v28 }
 0x103   :  { %v793_v30 = vmax.f32 %v756_v29, 0.0 }
 0x105   :  { %v814_v32 = vpack.c.bf16 %v793_v30, %v793_v30 }
 0x106   :  { %v695_v33 = vpop.f32.mrf.mxu2  ;;  %v571_v36 = vpop.f32.mrf.mxu0 }
 0x107   :  { %v758_v34 = vpop.f32.mrf.mxu3  ;;  %836 = vst.msk [vmem:[%s1686_s3 + $0x2c] sm:$0xf] %vm824_vm0, %v814_v32  ;;  %v696_v35 = vadd.f32 %v695_v33, %v633_v31  ;;  %v634_v37 = vpop.f32.mrf.mxu1  ;;  %v572_v39 = vadd.f32 %v1522_v0, %v571_v36 }
 0x109   :  { %v759_v38 = vadd.f32 %v758_v34, %v696_v35  ;;  %v635_v42 = vadd.f32 %v634_v37, %v572_v39 }
 0x10b   :  { %v794_v40 = vmax.f32 %v759_v38, 0.0 }
 0x10d   :  { %v815_v41 = vpack.c.bf16 %v794_v40, %v794_v40 }
 0x10e   :  { %v697_v43 = vpop.f32.mrf.mxu2  ;;  %v574_v46 = vpop.f32.mrf.mxu0 }
 0x10f   :  { %v760_v44 = vpop.f32.mrf.mxu3  ;;  %837 = vst.msk [vmem:[%s1686_s3 + $0x30] sm:$0xf] %vm824_vm0, %v815_v41  ;;  %v698_v45 = vadd.f32 %v697_v43, %v635_v42  ;;  %v637_v47 = vpop.f32.mrf.mxu1  ;;  %v575_v48 = vadd.f32 %v1522_v0, %v574_v46 }
 0x111   :  { %v761_v49 = vadd.f32 %v760_v44, %v698_v45  ;;  %v638_v51 = vadd.f32 %v637_v47, %v575_v48 }
 0x113   :  { %v795_v50 = vmax.f32 %v761_v49, 0.0 }
 0x115   :  { %v816_v52 = vpack.c.bf16 %v795_v50, %v795_v50 }
 0x116   :  { %v700_v53 = vpop.f32.mrf.mxu2  ;;  %v576_v56 = vpop.f32.mrf.mxu0 }
 0x117   :  { %v763_v54 = vpop.f32.mrf.mxu3  ;;  %838 = vst.msk [vmem:[%s1686_s3 + $0x34] sm:$0xf] %vm824_vm0, %v816_v52  ;;  %v701_v55 = vadd.f32 %v700_v53, %v638_v51  ;;  %v639_v57 = vpop.f32.mrf.mxu1  ;;  %v577_v59 = vadd.f32 %v1522_v0, %v576_v56 }
 0x119   :  { %v764_v58 = vadd.f32 %v763_v54, %v701_v55  ;;  %v640_v62 = vadd.f32 %v639_v57, %v577_v59 }
 0x11b   :  { %v796_v60 = vmax.f32 %v764_v58, 0.0 }
 0x11d   :  { %v817_v61 = vpack.c.bf16 %v796_v60, %v796_v60 }
 0x11e   :  { %v702_v63 = vpop.f32.mrf.mxu2  ;;  %v579_v3 = vpop.f32.mrf.mxu0 }
 0x11f   :  { %v765_v1 = vpop.f32.mrf.mxu3  ;;  %839 = vst.msk [vmem:[%s1686_s3 + $0x38] sm:$0xf] %vm824_vm0, %v817_v61  ;;  %v703_v2 = vadd.f32 %v702_v63, %v640_v62  ;;  %v642_v4 = vpop.f32.mrf.mxu1  ;;  %v580_v5 = vadd.f32 %v1522_v0, %v579_v3 }
 0x121   :  { %v766_v6 = vadd.f32 %v765_v1, %v703_v2  ;;  %v643_v8 = vadd.f32 %v642_v4, %v580_v5 }
 0x123   :  { %v797_v7 = vmax.f32 %v766_v6, 0.0 }
 0x125   :  { %v818_v9 = vpack.c.bf16 %v797_v7, %v797_v7 }
 0x126   :  { %v705_v10 = vpop.f32.mrf.mxu2  ;;  %v581_v13 = vpop.f32.mrf.mxu0 }
 0x127   :  { %v768_v11 = vpop.f32.mrf.mxu3  ;;  %840 = vst.msk [vmem:[%s1686_s3 + $0x3c] sm:$0xf] %vm824_vm0, %v818_v9  ;;  %v706_v12 = vadd.f32 %v705_v10, %v643_v8  ;;  %v644_v14 = vpop.f32.mrf.mxu1  ;;  %v582_v16 = vadd.f32 %v1522_v0, %v581_v13 }
 0x129   :  { %v769_v15 = vadd.f32 %v768_v11, %v706_v12  ;;  %v645_v19 = vadd.f32 %v644_v14, %v582_v16 }
 0x12b   :  { %v798_v17 = vmax.f32 %v769_v15, 0.0 }
 0x12d   :  { %v819_v18 = vpack.c.bf16 %v798_v17, %v798_v17 }
 0x12e   :  { %v707_v20 = vpop.f32.mrf.mxu2  ;;  %v584_v23 = vpop.f32.mrf.mxu0 }
 0x12f   :  { %v770_v21 = vpop.f32.mrf.mxu3  ;;  %841 = vst.msk [vmem:[%s1686_s3 + $0x40] sm:$0xf] %vm824_vm0, %v819_v18  ;;  %v708_v22 = vadd.f32 %v707_v20, %v645_v19  ;;  %v647_v24 = vpop.f32.mrf.mxu1  ;;  %v585_v25 = vadd.f32 %v1522_v0, %v584_v23 }
 0x131   :  { %v771_v26 = vadd.f32 %v770_v21, %v708_v22  ;;  %v648_v28 = vadd.f32 %v647_v24, %v585_v25 }
 0x133   :  { %v799_v27 = vmax.f32 %v771_v26, 0.0 }
 0x135   :  { %v820_v29 = vpack.c.bf16 %v799_v27, %v799_v27 }
 0x136   :  { %v710_v30 = vpop.f32.mrf.mxu2  ;;  %v586_v33 = vpop.f32.mrf.mxu0 }
 0x137   :  { %v773_v31 = vpop.f32.mrf.mxu3  ;;  %842 = vst.msk [vmem:[%s1686_s3 + $0x44] sm:$0xf] %vm824_vm0, %v820_v29  ;;  %v711_v32 = vadd.f32 %v710_v30, %v648_v28  ;;  %v649_v34 = vpop.f32.mrf.mxu1  ;;  %v587_v36 = vadd.f32 %v1522_v0, %v586_v33 }
 0x139   :  { %v774_v35 = vadd.f32 %v773_v31, %v711_v32  ;;  %v650_v39 = vadd.f32 %v649_v34, %v587_v36 }
 0x13b   :  { %v800_v37 = vmax.f32 %v774_v35, 0.0 }
 0x13d   :  { %v821_v38 = vpack.c.bf16 %v800_v37, %v800_v37 }
 0x13e   :  { %v712_v40 = vpop.f32.mrf.mxu2  ;;  %v589_v43 = vpop.f32.mrf.mxu0 }
 0x13f   :  { %v775_v41 = vpop.f32.mrf.mxu3  ;;  %843 = vst.msk [vmem:[%s1686_s3 + $0x48] sm:$0xf] %vm824_vm0, %v821_v38  ;;  %v713_v42 = vadd.f32 %v712_v40, %v650_v39  ;;  %v652_v44 = vpop.f32.mrf.mxu1  ;;  %v590_v45 = vadd.f32 %v1522_v0, %v589_v43 }
 0x141   :  { %v776_v46 = vadd.f32 %v775_v41, %v713_v42  ;;  %v653_v48 = vadd.f32 %v652_v44, %v590_v45 }
 0x143   :  { %v801_v47 = vmax.f32 %v776_v46, 0.0 }
 0x145   :  { %v822_v49 = vpack.c.bf16 %v801_v47, %v801_v47 }
 0x146   :  { %v715_v50 = vpop.f32.mrf.mxu2  ;;  %v591_v53 = vpop.f32.mrf.mxu0 }
 0x147   :  { %v778_v51 = vpop.f32.mrf.mxu3  ;;  %844 = vst.msk [vmem:[%s1686_s3 + $0x4c] sm:$0xf] %vm824_vm0, %v822_v49  ;;  %v716_v52 = vadd.f32 %v715_v50, %v653_v48  ;;  %v654_v54 = vpop.f32.mrf.mxu1 }
 0x149   :  { %v779_v55 = vadd.f32 %v778_v51, %v716_v52 }
 0x14b   :  { %v802_v56 = vmax.f32 %v779_v55, 0.0 }
 0x14d   :  { %v823_v57 = vpack.c.bf16 %v802_v56, %v802_v56 }
 0x14e   :  { %v717_v58 = vpop.f32.mrf.mxu2 }
 0x14f   :  { %v780_v59 = vpop.f32.mrf.mxu3  ;;  %845 = vst.msk [vmem:[%s1686_s3 + $0x50] sm:$0xf] %vm824_vm0, %v823_v57 }

// kernel: dueling_dqn_forward.6
= control target key start
LH: loop header
LB: loop body
LE: loop exit
PB: predicated region body
PF: predicated region fallthrough
CT: control target
= control target key end

     0   :  { %vm513_vm0 = vcmask 523264   ;;  %vm776_vm1 = vcmask 519168   ;;  %s1581_s1 = inlined_call_operand.vmem [shape: bf16[576,64], index: 1, kind: input, shape index: {}]   ;;  %s1582_s2 = inlined_call_operand.vmem [shape: f32[1,64], index: 2, kind: input, shape index: {}]   ;;  %s1583_s0 = inlined_call_operand.vmem [shape: bf16[104,576], index: 0, kind: input, shape index: {}]   ;;  %s1584_s3 = inlined_call_operand.vmem [shape: bf16[104,64], index: 3, kind: output, shape index: {}]  }
   0x1   :  { %v1102_v0 = vld [vmem:[%s1581_s1 + $0x38] sm:$0xff]  ;;  %v1101_v1 = vld [vmem:[%s1581_s1 + $0x30] sm:$0xff]  ;;  %v1100_v2 = vld [vmem:[%s1581_s1 + $0x28] sm:$0xff] }
   0x2   :  { %1131 = vmatpush.bf16.msra.mxu1 %v1102_v0  ;;  %1132 = vmatpush.bf16.msra.mxu2 %v1102_v0  ;;  %v1099_v3 = vld [vmem:[%s1581_s1 + $0x20] sm:$0xff]  ;;  %v1098_v4 = vld [vmem:[%s1581_s1 + $0x18] sm:$0xff]  ;;  %v1097_v5 = vld [vmem:[%s1581_s1 + $0x10] sm:$0xff] }
   0x3   :  { %1133 = vmatpush.bf16.msra.mxu3 %v1102_v0  ;;  %535 = vmatpush.bf16.msra.mxu0 %v1102_v0  ;;  %v1096_v6 = vld [vmem:[%s1581_s1 + $0x8] sm:$0xff]  ;;  %v1200_v7 = vld [vmem:[%s1583_s0 + $0xf0] sm:$0xff]  ;;  %v1095_v8 = vld [vmem:[%s1581_s1] sm:$0xff] }
   0x4   :  { %v836_v9 = vld [vmem:[%s1583_s0 + $0x50] sm:$0xf]  ;;  %v1077_v10 = vld [vmem:[%s1583_s0 + $0x60] sm:$0xf0]  ;;  %v876_v11 = vld [vmem:[%s1583_s0 + $0xa0] sm:$0xf]  ;;  %v229_v15 = vunpack.c.l.b16 %v1200_v7 }
   0x5   :  { %v1087_v12 = vld [vmem:[%s1583_s0 + $0xb0] sm:$0xf0]  ;;  %v796_v13 = vld [vmem:[%s1583_s0] sm:$0xf]  ;;  %v1126_v16 = vld [vmem:[%s1581_s1 + $0xf8] sm:$0xff]  ;;  %v837_v18 = vor.u32 %v1077_v10, %v836_v9 }
   0x6   :  { %1134 = vmatpush.bf16.msra.mxu1 %v1101_v1  ;;  %1135 = vmatpush.bf16.msra.mxu2 %v1101_v1  ;;  %v1067_v14 = vld [vmem:[%s1583_s0 + $0x10] sm:$0xf0]  ;;  %v1118_v17 = vld [vmem:[%s1581_s1 + $0xb8] sm:$0xff]  ;;  %v877_v19 = vor.u32 %v1087_v12, %v876_v11  ;;  %v264_v23 = vpack.c.b16 %v229_v15, %v229_v15  ;;  %v1124_v28 = vld [vmem:[%s1581_s1 + $0xe8] sm:$0xff] }
   0x7   :  { %1136 = vmatpush.bf16.msra.mxu3 %v1101_v1  ;;  %536 = vmatpush.bf16.msra.mxu0 %v1101_v1  ;;  %v797_v20 = vor.u32 %v1067_v14, %v796_v13  ;;  %v1110_v21 = vld [vmem:[%s1581_s1 + $0x78] sm:$0xff]  ;;  %v1125_v24 = vld [vmem:[%s1581_s1 + $0xf0] sm:$0xff]  ;;  %v1116_v29 = vld [vmem:[%s1581_s1 + $0xa8] sm:$0xff] }
   0x8   :  { %v1130_v22 = vld [vmem:[%s1581_s1 + $0x118] sm:$0xff]  ;;  %v1117_v25 = vld [vmem:[%s1581_s1 + $0xb0] sm:$0xff]  ;;  %v1108_v30 = vld [vmem:[%s1581_s1 + $0x68] sm:$0xff] }
   0x9   :  { %v1109_v26 = vld [vmem:[%s1581_s1 + $0x70] sm:$0xff]  ;;  %v1128_v31 = vld [vmem:[%s1581_s1 + $0x108] sm:$0xff]  ;;  %v1123_v32 = vld [vmem:[%s1581_s1 + $0xe0] sm:$0xff] }
   0xa   :  { %1137 = vmatpush.bf16.msra.mxu1 %v1100_v2  ;;  %1138 = vmatpush.bf16.msra.mxu2 %v1100_v2  ;;  %v1129_v27 = vld [vmem:[%s1581_s1 + $0x110] sm:$0xff]  ;;  %v1115_v33 = vld [vmem:[%s1581_s1 + $0xa0] sm:$0xff]  ;;  %v856_v35 = vld [vmem:[%s1583_s0 + $0x78] sm:$0xf] }
   0xb   :  { %1139 = vmatpush.bf16.msra.mxu3 %v1100_v2  ;;  %537 = vmatpush.bf16.msra.mxu0 %v1100_v2  ;;  %v1107_v34 = vld [vmem:[%s1581_s1 + $0x60] sm:$0xff]  ;;  %v1082_v36 = vld [vmem:[%s1583_s0 + $0x88] sm:$0xf0]  ;;  %v896_v37 = vld [vmem:[%s1583_s0 + $0xc8] sm:$0xf] }
   0xc   :  { %v1092_v38 = vld [vmem:[%s1583_s0 + $0xd8] sm:$0xf0]  ;;  %v816_v39 = vld [vmem:[%s1583_s0 + $0x28] sm:$0xf]  ;;  %v1127_v41 = vld [vmem:[%s1581_s1 + $0x100] sm:$0xff]  ;;  %v857_v44 = vor.u32 %v1082_v36, %v856_v35 }
   0xd   :  { %v1072_v40 = vld [vmem:[%s1583_s0 + $0x38] sm:$0xf0]  ;;  %v897_v45 = vor.u32 %v1092_v38, %v896_v37  ;;  %v1121_v48 = vld [vmem:[%s1581_s1 + $0xd0] sm:$0xff]  ;;  %v1120_v51 = vld [vmem:[%s1581_s1 + $0xc8] sm:$0xff] }
   0xe   :  { %1140 = vmatpush.bf16.msra.mxu1 %v1099_v3  ;;  %1141 = vmatpush.bf16.msra.mxu2 %v1099_v3  ;;  %v1122_v42 = vld [vmem:[%s1581_s1 + $0xd8] sm:$0xff]  ;;  %v817_v46 = vor.u32 %v1072_v40, %v816_v39  ;;  %v1113_v49 = vld [vmem:[%s1581_s1 + $0x90] sm:$0xff]  ;;  %v1112_v52 = vld [vmem:[%s1581_s1 + $0x88] sm:$0xff] }
   0xf   :  { %1142 = vmatpush.bf16.msra.mxu3 %v1099_v3  ;;  %538 = vmatpush.bf16.msra.mxu0 %v1099_v3  ;;  %v1114_v43 = vld [vmem:[%s1581_s1 + $0x98] sm:$0xff]  ;;  %v1105_v50 = vld [vmem:[%s1581_s1 + $0x50] sm:$0xff]  ;;  %v1104_v53 = vld [vmem:[%s1581_s1 + $0x48] sm:$0xff] }
  0x10   :  { %v1106_v47 = vld [vmem:[%s1581_s1 + $0x58] sm:$0xff]  ;;  %v1119_v54 = vld [vmem:[%s1581_s1 + $0xc0] sm:$0xff]  ;;  %v1066_v56 = vld [vmem:[%s1583_s0 + $0xc] sm:$0xf] }
  0x11   :  { %v1111_v55 = vld [vmem:[%s1581_s1 + $0x80] sm:$0xff]  ;;  %v798_v60 = vld [vmem:[%s1583_s0 + $0x14] sm:$0xf0]  ;;  %v804_v61 = vld [vmem:[%s1583_s0 + $0x8] sm:$0xf] }
  0x12   :  { %1143 = vmatpush.bf16.msra.mxu1 %v1098_v4  ;;  %1144 = vmatpush.bf16.msra.mxu2 %v1098_v4  ;;  %v806_v57 = vld [vmem:[%s1583_s0 + $0x1c] sm:$0xf0]  ;;  %v1065_v59 = vld [vmem:[%s1583_s0 + $0x4] sm:$0xf]  ;;  %v1068_v62 = vld [vmem:[%s1583_s0 + $0x18] sm:$0xf0] }
  0x13   :  { %1145 = vmatpush.bf16.msra.mxu3 %v1098_v4  ;;  %539 = vmatpush.bf16.msra.mxu0 %v1098_v4  ;;  %v1103_v58 = vld [vmem:[%s1581_s1 + $0x40] sm:$0xff]  ;;  %v809_v63 = vor.u32 %v1066_v56, %v806_v57  ;;  %v812_v0 = vld [vmem:[%s1583_s0 + $0x10] sm:$0xf]  ;;  %v801_v2 = vor.u32 %v1065_v59, %v798_v60  ;;  %v805_v3 = vor.u32 %v1068_v62, %v804_v61  ;;  %v832_v13 = vld [vmem:[%s1583_s0 + $0x38] sm:$0xf] }
  0x14   :  { %v1069_v1 = vld [vmem:[%s1583_s0 + $0x20] sm:$0xf0]  ;;  %v818_v9 = vld [vmem:[%s1583_s0 + $0x3c] sm:$0xf0]  ;;  %v824_v10 = vld [vmem:[%s1583_s0 + $0x30] sm:$0xf] }
  0x15   :  { %v813_v4 = vor.u32 %v1069_v1, %v812_v0  ;;  %v1073_v11 = vld [vmem:[%s1583_s0 + $0x40] sm:$0xf0]  ;;  %v1074_v14 = vld [vmem:[%s1583_s0 + $0x48] sm:$0xf0]  ;;  %v1083_v35 = vld [vmem:[%s1583_s0 + $0x90] sm:$0xf0] }
  0x16   :  { %1146 = vmatpush.bf16.msra.mxu1 %v1097_v5  ;;  %1147 = vmatpush.bf16.msra.mxu2 %v1097_v5  ;;  %v872_v37 = vld [vmem:[%s1583_s0 + $0x88] sm:$0xf]  ;;  %v1084_v38 = vld [vmem:[%s1583_s0 + $0x98] sm:$0xf0]  ;;  %v1090_v56 = vld [vmem:[%s1583_s0 + $0xcc] sm:$0xf] }
  0x17   :  { %1148 = vmatpush.bf16.msra.mxu3 %v1097_v5  ;;  %540 = vmatpush.bf16.msra.mxu0 %v1097_v5  ;;  %v1071_v5 = vld [vmem:[%s1583_s0 + $0x34] sm:$0xf]  ;;  %v898_v57 = vld [vmem:[%s1583_s0 + $0xdc] sm:$0xf0]  ;;  %v1093_v59 = vld [vmem:[%s1583_s0 + $0xe0] sm:$0xf0] }
  0x18   :  { %v912_v61 = vld [vmem:[%s1583_s0 + $0xd8] sm:$0xf]  ;;  %v1094_v62 = vld [vmem:[%s1583_s0 + $0xe8] sm:$0xf0] }
  0x19   :  { %v913_v1 = vor.u32 %v1094_v62, %v912_v61 }
  0x1a   :  { %1149 = vmatpush.bf16.msra.mxu1 %v1096_v6  ;;  %1150 = vmatpush.bf16.msra.mxu2 %v1096_v6 }
  0x1b   :  { %1151 = vmatpush.bf16.msra.mxu3 %v1096_v6  ;;  %541 = vmatpush.bf16.msra.mxu0 %v1096_v6  ;;  %v826_v6 = vld [vmem:[%s1583_s0 + $0x44] sm:$0xf0] }
  0x1c   :  { %v829_v12 = vor.u32 %v1071_v5, %v826_v6  ;;  %v230_v5 = vunpack.c.h.b16 %v1200_v7 }
  0x1e   :  { %1152 = vmatpush.bf16.msra.mxu1 %v1095_v8  ;;  %1153 = vmatpush.bf16.msra.mxu2 %v1095_v8 }
  0x1f   :  { %1154 = vmatpush.bf16.msra.mxu3 %v1095_v8  ;;  %542 = vmatpush.bf16.msra.mxu0 %v1095_v8  ;;  %v1070_v8 = vld [vmem:[%s1583_s0 + $0x2c] sm:$0xf] }
  0x20   :  { %v821_v15 = vor.u32 %v1070_v8, %v818_v9 }
  0x21   :  { %553 = vmatmul.bf16.vlgmr.msra.gmra.mxu1 %v837_v18  ;;  %563 = vmatmul.bf16.vlgmr.msra.gmra.mxu2 %v877_v19  ;;  %v1076_v18 = vld [vmem:[%s1583_s0 + $0x5c] sm:$0xf]  ;;  %v846_v19 = vld [vmem:[%s1583_s0 + $0x6c] sm:$0xf0] }
  0x22   :  { %621 = vmatpush.bf16.msrb.mxu2 %v1118_v17  ;;  %543 = vmatmul.bf16.vlgmr.msra.gmra.mxu0 %v797_v20  ;;  %v833_v17 = vor.u32 %v1074_v14, %v832_v13  ;;  %v1075_v20 = vld [vmem:[%s1583_s0 + $0x54] sm:$0xf] }
  0x23   :  { %664 = vmatpush.bf16.msrb.mxu3 %v1126_v16  ;;  %578 = vmatpush.bf16.msrb.mxu1 %v1110_v21  ;;  %v825_v16 = vor.u32 %v1073_v11, %v824_v10  ;;  %v838_v21 = vld [vmem:[%s1583_s0 + $0x64] sm:$0xf0]  ;;  %v265_v10 = vpack.c.b16 %v230_v5, %v230_v5 }
  0x24   :  { %711 = vmatpush.bf16.msrb.mxu0 %v1130_v22  ;;  %573 = vmatmul.bf16.vlgmr.msra.gmra.mxu3 %v264_v23  ;;  %v844_v22 = vld [vmem:[%s1583_s0 + $0x58] sm:$0xf]  ;;  %v1078_v23 = vld [vmem:[%s1583_s0 + $0x68] sm:$0xf0] }
  0x26   :  { %622 = vmatpush.bf16.msrb.mxu2 %v1117_v25  ;;  %v852_v25 = vld [vmem:[%s1583_s0 + $0x60] sm:$0xf] }
  0x27   :  { %665 = vmatpush.bf16.msrb.mxu3 %v1125_v24  ;;  %579 = vmatpush.bf16.msrb.mxu1 %v1109_v26  ;;  %v849_v24 = vor.u32 %v1076_v18, %v846_v19  ;;  %v1079_v26 = vld [vmem:[%s1583_s0 + $0x70] sm:$0xf0] }
  0x28   :  { %712 = vmatpush.bf16.msrb.mxu0 %v1129_v27  ;;  %v841_v27 = vor.u32 %v1075_v20, %v838_v21 }
  0x2a   :  { %623 = vmatpush.bf16.msrb.mxu2 %v1116_v29  ;;  %v853_v29 = vor.u32 %v1079_v26, %v852_v25 }
  0x2b   :  { %666 = vmatpush.bf16.msrb.mxu3 %v1124_v28  ;;  %580 = vmatpush.bf16.msrb.mxu1 %v1108_v30  ;;  %v845_v28 = vor.u32 %v1078_v23, %v844_v22  ;;  %v1081_v30 = vld [vmem:[%s1583_s0 + $0x84] sm:$0xf] }
  0x2c   :  { %713 = vmatpush.bf16.msrb.mxu0 %v1128_v31  ;;  %v866_v31 = vld [vmem:[%s1583_s0 + $0x94] sm:$0xf0] }
  0x2d   :  { %v869_v36 = vor.u32 %v1081_v30, %v866_v31 }
  0x2e   :  { %624 = vmatpush.bf16.msrb.mxu2 %v1115_v33  ;;  %v858_v33 = vld [vmem:[%s1583_s0 + $0x8c] sm:$0xf0] }
  0x2f   :  { %667 = vmatpush.bf16.msrb.mxu3 %v1123_v32  ;;  %581 = vmatpush.bf16.msrb.mxu1 %v1107_v34  ;;  %v1080_v32 = vld [vmem:[%s1583_s0 + $0x7c] sm:$0xf]  ;;  %v864_v34 = vld [vmem:[%s1583_s0 + $0x80] sm:$0xf] }
  0x30   :  { %714 = vmatpush.bf16.msrb.mxu0 %v1127_v41  ;;  %v861_v39 = vor.u32 %v1080_v32, %v858_v33  ;;  %v865_v40 = vor.u32 %v1083_v35, %v864_v34  ;;  %v873_v41 = vor.u32 %v1084_v38, %v872_v37 }
  0x31   :  { %558 = vmatmul.bf16.gmra.mxu1 %v857_v44  ;;  %568 = vmatmul.bf16.gmra.mxu2 %v897_v45  ;;  %v1085_v44 = vld [vmem:[%s1583_s0 + $0xa4] sm:$0xf]  ;;  %v878_v45 = vld [vmem:[%s1583_s0 + $0xb4] sm:$0xf0] }
  0x32   :  { %625 = vmatpush.bf16.msrb.mxu2 %v1114_v43  ;;  %548 = vmatmul.bf16.gmra.mxu0 %v817_v46  ;;  %v886_v43 = vld [vmem:[%s1583_s0 + $0xbc] sm:$0xf0]  ;;  %v884_v46 = vld [vmem:[%s1583_s0 + $0xa8] sm:$0xf] }
  0x33   :  { %668 = vmatpush.bf16.msrb.mxu3 %v1122_v42  ;;  %582 = vmatpush.bf16.msrb.mxu1 %v1106_v47  ;;  %v1086_v42 = vld [vmem:[%s1583_s0 + $0xac] sm:$0xf]  ;;  %v1088_v47 = vld [vmem:[%s1583_s0 + $0xb8] sm:$0xf0] }
  0x36   :  { %626 = vmatpush.bf16.msrb.mxu2 %v1113_v49  ;;  %v892_v49 = vld [vmem:[%s1583_s0 + $0xb0] sm:$0xf] }
  0x37   :  { %669 = vmatpush.bf16.msrb.mxu3 %v1121_v48  ;;  %583 = vmatpush.bf16.msrb.mxu1 %v1105_v50  ;;  %v889_v48 = vor.u32 %v1086_v42, %v886_v43  ;;  %v1089_v50 = vld [vmem:[%s1583_s0 + $0xc0] sm:$0xf0] }
  0x3a   :  { %627 = vmatpush.bf16.msrb.mxu2 %v1112_v52  ;;  %v885_v52 = vor.u32 %v1088_v47, %v884_v46 }
  0x3b   :  { %670 = vmatpush.bf16.msrb.mxu3 %v1120_v51  ;;  %584 = vmatpush.bf16.msrb.mxu1 %v1104_v53  ;;  %v881_v51 = vor.u32 %v1085_v44, %v878_v45  ;;  %v893_v53 = vor.u32 %v1089_v50, %v892_v49 }
  0x3e   :  { %628 = vmatpush.bf16.msrb.mxu2 %v1111_v55  ;;  %v906_v55 = vld [vmem:[%s1583_s0 + $0xe4] sm:$0xf0] }
  0x3f   :  { %671 = vmatpush.bf16.msrb.mxu3 %v1119_v54  ;;  %585 = vmatpush.bf16.msrb.mxu1 %v1103_v58  ;;  %v1091_v54 = vld [vmem:[%s1583_s0 + $0xd4] sm:$0xf]  ;;  %v904_v58 = vld [vmem:[%s1583_s0 + $0xd0] sm:$0xf] }
  0x40   :  { %v909_v60 = vor.u32 %v1091_v54, %v906_v55  ;;  %v905_v0 = vor.u32 %v1093_v59, %v904_v58 }
  0x41   :  { %629 = vmatmul.bf16.vlgmr.msrb.gmra.mxu2 %v805_v3 }
  0x42   :  { %672 = vmatmul.bf16.vlgmr.msrb.gmra.mxu3 %v809_v63  ;;  %586 = vmatmul.bf16.vlgmr.msrb.gmra.mxu1 %v801_v2  ;;  %v901_v63 = vor.u32 %v1090_v56, %v898_v57  ;;  %v52_v2 = vld [vmem:[%s1583_s0 + $0xf8] sm:$0xff] }
  0x43   :  { %1058 = vmatmul.msk.bf16.vlgmr.msrb.gmra.mxu0 %vm513_vm0, %v813_v4  ;;  %v232_v3 = vunpack.c.h.b16 %v52_v2  ;;  %v53_v4 = vld [vmem:[%s1583_s0 + $0x100] sm:$0xf]  ;;  %v231_v6 = vunpack.c.l.b16 %v52_v2 }
  0x44   :  { %v233_v8 = vunpack.c.l.b16 %v53_v4 }
  0x45   :  { %v267_v9 = vpack.c.b16 %v232_v3, %v232_v3  ;;  %v266_v11 = vpack.c.b16 %v231_v6, %v231_v6 }
  0x46   :  { %v268_v13 = vpack.c.b16 %v233_v8, %v233_v8 }
  0x51   :  { %634 = vmatmul.bf16.gmra.mxu2 %v825_v16 }
  0x52   :  { %677 = vmatmul.bf16.gmra.mxu3 %v829_v12  ;;  %591 = vmatmul.bf16.gmra.mxu1 %v821_v15  ;;  %v1489_v15 = vld [vmem:[%s1582_s2] ss:$0 sm:$0xff] }
  0x53   :  { %1059 = vmatmul.msk.bf16.gmra.mxu0 %vm513_vm0, %v833_v17 }
  0x61   :  { %639 = vmatmul.bf16.gmra.mxu2 %v845_v28 }
  0x62   :  { %682 = vmatmul.bf16.gmra.mxu3 %v849_v24  ;;  %596 = vmatmul.bf16.gmra.mxu1 %v841_v27 }
  0x63   :  { %1060 = vmatmul.msk.bf16.gmra.mxu0 %vm513_vm0, %v853_v29 }
  0x71   :  { %644 = vmatmul.bf16.gmra.mxu2 %v865_v40 }
  0x72   :  { %687 = vmatmul.bf16.gmra.mxu3 %v869_v36  ;;  %601 = vmatmul.bf16.gmra.mxu1 %v861_v39 }
  0x73   :  { %1061 = vmatmul.msk.bf16.gmra.mxu0 %vm513_vm0, %v873_v41 }
  0x81   :  { %649 = vmatmul.bf16.gmra.mxu2 %v885_v52 }
  0x82   :  { %692 = vmatmul.bf16.gmra.mxu3 %v889_v48  ;;  %606 = vmatmul.bf16.gmra.mxu1 %v881_v51 }
  0x83   :  { %1062 = vmatmul.msk.bf16.gmra.mxu0 %vm513_vm0, %v893_v53 }
  0x91   :  { %654 = vmatmul.bf16.gmra.mxu2 %v905_v0 }
  0x92   :  { %697 = vmatmul.bf16.gmra.mxu3 %v909_v60  ;;  %611 = vmatmul.bf16.gmra.mxu1 %v901_v63 }
  0x93   :  { %1063 = vmatmul.msk.bf16.gmra.mxu0 %vm513_vm0, %v913_v1 }
  0x9e   :  { %v1483_v12 = vpop.f32.mrf.mxu1 }
  0x9f   :  { %v544_v14 = vpop.f32.mrf.mxu0 }
  0xa0   :  { %v545_v34 = vadd.f32 %v1489_v15, %v544_v14 }
  0xa1   :  { %659 = vmatmul.bf16.gmra.mxu2 %v266_v11 }
  0xa2   :  { %702 = vmatmul.bf16.gmra.mxu3 %v267_v9  ;;  %616 = vmatmul.bf16.gmra.mxu1 %v265_v10 }
  0xa3   :  { %1064 = vmatmul.msk.bf16.gmra.mxu0 %vm513_vm0, %v268_v13  ;;  %v555_v13 = vadd.f32 %v1489_v15, %v1483_v12 }
  0xa4   :  { %v564_v7 = vpop.f32.mrf.mxu2 }
  0xa5   :  { %v1492_v16 = vadd.f32 %v1489_v15, %v564_v7 }
  0xa6   :  { %v1494_v17 = vpop.f32.mrf.mxu1 }
  0xa7   :  { %v574_v18 = vpop.f32.mrf.mxu3  ;;  %v546_v19 = vpop.f32.mrf.mxu0 }
  0xa8   :  { %v1497_v20 = vadd.f32 %v1489_v15, %v574_v18  ;;  %v547_v42 = vadd.f32 %v1489_v15, %v546_v19 }
  0xac   :  { %v566_v21 = vpop.f32.mrf.mxu2 }
  0xad   :  { %v1500_v22 = vadd.f32 %v1489_v15, %v566_v21 }
  0xae   :  { %v1502_v23 = vpop.f32.mrf.mxu1 }
  0xaf   :  { %v576_v24 = vpop.f32.mrf.mxu3  ;;  %v549_v25 = vpop.f32.mrf.mxu0 }
  0xb0   :  { %v550_v53 = vadd.f32 %v1489_v15, %v549_v25 }
  0xb4   :  { %v569_v26 = vpop.f32.mrf.mxu2 }
  0xb5   :  { %v1505_v27 = vadd.f32 %v1489_v15, %v569_v26 }
  0xb6   :  { %v1507_v28 = vpop.f32.mrf.mxu1 }
  0xb7   :  { %v551_v29 = vpop.f32.mrf.mxu0 }
  0xb8   :  { %v552_v0 = vadd.f32 %v1489_v15, %v551_v29 }
  0xbc   :  { %v571_v30 = vpop.f32.mrf.mxu2 }
  0xbd   :  { %v1510_v31 = vadd.f32 %v1489_v15, %v571_v30 }
  0xbf   :  { %v587_v32 = vpop.f32.mrf.mxu1 }
  0xc0   :  { %v716_v33 = vpop.f32.mrf.mxu0  ;;  %v588_v36 = vadd.f32 %v587_v32, %v545_v34  ;;  %v557_v32 = vadd.f32 %v1489_v15, %v1494_v17 }
  0xc4   :  { %v630_v37 = vpop.f32.mrf.mxu2 }
  0xc5   :  { %v673_v35 = vpop.f32.mrf.mxu3  ;;  %v631_v38 = vadd.f32 %v630_v37, %v588_v36 }
  0xc7   :  { %v589_v39 = vpop.f32.mrf.mxu1  ;;  %v674_v40 = vadd.f32 %v673_v35, %v631_v38 }
  0xc8   :  { %v718_v41 = vpop.f32.mrf.mxu0  ;;  %v590_v46 = vadd.f32 %v589_v39, %v547_v42  ;;  %v560_v42 = vadd.f32 %v1489_v15, %v1502_v23 }
  0xc9   :  { %v717_v43 = vadd.f32 %v716_v33, %v674_v40 }
  0xcb   :  { %v750_v45 = vmax.f32 %v717_v43, 0.0 }
  0xcc   :  { %v632_v47 = vpop.f32.mrf.mxu2 }
  0xcd   :  { %v675_v44 = vpop.f32.mrf.mxu3  ;;  %v763_v48 = vpack.c.bf16 %v750_v45, %v750_v45  ;;  %v633_v49 = vadd.f32 %v632_v47, %v590_v46 }
  0xcf   :  { %v592_v50 = vpop.f32.mrf.mxu1  ;;  %777 = vst.msk [vmem:[%s1584_s3] sm:$0xf] %vm776_vm1, %v763_v48  ;;  %v676_v51 = vadd.f32 %v675_v44, %v633_v49 }
  0xd0   :  { %v721_v52 = vpop.f32.mrf.mxu0  ;;  %v593_v57 = vadd.f32 %v592_v50, %v550_v53 }
  0xd1   :  { %v719_v54 = vadd.f32 %v718_v41, %v676_v51 }
  0xd3   :  { %v751_v56 = vmax.f32 %v719_v54, 0.0 }
  0xd4   :  { %v635_v58 = vpop.f32.mrf.mxu2 }
  0xd5   :  { %v678_v55 = vpop.f32.mrf.mxu3  ;;  %v764_v59 = vpack.c.bf16 %v751_v56, %v751_v56  ;;  %v636_v60 = vadd.f32 %v635_v58, %v593_v57 }
  0xd7   :  { %v594_v61 = vpop.f32.mrf.mxu1  ;;  %778 = vst.msk [vmem:[%s1584_s3 + $0x4] sm:$0xf] %vm776_vm1, %v764_v59  ;;  %v679_v62 = vadd.f32 %v678_v55, %v636_v60 }
  0xd8   :  { %v723_v63 = vpop.f32.mrf.mxu0  ;;  %v595_v4 = vadd.f32 %v594_v61, %v552_v0 }
  0xd9   :  { %v722_v1 = vadd.f32 %v721_v52, %v679_v62  ;;  %v562_v52 = vadd.f32 %v1489_v15, %v1507_v28 }
  0xdb   :  { %v752_v3 = vmax.f32 %v722_v1, 0.0 }
  0xdc   :  { %v637_v5 = vpop.f32.mrf.mxu2 }
  0xdd   :  { %v680_v2 = vpop.f32.mrf.mxu3  ;;  %v765_v6 = vpack.c.bf16 %v752_v3, %v752_v3  ;;  %v638_v8 = vadd.f32 %v637_v5, %v595_v4 }
  0xdf   :  { %v597_v9 = vpop.f32.mrf.mxu1  ;;  %779 = vst.msk [vmem:[%s1584_s3 + $0x8] sm:$0xf] %vm776_vm1, %v765_v6  ;;  %v681_v10 = vadd.f32 %v680_v2, %v638_v8 }
  0xe0   :  { %v726_v11 = vpop.f32.mrf.mxu0  ;;  %v598_v19 = vadd.f32 %v597_v9, %v555_v13 }
  0xe1   :  { %v724_v14 = vadd.f32 %v723_v63, %v681_v10 }
  0xe3   :  { %v753_v18 = vmax.f32 %v724_v14, 0.0 }
  0xe4   :  { %v640_v21 = vpop.f32.mrf.mxu2 }
  0xe5   :  { %v683_v7 = vpop.f32.mrf.mxu3  ;;  %v766_v24 = vpack.c.bf16 %v753_v18, %v753_v18  ;;  %v641_v25 = vadd.f32 %v640_v21, %v598_v19 }
  0xe7   :  { %v599_v26 = vpop.f32.mrf.mxu1  ;;  %780 = vst.msk [vmem:[%s1584_s3 + $0xc] sm:$0xf] %vm776_vm1, %v766_v24  ;;  %v684_v29 = vadd.f32 %v683_v7, %v641_v25 }
  0xe8   :  { %v728_v30 = vpop.f32.mrf.mxu0  ;;  %v600_v35 = vadd.f32 %v599_v26, %v557_v32 }
  0xe9   :  { %v727_v33 = vadd.f32 %v726_v11, %v684_v29 }
  0xeb   :  { %v754_v34 = vmax.f32 %v727_v33, 0.0 }
  0xec   :  { %v642_v36 = vpop.f32.mrf.mxu2 }
  0xed   :  { %v685_v12 = vpop.f32.mrf.mxu3  ;;  %v767_v37 = vpack.c.bf16 %v754_v34, %v754_v34  ;;  %v643_v38 = vadd.f32 %v642_v36, %v600_v35 }
  0xef   :  { %v602_v39 = vpop.f32.mrf.mxu1  ;;  %781 = vst.msk [vmem:[%s1584_s3 + $0x10] sm:$0xf] %vm776_vm1, %v767_v37  ;;  %v686_v40 = vadd.f32 %v685_v12, %v643_v38 }
  0xf0   :  { %v731_v41 = vpop.f32.mrf.mxu0  ;;  %v603_v45 = vadd.f32 %v602_v39, %v560_v42 }
  0xf1   :  { %v729_v43 = vadd.f32 %v728_v30, %v686_v40 }
  0xf3   :  { %v755_v44 = vmax.f32 %v729_v43, 0.0 }
  0xf4   :  { %v645_v46 = vpop.f32.mrf.mxu2 }
  0xf5   :  { %v688_v17 = vpop.f32.mrf.mxu3  ;;  %v768_v47 = vpack.c.bf16 %v755_v44, %v755_v44  ;;  %v646_v48 = vadd.f32 %v645_v46, %v603_v45 }
  0xf7   :  { %v604_v49 = vpop.f32.mrf.mxu1  ;;  %782 = vst.msk [vmem:[%s1584_s3 + $0x14] sm:$0xf] %vm776_vm1, %v768_v47  ;;  %v689_v50 = vadd.f32 %v688_v17, %v646_v48 }
  0xf8   :  { %v733_v51 = vpop.f32.mrf.mxu0  ;;  %v605_v55 = vadd.f32 %v604_v49, %v562_v52 }
  0xf9   :  { %v732_v53 = vadd.f32 %v731_v41, %v689_v50 }
  0xfb   :  { %v756_v54 = vmax.f32 %v732_v53, 0.0 }
  0xfc   :  { %v647_v56 = vpop.f32.mrf.mxu2 }
  0xfd   :  { %v690_v23 = vpop.f32.mrf.mxu3  ;;  %v769_v57 = vpack.c.bf16 %v756_v54, %v756_v54  ;;  %v648_v58 = vadd.f32 %v647_v56, %v605_v55 }
  0xff   :  { %v607_v59 = vpop.f32.mrf.mxu1  ;;  %783 = vst.msk [vmem:[%s1584_s3 + $0x18] sm:$0xf] %vm776_vm1, %v769_v57  ;;  %v691_v60 = vadd.f32 %v690_v23, %v648_v58 }
 0x100   :  { %v736_v61 = vpop.f32.mrf.mxu0  ;;  %v608_v15 = vadd.f32 %v607_v59, %v1492_v16 }
 0x101   :  { %v734_v62 = vadd.f32 %v733_v51, %v691_v60 }
 0x103   :  { %v757_v0 = vmax.f32 %v734_v62, 0.0 }
 0x104   :  { %v650_v28 = vpop.f32.mrf.mxu2 }
 0x105   :  { %v693_v63 = vpop.f32.mrf.mxu3  ;;  %v770_v1 = vpack.c.bf16 %v757_v0, %v757_v0  ;;  %v651_v2 = vadd.f32 %v650_v28, %v608_v15 }
 0x107   :  { %v609_v3 = vpop.f32.mrf.mxu1  ;;  %784 = vst.msk [vmem:[%s1584_s3 + $0x1c] sm:$0xf] %vm776_vm1, %v770_v1  ;;  %v694_v4 = vadd.f32 %v693_v63, %v651_v2 }
 0x108   :  { %v738_v5 = vpop.f32.mrf.mxu0  ;;  %v610_v10 = vadd.f32 %v609_v3, %v1500_v22 }
 0x109   :  { %v737_v6 = vadd.f32 %v736_v61, %v694_v4 }
 0x10b   :  { %v758_v9 = vmax.f32 %v737_v6, 0.0 }
 0x10c   :  { %v652_v11 = vpop.f32.mrf.mxu2 }
 0x10d   :  { %v695_v8 = vpop.f32.mrf.mxu3  ;;  %v771_v13 = vpack.c.bf16 %v758_v9, %v758_v9  ;;  %v653_v14 = vadd.f32 %v652_v11, %v610_v10 }
 0x10f   :  { %v612_v16 = vpop.f32.mrf.mxu1  ;;  %785 = vst.msk [vmem:[%s1584_s3 + $0x20] sm:$0xf] %vm776_vm1, %v771_v13  ;;  %v696_v7 = vadd.f32 %v695_v8, %v653_v14 }
 0x110   :  { %v741_v18 = vpop.f32.mrf.mxu0  ;;  %v613_v25 = vadd.f32 %v612_v16, %v1505_v27 }
 0x111   :  { %v739_v19 = vadd.f32 %v738_v5, %v696_v7 }
 0x113   :  { %v759_v24 = vmax.f32 %v739_v19, 0.0 }
 0x114   :  { %v655_v26 = vpop.f32.mrf.mxu2 }
 0x115   :  { %v698_v21 = vpop.f32.mrf.mxu3  ;;  %v772_v29 = vpack.c.bf16 %v759_v24, %v759_v24  ;;  %v656_v30 = vadd.f32 %v655_v26, %v613_v25 }
 0x117   :  { %v614_v22 = vpop.f32.mrf.mxu1  ;;  %786 = vst.msk [vmem:[%s1584_s3 + $0x24] sm:$0xf] %vm776_vm1, %v772_v29  ;;  %v699_v32 = vadd.f32 %v698_v21, %v656_v30 }
 0x118   :  { %v743_v33 = vpop.f32.mrf.mxu0  ;;  %v615_v36 = vadd.f32 %v614_v22, %v1510_v31 }
 0x119   :  { %v742_v12 = vadd.f32 %v741_v18, %v699_v32 }
 0x11b   :  { %v760_v35 = vmax.f32 %v742_v12, 0.0 }
 0x11c   :  { %v657_v37 = vpop.f32.mrf.mxu2 }
 0x11d   :  { %v700_v34 = vpop.f32.mrf.mxu3  ;;  %v773_v38 = vpack.c.bf16 %v760_v35, %v760_v35  ;;  %v658_v39 = vadd.f32 %v657_v37, %v615_v36 }
 0x11f   :  { %v617_v27 = vpop.f32.mrf.mxu1  ;;  %787 = vst.msk [vmem:[%s1584_s3 + $0x28] sm:$0xf] %vm776_vm1, %v773_v38  ;;  %v701_v40 = vadd.f32 %v700_v34, %v658_v39 }
 0x120   :  { %v746_v41 = vpop.f32.mrf.mxu0  ;;  %v618_v44 = vadd.f32 %v617_v27, %v1497_v20 }
 0x121   :  { %v744_v42 = vadd.f32 %v743_v33, %v701_v40 }
 0x123   :  { %v761_v17 = vmax.f32 %v744_v42, 0.0 }
 0x124   :  { %v660_v45 = vpop.f32.mrf.mxu2 }
 0x125   :  { %v703_v43 = vpop.f32.mrf.mxu3  ;;  %v774_v46 = vpack.c.bf16 %v761_v17, %v761_v17  ;;  %v661_v47 = vadd.f32 %v660_v45, %v618_v44 }
 0x127   :  { %v619_v31 = vpop.f32.mrf.mxu1  ;;  %788 = vst.msk [vmem:[%s1584_s3 + $0x2c] sm:$0xf] %vm776_vm1, %v774_v46  ;;  %v704_v48 = vadd.f32 %v703_v43, %v661_v47 }
 0x128   :  { %v748_v49 = vpop.f32.mrf.mxu0 }
 0x129   :  { %v747_v50 = vadd.f32 %v746_v41, %v704_v48 }
 0x12b   :  { %v762_v52 = vmax.f32 %v747_v50, 0.0 }
 0x12c   :  { %v662_v53 = vpop.f32.mrf.mxu2 }
 0x12d   :  { %v705_v51 = vpop.f32.mrf.mxu3  ;;  %v775_v23 = vpack.c.bf16 %v762_v52, %v762_v52 }
 0x12f   :  { %789 = vst.msk [vmem:[%s1584_s3 + $0x30] sm:$0xf] %vm776_vm1, %v775_v23 }

// kernel: dueling_dqn_forward.7
= control target key start
LH: loop header
LB: loop body
LE: loop exit
PB: predicated region body
PF: predicated region fallthrough
CT: control target
= control target key end

     0   :  { %vm4835_vm0 = vcmask 523264   ;;  %s10586_s28 = smov 127   ;;  %vm6463_vm1 = vcmask 48128   ;;  %s15688_s1 = inlined_call_operand.vmem [shape: bf16[3136,512], index: 1, kind: input, shape index: {}]   ;;  %s15689_s0 = inlined_call_operand.vmem [shape: bf16[8,3136], index: 0, kind: input, shape index: {}]   ;;  %s15690_s2 = inlined_call_operand.vmem [shape: f32[1,512], index: 2, kind: input, shape index: {}]   ;;  %s15691_s3 = inlined_call_operand.vmem [shape: bf16[512,7], index: 3, kind: input, shape index: {}]   ;;  %s15692_s4 = inlined_call_operand.vmem [shape: f32[1,7], index: 4, kind: input, shape index: {}]   ;;  %s15693_s5 = inlined_call_operand.vmem [shape: f32[8,6], index: 5, kind: output, shape index: {}]  }
   0x1   :  { %v6604_v0 = vld [vmem:[%s15688_s1 + $0xe0] sm:$0xf]  ;;  %v9788_v1 = vld [vmem:[%s15688_s1 + $0xec] sm:$0xf0] }
   0x2   :  { %v6732_v2 = vld [vmem:[%s15688_s1 + $0x1e0] sm:$0xf]  ;;  %v6605_v3 = vor.u32 %v9788_v1, %v6604_v0  ;;  %v9820_v4 = vld [vmem:[%s15688_s1 + $0x1ec] sm:$0xf0] }
   0x3   :  { %v6860_v5 = vld [vmem:[%s15688_s1 + $0x2e0] sm:$0xf]  ;;  %v9852_v6 = vld [vmem:[%s15688_s1 + $0x2ec] sm:$0xf0]  ;;  %v6733_v7 = vor.u32 %v9820_v4, %v6732_v2 }
   0x4   :  { %v6861_v8 = vor.u32 %v9852_v6, %v6860_v5  ;;  %v6988_v9 = vld [vmem:[%s15688_s1 + $0x3e0] sm:$0xf]  ;;  %v9884_v10 = vld [vmem:[%s15688_s1 + $0x3ec] sm:$0xf0]  ;;  %4839 = vmatpush.bf16.msra.mxu0 %v6605_v3 }
   0x5   :  { %v6588_v11 = vld [vmem:[%s15688_s1 + $0xc0] sm:$0xf]  ;;  %v6989_v12 = vor.u32 %v9884_v10, %v6988_v9  ;;  %v9784_v13 = vld [vmem:[%s15688_s1 + $0xcc] sm:$0xf0]  ;;  %4852 = vmatpush.bf16.msra.mxu1 %v6733_v7 }
   0x6   :  { %v6716_v14 = vld [vmem:[%s15688_s1 + $0x1c0] sm:$0xf]  ;;  %v9816_v15 = vld [vmem:[%s15688_s1 + $0x1cc] sm:$0xf0]  ;;  %4865 = vmatpush.bf16.msra.mxu2 %v6861_v8  ;;  %v6589_v16 = vor.u32 %v9784_v13, %v6588_v11 }
   0x7   :  { %v6717_v17 = vor.u32 %v9816_v15, %v6716_v14  ;;  %v6844_v18 = vld [vmem:[%s15688_s1 + $0x2c0] sm:$0xf]  ;;  %v9848_v19 = vld [vmem:[%s15688_s1 + $0x2cc] sm:$0xf0]  ;;  %4878 = vmatpush.bf16.msra.mxu3 %v6989_v12 }
   0x8   :  { %v6972_v20 = vld [vmem:[%s15688_s1 + $0x3c0] sm:$0xf]  ;;  %v6845_v21 = vor.u32 %v9848_v19, %v6844_v18  ;;  %v9880_v22 = vld [vmem:[%s15688_s1 + $0x3cc] sm:$0xf0]  ;;  %4840 = vmatpush.bf16.msra.mxu0 %v6589_v16 }
   0x9   :  { %v6572_v23 = vld [vmem:[%s15688_s1 + $0xa0] sm:$0xf]  ;;  %v9780_v24 = vld [vmem:[%s15688_s1 + $0xac] sm:$0xf0]  ;;  %v6973_v25 = vor.u32 %v9880_v22, %v6972_v20  ;;  %4853 = vmatpush.bf16.msra.mxu1 %v6717_v17 }
   0xa   :  { %v6700_v26 = vld [vmem:[%s15688_s1 + $0x1a0] sm:$0xf]  ;;  %v9812_v27 = vld [vmem:[%s15688_s1 + $0x1ac] sm:$0xf0]  ;;  %v6573_v29 = vor.u32 %v9780_v24, %v6572_v23  ;;  %4866 = vmatpush.bf16.msra.mxu2 %v6845_v21 }
   0xb   :  { %v6828_v28 = vld [vmem:[%s15688_s1 + $0x2a0] sm:$0xf]  ;;  %v9844_v30 = vld [vmem:[%s15688_s1 + $0x2ac] sm:$0xf0]  ;;  %v6701_v33 = vor.u32 %v9812_v27, %v6700_v26  ;;  %4879 = vmatpush.bf16.msra.mxu3 %v6973_v25 }
   0xc   :  { %v6956_v31 = vld [vmem:[%s15688_s1 + $0x3a0] sm:$0xf]  ;;  %v9876_v32 = vld [vmem:[%s15688_s1 + $0x3ac] sm:$0xf0]  ;;  %v6829_v34 = vor.u32 %v9844_v30, %v6828_v28  ;;  %4841 = vmatpush.bf16.msra.mxu0 %v6573_v29 }
   0xd   :  { %v6556_v35 = vld [vmem:[%s15688_s1 + $0x80] sm:$0xf]  ;;  %v9776_v36 = vld [vmem:[%s15688_s1 + $0x8c] sm:$0xf0]  ;;  %v6957_v38 = vor.u32 %v9876_v32, %v6956_v31  ;;  %4854 = vmatpush.bf16.msra.mxu1 %v6701_v33 }
   0xe   :  { %v6684_v37 = vld [vmem:[%s15688_s1 + $0x180] sm:$0xf]  ;;  %v9808_v39 = vld [vmem:[%s15688_s1 + $0x18c] sm:$0xf0]  ;;  %v6557_v44 = vor.u32 %v9776_v36, %v6556_v35  ;;  %4867 = vmatpush.bf16.msra.mxu2 %v6829_v34 }
   0xf   :  { %v6812_v40 = vld [vmem:[%s15688_s1 + $0x280] sm:$0xf]  ;;  %v9840_v41 = vld [vmem:[%s15688_s1 + $0x28c] sm:$0xf0]  ;;  %v6685_v45 = vor.u32 %v9808_v39, %v6684_v37  ;;  %4880 = vmatpush.bf16.msra.mxu3 %v6957_v38 }
  0x10   :  { %v6940_v42 = vld [vmem:[%s15688_s1 + $0x380] sm:$0xf]  ;;  %v9872_v43 = vld [vmem:[%s15688_s1 + $0x38c] sm:$0xf0]  ;;  %v6813_v46 = vor.u32 %v9840_v41, %v6812_v40  ;;  %4842 = vmatpush.bf16.msra.mxu0 %v6557_v44 }
  0x11   :  { %v6540_v47 = vld [vmem:[%s15688_s1 + $0x60] sm:$0xf]  ;;  %v9772_v48 = vld [vmem:[%s15688_s1 + $0x6c] sm:$0xf0]  ;;  %v6941_v50 = vor.u32 %v9872_v43, %v6940_v42  ;;  %4855 = vmatpush.bf16.msra.mxu1 %v6685_v45 }
  0x12   :  { %v6668_v49 = vld [vmem:[%s15688_s1 + $0x160] sm:$0xf]  ;;  %v9804_v51 = vld [vmem:[%s15688_s1 + $0x16c] sm:$0xf0]  ;;  %v6541_v56 = vor.u32 %v9772_v48, %v6540_v47  ;;  %4868 = vmatpush.bf16.msra.mxu2 %v6813_v46 }
  0x13   :  { %v6796_v52 = vld [vmem:[%s15688_s1 + $0x260] sm:$0xf]  ;;  %v9836_v53 = vld [vmem:[%s15688_s1 + $0x26c] sm:$0xf0]  ;;  %v6669_v57 = vor.u32 %v9804_v51, %v6668_v49  ;;  %4881 = vmatpush.bf16.msra.mxu3 %v6941_v50 }
  0x14   :  { %v6924_v54 = vld [vmem:[%s15688_s1 + $0x360] sm:$0xf]  ;;  %v9868_v55 = vld [vmem:[%s15688_s1 + $0x36c] sm:$0xf0]  ;;  %v6797_v58 = vor.u32 %v9836_v53, %v6796_v52  ;;  %4843 = vmatpush.bf16.msra.mxu0 %v6541_v56 }
  0x15   :  { %v6524_v59 = vld [vmem:[%s15688_s1 + $0x40] sm:$0xf]  ;;  %v9768_v60 = vld [vmem:[%s15688_s1 + $0x4c] sm:$0xf0]  ;;  %v6925_v62 = vor.u32 %v9868_v55, %v6924_v54  ;;  %4856 = vmatpush.bf16.msra.mxu1 %v6669_v57 }
  0x16   :  { %v6652_v61 = vld [vmem:[%s15688_s1 + $0x140] sm:$0xf]  ;;  %v9800_v63 = vld [vmem:[%s15688_s1 + $0x14c] sm:$0xf0]  ;;  %v6525_v4 = vor.u32 %v9768_v60, %v6524_v59  ;;  %4869 = vmatpush.bf16.msra.mxu2 %v6797_v58  ;;  %v22_v58 = vld [vmem:[%s15689_s0 + $0x8] sm:$0xff] }
  0x17   :  { %v6780_v0 = vld [vmem:[%s15688_s1 + $0x240] sm:$0xf]  ;;  %v9832_v1 = vld [vmem:[%s15688_s1 + $0x24c] sm:$0xf0]  ;;  %v6653_v5 = vor.u32 %v9800_v63, %v6652_v61  ;;  %4882 = vmatpush.bf16.msra.mxu3 %v6925_v62  ;;  %v843_v63 = vunpack.c.l.b16 %v22_v58 }
  0x18   :  { %v6908_v2 = vld [vmem:[%s15688_s1 + $0x340] sm:$0xf]  ;;  %v9864_v3 = vld [vmem:[%s15688_s1 + $0x34c] sm:$0xf0]  ;;  %v6781_v6 = vor.u32 %v9832_v1, %v6780_v0  ;;  %4844 = vmatpush.bf16.msra.mxu0 %v6525_v4  ;;  %v844_v0 = vunpack.c.h.b16 %v22_v58 }
  0x19   :  { %v6508_v7 = vld [vmem:[%s15688_s1 + $0x20] sm:$0xf]  ;;  %v9764_v8 = vld [vmem:[%s15688_s1 + $0x2c] sm:$0xf0]  ;;  %v6909_v10 = vor.u32 %v9864_v3, %v6908_v2  ;;  %4857 = vmatpush.bf16.msra.mxu1 %v6653_v5  ;;  %v10885_v4 = vpack.c.b16 %v843_v63, %v843_v63 }
  0x1a   :  { %v6636_v9 = vld [vmem:[%s15688_s1 + $0x120] sm:$0xf]  ;;  %v9796_v11 = vld [vmem:[%s15688_s1 + $0x12c] sm:$0xf0]  ;;  %v6509_v16 = vor.u32 %v9764_v8, %v6508_v7  ;;  %4870 = vmatpush.bf16.msra.mxu2 %v6781_v6  ;;  %v10890_v6 = vpack.c.b16 %v844_v0, %v844_v0 }
  0x1b   :  { %v6764_v12 = vld [vmem:[%s15688_s1 + $0x220] sm:$0xf]  ;;  %v9828_v13 = vld [vmem:[%s15688_s1 + $0x22c] sm:$0xf0]  ;;  %v6637_v19 = vor.u32 %v9796_v11, %v6636_v9  ;;  %4883 = vmatpush.bf16.msra.mxu3 %v6909_v10 }
  0x1c   :  { %v6892_v14 = vld [vmem:[%s15688_s1 + $0x320] sm:$0xf]  ;;  %v9860_v15 = vld [vmem:[%s15688_s1 + $0x32c] sm:$0xf0]  ;;  %v6765_v20 = vor.u32 %v9828_v13, %v6764_v12  ;;  %4845 = vmatpush.bf16.msra.mxu0 %v6509_v16 }
  0x1d   :  { %v6492_v17 = vld [vmem:[%s15688_s1] sm:$0xf]  ;;  %v9760_v18 = vld [vmem:[%s15688_s1 + $0xc] sm:$0xf0]  ;;  %v6893_v24 = vor.u32 %v9860_v15, %v6892_v14  ;;  %4858 = vmatpush.bf16.msra.mxu1 %v6637_v19 }
  0x1e   :  { %v6620_v21 = vld [vmem:[%s15688_s1 + $0x100] sm:$0xf]  ;;  %v9792_v22 = vld [vmem:[%s15688_s1 + $0x10c] sm:$0xf0]  ;;  %v6493_v31 = vor.u32 %v9760_v18, %v6492_v17  ;;  %4871 = vmatpush.bf16.msra.mxu2 %v6765_v20 }
  0x1f   :  { %v6748_v23 = vld [vmem:[%s15688_s1 + $0x200] sm:$0xf]  ;;  %v9824_v25 = vld [vmem:[%s15688_s1 + $0x20c] sm:$0xf0]  ;;  %v6621_v35 = vor.u32 %v9792_v22, %v6620_v21  ;;  %4884 = vmatpush.bf16.msra.mxu3 %v6893_v24 }
  0x20   :  { %v6876_v26 = vld [vmem:[%s15688_s1 + $0x300] sm:$0xf]  ;;  %v9856_v27 = vld [vmem:[%s15688_s1 + $0x30c] sm:$0xf0]  ;;  %v6749_v36 = vor.u32 %v9824_v25, %v6748_v23  ;;  %4846 = vmatpush.bf16.msra.mxu0 %v6493_v31 }
  0x21   :  { %v7116_v28 = vld [vmem:[%s15688_s1 + $0x4e0] sm:$0xf]  ;;  %v9916_v29 = vld [vmem:[%s15688_s1 + $0x4ec] sm:$0xf0]  ;;  %v6877_v39 = vor.u32 %v9856_v27, %v6876_v26  ;;  %4859 = vmatpush.bf16.msra.mxu1 %v6621_v35 }
  0x22   :  { %v7244_v30 = vld [vmem:[%s15688_s1 + $0x5e0] sm:$0xf]  ;;  %v9948_v32 = vld [vmem:[%s15688_s1 + $0x5ec] sm:$0xf0]  ;;  %v7117_v40 = vor.u32 %v9916_v29, %v7116_v28  ;;  %4872 = vmatpush.bf16.msra.mxu2 %v6749_v36 }
  0x23   :  { %v7372_v33 = vld [vmem:[%s15688_s1 + $0x6e0] sm:$0xf]  ;;  %v9980_v34 = vld [vmem:[%s15688_s1 + $0x6ec] sm:$0xf0]  ;;  %v7245_v41 = vor.u32 %v9948_v32, %v7244_v30  ;;  %4885 = vmatpush.bf16.msra.mxu3 %v6877_v39 }
  0x24   :  { %v7500_v37 = vld [vmem:[%s15688_s1 + $0x7e0] sm:$0xf]  ;;  %v10012_v38 = vld [vmem:[%s15688_s1 + $0x7ec] sm:$0xf0]  ;;  %v7373_v42 = vor.u32 %v9980_v34, %v7372_v33  ;;  %4891 = vmatpush.bf16.msrb.mxu0 %v7117_v40 }
  0x25   :  { %v7100_v43 = vld [vmem:[%s15688_s1 + $0x4c0] sm:$0xf]  ;;  %v9912_v44 = vld [vmem:[%s15688_s1 + $0x4cc] sm:$0xf0]  ;;  %v7501_v46 = vor.u32 %v10012_v38, %v7500_v37  ;;  %4904 = vmatpush.bf16.msrb.mxu1 %v7245_v41  ;;  %4873 = vmatmul.bf16.vlgmr.msra.gmra.mxu2 %v10885_v4 }
  0x26   :  { %v7228_v45 = vld [vmem:[%s15688_s1 + $0x5c0] sm:$0xf]  ;;  %v9944_v47 = vld [vmem:[%s15688_s1 + $0x5cc] sm:$0xf0]  ;;  %v7101_v52 = vor.u32 %v9912_v44, %v7100_v43  ;;  %4917 = vmatpush.bf16.msrb.mxu2 %v7373_v42  ;;  %4886 = vmatmul.bf16.vlgmr.msra.gmra.mxu3 %v10890_v6 }
  0x27   :  { %v7356_v48 = vld [vmem:[%s15688_s1 + $0x6c0] sm:$0xf]  ;;  %v9976_v49 = vld [vmem:[%s15688_s1 + $0x6cc] sm:$0xf0]  ;;  %v7229_v54 = vor.u32 %v9944_v47, %v7228_v45  ;;  %4930 = vmatpush.bf16.msrb.mxu3 %v7501_v46 }
  0x28   :  { %v7484_v50 = vld [vmem:[%s15688_s1 + $0x7c0] sm:$0xf]  ;;  %v10008_v51 = vld [vmem:[%s15688_s1 + $0x7cc] sm:$0xf0]  ;;  %v7357_v55 = vor.u32 %v9976_v49, %v7356_v48  ;;  %4892 = vmatpush.bf16.msrb.mxu0 %v7101_v52 }
  0x29   :  { %v7084_v53 = vld [vmem:[%s15688_s1 + $0x4a0] sm:$0xf]  ;;  %v9908_v56 = vld [vmem:[%s15688_s1 + $0x4ac] sm:$0xf0]  ;;  %v7485_v59 = vor.u32 %v10008_v51, %v7484_v50  ;;  %4905 = vmatpush.bf16.msrb.mxu1 %v7229_v54 }
  0x2a   :  { %v7212_v57 = vld [vmem:[%s15688_s1 + $0x5a0] sm:$0xf]  ;;  %v9940_v60 = vld [vmem:[%s15688_s1 + $0x5ac] sm:$0xf0]  ;;  %v7085_v3 = vor.u32 %v9908_v56, %v7084_v53  ;;  %4918 = vmatpush.bf16.msrb.mxu2 %v7357_v55 }
  0x2b   :  { %v7340_v61 = vld [vmem:[%s15688_s1 + $0x6a0] sm:$0xf]  ;;  %v9972_v62 = vld [vmem:[%s15688_s1 + $0x6ac] sm:$0xf0]  ;;  %v7213_v7 = vor.u32 %v9940_v60, %v7212_v57  ;;  %4931 = vmatpush.bf16.msrb.mxu3 %v7485_v59 }
  0x2c   :  { %v7468_v1 = vld [vmem:[%s15688_s1 + $0x7a0] sm:$0xf]  ;;  %v10004_v2 = vld [vmem:[%s15688_s1 + $0x7ac] sm:$0xf0]  ;;  %v7341_v8 = vor.u32 %v9972_v62, %v7340_v61  ;;  %4893 = vmatpush.bf16.msrb.mxu0 %v7085_v3  ;;  %v24_v3 = vld [vmem:[%s15689_s0 + $0x18] sm:$0xff] }
  0x2d   :  { %v21_v5 = vld [vmem:[%s15689_s0] sm:$0xff]  ;;  %v9904_v10 = vld [vmem:[%s15688_s1 + $0x48c] sm:$0xf0]  ;;  %v7469_v14 = vor.u32 %v10004_v2, %v7468_v1  ;;  %4906 = vmatpush.bf16.msrb.mxu1 %v7213_v7 }
  0x2e   :  { %v7068_v9 = vld [vmem:[%s15688_s1 + $0x480] sm:$0xf]  ;;  %v841_v12 = vunpack.c.l.b16 %v21_v5  ;;  %v842_v13 = vunpack.c.h.b16 %v21_v5  ;;  %v9936_v15 = vld [vmem:[%s15688_s1 + $0x58c] sm:$0xf0]  ;;  %4919 = vmatpush.bf16.msrb.mxu2 %v7341_v8 }
  0x2f   :  { %v7196_v11 = vld [vmem:[%s15688_s1 + $0x580] sm:$0xf]  ;;  %v9968_v17 = vld [vmem:[%s15688_s1 + $0x68c] sm:$0xf0]  ;;  %v7069_v22 = vor.u32 %v9904_v10, %v7068_v9  ;;  %4932 = vmatpush.bf16.msrb.mxu3 %v7469_v14 }
  0x30   :  { %v7324_v16 = vld [vmem:[%s15688_s1 + $0x680] sm:$0xf]  ;;  %v10000_v19 = vld [vmem:[%s15688_s1 + $0x78c] sm:$0xf0]  ;;  %v10917_v20 = vpack.c.b16 %v841_v12, %v841_v12  ;;  %v10920_v21 = vpack.c.b16 %v842_v13, %v842_v13  ;;  %v7197_v23 = vor.u32 %v9936_v15, %v7196_v11 }
  0x31   :  { %v7452_v18 = vld [vmem:[%s15688_s1 + $0x780] sm:$0xf]  ;;  %v7325_v24 = vor.u32 %v9968_v17, %v7324_v16  ;;  %v9900_v26 = vld [vmem:[%s15688_s1 + $0x46c] sm:$0xf0]  ;;  %4894 = vmatpush.bf16.msrb.mxu0 %v7069_v22  ;;  %v847_v17 = vunpack.c.l.b16 %v24_v3 }
  0x32   :  { %v7052_v25 = vld [vmem:[%s15688_s1 + $0x460] sm:$0xf]  ;;  %v7453_v28 = vor.u32 %v10000_v19, %v7452_v18  ;;  %v9932_v29 = vld [vmem:[%s15688_s1 + $0x56c] sm:$0xf0]  ;;  %4847 = vmatmul.bf16.vlgmr.msra.gmra.mxu0 %v10917_v20  ;;  %4860 = vmatmul.bf16.vlgmr.msra.gmra.mxu1 %v10920_v21 }
  0x33   :  { %v7180_v27 = vld [vmem:[%s15688_s1 + $0x560] sm:$0xf]  ;;  %v9964_v31 = vld [vmem:[%s15688_s1 + $0x66c] sm:$0xf0]  ;;  %v7053_v34 = vor.u32 %v9900_v26, %v7052_v25  ;;  %4907 = vmatpush.bf16.msrb.mxu1 %v7197_v23  ;;  %4920 = vmatpush.bf16.msrb.mxu2 %v7325_v24  ;;  %v848_v25 = vunpack.c.h.b16 %v24_v3 }
  0x34   :  { %v7308_v30 = vld [vmem:[%s15688_s1 + $0x660] sm:$0xf]  ;;  %v9996_v33 = vld [vmem:[%s15688_s1 + $0x76c] sm:$0xf0]  ;;  %v7181_v35 = vor.u32 %v9932_v29, %v7180_v27  ;;  %4933 = vmatpush.bf16.msrb.mxu3 %v7453_v28 }
  0x35   :  { %v7436_v32 = vld [vmem:[%s15688_s1 + $0x760] sm:$0xf]  ;;  %v7309_v36 = vor.u32 %v9964_v31, %v7308_v30  ;;  %v9896_v38 = vld [vmem:[%s15688_s1 + $0x44c] sm:$0xf0]  ;;  %4895 = vmatpush.bf16.msrb.mxu0 %v7053_v34 }
  0x36   :  { %v7036_v37 = vld [vmem:[%s15688_s1 + $0x440] sm:$0xf]  ;;  %v7437_v40 = vor.u32 %v9996_v33, %v7436_v32  ;;  %v9928_v41 = vld [vmem:[%s15688_s1 + $0x54c] sm:$0xf0] }
  0x37   :  { %v7164_v39 = vld [vmem:[%s15688_s1 + $0x540] sm:$0xf]  ;;  %v9960_v43 = vld [vmem:[%s15688_s1 + $0x64c] sm:$0xf0]  ;;  %v7037_v46 = vor.u32 %v9896_v38, %v7036_v37  ;;  %4908 = vmatpush.bf16.msrb.mxu1 %v7181_v35  ;;  %4921 = vmatpush.bf16.msrb.mxu2 %v7309_v36  ;;  %v11068_v38 = vpack.c.b16 %v847_v17, %v847_v17 }
  0x38   :  { %v7292_v42 = vld [vmem:[%s15688_s1 + $0x640] sm:$0xf]  ;;  %v9992_v45 = vld [vmem:[%s15688_s1 + $0x74c] sm:$0xf0]  ;;  %v7165_v47 = vor.u32 %v9928_v41, %v7164_v39  ;;  %4934 = vmatpush.bf16.msrb.mxu3 %v7437_v40 }
  0x39   :  { %v7420_v44 = vld [vmem:[%s15688_s1 + $0x740] sm:$0xf]  ;;  %v7293_v48 = vor.u32 %v9960_v43, %v7292_v42  ;;  %v9892_v50 = vld [vmem:[%s15688_s1 + $0x42c] sm:$0xf0]  ;;  %4896 = vmatpush.bf16.msrb.mxu0 %v7037_v46  ;;  %v11078_v42 = vpack.c.b16 %v848_v25, %v848_v25 }
  0x3a   :  { %v7020_v49 = vld [vmem:[%s15688_s1 + $0x420] sm:$0xf]  ;;  %v7421_v52 = vor.u32 %v9992_v45, %v7420_v44  ;;  %v9924_v53 = vld [vmem:[%s15688_s1 + $0x52c] sm:$0xf0] }
  0x3b   :  { %v7148_v51 = vld [vmem:[%s15688_s1 + $0x520] sm:$0xf]  ;;  %v9956_v55 = vld [vmem:[%s15688_s1 + $0x62c] sm:$0xf0]  ;;  %v7021_v59 = vor.u32 %v9892_v50, %v7020_v49  ;;  %4909 = vmatpush.bf16.msrb.mxu1 %v7165_v47  ;;  %4922 = vmatpush.bf16.msrb.mxu2 %v7293_v48 }
  0x3c   :  { %v7276_v54 = vld [vmem:[%s15688_s1 + $0x620] sm:$0xf]  ;;  %v9988_v57 = vld [vmem:[%s15688_s1 + $0x72c] sm:$0xf0]  ;;  %v7149_v63 = vor.u32 %v9924_v53, %v7148_v51  ;;  %4935 = vmatpush.bf16.msrb.mxu3 %v7421_v52 }
  0x3d   :  { %v7404_v56 = vld [vmem:[%s15688_s1 + $0x720] sm:$0xf]  ;;  %v9888_v60 = vld [vmem:[%s15688_s1 + $0x40c] sm:$0xf0]  ;;  %v7277_v0 = vor.u32 %v9956_v55, %v7276_v54  ;;  %4897 = vmatpush.bf16.msrb.mxu0 %v7021_v59 }
  0x3e   :  { %v7004_v58 = vld [vmem:[%s15688_s1 + $0x400] sm:$0xf]  ;;  %v9920_v62 = vld [vmem:[%s15688_s1 + $0x50c] sm:$0xf0]  ;;  %v7405_v5 = vor.u32 %v9988_v57, %v7404_v56 }
  0x3f   :  { %v7132_v61 = vld [vmem:[%s15688_s1 + $0x500] sm:$0xf]  ;;  %v9952_v2 = vld [vmem:[%s15688_s1 + $0x60c] sm:$0xf0]  ;;  %v7005_v13 = vor.u32 %v9888_v60, %v7004_v58  ;;  %4910 = vmatpush.bf16.msrb.mxu1 %v7149_v63  ;;  %4923 = vmatpush.bf16.msrb.mxu2 %v7277_v0 }
  0x40   :  { %v7260_v1 = vld [vmem:[%s15688_s1 + $0x600] sm:$0xf]  ;;  %v9984_v8 = vld [vmem:[%s15688_s1 + $0x70c] sm:$0xf0]  ;;  %v7133_v18 = vor.u32 %v9920_v62, %v7132_v61  ;;  %4936 = vmatpush.bf16.msrb.mxu3 %v7405_v5 }
  0x41   :  { %v7388_v7 = vld [vmem:[%s15688_s1 + $0x700] sm:$0xf]  ;;  %v23_v9 = vld [vmem:[%s15689_s0 + $0x10] sm:$0xff]  ;;  %v7261_v19 = vor.u32 %v9952_v2, %v7260_v1  ;;  %4898 = vmatpush.bf16.msrb.mxu0 %v7005_v13 }
  0x42   :  { %v7628_v10 = vld [vmem:[%s15688_s1 + $0x8e0] sm:$0xf]  ;;  %v10044_v11 = vld [vmem:[%s15688_s1 + $0x8ec] sm:$0xf0]  ;;  %v845_v24 = vunpack.c.l.b16 %v23_v9  ;;  %v7389_v26 = vor.u32 %v9984_v8, %v7388_v7  ;;  %v846_v28 = vunpack.c.h.b16 %v23_v9 }
  0x43   :  { %v7756_v12 = vld [vmem:[%s15688_s1 + $0x9e0] sm:$0xf]  ;;  %v10076_v14 = vld [vmem:[%s15688_s1 + $0x9ec] sm:$0xf0]  ;;  %v7629_v27 = vor.u32 %v10044_v11, %v7628_v10  ;;  %4911 = vmatpush.bf16.msrb.mxu1 %v7133_v18  ;;  %4924 = vmatpush.bf16.msrb.mxu2 %v7261_v19 }
  0x44   :  { %v7884_v15 = vld [vmem:[%s15688_s1 + $0xae0] sm:$0xf]  ;;  %v10108_v16 = vld [vmem:[%s15688_s1 + $0xaec] sm:$0xf0]  ;;  %v7757_v29 = vor.u32 %v10076_v14, %v7756_v12  ;;  %v11076_v41 = vpack.c.b16 %v845_v24, %v845_v24  ;;  %4937 = vmatpush.bf16.msrb.mxu3 %v7389_v26  ;;  %v11080_v44 = vpack.c.b16 %v846_v28, %v846_v28 }
  0x45   :  { %v8012_v22 = vld [vmem:[%s15688_s1 + $0xbe0] sm:$0xf]  ;;  %v10140_v23 = vld [vmem:[%s15688_s1 + $0xbec] sm:$0xf0]  ;;  %v7885_v30 = vor.u32 %v10108_v16, %v7884_v15  ;;  %4943 = vmatpush.bf16.msra.mxu0 %v7629_v27 }
  0x46   :  { %v7612_v31 = vld [vmem:[%s15688_s1 + $0x8c0] sm:$0xf]  ;;  %v10040_v32 = vld [vmem:[%s15688_s1 + $0x8cc] sm:$0xf0]  ;;  %v8013_v34 = vor.u32 %v10140_v23, %v8012_v22  ;;  %4925 = vmatmul.bf16.vlgmr.msrb.gmra.mxu2 %v11068_v38  ;;  %4899 = vmatmul.bf16.vlgmr.msrb.gmra.mxu0 %v11076_v41 }
  0x47   :  { %v7740_v33 = vld [vmem:[%s15688_s1 + $0x9c0] sm:$0xf]  ;;  %v10072_v35 = vld [vmem:[%s15688_s1 + $0x9cc] sm:$0xf0]  ;;  %v7613_v43 = vor.u32 %v10040_v32, %v7612_v31  ;;  %4956 = vmatpush.bf16.msra.mxu1 %v7757_v29  ;;  %4969 = vmatpush.bf16.msra.mxu2 %v7885_v30 }
  0x48   :  { %v7868_v36 = vld [vmem:[%s15688_s1 + $0xac0] sm:$0xf]  ;;  %v10104_v37 = vld [vmem:[%s15688_s1 + $0xacc] sm:$0xf0]  ;;  %v7741_v45 = vor.u32 %v10072_v35, %v7740_v33  ;;  %4982 = vmatpush.bf16.msra.mxu3 %v8013_v34  ;;  %4912 = vmatmul.bf16.vlgmr.msrb.gmra.mxu1 %v11080_v44 }
  0x49   :  { %v7996_v39 = vld [vmem:[%s15688_s1 + $0xbc0] sm:$0xf]  ;;  %v10136_v40 = vld [vmem:[%s15688_s1 + $0xbcc] sm:$0xf0]  ;;  %v7869_v46 = vor.u32 %v10104_v37, %v7868_v36  ;;  %4938 = vmatmul.bf16.vlgmr.msrb.gmra.mxu3 %v11078_v42  ;;  %4944 = vmatpush.bf16.msra.mxu0 %v7613_v43 }
  0x4a   :  { %v7596_v47 = vld [vmem:[%s15688_s1 + $0x8a0] sm:$0xf]  ;;  %v10036_v48 = vld [vmem:[%s15688_s1 + $0x8ac] sm:$0xf0]  ;;  %v7997_v50 = vor.u32 %v10136_v40, %v7996_v39 }
  0x4b   :  { %v7724_v49 = vld [vmem:[%s15688_s1 + $0x9a0] sm:$0xf]  ;;  %v10068_v51 = vld [vmem:[%s15688_s1 + $0x9ac] sm:$0xf0]  ;;  %v7597_v56 = vor.u32 %v10036_v48, %v7596_v47  ;;  %4957 = vmatpush.bf16.msra.mxu1 %v7741_v45  ;;  %4970 = vmatpush.bf16.msra.mxu2 %v7869_v46 }
  0x4c   :  { %v7852_v52 = vld [vmem:[%s15688_s1 + $0xaa0] sm:$0xf]  ;;  %v10100_v53 = vld [vmem:[%s15688_s1 + $0xaac] sm:$0xf0]  ;;  %v7725_v57 = vor.u32 %v10068_v51, %v7724_v49  ;;  %4983 = vmatpush.bf16.msra.mxu3 %v7997_v50 }
  0x4d   :  { %v7980_v54 = vld [vmem:[%s15688_s1 + $0xba0] sm:$0xf]  ;;  %v10132_v55 = vld [vmem:[%s15688_s1 + $0xbac] sm:$0xf0]  ;;  %v7853_v58 = vor.u32 %v10100_v53, %v7852_v52  ;;  %4945 = vmatpush.bf16.msra.mxu0 %v7597_v56 }
  0x4e   :  { %v7580_v59 = vld [vmem:[%s15688_s1 + $0x880] sm:$0xf]  ;;  %v10032_v60 = vld [vmem:[%s15688_s1 + $0x88c] sm:$0xf0]  ;;  %v7981_v62 = vor.u32 %v10132_v55, %v7980_v54 }
  0x4f   :  { %v7708_v61 = vld [vmem:[%s15688_s1 + $0x980] sm:$0xf]  ;;  %v10064_v63 = vld [vmem:[%s15688_s1 + $0x98c] sm:$0xf0]  ;;  %v7581_v5 = vor.u32 %v10032_v60, %v7580_v59  ;;  %4958 = vmatpush.bf16.msra.mxu1 %v7725_v57  ;;  %4971 = vmatpush.bf16.msra.mxu2 %v7853_v58 }
  0x50   :  { %v7836_v0 = vld [vmem:[%s15688_s1 + $0xa80] sm:$0xf]  ;;  %v10096_v1 = vld [vmem:[%s15688_s1 + $0xa8c] sm:$0xf0]  ;;  %v7709_v7 = vor.u32 %v10064_v63, %v7708_v61  ;;  %4984 = vmatpush.bf16.msra.mxu3 %v7981_v62  ;;  %v26_v61 = vld [vmem:[%s15689_s0 + $0x28] sm:$0xff] }
  0x51   :  { %v7964_v2 = vld [vmem:[%s15688_s1 + $0xb80] sm:$0xf]  ;;  %v10128_v3 = vld [vmem:[%s15688_s1 + $0xb8c] sm:$0xf0]  ;;  %v7837_v8 = vor.u32 %v10096_v1, %v7836_v0  ;;  %4946 = vmatpush.bf16.msra.mxu0 %v7581_v5 }
  0x52   :  { %v7564_v9 = vld [vmem:[%s15688_s1 + $0x860] sm:$0xf]  ;;  %v10028_v10 = vld [vmem:[%s15688_s1 + $0x86c] sm:$0xf0]  ;;  %v7965_v12 = vor.u32 %v10128_v3, %v7964_v2 }
  0x53   :  { %v7692_v11 = vld [vmem:[%s15688_s1 + $0x960] sm:$0xf]  ;;  %v10060_v13 = vld [vmem:[%s15688_s1 + $0x96c] sm:$0xf0]  ;;  %v7565_v18 = vor.u32 %v10028_v10, %v7564_v9  ;;  %4959 = vmatpush.bf16.msra.mxu1 %v7709_v7  ;;  %4972 = vmatpush.bf16.msra.mxu2 %v7837_v8 }
  0x54   :  { %v7820_v14 = vld [vmem:[%s15688_s1 + $0xa60] sm:$0xf]  ;;  %v10092_v15 = vld [vmem:[%s15688_s1 + $0xa6c] sm:$0xf0]  ;;  %v7693_v19 = vor.u32 %v10060_v13, %v7692_v11  ;;  %4985 = vmatpush.bf16.msra.mxu3 %v7965_v12  ;;  %v851_v12 = vunpack.c.l.b16 %v26_v61 }
  0x55   :  { %v7948_v16 = vld [vmem:[%s15688_s1 + $0xb60] sm:$0xf]  ;;  %v10124_v17 = vld [vmem:[%s15688_s1 + $0xb6c] sm:$0xf0]  ;;  %v7821_v22 = vor.u32 %v10092_v15, %v7820_v14  ;;  %4947 = vmatpush.bf16.msra.mxu0 %v7565_v18 }
  0x56   :  { %v7548_v23 = vld [vmem:[%s15688_s1 + $0x840] sm:$0xf]  ;;  %v10024_v24 = vld [vmem:[%s15688_s1 + $0x84c] sm:$0xf0]  ;;  %v7949_v26 = vor.u32 %v10124_v17, %v7948_v16  ;;  %v852_v16 = vunpack.c.h.b16 %v26_v61 }
  0x57   :  { %v7676_v25 = vld [vmem:[%s15688_s1 + $0x940] sm:$0xf]  ;;  %v10056_v27 = vld [vmem:[%s15688_s1 + $0x94c] sm:$0xf0]  ;;  %v7549_v32 = vor.u32 %v10024_v24, %v7548_v23  ;;  %4960 = vmatpush.bf16.msra.mxu1 %v7693_v19  ;;  %4973 = vmatpush.bf16.msra.mxu2 %v7821_v22 }
  0x58   :  { %v7804_v28 = vld [vmem:[%s15688_s1 + $0xa40] sm:$0xf]  ;;  %v10088_v29 = vld [vmem:[%s15688_s1 + $0xa4c] sm:$0xf0]  ;;  %v7677_v33 = vor.u32 %v10056_v27, %v7676_v25  ;;  %4986 = vmatpush.bf16.msra.mxu3 %v7949_v26 }
  0x59   :  { %v7932_v30 = vld [vmem:[%s15688_s1 + $0xb40] sm:$0xf]  ;;  %v10120_v31 = vld [vmem:[%s15688_s1 + $0xb4c] sm:$0xf0]  ;;  %v7805_v34 = vor.u32 %v10088_v29, %v7804_v28  ;;  %4948 = vmatpush.bf16.msra.mxu0 %v7549_v32  ;;  %v11280_v29 = vpack.c.b16 %v851_v12, %v851_v12 }
  0x5a   :  { %v7532_v35 = vld [vmem:[%s15688_s1 + $0x820] sm:$0xf]  ;;  %v10020_v36 = vld [vmem:[%s15688_s1 + $0x82c] sm:$0xf0]  ;;  %v7933_v39 = vor.u32 %v10120_v31, %v7932_v30 }
  0x5b   :  { %v7660_v37 = vld [vmem:[%s15688_s1 + $0x920] sm:$0xf]  ;;  %v10052_v40 = vld [vmem:[%s15688_s1 + $0x92c] sm:$0xf0]  ;;  %v7533_v49 = vor.u32 %v10020_v36, %v7532_v35  ;;  %4961 = vmatpush.bf16.msra.mxu1 %v7677_v33  ;;  %4974 = vmatpush.bf16.msra.mxu2 %v7805_v34  ;;  %v11290_v33 = vpack.c.b16 %v852_v16, %v852_v16 }
  0x5c   :  { %v7788_v43 = vld [vmem:[%s15688_s1 + $0xa20] sm:$0xf]  ;;  %v10084_v45 = vld [vmem:[%s15688_s1 + $0xa2c] sm:$0xf0]  ;;  %v7661_v53 = vor.u32 %v10052_v40, %v7660_v37  ;;  %4987 = vmatpush.bf16.msra.mxu3 %v7933_v39 }
  0x5d   :  { %v7916_v46 = vld [vmem:[%s15688_s1 + $0xb20] sm:$0xf]  ;;  %v10116_v47 = vld [vmem:[%s15688_s1 + $0xb2c] sm:$0xf0]  ;;  %v7789_v54 = vor.u32 %v10084_v45, %v7788_v43  ;;  %4949 = vmatpush.bf16.msra.mxu0 %v7533_v49 }
  0x5e   :  { %v7516_v48 = vld [vmem:[%s15688_s1 + $0x800] sm:$0xf]  ;;  %v10016_v50 = vld [vmem:[%s15688_s1 + $0x80c] sm:$0xf0]  ;;  %v7917_v58 = vor.u32 %v10116_v47, %v7916_v46 }
  0x5f   :  { %v7644_v51 = vld [vmem:[%s15688_s1 + $0x900] sm:$0xf]  ;;  %v10048_v52 = vld [vmem:[%s15688_s1 + $0x90c] sm:$0xf0]  ;;  %v7517_v1 = vor.u32 %v10016_v50, %v7516_v48  ;;  %4962 = vmatpush.bf16.msra.mxu1 %v7661_v53  ;;  %4975 = vmatpush.bf16.msra.mxu2 %v7789_v54 }
  0x60   :  { %v7772_v55 = vld [vmem:[%s15688_s1 + $0xa00] sm:$0xf]  ;;  %v10080_v56 = vld [vmem:[%s15688_s1 + $0xa0c] sm:$0xf0]  ;;  %v7645_v8 = vor.u32 %v10048_v52, %v7644_v51  ;;  %4988 = vmatpush.bf16.msra.mxu3 %v7917_v58 }
  0x61   :  { %v25_v57 = vld [vmem:[%s15689_s0 + $0x20] sm:$0xff]  ;;  %v10112_v60 = vld [vmem:[%s15688_s1 + $0xb0c] sm:$0xf0]  ;;  %v7773_v9 = vor.u32 %v10080_v56, %v7772_v55  ;;  %4950 = vmatpush.bf16.msra.mxu0 %v7517_v1 }
  0x62   :  { %v7900_v59 = vld [vmem:[%s15688_s1 + $0xb00] sm:$0xf]  ;;  %v10172_v63 = vld [vmem:[%s15688_s1 + $0xcec] sm:$0xf0]  ;;  %v849_v7 = vunpack.c.l.b16 %v25_v57  ;;  %v850_v13 = vunpack.c.h.b16 %v25_v57 }
  0x63   :  { %v8140_v62 = vld [vmem:[%s15688_s1 + $0xce0] sm:$0xf]  ;;  %v10204_v2 = vld [vmem:[%s15688_s1 + $0xdec] sm:$0xf0]  ;;  %v7901_v14 = vor.u32 %v10112_v60, %v7900_v59  ;;  %4963 = vmatpush.bf16.msra.mxu1 %v7645_v8  ;;  %4976 = vmatpush.bf16.msra.mxu2 %v7773_v9 }
  0x64   :  { %v8268_v0 = vld [vmem:[%s15688_s1 + $0xde0] sm:$0xf]  ;;  %v10236_v5 = vld [vmem:[%s15688_s1 + $0xeec] sm:$0xf0]  ;;  %v8141_v15 = vor.u32 %v10172_v63, %v8140_v62  ;;  %v11269_v25 = vpack.c.b16 %v849_v7, %v849_v7  ;;  %v11282_v30 = vpack.c.b16 %v850_v13, %v850_v13 }
  0x65   :  { %v8396_v3 = vld [vmem:[%s15688_s1 + $0xee0] sm:$0xf]  ;;  %v10268_v11 = vld [vmem:[%s15688_s1 + $0xfec] sm:$0xf0]  ;;  %v8269_v17 = vor.u32 %v10204_v2, %v8268_v0  ;;  %4989 = vmatpush.bf16.msra.mxu3 %v7901_v14 }
  0x66   :  { %v8524_v10 = vld [vmem:[%s15688_s1 + $0xfe0] sm:$0xf]  ;;  %v8397_v18 = vor.u32 %v10236_v5, %v8396_v3  ;;  %v10168_v22 = vld [vmem:[%s15688_s1 + $0xccc] sm:$0xf0]  ;;  %4995 = vmatpush.bf16.msrb.mxu0 %v8141_v15  ;;  %4977 = vmatmul.bf16.vlgmr.msra.gmra.mxu2 %v11280_v29 }
  0x67   :  { %v8124_v19 = vld [vmem:[%s15688_s1 + $0xcc0] sm:$0xf]  ;;  %v8525_v24 = vor.u32 %v10268_v11, %v8524_v10  ;;  %v10200_v26 = vld [vmem:[%s15688_s1 + $0xdcc] sm:$0xf0]  ;;  %5008 = vmatpush.bf16.msrb.mxu1 %v8269_v17  ;;  %4951 = vmatmul.bf16.vlgmr.msra.gmra.mxu0 %v11269_v25 }
  0x68   :  { %v8252_v23 = vld [vmem:[%s15688_s1 + $0xdc0] sm:$0xf]  ;;  %v10232_v28 = vld [vmem:[%s15688_s1 + $0xecc] sm:$0xf0]  ;;  %v8125_v34 = vor.u32 %v10168_v22, %v8124_v19  ;;  %5021 = vmatpush.bf16.msrb.mxu2 %v8397_v18  ;;  %4964 = vmatmul.bf16.vlgmr.msra.gmra.mxu1 %v11282_v30 }
  0x69   :  { %v8380_v27 = vld [vmem:[%s15688_s1 + $0xec0] sm:$0xf]  ;;  %v10264_v32 = vld [vmem:[%s15688_s1 + $0xfcc] sm:$0xf0]  ;;  %v8253_v35 = vor.u32 %v10200_v26, %v8252_v23  ;;  %5034 = vmatpush.bf16.msrb.mxu3 %v8525_v24 }
  0x6a   :  { %v8508_v31 = vld [vmem:[%s15688_s1 + $0xfc0] sm:$0xf]  ;;  %v8381_v36 = vor.u32 %v10232_v28, %v8380_v27  ;;  %v10164_v39 = vld [vmem:[%s15688_s1 + $0xcac] sm:$0xf0]  ;;  %4990 = vmatmul.bf16.vlgmr.msra.gmra.mxu3 %v11290_v33  ;;  %4996 = vmatpush.bf16.msrb.mxu0 %v8125_v34 }
  0x6b   :  { %v8108_v37 = vld [vmem:[%s15688_s1 + $0xca0] sm:$0xf]  ;;  %v8509_v43 = vor.u32 %v10264_v32, %v8508_v31  ;;  %v10196_v45 = vld [vmem:[%s15688_s1 + $0xdac] sm:$0xf0]  ;;  %5009 = vmatpush.bf16.msrb.mxu1 %v8253_v35 }
  0x6c   :  { %v8236_v40 = vld [vmem:[%s15688_s1 + $0xda0] sm:$0xf]  ;;  %v10228_v47 = vld [vmem:[%s15688_s1 + $0xeac] sm:$0xf0]  ;;  %v8109_v50 = vor.u32 %v10164_v39, %v8108_v37  ;;  %5022 = vmatpush.bf16.msrb.mxu2 %v8381_v36 }
  0x6d   :  { %v8364_v46 = vld [vmem:[%s15688_s1 + $0xea0] sm:$0xf]  ;;  %v10260_v49 = vld [vmem:[%s15688_s1 + $0xfac] sm:$0xf0]  ;;  %v8237_v51 = vor.u32 %v10196_v45, %v8236_v40  ;;  %5035 = vmatpush.bf16.msrb.mxu3 %v8509_v43 }
  0x6e   :  { %v8492_v48 = vld [vmem:[%s15688_s1 + $0xfa0] sm:$0xf]  ;;  %v8365_v52 = vor.u32 %v10228_v47, %v8364_v46  ;;  %v10160_v54 = vld [vmem:[%s15688_s1 + $0xc8c] sm:$0xf0]  ;;  %4997 = vmatpush.bf16.msrb.mxu0 %v8109_v50 }
  0x6f   :  { %v8092_v53 = vld [vmem:[%s15688_s1 + $0xc80] sm:$0xf]  ;;  %v8493_v56 = vor.u32 %v10260_v49, %v8492_v48  ;;  %v10192_v57 = vld [vmem:[%s15688_s1 + $0xd8c] sm:$0xf0]  ;;  %5010 = vmatpush.bf16.msrb.mxu1 %v8237_v51 }
  0x70   :  { %v8220_v55 = vld [vmem:[%s15688_s1 + $0xd80] sm:$0xf]  ;;  %v10224_v59 = vld [vmem:[%s15688_s1 + $0xe8c] sm:$0xf0]  ;;  %v8093_v62 = vor.u32 %v10160_v54, %v8092_v53  ;;  %5023 = vmatpush.bf16.msrb.mxu2 %v8365_v52 }
  0x71   :  { %v8348_v58 = vld [vmem:[%s15688_s1 + $0xe80] sm:$0xf]  ;;  %v10256_v61 = vld [vmem:[%s15688_s1 + $0xf8c] sm:$0xf0]  ;;  %v8221_v63 = vor.u32 %v10192_v57, %v8220_v55  ;;  %5036 = vmatpush.bf16.msrb.mxu3 %v8493_v56 }
  0x72   :  { %v8476_v60 = vld [vmem:[%s15688_s1 + $0xf80] sm:$0xf]  ;;  %v8349_v0 = vor.u32 %v10224_v59, %v8348_v58  ;;  %v10156_v2 = vld [vmem:[%s15688_s1 + $0xc6c] sm:$0xf0]  ;;  %4998 = vmatpush.bf16.msrb.mxu0 %v8093_v62  ;;  %v28_v59 = vld [vmem:[%s15689_s0 + $0x38] sm:$0xff] }
  0x73   :  { %v8076_v1 = vld [vmem:[%s15688_s1 + $0xc60] sm:$0xf]  ;;  %v8477_v5 = vor.u32 %v10256_v61, %v8476_v60  ;;  %v10188_v7 = vld [vmem:[%s15688_s1 + $0xd6c] sm:$0xf0]  ;;  %5011 = vmatpush.bf16.msrb.mxu1 %v8221_v63 }
  0x74   :  { %v8204_v3 = vld [vmem:[%s15688_s1 + $0xd60] sm:$0xf]  ;;  %v10220_v9 = vld [vmem:[%s15688_s1 + $0xe6c] sm:$0xf0]  ;;  %v8077_v12 = vor.u32 %v10156_v2, %v8076_v1  ;;  %5024 = vmatpush.bf16.msrb.mxu2 %v8349_v0 }
  0x75   :  { %v8332_v8 = vld [vmem:[%s15688_s1 + $0xe60] sm:$0xf]  ;;  %v10252_v11 = vld [vmem:[%s15688_s1 + $0xf6c] sm:$0xf0]  ;;  %v8205_v13 = vor.u32 %v10188_v7, %v8204_v3  ;;  %5037 = vmatpush.bf16.msrb.mxu3 %v8477_v5 }
  0x76   :  { %v8460_v10 = vld [vmem:[%s15688_s1 + $0xf60] sm:$0xf]  ;;  %v8333_v14 = vor.u32 %v10220_v9, %v8332_v8  ;;  %v10152_v16 = vld [vmem:[%s15688_s1 + $0xc4c] sm:$0xf0]  ;;  %4999 = vmatpush.bf16.msrb.mxu0 %v8077_v12 }
  0x77   :  { %v8060_v15 = vld [vmem:[%s15688_s1 + $0xc40] sm:$0xf]  ;;  %v8461_v18 = vor.u32 %v10252_v11, %v8460_v10  ;;  %v10184_v19 = vld [vmem:[%s15688_s1 + $0xd4c] sm:$0xf0]  ;;  %5012 = vmatpush.bf16.msrb.mxu1 %v8205_v13  ;;  %v855_v10 = vunpack.c.l.b16 %v28_v59 }
  0x78   :  { %v8188_v17 = vld [vmem:[%s15688_s1 + $0xd40] sm:$0xf]  ;;  %v10216_v23 = vld [vmem:[%s15688_s1 + $0xe4c] sm:$0xf0]  ;;  %v8061_v27 = vor.u32 %v10152_v16, %v8060_v15  ;;  %5025 = vmatpush.bf16.msrb.mxu2 %v8333_v14  ;;  %v856_v14 = vunpack.c.h.b16 %v28_v59 }
  0x79   :  { %v8316_v22 = vld [vmem:[%s15688_s1 + $0xe40] sm:$0xf]  ;;  %v10248_v26 = vld [vmem:[%s15688_s1 + $0xf4c] sm:$0xf0]  ;;  %v8189_v28 = vor.u32 %v10184_v19, %v8188_v17  ;;  %5038 = vmatpush.bf16.msrb.mxu3 %v8461_v18 }
  0x7a   :  { %v8444_v24 = vld [vmem:[%s15688_s1 + $0xf40] sm:$0xf]  ;;  %v8317_v31 = vor.u32 %v10216_v23, %v8316_v22  ;;  %v10148_v34 = vld [vmem:[%s15688_s1 + $0xc2c] sm:$0xf0]  ;;  %5000 = vmatpush.bf16.msrb.mxu0 %v8061_v27 }
  0x7b   :  { %v8044_v32 = vld [vmem:[%s15688_s1 + $0xc20] sm:$0xf]  ;;  %v8445_v36 = vor.u32 %v10248_v26, %v8444_v24  ;;  %v10180_v37 = vld [vmem:[%s15688_s1 + $0xd2c] sm:$0xf0]  ;;  %5013 = vmatpush.bf16.msrb.mxu1 %v8189_v28  ;;  %v11490_v28 = vpack.c.b16 %v855_v10, %v855_v10 }
  0x7c   :  { %v8172_v35 = vld [vmem:[%s15688_s1 + $0xd20] sm:$0xf]  ;;  %v10212_v40 = vld [vmem:[%s15688_s1 + $0xe2c] sm:$0xf0]  ;;  %v8045_v47 = vor.u32 %v10148_v34, %v8044_v32  ;;  %5026 = vmatpush.bf16.msrb.mxu2 %v8317_v31 }
  0x7d   :  { %v8300_v39 = vld [vmem:[%s15688_s1 + $0xe20] sm:$0xf]  ;;  %v10244_v45 = vld [vmem:[%s15688_s1 + $0xf2c] sm:$0xf0]  ;;  %v8173_v51 = vor.u32 %v10180_v37, %v8172_v35  ;;  %5039 = vmatpush.bf16.msrb.mxu3 %v8445_v36  ;;  %v11500_v35 = vpack.c.b16 %v856_v14, %v856_v14 }
  0x7e   :  { %v8428_v43 = vld [vmem:[%s15688_s1 + $0xf20] sm:$0xf]  ;;  %v10144_v48 = vld [vmem:[%s15688_s1 + $0xc0c] sm:$0xf0]  ;;  %v8301_v52 = vor.u32 %v10212_v40, %v8300_v39  ;;  %5001 = vmatpush.bf16.msrb.mxu0 %v8045_v47 }
  0x7f   :  { %v8028_v46 = vld [vmem:[%s15688_s1 + $0xc00] sm:$0xf]  ;;  %v10176_v50 = vld [vmem:[%s15688_s1 + $0xd0c] sm:$0xf0]  ;;  %v8429_v56 = vor.u32 %v10244_v45, %v8428_v43  ;;  %5014 = vmatpush.bf16.msrb.mxu1 %v8173_v51 }
  0x80   :  { %v8156_v49 = vld [vmem:[%s15688_s1 + $0xd00] sm:$0xf]  ;;  %v10208_v54 = vld [vmem:[%s15688_s1 + $0xe0c] sm:$0xf0]  ;;  %v8029_v63 = vor.u32 %v10144_v48, %v8028_v46  ;;  %5027 = vmatpush.bf16.msrb.mxu2 %v8301_v52 }
  0x81   :  { %v8284_v53 = vld [vmem:[%s15688_s1 + $0xe00] sm:$0xf]  ;;  %v27_v55 = vld [vmem:[%s15689_s0 + $0x30] sm:$0xff]  ;;  %v8157_v5 = vor.u32 %v10176_v50, %v8156_v49  ;;  %5040 = vmatpush.bf16.msrb.mxu3 %v8429_v56 }
  0x82   :  { %v8412_v57 = vld [vmem:[%s15688_s1 + $0xf00] sm:$0xf]  ;;  %v10240_v58 = vld [vmem:[%s15688_s1 + $0xf0c] sm:$0xf0]  ;;  %v853_v3 = vunpack.c.l.b16 %v27_v55  ;;  %v8285_v7 = vor.u32 %v10208_v54, %v8284_v53  ;;  %v854_v11 = vunpack.c.h.b16 %v27_v55  ;;  %5002 = vmatpush.bf16.msrb.mxu0 %v8029_v63 }
  0x83   :  { %v8652_v60 = vld [vmem:[%s15688_s1 + $0x10e0] sm:$0xf]  ;;  %v10300_v61 = vld [vmem:[%s15688_s1 + $0x10ec] sm:$0xf0]  ;;  %v8413_v12 = vor.u32 %v10240_v58, %v8412_v57  ;;  %5015 = vmatpush.bf16.msrb.mxu1 %v8157_v5 }
  0x84   :  { %v8780_v62 = vld [vmem:[%s15688_s1 + $0x11e0] sm:$0xf]  ;;  %v10332_v0 = vld [vmem:[%s15688_s1 + $0x11ec] sm:$0xf0]  ;;  %v8653_v13 = vor.u32 %v10300_v61, %v8652_v60  ;;  %v11479_v23 = vpack.c.b16 %v853_v3, %v853_v3  ;;  %5028 = vmatpush.bf16.msrb.mxu2 %v8285_v7  ;;  %v11492_v31 = vpack.c.b16 %v854_v11, %v854_v11 }
  0x85   :  { %v8908_v1 = vld [vmem:[%s15688_s1 + $0x12e0] sm:$0xf]  ;;  %v10364_v2 = vld [vmem:[%s15688_s1 + $0x12ec] sm:$0xf0]  ;;  %v8781_v15 = vor.u32 %v10332_v0, %v8780_v62  ;;  %5041 = vmatpush.bf16.msrb.mxu3 %v8413_v12 }
  0x86   :  { %v9036_v8 = vld [vmem:[%s15688_s1 + $0x13e0] sm:$0xf]  ;;  %v10396_v9 = vld [vmem:[%s15688_s1 + $0x13ec] sm:$0xf0]  ;;  %v8909_v16 = vor.u32 %v10364_v2, %v8908_v1  ;;  %5047 = vmatpush.bf16.msra.mxu0 %v8653_v13  ;;  %5016 = vmatmul.bf16.vlgmr.msrb.gmra.mxu1 %v11492_v31 }
  0x87   :  { %v8636_v17 = vld [vmem:[%s15688_s1 + $0x10c0] sm:$0xf]  ;;  %v10296_v18 = vld [vmem:[%s15688_s1 + $0x10cc] sm:$0xf0]  ;;  %v9037_v22 = vor.u32 %v10396_v9, %v9036_v8  ;;  %5060 = vmatpush.bf16.msra.mxu1 %v8781_v15  ;;  %5003 = vmatmul.bf16.vlgmr.msrb.gmra.mxu0 %v11479_v23 }
  0x88   :  { %v8764_v19 = vld [vmem:[%s15688_s1 + $0x11c0] sm:$0xf]  ;;  %v10328_v24 = vld [vmem:[%s15688_s1 + $0x11cc] sm:$0xf0]  ;;  %v8637_v36 = vor.u32 %v10296_v18, %v8636_v17  ;;  %5073 = vmatpush.bf16.msra.mxu2 %v8909_v16  ;;  %5042 = vmatmul.bf16.vlgmr.msrb.gmra.mxu3 %v11500_v35 }
  0x89   :  { %v8892_v26 = vld [vmem:[%s15688_s1 + $0x12c0] sm:$0xf]  ;;  %v10360_v27 = vld [vmem:[%s15688_s1 + $0x12cc] sm:$0xf0]  ;;  %v8765_v37 = vor.u32 %v10328_v24, %v8764_v19  ;;  %5086 = vmatpush.bf16.msra.mxu3 %v9037_v22  ;;  %5029 = vmatmul.bf16.vlgmr.msrb.gmra.mxu2 %v11490_v28 }
  0x8a   :  { %v9020_v32 = vld [vmem:[%s15688_s1 + $0x13c0] sm:$0xf]  ;;  %v10392_v34 = vld [vmem:[%s15688_s1 + $0x13cc] sm:$0xf0]  ;;  %v8893_v39 = vor.u32 %v10360_v27, %v8892_v26  ;;  %5048 = vmatpush.bf16.msra.mxu0 %v8637_v36 }
  0x8b   :  { %v8620_v40 = vld [vmem:[%s15688_s1 + $0x10a0] sm:$0xf]  ;;  %v10292_v43 = vld [vmem:[%s15688_s1 + $0x10ac] sm:$0xf0]  ;;  %v9021_v46 = vor.u32 %v10392_v34, %v9020_v32  ;;  %5061 = vmatpush.bf16.msra.mxu1 %v8765_v37 }
  0x8c   :  { %v8748_v45 = vld [vmem:[%s15688_s1 + $0x11a0] sm:$0xf]  ;;  %v10324_v47 = vld [vmem:[%s15688_s1 + $0x11ac] sm:$0xf0]  ;;  %v8621_v52 = vor.u32 %v10292_v43, %v8620_v40  ;;  %5074 = vmatpush.bf16.msra.mxu2 %v8893_v39 }
  0x8d   :  { %v8876_v48 = vld [vmem:[%s15688_s1 + $0x12a0] sm:$0xf]  ;;  %v10356_v49 = vld [vmem:[%s15688_s1 + $0x12ac] sm:$0xf0]  ;;  %v8749_v53 = vor.u32 %v10324_v47, %v8748_v45  ;;  %5087 = vmatpush.bf16.msra.mxu3 %v9021_v46 }
  0x8e   :  { %v9004_v50 = vld [vmem:[%s15688_s1 + $0x13a0] sm:$0xf]  ;;  %v10388_v51 = vld [vmem:[%s15688_s1 + $0x13ac] sm:$0xf0]  ;;  %v8877_v54 = vor.u32 %v10356_v49, %v8876_v48  ;;  %5049 = vmatpush.bf16.msra.mxu0 %v8621_v52 }
  0x8f   :  { %v8604_v55 = vld [vmem:[%s15688_s1 + $0x1080] sm:$0xf]  ;;  %v10288_v56 = vld [vmem:[%s15688_s1 + $0x108c] sm:$0xf0]  ;;  %v9005_v58 = vor.u32 %v10388_v51, %v9004_v50  ;;  %5062 = vmatpush.bf16.msra.mxu1 %v8749_v53 }
  0x90   :  { %v8732_v57 = vld [vmem:[%s15688_s1 + $0x1180] sm:$0xf]  ;;  %v10320_v59 = vld [vmem:[%s15688_s1 + $0x118c] sm:$0xf0]  ;;  %v8605_v0 = vor.u32 %v10288_v56, %v8604_v55  ;;  %5075 = vmatpush.bf16.msra.mxu2 %v8877_v54 }
  0x91   :  { %v8860_v60 = vld [vmem:[%s15688_s1 + $0x1280] sm:$0xf]  ;;  %v10352_v61 = vld [vmem:[%s15688_s1 + $0x128c] sm:$0xf0]  ;;  %v8733_v1 = vor.u32 %v10320_v59, %v8732_v57  ;;  %5088 = vmatpush.bf16.msra.mxu3 %v9005_v58 }
  0x92   :  { %v8988_v62 = vld [vmem:[%s15688_s1 + $0x1380] sm:$0xf]  ;;  %v10384_v63 = vld [vmem:[%s15688_s1 + $0x138c] sm:$0xf0]  ;;  %v8861_v2 = vor.u32 %v10352_v61, %v8860_v60  ;;  %5050 = vmatpush.bf16.msra.mxu0 %v8605_v0 }
  0x93   :  { %v8588_v3 = vld [vmem:[%s15688_s1 + $0x1060] sm:$0xf]  ;;  %v10284_v5 = vld [vmem:[%s15688_s1 + $0x106c] sm:$0xf0]  ;;  %v8989_v8 = vor.u32 %v10384_v63, %v8988_v62  ;;  %5063 = vmatpush.bf16.msra.mxu1 %v8733_v1  ;;  %v30_v1 = vld [vmem:[%s15689_s0 + $0x48] sm:$0xff] }
  0x94   :  { %v8716_v7 = vld [vmem:[%s15688_s1 + $0x1160] sm:$0xf]  ;;  %v10316_v9 = vld [vmem:[%s15688_s1 + $0x116c] sm:$0xf0]  ;;  %v8589_v14 = vor.u32 %v10284_v5, %v8588_v3  ;;  %5076 = vmatpush.bf16.msra.mxu2 %v8861_v2 }
  0x95   :  { %v8844_v10 = vld [vmem:[%s15688_s1 + $0x1260] sm:$0xf]  ;;  %v10348_v11 = vld [vmem:[%s15688_s1 + $0x126c] sm:$0xf0]  ;;  %v8717_v15 = vor.u32 %v10316_v9, %v8716_v7  ;;  %5089 = vmatpush.bf16.msra.mxu3 %v8989_v8 }
  0x96   :  { %v8972_v12 = vld [vmem:[%s15688_s1 + $0x1360] sm:$0xf]  ;;  %v10380_v13 = vld [vmem:[%s15688_s1 + $0x136c] sm:$0xf0]  ;;  %v8845_v16 = vor.u32 %v10348_v11, %v8844_v10  ;;  %5051 = vmatpush.bf16.msra.mxu0 %v8589_v14 }
  0x97   :  { %v8572_v17 = vld [vmem:[%s15688_s1 + $0x1040] sm:$0xf]  ;;  %v10280_v18 = vld [vmem:[%s15688_s1 + $0x104c] sm:$0xf0]  ;;  %v8973_v22 = vor.u32 %v10380_v13, %v8972_v12  ;;  %5064 = vmatpush.bf16.msra.mxu1 %v8717_v15 }
  0x98   :  { %v8700_v19 = vld [vmem:[%s15688_s1 + $0x1140] sm:$0xf]  ;;  %v10312_v24 = vld [vmem:[%s15688_s1 + $0x114c] sm:$0xf0]  ;;  %v8573_v36 = vor.u32 %v10280_v18, %v8572_v17  ;;  %5077 = vmatpush.bf16.msra.mxu2 %v8845_v16  ;;  %v859_v16 = vunpack.c.l.b16 %v30_v1 }
  0x99   :  { %v8828_v26 = vld [vmem:[%s15688_s1 + $0x1240] sm:$0xf]  ;;  %v10344_v27 = vld [vmem:[%s15688_s1 + $0x124c] sm:$0xf0]  ;;  %v8701_v37 = vor.u32 %v10312_v24, %v8700_v19  ;;  %5090 = vmatpush.bf16.msra.mxu3 %v8973_v22  ;;  %v860_v22 = vunpack.c.h.b16 %v30_v1 }
  0x9a   :  { %v8956_v32 = vld [vmem:[%s15688_s1 + $0x1340] sm:$0xf]  ;;  %v10376_v34 = vld [vmem:[%s15688_s1 + $0x134c] sm:$0xf0]  ;;  %v8829_v39 = vor.u32 %v10344_v27, %v8828_v26  ;;  %5052 = vmatpush.bf16.msra.mxu0 %v8573_v36 }
  0x9b   :  { %v8556_v40 = vld [vmem:[%s15688_s1 + $0x1020] sm:$0xf]  ;;  %v10276_v43 = vld [vmem:[%s15688_s1 + $0x102c] sm:$0xf0]  ;;  %v8957_v46 = vor.u32 %v10376_v34, %v8956_v32  ;;  %5065 = vmatpush.bf16.msra.mxu1 %v8701_v37 }
  0x9c   :  { %v8684_v45 = vld [vmem:[%s15688_s1 + $0x1120] sm:$0xf]  ;;  %v10308_v47 = vld [vmem:[%s15688_s1 + $0x112c] sm:$0xf0]  ;;  %v8557_v53 = vor.u32 %v10276_v43, %v8556_v40  ;;  %5078 = vmatpush.bf16.msra.mxu2 %v8829_v39 }
  0x9d   :  { %v8812_v48 = vld [vmem:[%s15688_s1 + $0x1220] sm:$0xf]  ;;  %v10340_v49 = vld [vmem:[%s15688_s1 + $0x122c] sm:$0xf0]  ;;  %v8685_v57 = vor.u32 %v10308_v47, %v8684_v45  ;;  %5091 = vmatpush.bf16.msra.mxu3 %v8957_v46  ;;  %v11700_v45 = vpack.c.b16 %v859_v16, %v859_v16 }
  0x9e   :  { %v8940_v50 = vld [vmem:[%s15688_s1 + $0x1320] sm:$0xf]  ;;  %v10372_v51 = vld [vmem:[%s15688_s1 + $0x132c] sm:$0xf0]  ;;  %v8813_v58 = vor.u32 %v10340_v49, %v8812_v48  ;;  %5053 = vmatpush.bf16.msra.mxu0 %v8557_v53  ;;  %v11710_v49 = vpack.c.b16 %v860_v22, %v860_v22 }
  0x9f   :  { %v8540_v52 = vld [vmem:[%s15688_s1 + $0x1000] sm:$0xf]  ;;  %v10272_v54 = vld [vmem:[%s15688_s1 + $0x100c] sm:$0xf0]  ;;  %v8941_v62 = vor.u32 %v10372_v51, %v8940_v50  ;;  %5066 = vmatpush.bf16.msra.mxu1 %v8685_v57 }
  0xa0   :  { %v8668_v55 = vld [vmem:[%s15688_s1 + $0x1100] sm:$0xf]  ;;  %v10304_v56 = vld [vmem:[%s15688_s1 + $0x110c] sm:$0xf0]  ;;  %v8541_v7 = vor.u32 %v10272_v54, %v8540_v52  ;;  %5079 = vmatpush.bf16.msra.mxu2 %v8813_v58 }
  0xa1   :  { %v8796_v59 = vld [vmem:[%s15688_s1 + $0x1200] sm:$0xf]  ;;  %v10336_v60 = vld [vmem:[%s15688_s1 + $0x120c] sm:$0xf0]  ;;  %v8669_v12 = vor.u32 %v10304_v56, %v8668_v55  ;;  %5092 = vmatpush.bf16.msra.mxu3 %v8941_v62 }
  0xa2   :  { %v29_v61 = vld [vmem:[%s15689_s0 + $0x40] sm:$0xff]  ;;  %v10368_v0 = vld [vmem:[%s15688_s1 + $0x130c] sm:$0xf0]  ;;  %v8797_v13 = vor.u32 %v10336_v60, %v8796_v59  ;;  %5054 = vmatpush.bf16.msra.mxu0 %v8541_v7 }
  0xa3   :  { %v8924_v63 = vld [vmem:[%s15688_s1 + $0x1300] sm:$0xf]  ;;  %v10428_v3 = vld [vmem:[%s15688_s1 + $0x14ec] sm:$0xf0]  ;;  %v857_v11 = vunpack.c.l.b16 %v29_v61  ;;  %v858_v17 = vunpack.c.h.b16 %v29_v61  ;;  %5067 = vmatpush.bf16.msra.mxu1 %v8669_v12 }
  0xa4   :  { %v9164_v2 = vld [vmem:[%s15688_s1 + $0x14e0] sm:$0xf]  ;;  %v10460_v8 = vld [vmem:[%s15688_s1 + $0x15ec] sm:$0xf0]  ;;  %v8925_v18 = vor.u32 %v10368_v0, %v8924_v63  ;;  %5080 = vmatpush.bf16.msra.mxu2 %v8797_v13 }
  0xa5   :  { %v9292_v5 = vld [vmem:[%s15688_s1 + $0x15e0] sm:$0xf]  ;;  %v10492_v10 = vld [vmem:[%s15688_s1 + $0x16ec] sm:$0xf0]  ;;  %v9165_v19 = vor.u32 %v10428_v3, %v9164_v2  ;;  %v11689_v37 = vpack.c.b16 %v857_v11, %v857_v11  ;;  %v11702_v46 = vpack.c.b16 %v858_v17, %v858_v17 }
  0xa6   :  { %v9420_v9 = vld [vmem:[%s15688_s1 + $0x16e0] sm:$0xf]  ;;  %v10524_v15 = vld [vmem:[%s15688_s1 + $0x17ec] sm:$0xf0]  ;;  %v9293_v24 = vor.u32 %v10460_v8, %v9292_v5  ;;  %5093 = vmatpush.bf16.msra.mxu3 %v8925_v18 }
  0xa7   :  { %v9548_v14 = vld [vmem:[%s15688_s1 + $0x17e0] sm:$0xf]  ;;  %v9421_v26 = vor.u32 %v10492_v10, %v9420_v9  ;;  %v10424_v32 = vld [vmem:[%s15688_s1 + $0x14cc] sm:$0xf0]  ;;  %5099 = vmatpush.bf16.msrb.mxu0 %v9165_v19  ;;  %5081 = vmatmul.bf16.vlgmr.msra.gmra.mxu2 %v11700_v45 }
  0xa8   :  { %v9148_v27 = vld [vmem:[%s15688_s1 + $0x14c0] sm:$0xf]  ;;  %v9549_v36 = vor.u32 %v10524_v15, %v9548_v14  ;;  %v10456_v39 = vld [vmem:[%s15688_s1 + $0x15cc] sm:$0xf0]  ;;  %5112 = vmatpush.bf16.msrb.mxu1 %v9293_v24  ;;  %5055 = vmatmul.bf16.vlgmr.msra.gmra.mxu0 %v11689_v37 }
  0xa9   :  { %v9276_v34 = vld [vmem:[%s15688_s1 + $0x15c0] sm:$0xf]  ;;  %v10488_v43 = vld [vmem:[%s15688_s1 + $0x16cc] sm:$0xf0]  ;;  %v9149_v50 = vor.u32 %v10424_v32, %v9148_v27  ;;  %5125 = vmatpush.bf16.msrb.mxu2 %v9421_v26  ;;  %5068 = vmatmul.bf16.vlgmr.msra.gmra.mxu1 %v11702_v46 }
  0xaa   :  { %v9404_v40 = vld [vmem:[%s15688_s1 + $0x16c0] sm:$0xf]  ;;  %v10520_v48 = vld [vmem:[%s15688_s1 + $0x17cc] sm:$0xf0]  ;;  %v9277_v51 = vor.u32 %v10456_v39, %v9276_v34  ;;  %5138 = vmatpush.bf16.msrb.mxu3 %v9549_v36 }
  0xab   :  { %v9532_v47 = vld [vmem:[%s15688_s1 + $0x17c0] sm:$0xf]  ;;  %v9405_v52 = vor.u32 %v10488_v43, %v9404_v40  ;;  %v10420_v54 = vld [vmem:[%s15688_s1 + $0x14ac] sm:$0xf0]  ;;  %5094 = vmatmul.bf16.vlgmr.msra.gmra.mxu3 %v11710_v49  ;;  %5100 = vmatpush.bf16.msrb.mxu0 %v9149_v50 }
  0xac   :  { %v9132_v53 = vld [vmem:[%s15688_s1 + $0x14a0] sm:$0xf]  ;;  %v9533_v56 = vor.u32 %v10520_v48, %v9532_v47  ;;  %v10452_v57 = vld [vmem:[%s15688_s1 + $0x15ac] sm:$0xf0]  ;;  %5113 = vmatpush.bf16.msrb.mxu1 %v9277_v51 }
  0xad   :  { %v9260_v55 = vld [vmem:[%s15688_s1 + $0x15a0] sm:$0xf]  ;;  %v10484_v59 = vld [vmem:[%s15688_s1 + $0x16ac] sm:$0xf0]  ;;  %v9133_v62 = vor.u32 %v10420_v54, %v9132_v53  ;;  %5126 = vmatpush.bf16.msrb.mxu2 %v9405_v52 }
  0xae   :  { %v9388_v58 = vld [vmem:[%s15688_s1 + $0x16a0] sm:$0xf]  ;;  %v10516_v61 = vld [vmem:[%s15688_s1 + $0x17ac] sm:$0xf0]  ;;  %v9261_v63 = vor.u32 %v10452_v57, %v9260_v55  ;;  %5139 = vmatpush.bf16.msrb.mxu3 %v9533_v56 }
  0xaf   :  { %v9516_v60 = vld [vmem:[%s15688_s1 + $0x17a0] sm:$0xf]  ;;  %v9389_v0 = vor.u32 %v10484_v59, %v9388_v58  ;;  %v10416_v2 = vld [vmem:[%s15688_s1 + $0x148c] sm:$0xf0]  ;;  %5101 = vmatpush.bf16.msrb.mxu0 %v9133_v62  ;;  %v4848_v56 = vpop.f32.mrf.mxu0  ;;  %v4861_v59 = vpop.f32.mrf.mxu1 }
  0xb0   :  { %v9116_v1 = vld [vmem:[%s15688_s1 + $0x1480] sm:$0xf]  ;;  %v9517_v5 = vor.u32 %v10516_v61, %v9516_v60  ;;  %v10448_v7 = vld [vmem:[%s15688_s1 + $0x158c] sm:$0xf0]  ;;  %5114 = vmatpush.bf16.msrb.mxu1 %v9261_v63 }
  0xb1   :  { %v9244_v3 = vld [vmem:[%s15688_s1 + $0x1580] sm:$0xf]  ;;  %v10480_v9 = vld [vmem:[%s15688_s1 + $0x168c] sm:$0xf0]  ;;  %v9117_v12 = vor.u32 %v10416_v2, %v9116_v1  ;;  %5127 = vmatpush.bf16.msrb.mxu2 %v9389_v0  ;;  %v4874_v1 = vpop.f32.mrf.mxu2 }
  0xb2   :  { %v9372_v8 = vld [vmem:[%s15688_s1 + $0x1680] sm:$0xf]  ;;  %v10512_v11 = vld [vmem:[%s15688_s1 + $0x178c] sm:$0xf0]  ;;  %v9245_v14 = vor.u32 %v10448_v7, %v9244_v3  ;;  %5140 = vmatpush.bf16.msrb.mxu3 %v9517_v5 }
  0xb3   :  { %v9500_v10 = vld [vmem:[%s15688_s1 + $0x1780] sm:$0xf]  ;;  %v9373_v15 = vor.u32 %v10480_v9, %v9372_v8  ;;  %v10412_v16 = vld [vmem:[%s15688_s1 + $0x146c] sm:$0xf0]  ;;  %5102 = vmatpush.bf16.msrb.mxu0 %v9117_v12  ;;  %v4887_v9 = vpop.f32.mrf.mxu3 }
  0xb4   :  { %v9100_v13 = vld [vmem:[%s15688_s1 + $0x1460] sm:$0xf]  ;;  %v9501_v19 = vor.u32 %v10512_v11, %v9500_v10  ;;  %v10444_v22 = vld [vmem:[%s15688_s1 + $0x156c] sm:$0xf0]  ;;  %5115 = vmatpush.bf16.msrb.mxu1 %v9245_v14 }
  0xb5   :  { %v9228_v17 = vld [vmem:[%s15688_s1 + $0x1560] sm:$0xf]  ;;  %v10476_v26 = vld [vmem:[%s15688_s1 + $0x166c] sm:$0xf0]  ;;  %v9101_v34 = vor.u32 %v10412_v16, %v9100_v13  ;;  %5128 = vmatpush.bf16.msrb.mxu2 %v9373_v15 }
  0xb6   :  { %v818_v18 = vld [vmem:[%s15690_s2] sm:$0xf]  ;;  %v10508_v32 = vld [vmem:[%s15688_s1 + $0x176c] sm:$0xf0]  ;;  %v9229_v39 = vor.u32 %v10444_v22, %v9228_v17  ;;  %5141 = vmatpush.bf16.msrb.mxu3 %v9501_v19 }
  0xb7   :  { %v9356_v24 = vld [vmem:[%s15688_s1 + $0x1660] sm:$0xf]  ;;  %v820_v36 = vperm.slane %v818_v18, 0  ;;  %v10408_v47 = vld [vmem:[%s15688_s1 + $0x144c] sm:$0xf0]  ;;  %5103 = vmatpush.bf16.msrb.mxu0 %v9101_v34 }
  0xb8   :  { %v9484_v27 = vld [vmem:[%s15688_s1 + $0x1760] sm:$0xf]  ;;  %v9357_v40 = vor.u32 %v10476_v26, %v9356_v24  ;;  %v10440_v51 = vld [vmem:[%s15688_s1 + $0x154c] sm:$0xf0]  ;;  %5116 = vmatpush.bf16.msrb.mxu1 %v9229_v39 }
  0xb9   :  { %v9084_v43 = vld [vmem:[%s15688_s1 + $0x1440] sm:$0xf]  ;;  %v9485_v50 = vor.u32 %v10508_v32, %v9484_v27  ;;  %v10472_v53 = vld [vmem:[%s15688_s1 + $0x164c] sm:$0xf0]  ;;  %v4849_v58 = vadd.f32 %v4848_v56, %v820_v36  ;;  %v32_v36 = vld [vmem:[%s15689_s0 + $0x58] sm:$0xff] }
  0xba   :  { %v9212_v48 = vld [vmem:[%s15688_s1 + $0x1540] sm:$0xf]  ;;  %v10504_v55 = vld [vmem:[%s15688_s1 + $0x174c] sm:$0xf0]  ;;  %v9085_v57 = vor.u32 %v10408_v47, %v9084_v43  ;;  %5129 = vmatpush.bf16.msrb.mxu2 %v9357_v40  ;;  %v9786_v47 = vld [vmem:[%s15688_s1 + $0xe4] sm:$0xf] }
  0xbb   :  { %v9340_v52 = vld [vmem:[%s15688_s1 + $0x1640] sm:$0xf]  ;;  %v9213_v60 = vor.u32 %v10440_v51, %v9212_v48  ;;  %v10404_v63 = vld [vmem:[%s15688_s1 + $0x142c] sm:$0xf0]  ;;  %5142 = vmatpush.bf16.msrb.mxu3 %v9485_v50  ;;  %v4862_v8 = vadd.f32 %v4861_v59, %v4849_v58  ;;  %v4850_v48 = vpop.f32.mrf.mxu0  ;;  %v6606_v51 = vld [vmem:[%s15688_s1 + $0xf0] sm:$0xf0] }
  0xbc   :  { %v9468_v54 = vld [vmem:[%s15688_s1 + $0x1740] sm:$0xf]  ;;  %v9341_v61 = vor.u32 %v10472_v53, %v9340_v52  ;;  %v10436_v3 = vld [vmem:[%s15688_s1 + $0x152c] sm:$0xf0]  ;;  %5104 = vmatpush.bf16.msrb.mxu0 %v9085_v57  ;;  %v9818_v52 = vld [vmem:[%s15688_s1 + $0x1e4] sm:$0xf] }
  0xbd   :  { %v9068_v62 = vld [vmem:[%s15688_s1 + $0x1420] sm:$0xf]  ;;  %v9469_v2 = vor.u32 %v10504_v55, %v9468_v54  ;;  %v10468_v7 = vld [vmem:[%s15688_s1 + $0x162c] sm:$0xf0]  ;;  %v4875_v17 = vadd.f32 %v4874_v1, %v4862_v8  ;;  %5117 = vmatpush.bf16.msrb.mxu1 %v9213_v60  ;;  %v6734_v53 = vld [vmem:[%s15688_s1 + $0x1f0] sm:$0xf0]  ;;  %v4863_v55 = vpop.f32.mrf.mxu1  ;;  %v863_v60 = vunpack.c.l.b16 %v32_v36  ;;  %v864_v1 = vunpack.c.h.b16 %v32_v36 }
  0xbe   :  { %v9196_v0 = vld [vmem:[%s15688_s1 + $0x1520] sm:$0xf]  ;;  %v10500_v11 = vld [vmem:[%s15688_s1 + $0x172c] sm:$0xf0]  ;;  %v9069_v13 = vor.u32 %v10404_v63, %v9068_v62  ;;  %5130 = vmatpush.bf16.msrb.mxu2 %v9341_v61  ;;  %v9850_v58 = vld [vmem:[%s15688_s1 + $0x2e4] sm:$0xf]  ;;  %v4876_v62 = vpop.f32.mrf.mxu2 }
  0xbf   :  { %v9324_v5 = vld [vmem:[%s15688_s1 + $0x1620] sm:$0xf]  ;;  %v10400_v14 = vld [vmem:[%s15688_s1 + $0x140c] sm:$0xf0]  ;;  %v9197_v18 = vor.u32 %v10436_v3, %v9196_v0  ;;  %5143 = vmatpush.bf16.msrb.mxu3 %v9469_v2  ;;  %v11869_v39 = vadd.f32 %v4887_v9, %v4875_v17  ;;  %v6862_v59 = vld [vmem:[%s15688_s1 + $0x2f0] sm:$0xf0]  ;;  %v4889_v2 = vpop.f32.mrf.mxu3  ;;  %v6609_v3 = vor.u32 %v9786_v47, %v6606_v51 }
  0xc0   :  { %v9452_v10 = vld [vmem:[%s15688_s1 + $0x1720] sm:$0xf]  ;;  %v10432_v16 = vld [vmem:[%s15688_s1 + $0x150c] sm:$0xf0]  ;;  %v9325_v19 = vor.u32 %v10468_v7, %v9324_v5  ;;  %5105 = vmatpush.bf16.msrb.mxu0 %v9069_v13  ;;  %v6737_v5 = vor.u32 %v9818_v52, %v6734_v53  ;;  %v9782_v9 = vld [vmem:[%s15688_s1 + $0xc4] sm:$0xf] }
  0xc1   :  { %v9052_v12 = vld [vmem:[%s15688_s1 + $0x1400] sm:$0xf]  ;;  %v10464_v24 = vld [vmem:[%s15688_s1 + $0x160c] sm:$0xf0]  ;;  %v9453_v27 = vor.u32 %v10500_v11, %v9452_v10  ;;  %5118 = vmatpush.bf16.msrb.mxu1 %v9197_v18  ;;  %v6865_v10 = vor.u32 %v9850_v58, %v6862_v59  ;;  %v9814_v13 = vld [vmem:[%s15688_s1 + $0x1c4] sm:$0xf] }
  0xc2   :  { %v9180_v15 = vld [vmem:[%s15688_s1 + $0x1500] sm:$0xf]  ;;  %v31_v26 = vld [vmem:[%s15689_s0 + $0x50] sm:$0xff]  ;;  %v9053_v50 = vor.u32 %v10400_v14, %v9052_v12  ;;  %5131 = vmatpush.bf16.msrb.mxu2 %v9325_v19  ;;  %v9846_v17 = vld [vmem:[%s15688_s1 + $0x2c4] sm:$0xf]  ;;  %v11925_v19 = vpack.c.b16 %v864_v1, %v864_v1 }
  0xc3   :  { %v9308_v22 = vld [vmem:[%s15688_s1 + $0x1600] sm:$0xf]  ;;  %v10496_v34 = vld [vmem:[%s15688_s1 + $0x170c] sm:$0xf0]  ;;  %v861_v54 = vunpack.c.l.b16 %v31_v26  ;;  %v9181_v56 = vor.u32 %v10432_v16, %v9180_v15  ;;  %v862_v61 = vunpack.c.h.b16 %v31_v26  ;;  %5144 = vmatpush.bf16.msrb.mxu3 %v9453_v27  ;;  %v6590_v12 = vld [vmem:[%s15688_s1 + $0xd0] sm:$0xf0]  ;;  %v11915_v15 = vpack.c.b16 %v863_v60, %v863_v60  ;;  %v4900_v2 = vpop.f32.mrf.mxu0 }
  0xc4   :  { %v9436_v32 = vld [vmem:[%s15688_s1 + $0x1700] sm:$0xf]  ;;  %v10540_v43 = vld [vmem:[%s15688_s1 + $0x186c] sm:$0xf0]  ;;  %v9309_v57 = vor.u32 %v10464_v24, %v9308_v22  ;;  %5106 = vmatpush.bf16.msrb.mxu0 %v9053_v50  ;;  %v6718_v14 = vld [vmem:[%s15688_s1 + $0x1d0] sm:$0xf0]  ;;  %v6593_v24 = vor.u32 %v9782_v9, %v6590_v12 }
  0xc5   :  { %v9612_v40 = vld [vmem:[%s15688_s1 + $0x1860] sm:$0xf]  ;;  %v9437_v63 = vor.u32 %v10496_v34, %v9436_v32  ;;  %v10536_v8 = vld [vmem:[%s15688_s1 + $0x184c] sm:$0xf0]  ;;  %v11904_v11 = vpack.c.b16 %v861_v54, %v861_v54  ;;  %5119 = vmatpush.bf16.msrb.mxu1 %v9181_v56  ;;  %v11917_v16 = vpack.c.b16 %v862_v61, %v862_v61  ;;  %v6846_v18 = vld [vmem:[%s15688_s1 + $0x2d0] sm:$0xf0]  ;;  %v6721_v26 = vor.u32 %v9814_v13, %v6718_v14  ;;  %v4913_v12 = vpop.f32.mrf.mxu1 }
  0xc6   :  { %v9613_v0 = vor.u32 %v10540_v43, %v9612_v40  ;;  %v9596_v7 = vld [vmem:[%s15688_s1 + $0x1840] sm:$0xf]  ;;  %5132 = vmatpush.bf16.msrb.mxu2 %v9309_v57  ;;  %v10532_v32 = vld [vmem:[%s15688_s1 + $0x182c] sm:$0xf0]  ;;  %v9778_v34 = vld [vmem:[%s15688_s1 + $0xa4] sm:$0xf]  ;;  %v6849_v36 = vor.u32 %v9846_v17, %v6846_v18 }
  0xc7   :  { %5145 = vmatpush.bf16.msrb.mxu3 %v9437_v63  ;;  %v9597_v22 = vor.u32 %v10536_v8, %v9596_v7  ;;  %v9580_v27 = vld [vmem:[%s15688_s1 + $0x1820] sm:$0xf]  ;;  %5107 = vmatmul.bf16.vlgmr.msrb.gmra.mxu0 %v11904_v11  ;;  %v6574_v40 = vld [vmem:[%s15688_s1 + $0xb0] sm:$0xf0]  ;;  %v9810_v43 = vld [vmem:[%s15688_s1 + $0x1a4] sm:$0xf] }
  0xc8   :  { %5155 = vmatpush.bf16.msra.mxu0 %v9613_v0  ;;  %v6702_v47 = vld [vmem:[%s15688_s1 + $0x1b0] sm:$0xf0]  ;;  %5120 = vmatmul.bf16.vlgmr.msrb.gmra.mxu1 %v11917_v16  ;;  %v9842_v48 = vld [vmem:[%s15688_s1 + $0x2a4] sm:$0xf]  ;;  %v9581_v51 = vor.u32 %v10532_v32, %v9580_v27  ;;  %v9564_v52 = vld [vmem:[%s15688_s1 + $0x1800] sm:$0xf]  ;;  %v6577_v53 = vor.u32 %v9778_v34, %v6574_v40 }
  0xc9   :  { %5164 = vmatpush.bf16.msra.mxu1 %v6609_v3  ;;  %5133 = vmatmul.bf16.vlgmr.msrb.gmra.mxu2 %v11915_v15  ;;  %v6830_v50 = vld [vmem:[%s15688_s1 + $0x2b0] sm:$0xf0]  ;;  %v6705_v54 = vor.u32 %v9810_v43, %v6702_v47  ;;  %v10528_v55 = vld [vmem:[%s15688_s1 + $0x180c] sm:$0xf0]  ;;  %v9774_v56 = vld [vmem:[%s15688_s1 + $0x84] sm:$0xf]  ;;  %v4926_v47 = vpop.f32.mrf.mxu2 }
  0xca   :  { %5177 = vmatpush.bf16.msra.mxu2 %v6737_v5  ;;  %5146 = vmatmul.bf16.vlgmr.msrb.gmra.mxu3 %v11925_v19  ;;  %v6558_v57 = vld [vmem:[%s15688_s1 + $0x90] sm:$0xf0]  ;;  %v6833_v58 = vor.u32 %v9842_v48, %v6830_v50  ;;  %v9806_v59 = vld [vmem:[%s15688_s1 + $0x184] sm:$0xf]  ;;  %v9565_v1 = vor.u32 %v10528_v55, %v9564_v52  ;;  %v33_v3 = vld [vmem:[%s15689_s0 + $0x60] sm:$0xf] }
  0xcb   :  { %5190 = vmatpush.bf16.msra.mxu3 %v6865_v10  ;;  %v6686_v60 = vld [vmem:[%s15688_s1 + $0x190] sm:$0xf0]  ;;  %v9838_v61 = vld [vmem:[%s15688_s1 + $0x284] sm:$0xf]  ;;  %v6561_v5 = vor.u32 %v9774_v56, %v6558_v57  ;;  %v4901_v10 = vadd.f32 %v4900_v2, %v11869_v39  ;;  %v865_v27 = vunpack.c.l.b16 %v33_v3 }
  0xcc   :  { %5156 = vmatpush.bf16.msra.mxu0 %v9597_v22  ;;  %v6814_v62 = vld [vmem:[%s15688_s1 + $0x290] sm:$0xf0]  ;;  %v9882_v63 = vld [vmem:[%s15688_s1 + $0x3e4] sm:$0xf]  ;;  %v6689_v7 = vor.u32 %v9806_v59, %v6686_v60  ;;  %v4939_v55 = vpop.f32.mrf.mxu3 }
  0xcd   :  { %5165 = vmatpush.bf16.msra.mxu1 %v6593_v24  ;;  %v6990_v0 = vld [vmem:[%s15688_s1 + $0x3f0] sm:$0xf0]  ;;  %v9770_v8 = vld [vmem:[%s15688_s1 + $0x64] sm:$0xf]  ;;  %v6817_v13 = vor.u32 %v9838_v61, %v6814_v62  ;;  %v4914_v32 = vadd.f32 %v4913_v12, %v4901_v10  ;;  %v12028_v56 = vpack.c.b16 %v865_v27, %v865_v27  ;;  %v4902_v61 = vpop.f32.mrf.mxu0  ;;  %v4915_v2 = vpop.f32.mrf.mxu1 }
  0xce   :  { %5178 = vmatpush.bf16.msra.mxu2 %v6721_v26  ;;  %v6542_v9 = vld [vmem:[%s15688_s1 + $0x70] sm:$0xf0]  ;;  %v6993_v14 = vor.u32 %v9882_v63, %v6990_v0  ;;  %v9802_v17 = vld [vmem:[%s15688_s1 + $0x164] sm:$0xf] }
  0xcf   :  { %5191 = vmatpush.bf16.msra.mxu3 %v6849_v36  ;;  %v6670_v18 = vld [vmem:[%s15688_s1 + $0x170] sm:$0xf0]  ;;  %v9834_v22 = vld [vmem:[%s15688_s1 + $0x264] sm:$0xf]  ;;  %v6545_v34 = vor.u32 %v9770_v8, %v6542_v9 }
  0xd0   :  { %5157 = vmatpush.bf16.msra.mxu0 %v9581_v51  ;;  %v6798_v39 = vld [vmem:[%s15688_s1 + $0x270] sm:$0xf0]  ;;  %v9878_v24 = vld [vmem:[%s15688_s1 + $0x3c4] sm:$0xf]  ;;  %v6673_v36 = vor.u32 %v9802_v17, %v6670_v18 }
  0xd1   :  { %5166 = vmatpush.bf16.msra.mxu1 %v6577_v53  ;;  %v6974_v26 = vld [vmem:[%s15688_s1 + $0x3d0] sm:$0xf0]  ;;  %v9766_v40 = vld [vmem:[%s15688_s1 + $0x44] sm:$0xf]  ;;  %v6801_v48 = vor.u32 %v9834_v22, %v6798_v39 }
  0xd2   :  { %5179 = vmatpush.bf16.msra.mxu2 %v6705_v54  ;;  %v6526_v43 = vld [vmem:[%s15688_s1 + $0x50] sm:$0xf0]  ;;  %v6977_v50 = vor.u32 %v9878_v24, %v6974_v26  ;;  %v9798_v51 = vld [vmem:[%s15688_s1 + $0x144] sm:$0xf]  ;;  %v4927_v54 = vadd.f32 %v4926_v47, %v4914_v32  ;;  %v4928_v24 = vpop.f32.mrf.mxu2 }
  0xd3   :  { %5192 = vmatpush.bf16.msra.mxu3 %v6833_v58  ;;  %v6654_v52 = vld [vmem:[%s15688_s1 + $0x150] sm:$0xf0]  ;;  %v9830_v53 = vld [vmem:[%s15688_s1 + $0x244] sm:$0xf]  ;;  %v6529_v62 = vor.u32 %v9766_v40, %v6526_v43 }
  0xd4   :  { %5158 = vmatpush.bf16.msra.mxu0 %v9565_v1  ;;  %v6782_v57 = vld [vmem:[%s15688_s1 + $0x250] sm:$0xf0]  ;;  %v9874_v58 = vld [vmem:[%s15688_s1 + $0x3a4] sm:$0xf]  ;;  %v12039_v60 = vadd.f32 %v4939_v55, %v4927_v54  ;;  %v6657_v63 = vor.u32 %v9798_v51, %v6654_v52  ;;  %v4941_v40 = vpop.f32.mrf.mxu3 }
  0xd5   :  { %5167 = vmatpush.bf16.msra.mxu1 %v6561_v5  ;;  %v6958_v59 = vld [vmem:[%s15688_s1 + $0x3b0] sm:$0xf0]  ;;  %v9762_v0 = vld [vmem:[%s15688_s1 + $0x24] sm:$0xf]  ;;  %v6785_v3 = vor.u32 %v9830_v53, %v6782_v57 }
  0xd6   :  { %5180 = vmatpush.bf16.msra.mxu2 %v6689_v7  ;;  %v6510_v1 = vld [vmem:[%s15688_s1 + $0x30] sm:$0xf0]  ;;  %v6961_v5 = vor.u32 %v9874_v58, %v6958_v59  ;;  %v9794_v7 = vld [vmem:[%s15688_s1 + $0x124] sm:$0xf] }
  0xd7   :  { %5193 = vmatpush.bf16.msra.mxu3 %v6817_v13  ;;  %v6638_v8 = vld [vmem:[%s15688_s1 + $0x130] sm:$0xf0]  ;;  %v9826_v9 = vld [vmem:[%s15688_s1 + $0x224] sm:$0xf]  ;;  %9626 = vmatmul.msk.bf16.vlgmr.msra.gmra.mxu0 %vm4835_vm0, %v12028_v56 }
  0xd8   :  { %5203 = vmatpush.bf16.msrb.mxu0 %v6993_v14  ;;  %v6766_v10 = vld [vmem:[%s15688_s1 + $0x230] sm:$0xf0]  ;;  %v9870_v12 = vld [vmem:[%s15688_s1 + $0x384] sm:$0xf]  ;;  %v6513_v14 = vor.u32 %v9762_v0, %v6510_v1  ;;  %v6641_v17 = vor.u32 %v9794_v7, %v6638_v8 }
  0xd9   :  { %5168 = vmatpush.bf16.msra.mxu1 %v6545_v34  ;;  %v6942_v13 = vld [vmem:[%s15688_s1 + $0x390] sm:$0xf0]  ;;  %v9758_v18 = vld [vmem:[%s15688_s1 + $0x4] sm:$0xf]  ;;  %v6769_v26 = vor.u32 %v9826_v9, %v6766_v10 }
  0xda   :  { %5181 = vmatpush.bf16.msra.mxu2 %v6673_v36  ;;  %v6494_v22 = vld [vmem:[%s15688_s1 + $0x10] sm:$0xf0]  ;;  %v9790_v39 = vld [vmem:[%s15688_s1 + $0x104] sm:$0xf]  ;;  %v6945_v27 = vor.u32 %v9870_v12, %v6942_v13 }
  0xdb   :  { %5194 = vmatpush.bf16.msra.mxu3 %v6801_v48  ;;  %v6622_v32 = vld [vmem:[%s15688_s1 + $0x110] sm:$0xf0]  ;;  %v9822_v34 = vld [vmem:[%s15688_s1 + $0x204] sm:$0xf]  ;;  %v6497_v53 = vor.u32 %v9758_v18, %v6494_v22 }
  0xdc   :  { %5204 = vmatpush.bf16.msrb.mxu0 %v6977_v50  ;;  %v6750_v36 = vld [vmem:[%s15688_s1 + $0x210] sm:$0xf0]  ;;  %v9866_v43 = vld [vmem:[%s15688_s1 + $0x364] sm:$0xf]  ;;  %v6625_v54 = vor.u32 %v9790_v39, %v6622_v32 }
  0xdd   :  { %5169 = vmatpush.bf16.msra.mxu1 %v6529_v62  ;;  %v6926_v47 = vld [vmem:[%s15688_s1 + $0x370] sm:$0xf0]  ;;  %v9914_v48 = vld [vmem:[%s15688_s1 + $0x4e4] sm:$0xf]  ;;  %v6753_v58 = vor.u32 %v9822_v34, %v6750_v36 }
  0xde   :  { %5182 = vmatpush.bf16.msra.mxu2 %v6657_v63  ;;  %v7118_v50 = vld [vmem:[%s15688_s1 + $0x4f0] sm:$0xf0]  ;;  %v9946_v51 = vld [vmem:[%s15688_s1 + $0x5e4] sm:$0xf]  ;;  %v6929_v59 = vor.u32 %v9866_v43, %v6926_v47 }
  0xdf   :  { %5195 = vmatpush.bf16.msra.mxu3 %v6785_v3  ;;  %v7246_v52 = vld [vmem:[%s15688_s1 + $0x5f0] sm:$0xf0]  ;;  %v9978_v55 = vld [vmem:[%s15688_s1 + $0x6e4] sm:$0xf]  ;;  %v7121_v61 = vor.u32 %v9914_v48, %v7118_v50 }
  0xe0   :  { %5205 = vmatpush.bf16.msrb.mxu0 %v6961_v5  ;;  %v7374_v57 = vld [vmem:[%s15688_s1 + $0x6f0] sm:$0xf0]  ;;  %v7249_v62 = vor.u32 %v9946_v51, %v7246_v52  ;;  %v9862_v63 = vld [vmem:[%s15688_s1 + $0x344] sm:$0xf] }
  0xe1   :  { %5170 = vmatpush.bf16.msra.mxu1 %v6513_v14  ;;  %v6910_v0 = vld [vmem:[%s15688_s1 + $0x350] sm:$0xf0]  ;;  %v9910_v1 = vld [vmem:[%s15688_s1 + $0x4c4] sm:$0xf]  ;;  %v7377_v2 = vor.u32 %v9978_v55, %v7374_v57 }
  0xe2   :  { %5183 = vmatpush.bf16.msra.mxu2 %v6641_v17  ;;  %v7102_v3 = vld [vmem:[%s15688_s1 + $0x4d0] sm:$0xf0]  ;;  %v9942_v5 = vld [vmem:[%s15688_s1 + $0x5c4] sm:$0xf]  ;;  %v6913_v10 = vor.u32 %v9862_v63, %v6910_v0 }
  0xe3   :  { %5196 = vmatpush.bf16.msra.mxu3 %v6769_v26  ;;  %v7230_v7 = vld [vmem:[%s15688_s1 + $0x5d0] sm:$0xf0]  ;;  %v9974_v8 = vld [vmem:[%s15688_s1 + $0x6c4] sm:$0xf]  ;;  %v7105_v12 = vor.u32 %v9910_v1, %v7102_v3 }
  0xe4   :  { %5206 = vmatpush.bf16.msrb.mxu0 %v6945_v27  ;;  %v7358_v9 = vld [vmem:[%s15688_s1 + $0x6d0] sm:$0xf0]  ;;  %v7233_v13 = vor.u32 %v9942_v5, %v7230_v7  ;;  %v9858_v14 = vld [vmem:[%s15688_s1 + $0x324] sm:$0xf]  ;;  %v4952_v55 = vpop.f32.mrf.mxu0 }
  0xe5   :  { %5171 = vmatpush.bf16.msra.mxu1 %v6497_v53  ;;  %v6894_v17 = vld [vmem:[%s15688_s1 + $0x330] sm:$0xf0]  ;;  %v9906_v18 = vld [vmem:[%s15688_s1 + $0x4a4] sm:$0xf]  ;;  %v7361_v22 = vor.u32 %v9974_v8, %v7358_v9  ;;  %v4965_v63 = vpop.f32.mrf.mxu1 }
  0xe6   :  { %5184 = vmatpush.bf16.msra.mxu2 %v6625_v54  ;;  %v7086_v39 = vld [vmem:[%s15688_s1 + $0x4b0] sm:$0xf0]  ;;  %v9938_v24 = vld [vmem:[%s15688_s1 + $0x5a4] sm:$0xf]  ;;  %v6897_v34 = vor.u32 %v9858_v14, %v6894_v17 }
  0xe7   :  { %5197 = vmatpush.bf16.msra.mxu3 %v6753_v58  ;;  %v7214_v26 = vld [vmem:[%s15688_s1 + $0x5b0] sm:$0xf0]  ;;  %v9970_v27 = vld [vmem:[%s15688_s1 + $0x6a4] sm:$0xf]  ;;  %v7089_v40 = vor.u32 %v9906_v18, %v7086_v39 }
  0xe8   :  { %5207 = vmatpush.bf16.msrb.mxu0 %v6929_v59  ;;  %v7342_v32 = vld [vmem:[%s15688_s1 + $0x6b0] sm:$0xf0]  ;;  %5172 = vmatmul.bf16.vlgmr.msra.gmra.mxu1 %v10917_v20  ;;  %v9854_v36 = vld [vmem:[%s15688_s1 + $0x304] sm:$0xf]  ;;  %v7217_v43 = vor.u32 %v9938_v24, %v7214_v26 }
  0xe9   :  { %5216 = vmatpush.bf16.msrb.mxu1 %v7121_v61  ;;  %5185 = vmatmul.bf16.vlgmr.msra.gmra.mxu2 %v10920_v21  ;;  %v6878_v47 = vld [vmem:[%s15688_s1 + $0x310] sm:$0xf0]  ;;  %v9902_v48 = vld [vmem:[%s15688_s1 + $0x484] sm:$0xf]  ;;  %v7345_v51 = vor.u32 %v9970_v27, %v7342_v32  ;;  %v4953_v61 = vadd.f32 %v4952_v55, %v12039_v60  ;;  %v4978_v26 = vpop.f32.mrf.mxu2 }
  0xea   :  { %5229 = vmatpush.bf16.msrb.mxu2 %v7249_v62  ;;  %5198 = vmatmul.bf16.vlgmr.msra.gmra.mxu3 %v10885_v4  ;;  %v7070_v50 = vld [vmem:[%s15688_s1 + $0x490] sm:$0xf0]  ;;  %v9934_v52 = vld [vmem:[%s15688_s1 + $0x584] sm:$0xf]  ;;  %v6881_v62 = vor.u32 %v9854_v36, %v6878_v47 }
  0xeb   :  { %5242 = vmatpush.bf16.msrb.mxu3 %v7377_v2  ;;  %v7198_v53 = vld [vmem:[%s15688_s1 + $0x590] sm:$0xf0]  ;;  %v9966_v54 = vld [vmem:[%s15688_s1 + $0x684] sm:$0xf]  ;;  %v7073_v0 = vor.u32 %v9902_v48, %v7070_v50  ;;  %v4966_v7 = vadd.f32 %v4965_v63, %v4953_v61 }
  0xec   :  { %5208 = vmatpush.bf16.msrb.mxu0 %v6913_v10  ;;  %v7326_v57 = vld [vmem:[%s15688_s1 + $0x690] sm:$0xf0]  ;;  %v10010_v58 = vld [vmem:[%s15688_s1 + $0x7e4] sm:$0xf]  ;;  %v7201_v1 = vor.u32 %v9934_v52, %v7198_v53 }
  0xed   :  { %5217 = vmatpush.bf16.msrb.mxu1 %v7105_v12  ;;  %v7502_v59 = vld [vmem:[%s15688_s1 + $0x7f0] sm:$0xf0]  ;;  %v9898_v2 = vld [vmem:[%s15688_s1 + $0x464] sm:$0xf]  ;;  %v7329_v5 = vor.u32 %v9966_v54, %v7326_v57  ;;  %v4967_v52 = vpop.f32.mrf.mxu1 }
  0xee   :  { %5230 = vmatpush.bf16.msrb.mxu2 %v7233_v13  ;;  %v7054_v3 = vld [vmem:[%s15688_s1 + $0x470] sm:$0xf0]  ;;  %v7505_v8 = vor.u32 %v10010_v58, %v7502_v59  ;;  %v9930_v60 = vld [vmem:[%s15688_s1 + $0x564] sm:$0xf] }
  0xef   :  { %5243 = vmatpush.bf16.msrb.mxu3 %v7361_v22  ;;  %v7182_v9 = vld [vmem:[%s15688_s1 + $0x570] sm:$0xf0]  ;;  %v9962_v10 = vld [vmem:[%s15688_s1 + $0x664] sm:$0xf]  ;;  %v7057_v17 = vor.u32 %v9898_v2, %v7054_v3 }
  0xf0   :  { %5209 = vmatpush.bf16.msrb.mxu0 %v6897_v34  ;;  %v7310_v12 = vld [vmem:[%s15688_s1 + $0x670] sm:$0xf0]  ;;  %v10006_v13 = vld [vmem:[%s15688_s1 + $0x7c4] sm:$0xf]  ;;  %v7185_v18 = vor.u32 %v9930_v60, %v7182_v9 }
  0xf1   :  { %5218 = vmatpush.bf16.msrb.mxu1 %v7089_v40  ;;  %v7486_v14 = vld [vmem:[%s15688_s1 + $0x7d0] sm:$0xf0]  ;;  %v9894_v22 = vld [vmem:[%s15688_s1 + $0x444] sm:$0xf]  ;;  %v7313_v24 = vor.u32 %v9962_v10, %v7310_v12  ;;  %v4979_v40 = vadd.f32 %v4978_v26, %v4966_v7 }
  0xf2   :  { %5231 = vmatpush.bf16.msrb.mxu2 %v7217_v43  ;;  %v7038_v39 = vld [vmem:[%s15688_s1 + $0x450] sm:$0xf0]  ;;  %v7489_v27 = vor.u32 %v10006_v13, %v7486_v14  ;;  %v9926_v32 = vld [vmem:[%s15688_s1 + $0x544] sm:$0xf]  ;;  %v4991_v43 = vpop.f32.mrf.mxu3 }
  0xf3   :  { %5244 = vmatpush.bf16.msrb.mxu3 %v7345_v51  ;;  %v7166_v34 = vld [vmem:[%s15688_s1 + $0x550] sm:$0xf0]  ;;  %v9958_v36 = vld [vmem:[%s15688_s1 + $0x644] sm:$0xf]  ;;  %v4954_v51 = vpop.f32.mrf.mxu0  ;;  %v12240_v53 = vadd.f32 %v4991_v43, %v4979_v40  ;;  %v7041_v54 = vor.u32 %v9894_v22, %v7038_v39 }
  0xf4   :  { %5210 = vmatpush.bf16.msrb.mxu0 %v6881_v62  ;;  %v7294_v47 = vld [vmem:[%s15688_s1 + $0x650] sm:$0xf0]  ;;  %v10002_v48 = vld [vmem:[%s15688_s1 + $0x7a4] sm:$0xf]  ;;  %v7169_v55 = vor.u32 %v9926_v32, %v7166_v34 }
  0xf5   :  { %5219 = vmatpush.bf16.msrb.mxu1 %v7073_v0  ;;  %v7470_v50 = vld [vmem:[%s15688_s1 + $0x7b0] sm:$0xf0]  ;;  %v9890_v57 = vld [vmem:[%s15688_s1 + $0x424] sm:$0xf]  ;;  %v7297_v59 = vor.u32 %v9958_v36, %v7294_v47 }
  0xf6   :  { %5232 = vmatpush.bf16.msrb.mxu2 %v7201_v1  ;;  %v7022_v58 = vld [vmem:[%s15688_s1 + $0x430] sm:$0xf0]  ;;  %v7473_v61 = vor.u32 %v10002_v48, %v7470_v50  ;;  %v9922_v62 = vld [vmem:[%s15688_s1 + $0x524] sm:$0xf] }
  0xf7   :  { %5245 = vmatpush.bf16.msrb.mxu3 %v7329_v5  ;;  %5211 = vmatmul.bf16.vlgmr.msrb.gmra.mxu0 %v10890_v6  ;;  %v7150_v63 = vld [vmem:[%s15688_s1 + $0x530] sm:$0xf0]  ;;  %v9954_v0 = vld [vmem:[%s15688_s1 + $0x624] sm:$0xf]  ;;  %v7025_v5 = vor.u32 %v9890_v57, %v7022_v58 }
  0xf8   :  { %5255 = vmatpush.bf16.msra.mxu0 %v7505_v8  ;;  %v7278_v1 = vld [vmem:[%s15688_s1 + $0x630] sm:$0xf0]  ;;  %v9998_v2 = vld [vmem:[%s15688_s1 + $0x784] sm:$0xf]  ;;  %v7153_v7 = vor.u32 %v9922_v62, %v7150_v63 }
  0xf9   :  { %5220 = vmatpush.bf16.msrb.mxu1 %v7057_v17  ;;  %v7454_v3 = vld [vmem:[%s15688_s1 + $0x790] sm:$0xf0]  ;;  %v9886_v8 = vld [vmem:[%s15688_s1 + $0x404] sm:$0xf]  ;;  %v7281_v10 = vor.u32 %v9954_v0, %v7278_v1 }
  0xfa   :  { %5233 = vmatpush.bf16.msrb.mxu2 %v7185_v18  ;;  %v7006_v60 = vld [vmem:[%s15688_s1 + $0x410] sm:$0xf0]  ;;  %v9918_v9 = vld [vmem:[%s15688_s1 + $0x504] sm:$0xf]  ;;  %v7457_v12 = vor.u32 %v9998_v2, %v7454_v3  ;;  %v4980_v18 = vpop.f32.mrf.mxu2  ;;  %v4993_v26 = vpop.f32.mrf.mxu3 }
  0xfb   :  { %5246 = vmatpush.bf16.msrb.mxu3 %v7313_v24  ;;  %v7134_v13 = vld [vmem:[%s15688_s1 + $0x510] sm:$0xf0]  ;;  %v9950_v14 = vld [vmem:[%s15688_s1 + $0x604] sm:$0xf]  ;;  %v7009_v36 = vor.u32 %v9886_v8, %v7006_v60 }
  0xfc   :  { %5256 = vmatpush.bf16.msra.mxu0 %v7489_v27  ;;  %v7262_v17 = vld [vmem:[%s15688_s1 + $0x610] sm:$0xf0]  ;;  %v9994_v22 = vld [vmem:[%s15688_s1 + $0x764] sm:$0xf]  ;;  %v7137_v40 = vor.u32 %v9918_v9, %v7134_v13 }
  0xfd   :  { %5221 = vmatpush.bf16.msrb.mxu1 %v7041_v54  ;;  %v7438_v39 = vld [vmem:[%s15688_s1 + $0x770] sm:$0xf0]  ;;  %v10042_v24 = vld [vmem:[%s15688_s1 + $0x8e4] sm:$0xf]  ;;  %v7265_v48 = vor.u32 %v9950_v14, %v7262_v17 }
  0xfe   :  { %5234 = vmatpush.bf16.msrb.mxu2 %v7169_v55  ;;  %v7630_v27 = vld [vmem:[%s15688_s1 + $0x8f0] sm:$0xf0]  ;;  %v10074_v32 = vld [vmem:[%s15688_s1 + $0x9e4] sm:$0xf]  ;;  %v7441_v50 = vor.u32 %v9994_v22, %v7438_v39 }
  0xff   :  { %5247 = vmatpush.bf16.msrb.mxu3 %v7297_v59  ;;  %v7758_v34 = vld [vmem:[%s15688_s1 + $0x9f0] sm:$0xf0]  ;;  %v10106_v43 = vld [vmem:[%s15688_s1 + $0xae4] sm:$0xf]  ;;  %v7633_v51 = vor.u32 %v10042_v24, %v7630_v27 }
 0x100   :  { %5257 = vmatpush.bf16.msra.mxu0 %v7473_v61  ;;  %v7886_v47 = vld [vmem:[%s15688_s1 + $0xaf0] sm:$0xf0]  ;;  %v7761_v52 = vor.u32 %v10074_v32, %v7758_v34  ;;  %v9990_v54 = vld [vmem:[%s15688_s1 + $0x744] sm:$0xf] }
 0x101   :  { %5222 = vmatpush.bf16.msrb.mxu1 %v7025_v5  ;;  %v7422_v55 = vld [vmem:[%s15688_s1 + $0x750] sm:$0xf0]  ;;  %v10038_v57 = vld [vmem:[%s15688_s1 + $0x8c4] sm:$0xf]  ;;  %v7889_v58 = vor.u32 %v10106_v43, %v7886_v47 }
 0x102   :  { %5235 = vmatpush.bf16.msrb.mxu2 %v7153_v7  ;;  %v7614_v59 = vld [vmem:[%s15688_s1 + $0x8d0] sm:$0xf0]  ;;  %v10070_v61 = vld [vmem:[%s15688_s1 + $0x9c4] sm:$0xf]  ;;  %v7425_v1 = vor.u32 %v9990_v54, %v7422_v55 }
 0x103   :  { %5248 = vmatpush.bf16.msrb.mxu3 %v7281_v10  ;;  %v7742_v62 = vld [vmem:[%s15688_s1 + $0x9d0] sm:$0xf0]  ;;  %v10102_v63 = vld [vmem:[%s15688_s1 + $0xac4] sm:$0xf]  ;;  %v7617_v2 = vor.u32 %v10038_v57, %v7614_v59  ;;  %v5017_v54 = vpop.f32.mrf.mxu1 }
 0x104   :  { %5258 = vmatpush.bf16.msra.mxu0 %v7457_v12  ;;  %v7870_v0 = vld [vmem:[%s15688_s1 + $0xad0] sm:$0xf0]  ;;  %v7745_v3 = vor.u32 %v10070_v61, %v7742_v62  ;;  %v9986_v5 = vld [vmem:[%s15688_s1 + $0x724] sm:$0xf]  ;;  %v5004_v43 = vpop.f32.mrf.mxu0 }
 0x105   :  { %5223 = vmatpush.bf16.msrb.mxu1 %v7009_v36  ;;  %v7406_v7 = vld [vmem:[%s15688_s1 + $0x730] sm:$0xf0]  ;;  %v10034_v8 = vld [vmem:[%s15688_s1 + $0x8a4] sm:$0xf]  ;;  %v7873_v60 = vor.u32 %v10102_v63, %v7870_v0 }
 0x106   :  { %5236 = vmatpush.bf16.msrb.mxu2 %v7137_v40  ;;  %v7598_v9 = vld [vmem:[%s15688_s1 + $0x8b0] sm:$0xf0]  ;;  %v10066_v10 = vld [vmem:[%s15688_s1 + $0x9a4] sm:$0xf]  ;;  %v7409_v17 = vor.u32 %v9986_v5, %v7406_v7 }
 0x107   :  { %5249 = vmatpush.bf16.msrb.mxu3 %v7265_v48  ;;  %v7726_v12 = vld [vmem:[%s15688_s1 + $0x9b0] sm:$0xf0]  ;;  %v10098_v13 = vld [vmem:[%s15688_s1 + $0xaa4] sm:$0xf]  ;;  %v7601_v22 = vor.u32 %v10034_v8, %v7598_v9 }
 0x108   :  { %5259 = vmatpush.bf16.msra.mxu0 %v7441_v50  ;;  %v7854_v14 = vld [vmem:[%s15688_s1 + $0xab0] sm:$0xf0]  ;;  %5224 = vmatmul.bf16.vlgmr.msrb.gmra.mxu1 %v11076_v41  ;;  %v9982_v18 = vld [vmem:[%s15688_s1 + $0x704] sm:$0xf]  ;;  %v7729_v39 = vor.u32 %v10066_v10, %v7726_v12 }
 0x109   :  { %5268 = vmatpush.bf16.msra.mxu1 %v7633_v51  ;;  %5237 = vmatmul.bf16.vlgmr.msrb.gmra.mxu2 %v11080_v44  ;;  %v7390_v24 = vld [vmem:[%s15688_s1 + $0x710] sm:$0xf0]  ;;  %v10030_v26 = vld [vmem:[%s15688_s1 + $0x884] sm:$0xf]  ;;  %v7857_v32 = vor.u32 %v10098_v13, %v7854_v14  ;;  %v5005_v51 = vadd.f32 %v5004_v43, %v12240_v53 }
 0x10a   :  { %5281 = vmatpush.bf16.msra.mxu2 %v7761_v52  ;;  %5250 = vmatmul.bf16.vlgmr.msrb.gmra.mxu3 %v11068_v38  ;;  %v7582_v27 = vld [vmem:[%s15688_s1 + $0x890] sm:$0xf0]  ;;  %v10062_v34 = vld [vmem:[%s15688_s1 + $0x984] sm:$0xf]  ;;  %v7393_v52 = vor.u32 %v9982_v18, %v7390_v24 }
 0x10b   :  { %5294 = vmatpush.bf16.msra.mxu3 %v7889_v58  ;;  %v7710_v36 = vld [vmem:[%s15688_s1 + $0x990] sm:$0xf0]  ;;  %v10094_v40 = vld [vmem:[%s15688_s1 + $0xa84] sm:$0xf]  ;;  %v7585_v55 = vor.u32 %v10030_v26, %v7582_v27  ;;  %v5018_v62 = vadd.f32 %v5017_v54, %v5005_v51 }
 0x10c   :  { %5260 = vmatpush.bf16.msra.mxu0 %v7425_v1  ;;  %v7838_v47 = vld [vmem:[%s15688_s1 + $0xa90] sm:$0xf0]  ;;  %v10138_v48 = vld [vmem:[%s15688_s1 + $0xbe4] sm:$0xf]  ;;  %v7713_v57 = vor.u32 %v10062_v34, %v7710_v36  ;;  %v5030_v12 = vpop.f32.mrf.mxu2  ;;  %v5019_v34 = vpop.f32.mrf.mxu1 }
 0x10d   :  { %5269 = vmatpush.bf16.msra.mxu1 %v7617_v2  ;;  %v8014_v50 = vld [vmem:[%s15688_s1 + $0xbf0] sm:$0xf0]  ;;  %v10026_v58 = vld [vmem:[%s15688_s1 + $0x864] sm:$0xf]  ;;  %v7841_v61 = vor.u32 %v10094_v40, %v7838_v47 }
 0x10e   :  { %5282 = vmatpush.bf16.msra.mxu2 %v7745_v3  ;;  %v7566_v59 = vld [vmem:[%s15688_s1 + $0x870] sm:$0xf0]  ;;  %v8017_v63 = vor.u32 %v10138_v48, %v8014_v50  ;;  %v10058_v53 = vld [vmem:[%s15688_s1 + $0x964] sm:$0xf] }
 0x10f   :  { %5295 = vmatpush.bf16.msra.mxu3 %v7873_v60  ;;  %v7694_v0 = vld [vmem:[%s15688_s1 + $0x970] sm:$0xf0]  ;;  %v10090_v1 = vld [vmem:[%s15688_s1 + $0xa64] sm:$0xf]  ;;  %v7569_v7 = vor.u32 %v10026_v58, %v7566_v59 }
 0x110   :  { %5261 = vmatpush.bf16.msra.mxu0 %v7409_v17  ;;  %v7822_v2 = vld [vmem:[%s15688_s1 + $0xa70] sm:$0xf0]  ;;  %v10134_v3 = vld [vmem:[%s15688_s1 + $0xbc4] sm:$0xf]  ;;  %v7697_v8 = vor.u32 %v10058_v53, %v7694_v0 }
 0x111   :  { %5270 = vmatpush.bf16.msra.mxu1 %v7601_v22  ;;  %v7998_v5 = vld [vmem:[%s15688_s1 + $0xbd0] sm:$0xf0]  ;;  %v10022_v60 = vld [vmem:[%s15688_s1 + $0x844] sm:$0xf]  ;;  %v7825_v10 = vor.u32 %v10090_v1, %v7822_v2  ;;  %v5031_v22 = vadd.f32 %v5030_v12, %v5018_v62 }
 0x112   :  { %5283 = vmatpush.bf16.msra.mxu2 %v7729_v39  ;;  %v7550_v9 = vld [vmem:[%s15688_s1 + $0x850] sm:$0xf0]  ;;  %v8001_v13 = vor.u32 %v10134_v3, %v7998_v5  ;;  %v10054_v14 = vld [vmem:[%s15688_s1 + $0x944] sm:$0xf]  ;;  %v5043_v39 = vpop.f32.mrf.mxu3 }
 0x113   :  { %5296 = vmatpush.bf16.msra.mxu3 %v7857_v32  ;;  %v7678_v17 = vld [vmem:[%s15688_s1 + $0x950] sm:$0xf0]  ;;  %v10086_v18 = vld [vmem:[%s15688_s1 + $0xa44] sm:$0xf]  ;;  %v5006_v32 = vpop.f32.mrf.mxu0  ;;  %v12439_v36 = vadd.f32 %v5043_v39, %v5031_v22  ;;  %v7553_v40 = vor.u32 %v10022_v60, %v7550_v9 }
 0x114   :  { %5262 = vmatpush.bf16.msra.mxu0 %v7393_v52  ;;  %v7806_v24 = vld [vmem:[%s15688_s1 + $0xa50] sm:$0xf0]  ;;  %v10130_v26 = vld [vmem:[%s15688_s1 + $0xba4] sm:$0xf]  ;;  %v7681_v43 = vor.u32 %v10054_v14, %v7678_v17 }
 0x115   :  { %5271 = vmatpush.bf16.msra.mxu1 %v7585_v55  ;;  %v7982_v27 = vld [vmem:[%s15688_s1 + $0xbb0] sm:$0xf0]  ;;  %v10018_v47 = vld [vmem:[%s15688_s1 + $0x824] sm:$0xf]  ;;  %v7809_v50 = vor.u32 %v10086_v18, %v7806_v24 }
 0x116   :  { %5284 = vmatpush.bf16.msra.mxu2 %v7713_v57  ;;  %v7534_v48 = vld [vmem:[%s15688_s1 + $0x830] sm:$0xf0]  ;;  %v7985_v51 = vor.u32 %v10130_v26, %v7982_v27  ;;  %v10050_v52 = vld [vmem:[%s15688_s1 + $0x924] sm:$0xf] }
 0x117   :  { %5297 = vmatpush.bf16.msra.mxu3 %v7841_v61  ;;  %5263 = vmatmul.bf16.vlgmr.msra.gmra.mxu0 %v11078_v42  ;;  %v7662_v54 = vld [vmem:[%s15688_s1 + $0x930] sm:$0xf0]  ;;  %v10082_v55 = vld [vmem:[%s15688_s1 + $0xa24] sm:$0xf]  ;;  %v7537_v61 = vor.u32 %v10018_v47, %v7534_v48 }
 0x118   :  { %5307 = vmatpush.bf16.msrb.mxu0 %v8017_v63  ;;  %v7790_v57 = vld [vmem:[%s15688_s1 + $0xa30] sm:$0xf0]  ;;  %v10126_v58 = vld [vmem:[%s15688_s1 + $0xb84] sm:$0xf]  ;;  %v7665_v62 = vor.u32 %v10050_v52, %v7662_v54 }
 0x119   :  { %5272 = vmatpush.bf16.msra.mxu1 %v7569_v7  ;;  %v7966_v59 = vld [vmem:[%s15688_s1 + $0xb90] sm:$0xf0]  ;;  %v10014_v63 = vld [vmem:[%s15688_s1 + $0x804] sm:$0xf]  ;;  %v7793_v1 = vor.u32 %v10082_v55, %v7790_v57 }
 0x11a   :  { %5285 = vmatpush.bf16.msra.mxu2 %v7697_v8  ;;  %v7518_v53 = vld [vmem:[%s15688_s1 + $0x810] sm:$0xf0]  ;;  %v10046_v0 = vld [vmem:[%s15688_s1 + $0x904] sm:$0xf]  ;;  %v7969_v2 = vor.u32 %v10126_v58, %v7966_v59  ;;  %v5032_v8 = vpop.f32.mrf.mxu2  ;;  %v5045_v12 = vpop.f32.mrf.mxu3 }
 0x11b   :  { %5298 = vmatpush.bf16.msra.mxu3 %v7825_v10  ;;  %v7646_v3 = vld [vmem:[%s15688_s1 + $0x910] sm:$0xf0]  ;;  %v10078_v5 = vld [vmem:[%s15688_s1 + $0xa04] sm:$0xf]  ;;  %v7521_v18 = vor.u32 %v10014_v63, %v7518_v53 }
 0x11c   :  { %5308 = vmatpush.bf16.msrb.mxu0 %v8001_v13  ;;  %v7774_v7 = vld [vmem:[%s15688_s1 + $0xa10] sm:$0xf0]  ;;  %v10122_v60 = vld [vmem:[%s15688_s1 + $0xb64] sm:$0xf]  ;;  %v7649_v22 = vor.u32 %v10046_v0, %v7646_v3 }
 0x11d   :  { %5273 = vmatpush.bf16.msra.mxu1 %v7553_v40  ;;  %v7950_v9 = vld [vmem:[%s15688_s1 + $0xb70] sm:$0xf0]  ;;  %v10170_v10 = vld [vmem:[%s15688_s1 + $0xce4] sm:$0xf]  ;;  %v7777_v26 = vor.u32 %v10078_v5, %v7774_v7 }
 0x11e   :  { %5286 = vmatpush.bf16.msra.mxu2 %v7681_v43  ;;  %v8142_v13 = vld [vmem:[%s15688_s1 + $0xcf0] sm:$0xf0]  ;;  %v10202_v14 = vld [vmem:[%s15688_s1 + $0xde4] sm:$0xf]  ;;  %v7953_v27 = vor.u32 %v10122_v60, %v7950_v9 }
 0x11f   :  { %5299 = vmatpush.bf16.msra.mxu3 %v7809_v50  ;;  %v8270_v17 = vld [vmem:[%s15688_s1 + $0xdf0] sm:$0xf0]  ;;  %v10234_v39 = vld [vmem:[%s15688_s1 + $0xee4] sm:$0xf]  ;;  %v8145_v32 = vor.u32 %v10170_v10, %v8142_v13 }
 0x120   :  { %5309 = vmatpush.bf16.msrb.mxu0 %v7985_v51  ;;  %v8398_v24 = vld [vmem:[%s15688_s1 + $0xef0] sm:$0xf0]  ;;  %v8273_v34 = vor.u32 %v10202_v14, %v8270_v17  ;;  %v10118_v40 = vld [vmem:[%s15688_s1 + $0xb44] sm:$0xf] }
 0x121   :  { %5274 = vmatpush.bf16.msra.mxu1 %v7537_v61  ;;  %v7934_v43 = vld [vmem:[%s15688_s1 + $0xb50] sm:$0xf0]  ;;  %v10166_v47 = vld [vmem:[%s15688_s1 + $0xcc4] sm:$0xf]  ;;  %v8401_v48 = vor.u32 %v10234_v39, %v8398_v24 }
 0x122   :  { %5287 = vmatpush.bf16.msra.mxu2 %v7665_v62  ;;  %v8126_v50 = vld [vmem:[%s15688_s1 + $0xcd0] sm:$0xf0]  ;;  %v10198_v51 = vld [vmem:[%s15688_s1 + $0xdc4] sm:$0xf]  ;;  %v7937_v57 = vor.u32 %v10118_v40, %v7934_v43 }
 0x123   :  { %5300 = vmatpush.bf16.msra.mxu3 %v7793_v1  ;;  %v8254_v52 = vld [vmem:[%s15688_s1 + $0xdd0] sm:$0xf0]  ;;  %v10230_v54 = vld [vmem:[%s15688_s1 + $0xec4] sm:$0xf]  ;;  %v8129_v58 = vor.u32 %v10166_v47, %v8126_v50 }
 0x124   :  { %5310 = vmatpush.bf16.msrb.mxu0 %v7969_v2  ;;  %v8382_v55 = vld [vmem:[%s15688_s1 + $0xed0] sm:$0xf0]  ;;  %v8257_v59 = vor.u32 %v10198_v51, %v8254_v52  ;;  %v10114_v61 = vld [vmem:[%s15688_s1 + $0xb24] sm:$0xf] }
 0x125   :  { %5275 = vmatpush.bf16.msra.mxu1 %v7521_v18  ;;  %v7918_v62 = vld [vmem:[%s15688_s1 + $0xb30] sm:$0xf0]  ;;  %v10162_v63 = vld [vmem:[%s15688_s1 + $0xca4] sm:$0xf]  ;;  %v8385_v53 = vor.u32 %v10230_v54, %v8382_v55  ;;  %v5056_v39 = vpop.f32.mrf.mxu0 }
 0x126   :  { %5288 = vmatpush.bf16.msra.mxu2 %v7649_v22  ;;  %v8110_v0 = vld [vmem:[%s15688_s1 + $0xcb0] sm:$0xf0]  ;;  %v10194_v1 = vld [vmem:[%s15688_s1 + $0xda4] sm:$0xf]  ;;  %v7921_v7 = vor.u32 %v10114_v61, %v7918_v62  ;;  %v5069_v40 = vpop.f32.mrf.mxu1 }
 0x127   :  { %5301 = vmatpush.bf16.msra.mxu3 %v7777_v26  ;;  %v8238_v2 = vld [vmem:[%s15688_s1 + $0xdb0] sm:$0xf0]  ;;  %v10226_v3 = vld [vmem:[%s15688_s1 + $0xea4] sm:$0xf]  ;;  %v8113_v60 = vor.u32 %v10162_v63, %v8110_v0 }
 0x128   :  { %5311 = vmatpush.bf16.msrb.mxu0 %v7953_v27  ;;  %5276 = vmatmul.bf16.vlgmr.msra.gmra.mxu1 %v11269_v25  ;;  %v8366_v5 = vld [vmem:[%s15688_s1 + $0xeb0] sm:$0xf0]  ;;  %v10110_v8 = vld [vmem:[%s15688_s1 + $0xb04] sm:$0xf]  ;;  %v8241_v9 = vor.u32 %v10194_v1, %v8238_v2 }
 0x129   :  { %5320 = vmatpush.bf16.msrb.mxu1 %v8145_v32  ;;  %5289 = vmatmul.bf16.vlgmr.msra.gmra.mxu2 %v11282_v30  ;;  %v7902_v10 = vld [vmem:[%s15688_s1 + $0xb10] sm:$0xf0]  ;;  %v10158_v12 = vld [vmem:[%s15688_s1 + $0xc84] sm:$0xf]  ;;  %v8369_v14 = vor.u32 %v10226_v3, %v8366_v5  ;;  %v5057_v32 = vadd.f32 %v5056_v39, %v12439_v36 }
 0x12a   :  { %5333 = vmatpush.bf16.msrb.mxu2 %v8273_v34  ;;  %5302 = vmatmul.bf16.vlgmr.msra.gmra.mxu3 %v11280_v29  ;;  %v8094_v13 = vld [vmem:[%s15688_s1 + $0xc90] sm:$0xf0]  ;;  %v10190_v17 = vld [vmem:[%s15688_s1 + $0xd84] sm:$0xf]  ;;  %v7905_v34 = vor.u32 %v10110_v8, %v7902_v10  ;;  %v5082_v2 = vpop.f32.mrf.mxu2 }
 0x12b   :  { %5346 = vmatpush.bf16.msrb.mxu3 %v8401_v48  ;;  %v8222_v18 = vld [vmem:[%s15688_s1 + $0xd90] sm:$0xf0]  ;;  %v10222_v22 = vld [vmem:[%s15688_s1 + $0xe84] sm:$0xf]  ;;  %v8097_v43 = vor.u32 %v10158_v12, %v8094_v13  ;;  %v5070_v52 = vadd.f32 %v5069_v40, %v5057_v32 }
 0x12c   :  { %5312 = vmatpush.bf16.msrb.mxu0 %v7937_v57  ;;  %v8350_v24 = vld [vmem:[%s15688_s1 + $0xe90] sm:$0xf0]  ;;  %v10266_v26 = vld [vmem:[%s15688_s1 + $0xfe4] sm:$0xf]  ;;  %v8225_v47 = vor.u32 %v10190_v17, %v8222_v18 }
 0x12d   :  { %5321 = vmatpush.bf16.msrb.mxu1 %v8129_v58  ;;  %v8526_v27 = vld [vmem:[%s15688_s1 + $0xff0] sm:$0xf0]  ;;  %v10154_v48 = vld [vmem:[%s15688_s1 + $0xc64] sm:$0xf]  ;;  %v8353_v51 = vor.u32 %v10222_v22, %v8350_v24 }
 0x12e   :  { %5334 = vmatpush.bf16.msrb.mxu2 %v8257_v59  ;;  %v8078_v50 = vld [vmem:[%s15688_s1 + $0xc70] sm:$0xf0]  ;;  %v8529_v54 = vor.u32 %v10266_v26, %v8526_v27  ;;  %v10186_v36 = vld [vmem:[%s15688_s1 + $0xd64] sm:$0xf]  ;;  %v5071_v17 = vpop.f32.mrf.mxu1 }
 0x12f   :  { %5347 = vmatpush.bf16.msrb.mxu3 %v8385_v53  ;;  %v8206_v55 = vld [vmem:[%s15688_s1 + $0xd70] sm:$0xf0]  ;;  %v10218_v57 = vld [vmem:[%s15688_s1 + $0xe64] sm:$0xf]  ;;  %v8081_v62 = vor.u32 %v10154_v48, %v8078_v50 }
 0x130   :  { %5313 = vmatpush.bf16.msrb.mxu0 %v7921_v7  ;;  %v8334_v58 = vld [vmem:[%s15688_s1 + $0xe70] sm:$0xf0]  ;;  %v10262_v59 = vld [vmem:[%s15688_s1 + $0xfc4] sm:$0xf]  ;;  %v8209_v63 = vor.u32 %v10186_v36, %v8206_v55 }
 0x131   :  { %5322 = vmatpush.bf16.msrb.mxu1 %v8113_v60  ;;  %v8510_v61 = vld [vmem:[%s15688_s1 + $0xfd0] sm:$0xf0]  ;;  %v10150_v53 = vld [vmem:[%s15688_s1 + $0xc44] sm:$0xf]  ;;  %v8337_v1 = vor.u32 %v10218_v57, %v8334_v58  ;;  %v5083_v60 = vadd.f32 %v5082_v2, %v5070_v52 }
 0x132   :  { %5335 = vmatpush.bf16.msrb.mxu2 %v8241_v9  ;;  %v8062_v0 = vld [vmem:[%s15688_s1 + $0xc50] sm:$0xf0]  ;;  %v8513_v3 = vor.u32 %v10262_v59, %v8510_v61  ;;  %v10182_v5 = vld [vmem:[%s15688_s1 + $0xd44] sm:$0xf]  ;;  %v5095_v9 = vpop.f32.mrf.mxu3 }
 0x133   :  { %5348 = vmatpush.bf16.msrb.mxu3 %v8369_v14  ;;  %v8190_v7 = vld [vmem:[%s15688_s1 + $0xd50] sm:$0xf0]  ;;  %v10214_v8 = vld [vmem:[%s15688_s1 + $0xe44] sm:$0xf]  ;;  %v5058_v14 = vpop.f32.mrf.mxu0  ;;  %v12638_v18 = vadd.f32 %v5095_v9, %v5083_v60  ;;  %v8065_v22 = vor.u32 %v10150_v53, %v8062_v0 }
 0x134   :  { %5314 = vmatpush.bf16.msrb.mxu0 %v7905_v34  ;;  %v8318_v10 = vld [vmem:[%s15688_s1 + $0xe50] sm:$0xf0]  ;;  %v10258_v12 = vld [vmem:[%s15688_s1 + $0xfa4] sm:$0xf]  ;;  %v8193_v39 = vor.u32 %v10182_v5, %v8190_v7 }
 0x135   :  { %5323 = vmatpush.bf16.msrb.mxu1 %v8097_v43  ;;  %v8494_v13 = vld [vmem:[%s15688_s1 + $0xfb0] sm:$0xf0]  ;;  %v10146_v24 = vld [vmem:[%s15688_s1 + $0xc24] sm:$0xf]  ;;  %v8321_v27 = vor.u32 %v10214_v8, %v8318_v10 }
 0x136   :  { %5336 = vmatpush.bf16.msrb.mxu2 %v8225_v47  ;;  %v8046_v26 = vld [vmem:[%s15688_s1 + $0xc30] sm:$0xf0]  ;;  %v8497_v32 = vor.u32 %v10258_v12, %v8494_v13  ;;  %v10178_v34 = vld [vmem:[%s15688_s1 + $0xd24] sm:$0xf] }
 0x137   :  { %5349 = vmatpush.bf16.msrb.mxu3 %v8353_v51  ;;  %5315 = vmatmul.bf16.vlgmr.msrb.gmra.mxu0 %v11290_v33  ;;  %v8174_v40 = vld [vmem:[%s15688_s1 + $0xd30] sm:$0xf0]  ;;  %v10210_v43 = vld [vmem:[%s15688_s1 + $0xe24] sm:$0xf]  ;;  %v8049_v51 = vor.u32 %v10146_v24, %v8046_v26 }
 0x138   :  { %5359 = vmatpush.bf16.msra.mxu0 %v8529_v54  ;;  %v8302_v47 = vld [vmem:[%s15688_s1 + $0xe30] sm:$0xf0]  ;;  %v10254_v48 = vld [vmem:[%s15688_s1 + $0xf84] sm:$0xf]  ;;  %v8177_v52 = vor.u32 %v10178_v34, %v8174_v40 }
 0x139   :  { %5324 = vmatpush.bf16.msrb.mxu1 %v8081_v62  ;;  %v8478_v50 = vld [vmem:[%s15688_s1 + $0xf90] sm:$0xf0]  ;;  %v10142_v54 = vld [vmem:[%s15688_s1 + $0xc04] sm:$0xf]  ;;  %v8305_v57 = vor.u32 %v10210_v43, %v8302_v47 }
 0x13a   :  { %5337 = vmatpush.bf16.msrb.mxu2 %v8209_v63  ;;  %v8030_v36 = vld [vmem:[%s15688_s1 + $0xc10] sm:$0xf0]  ;;  %v10174_v55 = vld [vmem:[%s15688_s1 + $0xd04] sm:$0xf]  ;;  %v8481_v58 = vor.u32 %v10254_v48, %v8478_v50  ;;  %v5084_v63 = vpop.f32.mrf.mxu2  ;;  %v5097_v2 = vpop.f32.mrf.mxu3 }
 0x13b   :  { %5350 = vmatpush.bf16.msrb.mxu3 %v8337_v1  ;;  %v8158_v59 = vld [vmem:[%s15688_s1 + $0xd10] sm:$0xf0]  ;;  %v10206_v61 = vld [vmem:[%s15688_s1 + $0xe04] sm:$0xf]  ;;  %v8033_v8 = vor.u32 %v10142_v54, %v8030_v36 }
 0x13c   :  { %5360 = vmatpush.bf16.msra.mxu0 %v8513_v3  ;;  %v8286_v62 = vld [vmem:[%s15688_s1 + $0xe10] sm:$0xf0]  ;;  %v10250_v53 = vld [vmem:[%s15688_s1 + $0xf64] sm:$0xf]  ;;  %v8161_v60 = vor.u32 %v10174_v55, %v8158_v59 }
 0x13d   :  { %5325 = vmatpush.bf16.msrb.mxu1 %v8065_v22  ;;  %v8462_v0 = vld [vmem:[%s15688_s1 + $0xf70] sm:$0xf0]  ;;  %v10298_v1 = vld [vmem:[%s15688_s1 + $0x10e4] sm:$0xf]  ;;  %v8289_v12 = vor.u32 %v10206_v61, %v8286_v62 }
 0x13e   :  { %5338 = vmatpush.bf16.msrb.mxu2 %v8193_v39  ;;  %v8654_v3 = vld [vmem:[%s15688_s1 + $0x10f0] sm:$0xf0]  ;;  %v10330_v5 = vld [vmem:[%s15688_s1 + $0x11e4] sm:$0xf]  ;;  %v8465_v13 = vor.u32 %v10250_v53, %v8462_v0 }
 0x13f   :  { %5351 = vmatpush.bf16.msrb.mxu3 %v8321_v27  ;;  %v8782_v7 = vld [vmem:[%s15688_s1 + $0x11f0] sm:$0xf0]  ;;  %v10362_v9 = vld [vmem:[%s15688_s1 + $0x12e4] sm:$0xf]  ;;  %v8657_v14 = vor.u32 %v10298_v1, %v8654_v3 }
 0x140   :  { %5361 = vmatpush.bf16.msra.mxu0 %v8497_v32  ;;  %v8910_v10 = vld [vmem:[%s15688_s1 + $0x12f0] sm:$0xf0]  ;;  %v8785_v17 = vor.u32 %v10330_v5, %v8782_v7  ;;  %v10246_v22 = vld [vmem:[%s15688_s1 + $0xf44] sm:$0xf] }
 0x141   :  { %5326 = vmatpush.bf16.msrb.mxu1 %v8049_v51  ;;  %v8446_v39 = vld [vmem:[%s15688_s1 + $0xf50] sm:$0xf0]  ;;  %v10294_v24 = vld [vmem:[%s15688_s1 + $0x10c4] sm:$0xf]  ;;  %v8913_v26 = vor.u32 %v10362_v9, %v8910_v10 }
 0x142   :  { %5339 = vmatpush.bf16.msrb.mxu2 %v8177_v52  ;;  %v8638_v27 = vld [vmem:[%s15688_s1 + $0x10d0] sm:$0xf0]  ;;  %v10326_v32 = vld [vmem:[%s15688_s1 + $0x11c4] sm:$0xf]  ;;  %v8449_v47 = vor.u32 %v10246_v22, %v8446_v39 }
 0x143   :  { %5352 = vmatpush.bf16.msrb.mxu3 %v8305_v57  ;;  %v8766_v34 = vld [vmem:[%s15688_s1 + $0x11d0] sm:$0xf0]  ;;  %v10358_v40 = vld [vmem:[%s15688_s1 + $0x12c4] sm:$0xf]  ;;  %v8641_v48 = vor.u32 %v10294_v24, %v8638_v27 }
 0x144   :  { %5362 = vmatpush.bf16.msra.mxu0 %v8481_v58  ;;  %v8894_v43 = vld [vmem:[%s15688_s1 + $0x12d0] sm:$0xf0]  ;;  %v8769_v50 = vor.u32 %v10326_v32, %v8766_v34  ;;  %v10242_v51 = vld [vmem:[%s15688_s1 + $0xf24] sm:$0xf]  ;;  %v5108_v9 = vpop.f32.mrf.mxu0 }
 0x145   :  { %5327 = vmatpush.bf16.msrb.mxu1 %v8033_v8  ;;  %v8430_v52 = vld [vmem:[%s15688_s1 + $0xf30] sm:$0xf0]  ;;  %v10290_v54 = vld [vmem:[%s15688_s1 + $0x10a4] sm:$0xf]  ;;  %v8897_v36 = vor.u32 %v10358_v40, %v8894_v43  ;;  %v5121_v22 = vpop.f32.mrf.mxu1 }
 0x146   :  { %5340 = vmatpush.bf16.msrb.mxu2 %v8161_v60  ;;  %v8622_v55 = vld [vmem:[%s15688_s1 + $0x10b0] sm:$0xf0]  ;;  %v10322_v57 = vld [vmem:[%s15688_s1 + $0x11a4] sm:$0xf]  ;;  %v8433_v62 = vor.u32 %v10242_v51, %v8430_v52 }
 0x147   :  { %5353 = vmatpush.bf16.msrb.mxu3 %v8289_v12  ;;  %v8750_v58 = vld [vmem:[%s15688_s1 + $0x11b0] sm:$0xf0]  ;;  %v10354_v59 = vld [vmem:[%s15688_s1 + $0x12a4] sm:$0xf]  ;;  %v8625_v53 = vor.u32 %v10290_v54, %v8622_v55 }
 0x148   :  { %5363 = vmatpush.bf16.msra.mxu0 %v8465_v13  ;;  %5328 = vmatmul.bf16.vlgmr.msrb.gmra.mxu1 %v11479_v23  ;;  %v8878_v61 = vld [vmem:[%s15688_s1 + $0x12b0] sm:$0xf0]  ;;  %v10238_v63 = vld [vmem:[%s15688_s1 + $0xf04] sm:$0xf]  ;;  %v8753_v0 = vor.u32 %v10322_v57, %v8750_v58 }
 0x149   :  { %5372 = vmatpush.bf16.msra.mxu1 %v8657_v14  ;;  %5341 = vmatmul.bf16.vlgmr.msrb.gmra.mxu2 %v11492_v31  ;;  %v8414_v1 = vld [vmem:[%s15688_s1 + $0xf10] sm:$0xf0]  ;;  %v10286_v2 = vld [vmem:[%s15688_s1 + $0x1084] sm:$0xf]  ;;  %v8881_v5 = vor.u32 %v10354_v59, %v8878_v61  ;;  %v5109_v14 = vadd.f32 %v5108_v9, %v12638_v18 }
 0x14a   :  { %5385 = vmatpush.bf16.msra.mxu2 %v8785_v17  ;;  %5354 = vmatmul.bf16.vlgmr.msrb.gmra.mxu3 %v11490_v28  ;;  %v8606_v3 = vld [vmem:[%s15688_s1 + $0x1090] sm:$0xf0]  ;;  %v10318_v7 = vld [vmem:[%s15688_s1 + $0x1184] sm:$0xf]  ;;  %v8417_v17 = vor.u32 %v10238_v63, %v8414_v1 }
 0x14b   :  { %5398 = vmatpush.bf16.msra.mxu3 %v8913_v26  ;;  %v8734_v8 = vld [vmem:[%s15688_s1 + $0x1190] sm:$0xf0]  ;;  %v10350_v60 = vld [vmem:[%s15688_s1 + $0x1284] sm:$0xf]  ;;  %v8609_v39 = vor.u32 %v10286_v2, %v8606_v3  ;;  %v5122_v34 = vadd.f32 %v5121_v22, %v5109_v14 }
 0x14c   :  { %5364 = vmatpush.bf16.msra.mxu0 %v8449_v47  ;;  %v8862_v10 = vld [vmem:[%s15688_s1 + $0x1290] sm:$0xf0]  ;;  %v10394_v12 = vld [vmem:[%s15688_s1 + $0x13e4] sm:$0xf]  ;;  %v8737_v24 = vor.u32 %v10318_v7, %v8734_v8  ;;  %v5134_v58 = vpop.f32.mrf.mxu2 }
 0x14d   :  { %5373 = vmatpush.bf16.msra.mxu1 %v8641_v48  ;;  %v9038_v13 = vld [vmem:[%s15688_s1 + $0x13f0] sm:$0xf0]  ;;  %v10282_v26 = vld [vmem:[%s15688_s1 + $0x1064] sm:$0xf]  ;;  %v8865_v32 = vor.u32 %v10350_v60, %v8862_v10  ;;  %v5147_v1 = vpop.f32.mrf.mxu3  ;;  %v5123_v7 = vpop.f32.mrf.mxu1 }
 0x14e   :  { %5386 = vmatpush.bf16.msra.mxu2 %v8769_v50  ;;  %v8590_v27 = vld [vmem:[%s15688_s1 + $0x1070] sm:$0xf0]  ;;  %v9041_v40 = vor.u32 %v10394_v12, %v9038_v13  ;;  %v10314_v18 = vld [vmem:[%s15688_s1 + $0x1164] sm:$0xf] }
 0x14f   :  { %5399 = vmatpush.bf16.msra.mxu3 %v8897_v36  ;;  %v8718_v43 = vld [vmem:[%s15688_s1 + $0x1170] sm:$0xf0]  ;;  %v10346_v47 = vld [vmem:[%s15688_s1 + $0x1264] sm:$0xf]  ;;  %v8593_v52 = vor.u32 %v10282_v26, %v8590_v27 }
 0x150   :  { %5365 = vmatpush.bf16.msra.mxu0 %v8433_v62  ;;  %v8846_v48 = vld [vmem:[%s15688_s1 + $0x1270] sm:$0xf0]  ;;  %v10390_v50 = vld [vmem:[%s15688_s1 + $0x13c4] sm:$0xf]  ;;  %v8721_v54 = vor.u32 %v10314_v18, %v8718_v43 }
 0x151   :  { %5374 = vmatpush.bf16.msra.mxu1 %v8625_v53  ;;  %v9022_v51 = vld [vmem:[%s15688_s1 + $0x13d0] sm:$0xf0]  ;;  %v10278_v36 = vld [vmem:[%s15688_s1 + $0x1044] sm:$0xf]  ;;  %v8849_v57 = vor.u32 %v10346_v47, %v8846_v48  ;;  %v5135_v53 = vadd.f32 %v5134_v58, %v5122_v34 }
 0x152   :  { %5387 = vmatpush.bf16.msra.mxu2 %v8753_v0  ;;  %v8574_v55 = vld [vmem:[%s15688_s1 + $0x1050] sm:$0xf0]  ;;  %v9025_v59 = vor.u32 %v10390_v50, %v9022_v51  ;;  %v10310_v61 = vld [vmem:[%s15688_s1 + $0x1144] sm:$0xf]  ;;  %v5110_v0 = vpop.f32.mrf.mxu0 }
 0x153   :  { %5400 = vmatpush.bf16.msra.mxu3 %v8881_v5  ;;  %v8702_v62 = vld [vmem:[%s15688_s1 + $0x1150] sm:$0xf0]  ;;  %v10342_v63 = vld [vmem:[%s15688_s1 + $0x1244] sm:$0xf]  ;;  %v5148_v8 = vadd.f32 %v5147_v1, %v5135_v53  ;;  %v8577_v60 = vor.u32 %v10278_v36, %v8574_v55 }
 0x154   :  { %5366 = vmatpush.bf16.msra.mxu0 %v8417_v17  ;;  %v8830_v2 = vld [vmem:[%s15688_s1 + $0x1250] sm:$0xf0]  ;;  %v10386_v3 = vld [vmem:[%s15688_s1 + $0x13a4] sm:$0xf]  ;;  %v8705_v9 = vor.u32 %v10310_v61, %v8702_v62 }
 0x155   :  { %5375 = vmatpush.bf16.msra.mxu1 %v8609_v39  ;;  %v9006_v5 = vld [vmem:[%s15688_s1 + $0x13b0] sm:$0xf0]  ;;  %v10274_v10 = vld [vmem:[%s15688_s1 + $0x1024] sm:$0xf]  ;;  %v8833_v13 = vor.u32 %v10342_v63, %v8830_v2  ;;  %v5149_v58 = vpop.f32.mrf.mxu3 }
 0x156   :  { %5388 = vmatpush.bf16.msra.mxu2 %v8737_v24  ;;  %v8558_v12 = vld [vmem:[%s15688_s1 + $0x1030] sm:$0xf0]  ;;  %v9009_v14 = vor.u32 %v10386_v3, %v9006_v5  ;;  %v10306_v17 = vld [vmem:[%s15688_s1 + $0x1124] sm:$0xf] }
 0x157   :  { %5401 = vmatpush.bf16.msra.mxu3 %v8865_v32  ;;  %5367 = vmatmul.bf16.vlgmr.msra.gmra.mxu0 %v11500_v35  ;;  %v8686_v22 = vld [vmem:[%s15688_s1 + $0x1130] sm:$0xf0]  ;;  %v10338_v39 = vld [vmem:[%s15688_s1 + $0x1224] sm:$0xf]  ;;  %v8561_v32 = vor.u32 %v10274_v10, %v8558_v12 }
 0x158   :  { %5411 = vmatpush.bf16.msrb.mxu0 %v9041_v40  ;;  %v8814_v24 = vld [vmem:[%s15688_s1 + $0x1230] sm:$0xf0]  ;;  %v10382_v26 = vld [vmem:[%s15688_s1 + $0x1384] sm:$0xf]  ;;  %v8689_v34 = vor.u32 %v10306_v17, %v8686_v22 }
 0x159   :  { %5376 = vmatpush.bf16.msra.mxu1 %v8593_v52  ;;  %v8990_v27 = vld [vmem:[%s15688_s1 + $0x1390] sm:$0xf0]  ;;  %v10270_v40 = vld [vmem:[%s15688_s1 + $0x1004] sm:$0xf]  ;;  %v8817_v47 = vor.u32 %v10338_v39, %v8814_v24 }
 0x15a   :  { %5389 = vmatpush.bf16.msra.mxu2 %v8721_v54  ;;  %v8542_v18 = vld [vmem:[%s15688_s1 + $0x1010] sm:$0xf0]  ;;  %v10302_v43 = vld [vmem:[%s15688_s1 + $0x1104] sm:$0xf]  ;;  %v8993_v48 = vor.u32 %v10382_v26, %v8990_v27  ;;  %v5136_v54 = vpop.f32.mrf.mxu2 }
 0x15b   :  { %5402 = vmatpush.bf16.msra.mxu3 %v8849_v57  ;;  %v8670_v50 = vld [vmem:[%s15688_s1 + $0x1110] sm:$0xf0]  ;;  %v10334_v51 = vld [vmem:[%s15688_s1 + $0x1204] sm:$0xf]  ;;  %v8545_v0 = vor.u32 %v10270_v40, %v8542_v18 }
 0x15c   :  { %5412 = vmatpush.bf16.msrb.mxu0 %v9025_v59  ;;  %v8798_v52 = vld [vmem:[%s15688_s1 + $0x1210] sm:$0xf0]  ;;  %v10378_v36 = vld [vmem:[%s15688_s1 + $0x1364] sm:$0xf]  ;;  %v5160_v59 = vpop.f32.mrf.mxu0  ;;  %v8673_v1 = vor.u32 %v10302_v43, %v8670_v50 }
 0x15d   :  { %5377 = vmatpush.bf16.msra.mxu1 %v8577_v60  ;;  %v8974_v55 = vld [vmem:[%s15688_s1 + $0x1370] sm:$0xf0]  ;;  %v10426_v57 = vld [vmem:[%s15688_s1 + $0x14e4] sm:$0xf]  ;;  %v12897_v53 = vadd.f32 %v5160_v59, %v5148_v8  ;;  %v8801_v5 = vor.u32 %v10334_v51, %v8798_v52 }
 0x15e   :  { %5390 = vmatpush.bf16.msra.mxu2 %v8705_v9  ;;  %v9166_v61 = vld [vmem:[%s15688_s1 + $0x14f0] sm:$0xf0]  ;;  %v10458_v62 = vld [vmem:[%s15688_s1 + $0x15e4] sm:$0xf]  ;;  %v8977_v7 = vor.u32 %v10378_v36, %v8974_v55 }
 0x15f   :  { %5403 = vmatpush.bf16.msra.mxu3 %v8833_v13  ;;  %v9294_v63 = vld [vmem:[%s15688_s1 + $0x15f0] sm:$0xf0]  ;;  %v10490_v2 = vld [vmem:[%s15688_s1 + $0x16e4] sm:$0xf]  ;;  %v9169_v60 = vor.u32 %v10426_v57, %v9166_v61 }
 0x160   :  { %5413 = vmatpush.bf16.msrb.mxu0 %v9009_v14  ;;  %v9422_v3 = vld [vmem:[%s15688_s1 + $0x16f0] sm:$0xf0]  ;;  %v9297_v9 = vor.u32 %v10458_v62, %v9294_v63  ;;  %v10374_v8 = vld [vmem:[%s15688_s1 + $0x1344] sm:$0xf] }
 0x161   :  { %5378 = vmatpush.bf16.msra.mxu1 %v8561_v32  ;;  %v8958_v10 = vld [vmem:[%s15688_s1 + $0x1350] sm:$0xf0]  ;;  %v10422_v12 = vld [vmem:[%s15688_s1 + $0x14c4] sm:$0xf]  ;;  %v9425_v13 = vor.u32 %v10490_v2, %v9422_v3  ;;  %v10582_v3 = vld [vmem:[%s15690_s2] sm:$0xf] }
 0x162   :  { %5391 = vmatpush.bf16.msra.mxu2 %v8689_v34  ;;  %v9150_v14 = vld [vmem:[%s15688_s1 + $0x14d0] sm:$0xf0]  ;;  %v10454_v17 = vld [vmem:[%s15688_s1 + $0x15c4] sm:$0xf]  ;;  %v8961_v26 = vor.u32 %v10374_v8, %v8958_v10 }
 0x163   :  { %5404 = vmatpush.bf16.msra.mxu3 %v8817_v47  ;;  %v9278_v22 = vld [vmem:[%s15688_s1 + $0x15d0] sm:$0xf0]  ;;  %v10486_v39 = vld [vmem:[%s15688_s1 + $0x16c4] sm:$0xf]  ;;  %v9153_v27 = vor.u32 %v10422_v12, %v9150_v14 }
 0x164   :  { %5414 = vmatpush.bf16.msrb.mxu0 %v8993_v48  ;;  %v9406_v24 = vld [vmem:[%s15688_s1 + $0x16d0] sm:$0xf0]  ;;  %v9281_v32 = vor.u32 %v10454_v17, %v9278_v22  ;;  %v10370_v34 = vld [vmem:[%s15688_s1 + $0x1324] sm:$0xf]  ;;  %v5162_v51 = vpop.f32.mrf.mxu0 }
 0x165   :  { %5379 = vmatpush.bf16.msra.mxu1 %v8545_v0  ;;  %v8942_v40 = vld [vmem:[%s15688_s1 + $0x1330] sm:$0xf0]  ;;  %v10418_v18 = vld [vmem:[%s15688_s1 + $0x14a4] sm:$0xf]  ;;  %v9409_v43 = vor.u32 %v10486_v39, %v9406_v24  ;;  %v5173_v10 = vpop.f32.mrf.mxu1 }
 0x166   :  { %5392 = vmatpush.bf16.msra.mxu2 %v8673_v1  ;;  %v9134_v47 = vld [vmem:[%s15688_s1 + $0x14b0] sm:$0xf0]  ;;  %v10450_v48 = vld [vmem:[%s15688_s1 + $0x15a4] sm:$0xf]  ;;  %v8945_v36 = vor.u32 %v10370_v34, %v8942_v40 }
 0x167   :  { %5405 = vmatpush.bf16.msra.mxu3 %v8801_v5  ;;  %v9262_v50 = vld [vmem:[%s15688_s1 + $0x15b0] sm:$0xf0]  ;;  %v10482_v52 = vld [vmem:[%s15688_s1 + $0x16a4] sm:$0xf]  ;;  %v9137_v58 = vor.u32 %v10418_v18, %v9134_v47  ;;  %v821_v5 = vperm.slane %v10582_v3, 1 }
 0x168   :  { %5415 = vmatpush.bf16.msrb.mxu0 %v8977_v7  ;;  %5380 = vmatmul.bf16.vlgmr.msra.gmra.mxu1 %v11689_v37  ;;  %v9390_v54 = vld [vmem:[%s15688_s1 + $0x16b0] sm:$0xf0]  ;;  %v10366_v55 = vld [vmem:[%s15688_s1 + $0x1304] sm:$0xf]  ;;  %v9265_v59 = vor.u32 %v10450_v48, %v9262_v50 }
 0x169   :  { %5424 = vmatpush.bf16.msrb.mxu1 %v9169_v60  ;;  %5393 = vmatmul.bf16.vlgmr.msra.gmra.mxu2 %v11702_v46  ;;  %v8926_v57 = vld [vmem:[%s15688_s1 + $0x1310] sm:$0xf0]  ;;  %v10414_v61 = vld [vmem:[%s15688_s1 + $0x1484] sm:$0xf]  ;;  %v9393_v0 = vor.u32 %v10482_v52, %v9390_v54 }
 0x16a   :  { %5437 = vmatpush.bf16.msrb.mxu2 %v9297_v9  ;;  %5406 = vmatmul.bf16.vlgmr.msra.gmra.mxu3 %v11700_v45  ;;  %v9118_v62 = vld [vmem:[%s15688_s1 + $0x1490] sm:$0xf0]  ;;  %v10446_v63 = vld [vmem:[%s15688_s1 + $0x1584] sm:$0xf]  ;;  %v8929_v8 = vor.u32 %v10366_v55, %v8926_v57 }
 0x16b   :  { %5450 = vmatpush.bf16.msrb.mxu3 %v9425_v13  ;;  %v9246_v1 = vld [vmem:[%s15688_s1 + $0x1590] sm:$0xf0]  ;;  %v10478_v2 = vld [vmem:[%s15688_s1 + $0x1684] sm:$0xf]  ;;  %v9121_v12 = vor.u32 %v10414_v61, %v9118_v62 }
 0x16c   :  { %5416 = vmatpush.bf16.msrb.mxu0 %v8961_v26  ;;  %v9374_v7 = vld [vmem:[%s15688_s1 + $0x1690] sm:$0xf0]  ;;  %v10522_v60 = vld [vmem:[%s15688_s1 + $0x17e4] sm:$0xf]  ;;  %v9249_v13 = vor.u32 %v10446_v63, %v9246_v1  ;;  %v5186_v51 = vpop.f32.mrf.mxu2 }
 0x16d   :  { %5425 = vmatpush.bf16.msrb.mxu1 %v9153_v27  ;;  %v9550_v9 = vld [vmem:[%s15688_s1 + $0x17f0] sm:$0xf0]  ;;  %v10410_v14 = vld [vmem:[%s15688_s1 + $0x1464] sm:$0xf]  ;;  %v9377_v22 = vor.u32 %v10478_v2, %v9374_v7  ;;  %v5175_v1 = vpop.f32.mrf.mxu1 }
 0x16e   :  { %5438 = vmatpush.bf16.msrb.mxu2 %v9281_v32  ;;  %v9102_v17 = vld [vmem:[%s15688_s1 + $0x1470] sm:$0xf0]  ;;  %v9553_v39 = vor.u32 %v10522_v60, %v9550_v9  ;;  %v10442_v24 = vld [vmem:[%s15688_s1 + $0x1564] sm:$0xf]  ;;  %v5174_v32 = vadd.f32 %v5173_v10, %v821_v5 }
 0x16f   :  { %5451 = vmatpush.bf16.msrb.mxu3 %v9409_v43  ;;  %v9230_v26 = vld [vmem:[%s15688_s1 + $0x1570] sm:$0xf0]  ;;  %v10474_v27 = vld [vmem:[%s15688_s1 + $0x1664] sm:$0xf]  ;;  %v9105_v43 = vor.u32 %v10410_v14, %v9102_v17 }
 0x170   :  { %5417 = vmatpush.bf16.msrb.mxu0 %v8945_v36  ;;  %v9358_v34 = vld [vmem:[%s15688_s1 + $0x1670] sm:$0xf0]  ;;  %v10518_v40 = vld [vmem:[%s15688_s1 + $0x17c4] sm:$0xf]  ;;  %v9233_v47 = vor.u32 %v10442_v24, %v9230_v26 }
 0x171   :  { %5426 = vmatpush.bf16.msrb.mxu1 %v9137_v58  ;;  %v9534_v18 = vld [vmem:[%s15688_s1 + $0x17d0] sm:$0xf0]  ;;  %v10406_v48 = vld [vmem:[%s15688_s1 + $0x1444] sm:$0xf]  ;;  %v9361_v52 = vor.u32 %v10474_v27, %v9358_v34  ;;  %v5187_v58 = vadd.f32 %v5186_v51, %v5174_v32 }
 0x172   :  { %5439 = vmatpush.bf16.msrb.mxu2 %v9265_v59  ;;  %v9086_v50 = vld [vmem:[%s15688_s1 + $0x1450] sm:$0xf0]  ;;  %v9537_v54 = vor.u32 %v10518_v40, %v9534_v18  ;;  %v10438_v36 = vld [vmem:[%s15688_s1 + $0x1544] sm:$0xf]  ;;  %v5199_v59 = vpop.f32.mrf.mxu3 }
 0x173   :  { %5452 = vmatpush.bf16.msrb.mxu3 %v9393_v0  ;;  %v9214_v55 = vld [vmem:[%s15688_s1 + $0x1550] sm:$0xf0]  ;;  %v10470_v57 = vld [vmem:[%s15688_s1 + $0x1644] sm:$0xf]  ;;  %v5200_v0 = vadd.f32 %v5199_v59, %v5187_v58  ;;  %v9089_v2 = vor.u32 %v10406_v48, %v9086_v50  ;;  %v9789_v58 = vld [vmem:[%s15688_s1 + $0xf4] sm:$0xf0] }
 0x174   :  { %5418 = vmatpush.bf16.msrb.mxu0 %v8929_v8  ;;  %v9342_v61 = vld [vmem:[%s15688_s1 + $0x1650] sm:$0xf0]  ;;  %v10514_v62 = vld [vmem:[%s15688_s1 + $0x17a4] sm:$0xf]  ;;  %v9217_v3 = vor.u32 %v10438_v36, %v9214_v55  ;;  %v5188_v40 = vpop.f32.mrf.mxu2 }
 0x175   :  { %5427 = vmatpush.bf16.msrb.mxu1 %v9121_v12  ;;  %v9518_v63 = vld [vmem:[%s15688_s1 + $0x17b0] sm:$0xf0]  ;;  %v10402_v5 = vld [vmem:[%s15688_s1 + $0x1424] sm:$0xf]  ;;  %v9345_v60 = vor.u32 %v10470_v57, %v9342_v61  ;;  %v6612_v57 = vld [vmem:[%s15688_s1 + $0xe8] sm:$0xf] }
 0x176   :  { %5440 = vmatpush.bf16.msrb.mxu2 %v9249_v13  ;;  %v9070_v7 = vld [vmem:[%s15688_s1 + $0x1430] sm:$0xf0]  ;;  %v9521_v9 = vor.u32 %v10514_v62, %v9518_v63  ;;  %v10434_v8 = vld [vmem:[%s15688_s1 + $0x1524] sm:$0xf]  ;;  %v6740_v62 = vld [vmem:[%s15688_s1 + $0x1e8] sm:$0xf] }
 0x177   :  { %5453 = vmatpush.bf16.msrb.mxu3 %v9377_v22  ;;  %5419 = vmatmul.bf16.vlgmr.msrb.gmra.mxu0 %v11710_v49  ;;  %v9198_v10 = vld [vmem:[%s15688_s1 + $0x1530] sm:$0xf0]  ;;  %v10466_v12 = vld [vmem:[%s15688_s1 + $0x1624] sm:$0xf]  ;;  %v5212_v22 = vpop.f32.mrf.mxu0  ;;  %v9821_v63 = vld [vmem:[%s15688_s1 + $0x1f4] sm:$0xf0] }
 0x178   :  { %5463 = vmatpush.bf16.msra.mxu0 %v9553_v39  ;;  %v9326_v13 = vld [vmem:[%s15688_s1 + $0x1630] sm:$0xf0]  ;;  %v10510_v14 = vld [vmem:[%s15688_s1 + $0x1784] sm:$0xf]  ;;  %v9073_v39 = vor.u32 %v10402_v5, %v9070_v7  ;;  %v9201_v24 = vor.u32 %v10434_v8, %v9198_v10  ;;  %v13071_v34 = vadd.f32 %v5212_v22, %v5200_v0  ;;  %v6596_v10 = vld [vmem:[%s15688_s1 + $0xc8] sm:$0xf] }
 0x179   :  { %5428 = vmatpush.bf16.msrb.mxu1 %v9105_v43  ;;  %v9502_v17 = vld [vmem:[%s15688_s1 + $0x1790] sm:$0xf0]  ;;  %v10398_v26 = vld [vmem:[%s15688_s1 + $0x1404] sm:$0xf]  ;;  %v9329_v18 = vor.u32 %v10466_v12, %v9326_v13  ;;  %v9785_v12 = vld [vmem:[%s15688_s1 + $0xd4] sm:$0xf0] }
 0x17a   :  { %5441 = vmatpush.bf16.msrb.mxu2 %v9233_v47  ;;  %v9054_v27 = vld [vmem:[%s15688_s1 + $0x1410] sm:$0xf0]  ;;  %v10430_v32 = vld [vmem:[%s15688_s1 + $0x1504] sm:$0xf]  ;;  %v9505_v43 = vor.u32 %v10510_v14, %v9502_v17  ;;  %v5201_v51 = vpop.f32.mrf.mxu3  ;;  %v6724_v14 = vld [vmem:[%s15688_s1 + $0x1c8] sm:$0xf] }
 0x17b   :  { %5454 = vmatpush.bf16.msrb.mxu3 %v9361_v52  ;;  %v9182_v47 = vld [vmem:[%s15688_s1 + $0x1510] sm:$0xf0]  ;;  %v10462_v48 = vld [vmem:[%s15688_s1 + $0x1604] sm:$0xf]  ;;  %v9057_v59 = vor.u32 %v10398_v26, %v9054_v27  ;;  %v9817_v17 = vld [vmem:[%s15688_s1 + $0x1d4] sm:$0xf0] }
 0x17c   :  { %5464 = vmatpush.bf16.msra.mxu0 %v9537_v54  ;;  %v9310_v50 = vld [vmem:[%s15688_s1 + $0x1610] sm:$0xf0]  ;;  %v10506_v52 = vld [vmem:[%s15688_s1 + $0x1764] sm:$0xf]  ;;  %v9185_v61 = vor.u32 %v10430_v32, %v9182_v47  ;;  %v6725_v40 = vor.u32 %v9817_v17, %v6724_v14  ;;  %v9781_v47 = vld [vmem:[%s15688_s1 + $0xb4] sm:$0xf0] }
 0x17d   :  { %5429 = vmatpush.bf16.msrb.mxu1 %v9089_v2  ;;  %v9486_v54 = vld [vmem:[%s15688_s1 + $0x1770] sm:$0xf0]  ;;  %v10538_v36 = vld [vmem:[%s15688_s1 + $0x1864] sm:$0xf]  ;;  %v9313_v0 = vor.u32 %v10462_v48, %v9310_v50  ;;  %v6708_v48 = vld [vmem:[%s15688_s1 + $0x1a8] sm:$0xf] }
 0x17e   :  { %5442 = vmatpush.bf16.msrb.mxu2 %v9217_v3  ;;  %v9614_v55 = vld [vmem:[%s15688_s1 + $0x1870] sm:$0xf0]  ;;  %v9489_v1 = vor.u32 %v10506_v52, %v9486_v54  ;;  %v6613_v3 = vor.u32 %v9789_v58, %v6612_v57  ;;  %v10502_v5 = vld [vmem:[%s15688_s1 + $0x1744] sm:$0xf]  ;;  %v9813_v50 = vld [vmem:[%s15688_s1 + $0x1b4] sm:$0xf0] }
 0x17f   :  { %5455 = vmatpush.bf16.msrb.mxu3 %v9345_v60  ;;  %v9617_v2 = vor.u32 %v10538_v36, %v9614_v55  ;;  %v9470_v7 = vld [vmem:[%s15688_s1 + $0x1750] sm:$0xf0]  ;;  %v10534_v60 = vld [vmem:[%s15688_s1 + $0x1844] sm:$0xf]  ;;  %v5214_v13 = vpop.f32.mrf.mxu0  ;;  %v6548_v14 = vld [vmem:[%s15688_s1 + $0x68] sm:$0xf] }
 0x180   :  { %5465 = vmatpush.bf16.msra.mxu0 %v9521_v9  ;;  %v6741_v9 = vor.u32 %v9821_v63, %v6740_v62  ;;  %v9598_v8 = vld [vmem:[%s15688_s1 + $0x1850] sm:$0xf0]  ;;  %v9473_v22 = vor.u32 %v10502_v5, %v9470_v7  ;;  %v10498_v26 = vld [vmem:[%s15688_s1 + $0x1724] sm:$0xf]  ;;  %v9777_v62 = vld [vmem:[%s15688_s1 + $0x94] sm:$0xf0] }
 0x181   :  { %5430 = vmatpush.bf16.msrb.mxu1 %v9073_v39  ;;  %v9601_v39 = vor.u32 %v10534_v60, %v9598_v8  ;;  %v9454_v27 = vld [vmem:[%s15688_s1 + $0x1730] sm:$0xf0]  ;;  %v10530_v32 = vld [vmem:[%s15688_s1 + $0x1824] sm:$0xf]  ;;  %v6692_v63 = vld [vmem:[%s15688_s1 + $0x188] sm:$0xf] }
 0x182   :  { %5443 = vmatpush.bf16.msrb.mxu2 %v9201_v24  ;;  %v6597_v24 = vor.u32 %v9785_v12, %v6596_v10  ;;  %v9457_v51 = vor.u32 %v10498_v26, %v9454_v27  ;;  %v10494_v52 = vld [vmem:[%s15688_s1 + $0x1704] sm:$0xf]  ;;  %v9438_v55 = vld [vmem:[%s15688_s1 + $0x1710] sm:$0xf0]  ;;  %v6996_v5 = vld [vmem:[%s15688_s1 + $0x3e8] sm:$0xf] }
 0x183   :  { %5456 = vmatpush.bf16.msrb.mxu3 %v9329_v18  ;;  %v9582_v18 = vld [vmem:[%s15688_s1 + $0x1830] sm:$0xf0]  ;;  %v10526_v57 = vld [vmem:[%s15688_s1 + $0x1804] sm:$0xf]  ;;  %v9885_v7 = vld [vmem:[%s15688_s1 + $0x3f4] sm:$0xf0] }
 0x184   :  { %5466 = vmatpush.bf16.msra.mxu0 %v9505_v43  ;;  %v6580_v43 = vld [vmem:[%s15688_s1 + $0xa8] sm:$0xf]  ;;  %v9585_v54 = vor.u32 %v10530_v32, %v9582_v18  ;;  %v9566_v58 = vld [vmem:[%s15688_s1 + $0x1810] sm:$0xf0]  ;;  %v9773_v17 = vld [vmem:[%s15688_s1 + $0x74] sm:$0xf0] }
 0x185   :  { %5431 = vmatpush.bf16.msrb.mxu1 %v9057_v59  ;;  %v6581_v36 = vor.u32 %v9781_v47, %v6580_v43  ;;  %v6709_v59 = vor.u32 %v9813_v50, %v6708_v48  ;;  %v5225_v60 = vpop.f32.mrf.mxu1  ;;  %v9849_v26 = vld [vmem:[%s15688_s1 + $0x2d4] sm:$0xf0]  ;;  %v6980_v27 = vld [vmem:[%s15688_s1 + $0x3c8] sm:$0xf] }
 0x186   :  { %5444 = vmatpush.bf16.msrb.mxu2 %v9185_v61  ;;  %v6564_v61 = vld [vmem:[%s15688_s1 + $0x88] sm:$0xf]  ;;  %v5226_v10 = vadd.f32 %v5225_v60, %v13071_v34  ;;  %v9805_v34 = vld [vmem:[%s15688_s1 + $0x174] sm:$0xf0] }
 0x187   :  { %5457 = vmatpush.bf16.msrb.mxu3 %v9313_v0  ;;  %v9809_v0 = vld [vmem:[%s15688_s1 + $0x194] sm:$0xf0]  ;;  %v6565_v8 = vor.u32 %v9777_v62, %v6564_v61  ;;  %v6532_v48 = vld [vmem:[%s15688_s1 + $0x48] sm:$0xf] }
 0x188   :  { %5467 = vmatpush.bf16.msra.mxu0 %v9489_v1  ;;  %5432 = vmatmul.bf16.vlgmr.msrb.gmra.mxu1 %v11904_v11  ;;  %v6868_v1 = vld [vmem:[%s15688_s1 + $0x2e8] sm:$0xf]  ;;  %v6693_v12 = vor.u32 %v9809_v0, %v6692_v63  ;;  %v9881_v32 = vld [vmem:[%s15688_s1 + $0x3d4] sm:$0xf0] }
 0x189   :  { %5480 = vmatpush.bf16.msra.mxu1 %v9617_v2  ;;  %5445 = vmatmul.bf16.vlgmr.msrb.gmra.mxu2 %v11917_v16  ;;  %v9853_v2 = vld [vmem:[%s15688_s1 + $0x2f4] sm:$0xf0] }
 0x18a   :  { %5489 = vmatpush.bf16.msra.mxu2 %v6613_v3  ;;  %5458 = vmatmul.bf16.vlgmr.msrb.gmra.mxu3 %v11915_v15  ;;  %v9441_v3 = vor.u32 %v10494_v52, %v9438_v55  ;;  %v6869_v13 = vor.u32 %v9853_v2, %v6868_v1  ;;  %v9769_v50 = vld [vmem:[%s15688_s1 + $0x54] sm:$0xf0] }
 0x18b   :  { %5502 = vmatpush.bf16.msra.mxu3 %v6741_v9  ;;  %v9569_v9 = vor.u32 %v10526_v57, %v9566_v58  ;;  %v9801_v55 = vld [vmem:[%s15688_s1 + $0x154] sm:$0xf0]  ;;  %v6836_v57 = vld [vmem:[%s15688_s1 + $0x2a8] sm:$0xf]  ;;  %v6533_v0 = vor.u32 %v9769_v50, %v6532_v48 }
 0x18c   :  { %5468 = vmatpush.bf16.msra.mxu0 %v9473_v22  ;;  %v6676_v22 = vld [vmem:[%s15688_s1 + $0x168] sm:$0xf]  ;;  %v5238_v18 = vpop.f32.mrf.mxu2  ;;  %v9845_v58 = vld [vmem:[%s15688_s1 + $0x2b4] sm:$0xf0] }
 0x18d   :  { %5481 = vmatpush.bf16.msra.mxu1 %v9601_v39  ;;  %v6997_v39 = vor.u32 %v9885_v7, %v6996_v5  ;;  %v6677_v43 = vor.u32 %v9805_v34, %v6676_v22  ;;  %v5239_v52 = vadd.f32 %v5238_v18, %v5226_v10  ;;  %v9877_v61 = vld [vmem:[%s15688_s1 + $0x3b4] sm:$0xf0]  ;;  %v5227_v63 = vpop.f32.mrf.mxu1  ;;  %v6837_v2 = vor.u32 %v9845_v58, %v6836_v57  ;;  %v6644_v7 = vld [vmem:[%s15688_s1 + $0x128] sm:$0xf] }
 0x18e   :  { %5490 = vmatpush.bf16.msra.mxu2 %v6597_v24  ;;  %v6852_v24 = vld [vmem:[%s15688_s1 + $0x2c8] sm:$0xf]  ;;  %v9765_v5 = vld [vmem:[%s15688_s1 + $0x34] sm:$0xf0] }
 0x18f   :  { %5503 = vmatpush.bf16.msra.mxu3 %v6725_v40  ;;  %v6549_v40 = vor.u32 %v9773_v17, %v6548_v14  ;;  %v6853_v47 = vor.u32 %v9849_v26, %v6852_v24  ;;  %v9841_v10 = vld [vmem:[%s15688_s1 + $0x294] sm:$0xf0]  ;;  %v6932_v50 = vld [vmem:[%s15688_s1 + $0x368] sm:$0xf] }
 0x190   :  { %5469 = vmatpush.bf16.msra.mxu0 %v9457_v51  ;;  %v6660_v51 = vld [vmem:[%s15688_s1 + $0x148] sm:$0xf]  ;;  %v9873_v14 = vld [vmem:[%s15688_s1 + $0x394] sm:$0xf0] }
 0x191   :  { %5482 = vmatpush.bf16.msra.mxu1 %v9585_v54  ;;  %v5251_v54 = vpop.f32.mrf.mxu3  ;;  %v6661_v1 = vor.u32 %v9801_v55, %v6660_v51  ;;  %v9837_v48 = vld [vmem:[%s15688_s1 + $0x274] sm:$0xf0]  ;;  %v7252_v55 = vld [vmem:[%s15688_s1 + $0x5e8] sm:$0xf] }
 0x192   :  { %5491 = vmatpush.bf16.msra.mxu2 %v6581_v36  ;;  %v6981_v36 = vor.u32 %v9881_v32, %v6980_v27  ;;  %v5252_v62 = vadd.f32 %v5251_v54, %v5239_v52  ;;  %v9761_v27 = vld [vmem:[%s15688_s1 + $0x14] sm:$0xf0]  ;;  %v6628_v32 = vld [vmem:[%s15688_s1 + $0x108] sm:$0xf] }
 0x193   :  { %5504 = vmatpush.bf16.msra.mxu3 %v6709_v59  ;;  %v6964_v59 = vld [vmem:[%s15688_s1 + $0x3a8] sm:$0xf]  ;;  %v9869_v51 = vld [vmem:[%s15688_s1 + $0x374] sm:$0xf0] }
 0x194   :  { %5470 = vmatpush.bf16.msra.mxu0 %v9441_v3  ;;  %v6516_v3 = vld [vmem:[%s15688_s1 + $0x28] sm:$0xf]  ;;  %v6965_v60 = vor.u32 %v9877_v61, %v6964_v59  ;;  %v5240_v34 = vpop.f32.mrf.mxu2  ;;  %v9917_v54 = vld [vmem:[%s15688_s1 + $0x4f4] sm:$0xf0]  ;;  %v6933_v61 = vor.u32 %v9869_v51, %v6932_v50 }
 0x195   :  { %5483 = vmatpush.bf16.msra.mxu1 %v9569_v9  ;;  %v9797_v9 = vld [vmem:[%s15688_s1 + $0x134] sm:$0xf0]  ;;  %v6517_v17 = vor.u32 %v9765_v5, %v6516_v3  ;;  %v7124_v52 = vld [vmem:[%s15688_s1 + $0x4e8] sm:$0xf] }
 0x196   :  { %5492 = vmatpush.bf16.msra.mxu2 %v6565_v8  ;;  %v6820_v8 = vld [vmem:[%s15688_s1 + $0x288] sm:$0xf]  ;;  %v6645_v24 = vor.u32 %v9797_v9, %v6644_v7  ;;  %v9949_v57 = vld [vmem:[%s15688_s1 + $0x5f4] sm:$0xf0] }
 0x197   :  { %5505 = vmatpush.bf16.msra.mxu3 %v6693_v12  ;;  %5471 = vmatmul.bf16.vlgmr.msra.gmra.mxu0 %v11925_v19  ;;  %v5264_v12 = vpop.f32.mrf.mxu0  ;;  %v6821_v26 = vor.u32 %v9841_v10, %v6820_v8  ;;  %v6788_v63 = vld [vmem:[%s15688_s1 + $0x248] sm:$0xf]  ;;  %v9865_v3 = vld [vmem:[%s15688_s1 + $0x354] sm:$0xf0] }
 0x198   :  { %5515 = vmatpush.bf16.msrb.mxu0 %v6869_v13  ;;  %9627 = vmatmul.msk.bf16.vlgmr.msra.gmra.mxu1 %vm4835_vm0, %v12028_v56  ;;  %v6948_v13 = vld [vmem:[%s15688_s1 + $0x388] sm:$0xf]  ;;  %v13269_v22 = vadd.f32 %v5264_v12, %v5252_v62  ;;  %v7125_v62 = vor.u32 %v9917_v54, %v7124_v52  ;;  %v9913_v7 = vld [vmem:[%s15688_s1 + $0x4d4] sm:$0xf0] }
 0x199   :  { %5528 = vmatpush.bf16.msrb.mxu1 %v6997_v39  ;;  %v6500_v39 = vld [vmem:[%s15688_s1 + $0x8] sm:$0xf]  ;;  %v5253_v18 = vpop.f32.mrf.mxu3  ;;  %v9945_v8 = vld [vmem:[%s15688_s1 + $0x5d4] sm:$0xf0] }
 0x19a   :  { %5493 = vmatpush.bf16.msra.mxu2 %v6549_v40  ;;  %v9793_v40 = vld [vmem:[%s15688_s1 + $0x114] sm:$0xf0]  ;;  %v7108_v5 = vld [vmem:[%s15688_s1 + $0x4c8] sm:$0xf] }
 0x19b   :  { %5506 = vmatpush.bf16.msra.mxu3 %v6677_v43  ;;  %v6949_v43 = vor.u32 %v9873_v14, %v6948_v13  ;;  %v6629_v58 = vor.u32 %v9793_v40, %v6628_v32  ;;  %v7236_v9 = vld [vmem:[%s15688_s1 + $0x5c8] sm:$0xf]  ;;  %v7109_v13 = vor.u32 %v9913_v7, %v7108_v5  ;;  %v9941_v40 = vld [vmem:[%s15688_s1 + $0x5b4] sm:$0xf0] }
 0x19c   :  { %5516 = vmatpush.bf16.msrb.mxu0 %v6853_v47  ;;  %v6804_v47 = vld [vmem:[%s15688_s1 + $0x268] sm:$0xf]  ;;  %v7237_v34 = vor.u32 %v9945_v8, %v7236_v9  ;;  %v9825_v50 = vld [vmem:[%s15688_s1 + $0x214] sm:$0xf0] }
 0x19d   :  { %5529 = vmatpush.bf16.msrb.mxu1 %v6981_v36  ;;  %v6501_v36 = vor.u32 %v9761_v27, %v6500_v39  ;;  %v6805_v59 = vor.u32 %v9837_v48, %v6804_v47  ;;  %v6772_v14 = vld [vmem:[%s15688_s1 + $0x228] sm:$0xf]  ;;  %v9909_v27 = vld [vmem:[%s15688_s1 + $0x4b4] sm:$0xf0] }
 0x19e   :  { %5494 = vmatpush.bf16.msra.mxu2 %v6533_v0  ;;  %v9833_v0 = vld [vmem:[%s15688_s1 + $0x254] sm:$0xf0]  ;;  %v6900_v39 = vld [vmem:[%s15688_s1 + $0x328] sm:$0xf] }
 0x19f   :  { %5507 = vmatpush.bf16.msra.mxu3 %v6661_v1  ;;  %v6916_v1 = vld [vmem:[%s15688_s1 + $0x348] sm:$0xf]  ;;  %v6789_v10 = vor.u32 %v9833_v0, %v6788_v63  ;;  %v9857_v52 = vld [vmem:[%s15688_s1 + $0x314] sm:$0xf0] }
 0x1a0   :  { %5517 = vmatpush.bf16.msrb.mxu0 %v6837_v2  ;;  %v7253_v2 = vor.u32 %v9949_v57, %v7252_v55  ;;  %v6917_v12 = vor.u32 %v9865_v3, %v6916_v1  ;;  %v7220_v32 = vld [vmem:[%s15688_s1 + $0x5a8] sm:$0xf]  ;;  %v9905_v55 = vld [vmem:[%s15688_s1 + $0x494] sm:$0xf0] }
 0x1a1   :  { %5530 = vmatpush.bf16.msrb.mxu1 %v6965_v60  ;;  %v5266_v60 = vpop.f32.mrf.mxu0  ;;  %v6884_v51 = vld [vmem:[%s15688_s1 + $0x308] sm:$0xf]  ;;  %v7221_v54 = vor.u32 %v9941_v40, %v7220_v32  ;;  %v9901_v9 = vld [vmem:[%s15688_s1 + $0x474] sm:$0xf0] }
 0x1a2   :  { %5495 = vmatpush.bf16.msra.mxu2 %v6517_v17  ;;  %v9829_v17 = vld [vmem:[%s15688_s1 + $0x234] sm:$0xf0]  ;;  %v7204_v57 = vld [vmem:[%s15688_s1 + $0x588] sm:$0xf]  ;;  %v6885_v3 = vor.u32 %v9857_v52, %v6884_v51 }
 0x1a3   :  { %5508 = vmatpush.bf16.msra.mxu3 %v6645_v24  ;;  %v9861_v24 = vld [vmem:[%s15688_s1 + $0x334] sm:$0xf0]  ;;  %v6773_v18 = vor.u32 %v9829_v17, %v6772_v14  ;;  %v7508_v1 = vld [vmem:[%s15688_s1 + $0x7e8] sm:$0xf] }
 0x1a4   :  { %5518 = vmatpush.bf16.msrb.mxu0 %v6821_v26  ;;  %v7092_v26 = vld [vmem:[%s15688_s1 + $0x4a8] sm:$0xf]  ;;  %v6901_v47 = vor.u32 %v9861_v24, %v6900_v39  ;;  %v9977_v14 = vld [vmem:[%s15688_s1 + $0x6d4] sm:$0xf0] }
 0x1a5   :  { %5531 = vmatpush.bf16.msrb.mxu1 %v6949_v43  ;;  %v6756_v43 = vld [vmem:[%s15688_s1 + $0x208] sm:$0xf]  ;;  %v7093_v48 = vor.u32 %v9909_v27, %v7092_v26  ;;  %v10009_v39 = vld [vmem:[%s15688_s1 + $0x7d4] sm:$0xf0] }
 0x1a6   :  { %5496 = vmatpush.bf16.msra.mxu2 %v6501_v36  ;;  %v7076_v36 = vld [vmem:[%s15688_s1 + $0x488] sm:$0xf]  ;;  %v6757_v0 = vor.u32 %v9825_v50, %v6756_v43  ;;  %v9929_v50 = vld [vmem:[%s15688_s1 + $0x554] sm:$0xf0] }
 0x1a7   :  { %5509 = vmatpush.bf16.msra.mxu3 %v6629_v58  ;;  %v5277_v58 = vpop.f32.mrf.mxu1  ;;  %v7077_v5 = vor.u32 %v9905_v55, %v7076_v36  ;;  %v7188_v8 = vld [vmem:[%s15688_s1 + $0x568] sm:$0xf]  ;;  %v9973_v52 = vld [vmem:[%s15688_s1 + $0x6b4] sm:$0xf0] }
 0x1a8   :  { %5519 = vmatpush.bf16.msrb.mxu0 %v6805_v59  ;;  %v9937_v59 = vld [vmem:[%s15688_s1 + $0x594] sm:$0xf0]  ;;  %v5278_v63 = vadd.f32 %v5277_v58, %v13269_v22  ;;  %v7060_v22 = vld [vmem:[%s15688_s1 + $0x468] sm:$0xf] }
 0x1a9   :  { %5532 = vmatpush.bf16.msrb.mxu1 %v6933_v61  ;;  %5497 = vmatmul.bf16.vlgmr.msra.gmra.mxu2 %v10917_v20  ;;  %v7380_v61 = vld [vmem:[%s15688_s1 + $0x6e8] sm:$0xf]  ;;  %v7205_v7 = vor.u32 %v9937_v59, %v7204_v57  ;;  %v10005_v55 = vld [vmem:[%s15688_s1 + $0x7b4] sm:$0xf0] }
 0x1aa   :  { %5541 = vmatpush.bf16.msrb.mxu2 %v7125_v62  ;;  %5510 = vmatmul.bf16.vlgmr.msra.gmra.mxu3 %v10920_v21  ;;  %v9981_v62 = vld [vmem:[%s15688_s1 + $0x6f4] sm:$0xf0]  ;;  %v7492_v17 = vld [vmem:[%s15688_s1 + $0x7c8] sm:$0xf] }
 0x1ab   :  { %5554 = vmatpush.bf16.msrb.mxu3 %v7253_v2  ;;  %v10013_v2 = vld [vmem:[%s15688_s1 + $0x7f4] sm:$0xf0]  ;;  %v7381_v60 = vor.u32 %v9981_v62, %v7380_v61  ;;  %v7044_v40 = vld [vmem:[%s15688_s1 + $0x448] sm:$0xf] }
 0x1ac   :  { %5520 = vmatpush.bf16.msrb.mxu0 %v6789_v10  ;;  %v7509_v10 = vor.u32 %v10013_v2, %v7508_v1  ;;  %v5290_v26 = vpop.f32.mrf.mxu2  ;;  %v7172_v43 = vld [vmem:[%s15688_s1 + $0x548] sm:$0xf]  ;;  %v9925_v2 = vld [vmem:[%s15688_s1 + $0x534] sm:$0xf0] }
 0x1ad   :  { %5533 = vmatpush.bf16.msrb.mxu1 %v6917_v12  ;;  %v9933_v12 = vld [vmem:[%s15688_s1 + $0x574] sm:$0xf0]  ;;  %v5303_v32 = vpop.f32.mrf.mxu3  ;;  %v7348_v51 = vld [vmem:[%s15688_s1 + $0x6a8] sm:$0xf]  ;;  %v7173_v59 = vor.u32 %v9929_v50, %v7172_v43 }
 0x1ae   :  { %5542 = vmatpush.bf16.msrb.mxu2 %v7109_v13  ;;  %v7364_v13 = vld [vmem:[%s15688_s1 + $0x6c8] sm:$0xf]  ;;  %v7189_v24 = vor.u32 %v9933_v12, %v7188_v8  ;;  %v7349_v61 = vor.u32 %v9973_v52, %v7348_v51  ;;  %v10077_v51 = vld [vmem:[%s15688_s1 + $0x9f4] sm:$0xf0] }
 0x1af   :  { %5555 = vmatpush.bf16.msrb.mxu3 %v7237_v34  ;;  %v7061_v34 = vor.u32 %v9901_v9, %v7060_v22  ;;  %v7365_v27 = vor.u32 %v9977_v14, %v7364_v13  ;;  %v7476_v36 = vld [vmem:[%s15688_s1 + $0x7a8] sm:$0xf]  ;;  %v10001_v22 = vld [vmem:[%s15688_s1 + $0x794] sm:$0xf0] }
 0x1b0   :  { %5521 = vmatpush.bf16.msrb.mxu0 %v6773_v18  ;;  %v9897_v18 = vld [vmem:[%s15688_s1 + $0x454] sm:$0xf0]  ;;  %v7028_v62 = vld [vmem:[%s15688_s1 + $0x428] sm:$0xf]  ;;  %v7477_v1 = vor.u32 %v10005_v55, %v7476_v36 }
 0x1b1   :  { %5534 = vmatpush.bf16.msrb.mxu1 %v6901_v47  ;;  %v5291_v47 = vadd.f32 %v5290_v26, %v5278_v63  ;;  %v7045_v58 = vor.u32 %v9897_v18, %v7044_v40  ;;  %v9893_v63 = vld [vmem:[%s15688_s1 + $0x434] sm:$0xf0]  ;;  %v7444_v40 = vld [vmem:[%s15688_s1 + $0x768] sm:$0xf] }
 0x1b2   :  { %5543 = vmatpush.bf16.msrb.mxu2 %v7093_v48  ;;  %v7493_v48 = vor.u32 %v10009_v39, %v7492_v17  ;;  %v7029_v8 = vor.u32 %v9893_v63, %v7028_v62  ;;  %v9889_v14 = vld [vmem:[%s15688_s1 + $0x414] sm:$0xf0]  ;;  %v7140_v17 = vld [vmem:[%s15688_s1 + $0x508] sm:$0xf] }
 0x1b3   :  { %5556 = vmatpush.bf16.msrb.mxu3 %v7221_v54  ;;  %v5279_v54 = vpop.f32.mrf.mxu1  ;;  %v5304_v57 = vadd.f32 %v5303_v32, %v5291_v47  ;;  %v9921_v39 = vld [vmem:[%s15688_s1 + $0x514] sm:$0xf0]  ;;  %v7636_v43 = vld [vmem:[%s15688_s1 + $0x8e8] sm:$0xf] }
 0x1b4   :  { %5522 = vmatpush.bf16.msrb.mxu0 %v6757_v0  ;;  %v7156_v0 = vld [vmem:[%s15688_s1 + $0x528] sm:$0xf]  ;;  %v9965_v32 = vld [vmem:[%s15688_s1 + $0x674] sm:$0xf0]  ;;  %v7141_v52 = vor.u32 %v9921_v39, %v7140_v17 }
 0x1b5   :  { %5535 = vmatpush.bf16.msrb.mxu1 %v6885_v3  ;;  %v7332_v3 = vld [vmem:[%s15688_s1 + $0x688] sm:$0xf]  ;;  %v7157_v12 = vor.u32 %v9925_v2, %v7156_v0  ;;  %v9997_v18 = vld [vmem:[%s15688_s1 + $0x774] sm:$0xf0] }
 0x1b6   :  { %5544 = vmatpush.bf16.msrb.mxu2 %v7077_v5  ;;  %v9969_v5 = vld [vmem:[%s15688_s1 + $0x694] sm:$0xf0]  ;;  %v7764_v50 = vld [vmem:[%s15688_s1 + $0x9e8] sm:$0xf]  ;;  %v7445_v36 = vor.u32 %v9997_v18, %v7444_v40 }
 0x1b7   :  { %5557 = vmatpush.bf16.msrb.mxu3 %v7205_v7  ;;  %5523 = vmatmul.bf16.vlgmr.msrb.gmra.mxu0 %v10885_v4  ;;  %v5316_v7 = vpop.f32.mrf.mxu0  ;;  %v7333_v13 = vor.u32 %v9969_v5, %v7332_v3  ;;  %v10045_v47 = vld [vmem:[%s15688_s1 + $0x8f4] sm:$0xf0]  ;;  %v7620_v63 = vld [vmem:[%s15688_s1 + $0x8c8] sm:$0xf] }
 0x1b8   :  { %5567 = vmatpush.bf16.msra.mxu0 %v7381_v60  ;;  %5536 = vmatmul.bf16.vlgmr.msrb.gmra.mxu1 %v10890_v6  ;;  %v7460_v60 = vld [vmem:[%s15688_s1 + $0x788] sm:$0xf]  ;;  %v13468_v9 = vadd.f32 %v5316_v7, %v5304_v57  ;;  %v7637_v55 = vor.u32 %v10045_v47, %v7636_v43  ;;  %v9993_v62 = vld [vmem:[%s15688_s1 + $0x754] sm:$0xf0] }
 0x1b9   :  { %5580 = vmatpush.bf16.msra.mxu1 %v7509_v10  ;;  %v7012_v10 = vld [vmem:[%s15688_s1 + $0x408] sm:$0xf]  ;;  %v7461_v26 = vor.u32 %v10001_v22, %v7460_v60  ;;  %v10041_v0 = vld [vmem:[%s15688_s1 + $0x8d4] sm:$0xf0] }
 0x1ba   :  { %5545 = vmatpush.bf16.msrb.mxu2 %v7061_v34  ;;  %v5292_v34 = vpop.f32.mrf.mxu2  ;;  %v7300_v57 = vld [vmem:[%s15688_s1 + $0x648] sm:$0xf]  ;;  %v10073_v3 = vld [vmem:[%s15688_s1 + $0x9d4] sm:$0xf0]  ;;  %v7621_v60 = vor.u32 %v10041_v0, %v7620_v63 }
 0x1bb   :  { %5558 = vmatpush.bf16.msrb.mxu3 %v7189_v24  ;;  %v5305_v24 = vpop.f32.mrf.mxu3  ;;  %v7748_v2 = vld [vmem:[%s15688_s1 + $0x9c8] sm:$0xf]  ;;  %v10037_v17 = vld [vmem:[%s15688_s1 + $0x8b4] sm:$0xf0] }
 0x1bc   :  { %5568 = vmatpush.bf16.msra.mxu0 %v7365_v27  ;;  %v7316_v27 = vld [vmem:[%s15688_s1 + $0x668] sm:$0xf]  ;;  %v10069_v34 = vld [vmem:[%s15688_s1 + $0x9b4] sm:$0xf0] }
 0x1bd   :  { %5581 = vmatpush.bf16.msra.mxu1 %v7493_v48  ;;  %v7013_v48 = vor.u32 %v9889_v14, %v7012_v10  ;;  %v7317_v54 = vor.u32 %v9965_v32, %v7316_v27  ;;  %v7284_v22 = vld [vmem:[%s15688_s1 + $0x628] sm:$0xf]  ;;  %v9953_v40 = vld [vmem:[%s15688_s1 + $0x614] sm:$0xf0] }
 0x1be   :  { %5546 = vmatpush.bf16.msrb.mxu2 %v7045_v58  ;;  %v9961_v58 = vld [vmem:[%s15688_s1 + $0x654] sm:$0xf0]  ;;  %v7412_v10 = vld [vmem:[%s15688_s1 + $0x728] sm:$0xf] }
 0x1bf   :  { %5559 = vmatpush.bf16.msrb.mxu3 %v7173_v59  ;;  %v7428_v59 = vld [vmem:[%s15688_s1 + $0x748] sm:$0xf]  ;;  %v7301_v5 = vor.u32 %v9961_v58, %v7300_v57  ;;  %v9985_v43 = vld [vmem:[%s15688_s1 + $0x714] sm:$0xf0] }
 0x1c0   :  { %5569 = vmatpush.bf16.msra.mxu0 %v7349_v61  ;;  %v7765_v61 = vor.u32 %v10077_v51, %v7764_v50  ;;  %v7429_v7 = vor.u32 %v9993_v62, %v7428_v59  ;;  %v7604_v14 = vld [vmem:[%s15688_s1 + $0x8a8] sm:$0xf]  ;;  %v10033_v50 = vld [vmem:[%s15688_s1 + $0x894] sm:$0xf0] }
 0x1c1   :  { %5582 = vmatpush.bf16.msra.mxu1 %v7477_v1  ;;  %v5318_v1 = vpop.f32.mrf.mxu0  ;;  %v7732_v39 = vld [vmem:[%s15688_s1 + $0x9a8] sm:$0xf]  ;;  %v7605_v32 = vor.u32 %v10037_v17, %v7604_v14 }
 0x1c2   :  { %5547 = vmatpush.bf16.msrb.mxu2 %v7029_v8  ;;  %v9957_v8 = vld [vmem:[%s15688_s1 + $0x634] sm:$0xf0]  ;;  %v7396_v18 = vld [vmem:[%s15688_s1 + $0x708] sm:$0xf]  ;;  %v7733_v47 = vor.u32 %v10069_v34, %v7732_v39 }
 0x1c3   :  { %5560 = vmatpush.bf16.msrb.mxu3 %v7157_v12  ;;  %v7749_v12 = vor.u32 %v10073_v3, %v7748_v2  ;;  %v7285_v24 = vor.u32 %v9957_v8, %v7284_v22  ;;  %v7716_v51 = vld [vmem:[%s15688_s1 + $0x988] sm:$0xf]  ;;  %v7397_v62 = vor.u32 %v9985_v43, %v7396_v18  ;;  %v10029_v2 = vld [vmem:[%s15688_s1 + $0x874] sm:$0xf0] }
 0x1c4   :  { %5570 = vmatpush.bf16.msra.mxu0 %v7333_v13  ;;  %v9989_v13 = vld [vmem:[%s15688_s1 + $0x734] sm:$0xf0]  ;;  %v8020_v59 = vld [vmem:[%s15688_s1 + $0xbe8] sm:$0xf] }
 0x1c5   :  { %5583 = vmatpush.bf16.msra.mxu1 %v7461_v26  ;;  %v7268_v26 = vld [vmem:[%s15688_s1 + $0x608] sm:$0xf]  ;;  %v7413_v27 = vor.u32 %v9989_v13, %v7412_v10  ;;  %v10105_v22 = vld [vmem:[%s15688_s1 + $0xad4] sm:$0xf0] }
 0x1c6   :  { %5548 = vmatpush.bf16.msrb.mxu2 %v7013_v48  ;;  %v7588_v48 = vld [vmem:[%s15688_s1 + $0x888] sm:$0xf]  ;;  %v7269_v58 = vor.u32 %v9953_v40, %v7268_v26  ;;  %v10137_v10 = vld [vmem:[%s15688_s1 + $0xbd4] sm:$0xf0] }
 0x1c7   :  { %5561 = vmatpush.bf16.msrb.mxu3 %v7141_v52  ;;  %v5329_v52 = vpop.f32.mrf.mxu1  ;;  %v7589_v63 = vor.u32 %v10033_v50, %v7588_v48  ;;  %v7700_v3 = vld [vmem:[%s15688_s1 + $0x968] sm:$0xf]  ;;  %v10057_v40 = vld [vmem:[%s15688_s1 + $0x954] sm:$0xf0] }
 0x1c8   :  { %5571 = vmatpush.bf16.msra.mxu0 %v7317_v54  ;;  %v10065_v54 = vld [vmem:[%s15688_s1 + $0x994] sm:$0xf0]  ;;  %v5330_v57 = vadd.f32 %v5329_v52, %v13468_v9  ;;  %v7572_v9 = vld [vmem:[%s15688_s1 + $0x868] sm:$0xf] }
 0x1c9   :  { %5584 = vmatpush.bf16.msra.mxu1 %v7445_v36  ;;  %5549 = vmatmul.bf16.vlgmr.msrb.gmra.mxu2 %v11076_v41  ;;  %v7892_v36 = vld [vmem:[%s15688_s1 + $0xae8] sm:$0xf]  ;;  %v7717_v0 = vor.u32 %v10065_v54, %v7716_v51  ;;  %v10101_v43 = vld [vmem:[%s15688_s1 + $0xab4] sm:$0xf0] }
 0x1ca   :  { %5593 = vmatpush.bf16.msra.mxu2 %v7637_v55  ;;  %5562 = vmatmul.bf16.vlgmr.msrb.gmra.mxu3 %v11080_v44  ;;  %v10109_v55 = vld [vmem:[%s15688_s1 + $0xaf4] sm:$0xf0]  ;;  %v8004_v8 = vld [vmem:[%s15688_s1 + $0xbc8] sm:$0xf] }
 0x1cb   :  { %5606 = vmatpush.bf16.msra.mxu3 %v7765_v61  ;;  %v10141_v61 = vld [vmem:[%s15688_s1 + $0xbf4] sm:$0xf0]  ;;  %v7893_v1 = vor.u32 %v10109_v55, %v7892_v36  ;;  %v7556_v34 = vld [vmem:[%s15688_s1 + $0x848] sm:$0xf] }
 0x1cc   :  { %5572 = vmatpush.bf16.msra.mxu0 %v7301_v5  ;;  %v8021_v5 = vor.u32 %v10141_v61, %v8020_v59  ;;  %v5342_v14 = vpop.f32.mrf.mxu2  ;;  %v7684_v26 = vld [vmem:[%s15688_s1 + $0x948] sm:$0xf]  ;;  %v10133_v50 = vld [vmem:[%s15688_s1 + $0xbb4] sm:$0xf0] }
 0x1cd   :  { %5585 = vmatpush.bf16.msra.mxu1 %v7429_v7  ;;  %v10061_v7 = vld [vmem:[%s15688_s1 + $0x974] sm:$0xf0]  ;;  %v5355_v39 = vpop.f32.mrf.mxu3  ;;  %v7860_v18 = vld [vmem:[%s15688_s1 + $0xaa8] sm:$0xf]  ;;  %v7685_v54 = vor.u32 %v10057_v40, %v7684_v26 }
 0x1ce   :  { %5594 = vmatpush.bf16.msra.mxu2 %v7621_v60  ;;  %v7876_v60 = vld [vmem:[%s15688_s1 + $0xac8] sm:$0xf]  ;;  %v7701_v13 = vor.u32 %v10061_v7, %v7700_v3  ;;  %v7861_v36 = vor.u32 %v10101_v43, %v7860_v18  ;;  %v10053_v61 = vld [vmem:[%s15688_s1 + $0x934] sm:$0xf0] }
 0x1cf   :  { %5607 = vmatpush.bf16.msra.mxu3 %v7749_v12  ;;  %v7573_v12 = vor.u32 %v10029_v2, %v7572_v9  ;;  %v7877_v17 = vor.u32 %v10105_v22, %v7876_v60  ;;  %v7988_v48 = vld [vmem:[%s15688_s1 + $0xba8] sm:$0xf]  ;;  %v10129_v9 = vld [vmem:[%s15688_s1 + $0xb94] sm:$0xf0] }
 0x1d0   :  { %5573 = vmatpush.bf16.msra.mxu0 %v7285_v24  ;;  %v10025_v24 = vld [vmem:[%s15688_s1 + $0x854] sm:$0xf0]  ;;  %v7540_v55 = vld [vmem:[%s15688_s1 + $0x828] sm:$0xf]  ;;  %v7989_v59 = vor.u32 %v10133_v50, %v7988_v48 }
 0x1d1   :  { %5586 = vmatpush.bf16.msra.mxu1 %v7413_v27  ;;  %v5343_v27 = vadd.f32 %v5342_v14, %v5330_v57  ;;  %v7557_v52 = vor.u32 %v10025_v24, %v7556_v34  ;;  %v10021_v57 = vld [vmem:[%s15688_s1 + $0x834] sm:$0xf0]  ;;  %v7956_v34 = vld [vmem:[%s15688_s1 + $0xb68] sm:$0xf] }
 0x1d2   :  { %5595 = vmatpush.bf16.msra.mxu2 %v7605_v32  ;;  %v8005_v32 = vor.u32 %v10137_v10, %v8004_v8  ;;  %v7541_v3 = vor.u32 %v10021_v57, %v7540_v55  ;;  %v10017_v22 = vld [vmem:[%s15688_s1 + $0x814] sm:$0xf0]  ;;  %v7652_v8 = vld [vmem:[%s15688_s1 + $0x908] sm:$0xf] }
 0x1d3   :  { %5608 = vmatpush.bf16.msra.mxu3 %v7733_v47  ;;  %v5331_v47 = vpop.f32.mrf.mxu1  ;;  %v5356_v51 = vadd.f32 %v5355_v39, %v5343_v27  ;;  %v10049_v10 = vld [vmem:[%s15688_s1 + $0x914] sm:$0xf0]  ;;  %v8148_v26 = vld [vmem:[%s15688_s1 + $0xce8] sm:$0xf] }
 0x1d4   :  { %5574 = vmatpush.bf16.msra.mxu0 %v7269_v58  ;;  %v7668_v58 = vld [vmem:[%s15688_s1 + $0x928] sm:$0xf]  ;;  %v10093_v39 = vld [vmem:[%s15688_s1 + $0xa74] sm:$0xf0]  ;;  %v7653_v43 = vor.u32 %v10049_v10, %v7652_v8 }
 0x1d5   :  { %5587 = vmatpush.bf16.msra.mxu1 %v7397_v62  ;;  %v7844_v62 = vld [vmem:[%s15688_s1 + $0xa88] sm:$0xf]  ;;  %v7669_v7 = vor.u32 %v10053_v61, %v7668_v58  ;;  %v10125_v24 = vld [vmem:[%s15688_s1 + $0xb74] sm:$0xf0] }
 0x1d6   :  { %5596 = vmatpush.bf16.msra.mxu2 %v7589_v63  ;;  %v10097_v63 = vld [vmem:[%s15688_s1 + $0xa94] sm:$0xf0]  ;;  %v8276_v40 = vld [vmem:[%s15688_s1 + $0xde8] sm:$0xf]  ;;  %v7957_v48 = vor.u32 %v10125_v24, %v7956_v34 }
 0x1d7   :  { %5609 = vmatpush.bf16.msra.mxu3 %v7717_v0  ;;  %5575 = vmatmul.bf16.vlgmr.msra.gmra.mxu0 %v11068_v38  ;;  %v5368_v0 = vpop.f32.mrf.mxu0  ;;  %v7845_v60 = vor.u32 %v10097_v63, %v7844_v62  ;;  %v10173_v27 = vld [vmem:[%s15688_s1 + $0xcf4] sm:$0xf0]  ;;  %v8132_v57 = vld [vmem:[%s15688_s1 + $0xcc8] sm:$0xf] }
 0x1d8   :  { %5619 = vmatpush.bf16.msrb.mxu0 %v7893_v1  ;;  %5588 = vmatmul.bf16.vlgmr.msra.gmra.mxu1 %v11078_v42  ;;  %v7972_v1 = vld [vmem:[%s15688_s1 + $0xb88] sm:$0xf]  ;;  %v13667_v2 = vadd.f32 %v5368_v0, %v5356_v51  ;;  %v10205_v18 = vld [vmem:[%s15688_s1 + $0xdf4] sm:$0xf0]  ;;  %v8149_v50 = vor.u32 %v10173_v27, %v8148_v26 }
 0x1d9   :  { %5632 = vmatpush.bf16.msrb.mxu1 %v8021_v5  ;;  %v7524_v5 = vld [vmem:[%s15688_s1 + $0x808] sm:$0xf]  ;;  %v7973_v14 = vor.u32 %v10129_v9, %v7972_v1  ;;  %v10121_v55 = vld [vmem:[%s15688_s1 + $0xb54] sm:$0xf0] }
 0x1da   :  { %5597 = vmatpush.bf16.msra.mxu2 %v7573_v12  ;;  %v5344_v12 = vpop.f32.mrf.mxu2  ;;  %v7812_v51 = vld [vmem:[%s15688_s1 + $0xa48] sm:$0xf]  ;;  %v10169_v58 = vld [vmem:[%s15688_s1 + $0xcd4] sm:$0xf0] }
 0x1db   :  { %5610 = vmatpush.bf16.msra.mxu3 %v7701_v13  ;;  %v5357_v13 = vpop.f32.mrf.mxu3  ;;  %v8260_v61 = vld [vmem:[%s15688_s1 + $0xdc8] sm:$0xf]  ;;  %v10201_v62 = vld [vmem:[%s15688_s1 + $0xdd4] sm:$0xf0]  ;;  %v8133_v1 = vor.u32 %v10169_v58, %v8132_v57 }
 0x1dc   :  { %5620 = vmatpush.bf16.msrb.mxu0 %v7877_v17  ;;  %v7828_v17 = vld [vmem:[%s15688_s1 + $0xa68] sm:$0xf]  ;;  %v10165_v8 = vld [vmem:[%s15688_s1 + $0xcb4] sm:$0xf0] }
 0x1dd   :  { %5633 = vmatpush.bf16.msrb.mxu1 %v8005_v32  ;;  %v7525_v32 = vor.u32 %v10017_v22, %v7524_v5  ;;  %v7829_v47 = vor.u32 %v10093_v39, %v7828_v17  ;;  %v7796_v9 = vld [vmem:[%s15688_s1 + $0xa28] sm:$0xf]  ;;  %v10197_v12 = vld [vmem:[%s15688_s1 + $0xdb4] sm:$0xf0] }
 0x1de   :  { %5598 = vmatpush.bf16.msra.mxu2 %v7557_v52  ;;  %v10089_v52 = vld [vmem:[%s15688_s1 + $0xa54] sm:$0xf0]  ;;  %v7924_v5 = vld [vmem:[%s15688_s1 + $0xb28] sm:$0xf] }
 0x1df   :  { %5611 = vmatpush.bf16.msra.mxu3 %v7685_v54  ;;  %v7940_v54 = vld [vmem:[%s15688_s1 + $0xb48] sm:$0xf]  ;;  %v7813_v63 = vor.u32 %v10089_v52, %v7812_v51  ;;  %v10081_v34 = vld [vmem:[%s15688_s1 + $0xa14] sm:$0xf0] }
 0x1e0   :  { %5621 = vmatpush.bf16.msrb.mxu0 %v7861_v36  ;;  %v8277_v36 = vor.u32 %v10205_v18, %v8276_v40  ;;  %v7941_v0 = vor.u32 %v10121_v55, %v7940_v54  ;;  %v8116_v22 = vld [vmem:[%s15688_s1 + $0xca8] sm:$0xf]  ;;  %v10113_v26 = vld [vmem:[%s15688_s1 + $0xb14] sm:$0xf0] }
 0x1e1   :  { %5634 = vmatpush.bf16.msrb.mxu1 %v7989_v59  ;;  %v5370_v59 = vpop.f32.mrf.mxu0  ;;  %v8244_v10 = vld [vmem:[%s15688_s1 + $0xda8] sm:$0xf]  ;;  %v8117_v39 = vor.u32 %v10165_v8, %v8116_v22  ;;  %v10161_v40 = vld [vmem:[%s15688_s1 + $0xc94] sm:$0xf0] }
 0x1e2   :  { %5599 = vmatpush.bf16.msra.mxu2 %v7541_v3  ;;  %v10085_v3 = vld [vmem:[%s15688_s1 + $0xa34] sm:$0xf0]  ;;  %v7908_v24 = vld [vmem:[%s15688_s1 + $0xb08] sm:$0xf]  ;;  %v8245_v27 = vor.u32 %v10197_v12, %v8244_v10 }
 0x1e3   :  { %5612 = vmatpush.bf16.msra.mxu3 %v7669_v7  ;;  %v8261_v7 = vor.u32 %v10201_v62, %v8260_v61  ;;  %v7797_v13 = vor.u32 %v10085_v3, %v7796_v9  ;;  %v8228_v18 = vld [vmem:[%s15688_s1 + $0xd88] sm:$0xf]  ;;  %v7909_v55 = vor.u32 %v10113_v26, %v7908_v24  ;;  %v10157_v61 = vld [vmem:[%s15688_s1 + $0xc74] sm:$0xf0] }
 0x1e4   :  { %5622 = vmatpush.bf16.msrb.mxu0 %v7845_v60  ;;  %v10117_v60 = vld [vmem:[%s15688_s1 + $0xb34] sm:$0xf0]  ;;  %v8532_v54 = vld [vmem:[%s15688_s1 + $0xfe8] sm:$0xf] }
 0x1e5   :  { %5635 = vmatpush.bf16.msrb.mxu1 %v7973_v14  ;;  %v7780_v14 = vld [vmem:[%s15688_s1 + $0xa08] sm:$0xf]  ;;  %v7925_v17 = vor.u32 %v10117_v60, %v7924_v5  ;;  %v10233_v9 = vld [vmem:[%s15688_s1 + $0xed4] sm:$0xf0] }
 0x1e6   :  { %5600 = vmatpush.bf16.msra.mxu2 %v7525_v32  ;;  %v8100_v32 = vld [vmem:[%s15688_s1 + $0xc88] sm:$0xf]  ;;  %v7781_v52 = vor.u32 %v10081_v34, %v7780_v14  ;;  %v10265_v5 = vld [vmem:[%s15688_s1 + $0xfd4] sm:$0xf0] }
 0x1e7   :  { %5613 = vmatpush.bf16.msra.mxu3 %v7653_v43  ;;  %v5381_v43 = vpop.f32.mrf.mxu1  ;;  %v8101_v57 = vor.u32 %v10161_v40, %v8100_v32  ;;  %v8212_v62 = vld [vmem:[%s15688_s1 + $0xd68] sm:$0xf]  ;;  %v10185_v34 = vld [vmem:[%s15688_s1 + $0xd54] sm:$0xf0] }
 0x1e8   :  { %5623 = vmatpush.bf16.msrb.mxu0 %v7829_v47  ;;  %v10193_v47 = vld [vmem:[%s15688_s1 + $0xd94] sm:$0xf0]  ;;  %v5382_v51 = vadd.f32 %v5381_v43, %v13667_v2  ;;  %v8084_v2 = vld [vmem:[%s15688_s1 + $0xc68] sm:$0xf] }
 0x1e9   :  { %5636 = vmatpush.bf16.msrb.mxu1 %v7957_v48  ;;  %5601 = vmatmul.bf16.vlgmr.msra.gmra.mxu2 %v11269_v25  ;;  %v8404_v48 = vld [vmem:[%s15688_s1 + $0xee8] sm:$0xf]  ;;  %v8229_v58 = vor.u32 %v10193_v47, %v8228_v18  ;;  %v10229_v26 = vld [vmem:[%s15688_s1 + $0xeb4] sm:$0xf0] }
 0x1ea   :  { %5645 = vmatpush.bf16.msrb.mxu2 %v8149_v50  ;;  %5614 = vmatmul.bf16.vlgmr.msra.gmra.mxu3 %v11282_v30  ;;  %v10237_v50 = vld [vmem:[%s15688_s1 + $0xef4] sm:$0xf0]  ;;  %v8516_v3 = vld [vmem:[%s15688_s1 + $0xfc8] sm:$0xf] }
 0x1eb   :  { %5658 = vmatpush.bf16.msrb.mxu3 %v8277_v36  ;;  %v10269_v36 = vld [vmem:[%s15688_s1 + $0xff4] sm:$0xf0]  ;;  %v8405_v59 = vor.u32 %v10237_v50, %v8404_v48  ;;  %v8068_v12 = vld [vmem:[%s15688_s1 + $0xc48] sm:$0xf] }
 0x1ec   :  { %5624 = vmatpush.bf16.msrb.mxu0 %v7813_v63  ;;  %v8533_v63 = vor.u32 %v10269_v36, %v8532_v54  ;;  %v5394_v22 = vpop.f32.mrf.mxu2  ;;  %v8196_v14 = vld [vmem:[%s15688_s1 + $0xd48] sm:$0xf]  ;;  %v10261_v40 = vld [vmem:[%s15688_s1 + $0xfb4] sm:$0xf0] }
 0x1ed   :  { %5637 = vmatpush.bf16.msrb.mxu1 %v7941_v0  ;;  %v10189_v0 = vld [vmem:[%s15688_s1 + $0xd74] sm:$0xf0]  ;;  %v5407_v10 = vpop.f32.mrf.mxu3  ;;  %v8372_v24 = vld [vmem:[%s15688_s1 + $0xea8] sm:$0xf]  ;;  %v8197_v47 = vor.u32 %v10185_v34, %v8196_v14 }
 0x1ee   :  { %5646 = vmatpush.bf16.msrb.mxu2 %v8133_v1  ;;  %v8388_v1 = vld [vmem:[%s15688_s1 + $0xec8] sm:$0xf]  ;;  %v8213_v60 = vor.u32 %v10189_v0, %v8212_v62  ;;  %v8373_v48 = vor.u32 %v10229_v26, %v8372_v24  ;;  %v10181_v36 = vld [vmem:[%s15688_s1 + $0xd34] sm:$0xf0] }
 0x1ef   :  { %5659 = vmatpush.bf16.msrb.mxu3 %v8261_v7  ;;  %v8085_v7 = vor.u32 %v10157_v61, %v8084_v2  ;;  %v8389_v8 = vor.u32 %v10233_v9, %v8388_v1  ;;  %v8500_v32 = vld [vmem:[%s15688_s1 + $0xfa8] sm:$0xf]  ;;  %v10257_v2 = vld [vmem:[%s15688_s1 + $0xf94] sm:$0xf0] }
 0x1f0   :  { %5625 = vmatpush.bf16.msrb.mxu0 %v7797_v13  ;;  %v10153_v13 = vld [vmem:[%s15688_s1 + $0xc54] sm:$0xf0]  ;;  %v8052_v50 = vld [vmem:[%s15688_s1 + $0xc28] sm:$0xf]  ;;  %v8501_v54 = vor.u32 %v10261_v40, %v8500_v32 }
 0x1f1   :  { %5638 = vmatpush.bf16.msrb.mxu1 %v7925_v17  ;;  %v5395_v17 = vadd.f32 %v5394_v22, %v5382_v51  ;;  %v8069_v43 = vor.u32 %v10153_v13, %v8068_v12  ;;  %v10149_v51 = vld [vmem:[%s15688_s1 + $0xc34] sm:$0xf0]  ;;  %v8468_v12 = vld [vmem:[%s15688_s1 + $0xf68] sm:$0xf] }
 0x1f2   :  { %5647 = vmatpush.bf16.msrb.mxu2 %v8117_v39  ;;  %v8517_v39 = vor.u32 %v10265_v5, %v8516_v3  ;;  %v8053_v62 = vor.u32 %v10149_v51, %v8052_v50  ;;  %v10145_v9 = vld [vmem:[%s15688_s1 + $0xc14] sm:$0xf0]  ;;  %v8164_v3 = vld [vmem:[%s15688_s1 + $0xd08] sm:$0xf] }
 0x1f3   :  { %5660 = vmatpush.bf16.msrb.mxu3 %v8245_v27  ;;  %v5383_v27 = vpop.f32.mrf.mxu1  ;;  %v5408_v18 = vadd.f32 %v5407_v10, %v5395_v17  ;;  %v10177_v5 = vld [vmem:[%s15688_s1 + $0xd14] sm:$0xf0]  ;;  %v8660_v14 = vld [vmem:[%s15688_s1 + $0x10e8] sm:$0xf] }
 0x1f4   :  { %5626 = vmatpush.bf16.msrb.mxu0 %v7781_v52  ;;  %v8180_v52 = vld [vmem:[%s15688_s1 + $0xd28] sm:$0xf]  ;;  %v10221_v10 = vld [vmem:[%s15688_s1 + $0xe74] sm:$0xf0]  ;;  %v8165_v26 = vor.u32 %v10177_v5, %v8164_v3 }
 0x1f5   :  { %5639 = vmatpush.bf16.msrb.mxu1 %v7909_v55  ;;  %v8356_v55 = vld [vmem:[%s15688_s1 + $0xe88] sm:$0xf]  ;;  %v8181_v0 = vor.u32 %v10181_v36, %v8180_v52  ;;  %v10253_v13 = vld [vmem:[%s15688_s1 + $0xf74] sm:$0xf0] }
 0x1f6   :  { %5648 = vmatpush.bf16.msrb.mxu2 %v8101_v57  ;;  %v10225_v57 = vld [vmem:[%s15688_s1 + $0xe94] sm:$0xf0]  ;;  %v8788_v34 = vld [vmem:[%s15688_s1 + $0x11e8] sm:$0xf]  ;;  %v8469_v32 = vor.u32 %v10253_v13, %v8468_v12 }
 0x1f7   :  { %5661 = vmatpush.bf16.msrb.mxu3 %v8229_v58  ;;  %5627 = vmatmul.bf16.vlgmr.msrb.gmra.mxu0 %v11280_v29  ;;  %v5420_v58 = vpop.f32.mrf.mxu0  ;;  %v8357_v1 = vor.u32 %v10225_v57, %v8356_v55  ;;  %v10301_v17 = vld [vmem:[%s15688_s1 + $0x10f4] sm:$0xf0]  ;;  %v8644_v51 = vld [vmem:[%s15688_s1 + $0x10c8] sm:$0xf] }
 0x1f8   :  { %5671 = vmatpush.bf16.msra.mxu0 %v8405_v59  ;;  %5640 = vmatmul.bf16.vlgmr.msrb.gmra.mxu1 %v11290_v33  ;;  %v8484_v59 = vld [vmem:[%s15688_s1 + $0xf88] sm:$0xf]  ;;  %v13866_v61 = vadd.f32 %v5420_v58, %v5408_v18  ;;  %v10333_v24 = vld [vmem:[%s15688_s1 + $0x11f4] sm:$0xf0]  ;;  %v8661_v40 = vor.u32 %v10301_v17, %v8660_v14 }
 0x1f9   :  { %5684 = vmatpush.bf16.msra.mxu1 %v8533_v63  ;;  %v8036_v63 = vld [vmem:[%s15688_s1 + $0xc08] sm:$0xf]  ;;  %v8485_v22 = vor.u32 %v10257_v2, %v8484_v59  ;;  %v10249_v50 = vld [vmem:[%s15688_s1 + $0xf54] sm:$0xf0] }
 0x1fa   :  { %5649 = vmatpush.bf16.msrb.mxu2 %v8085_v7  ;;  %v5396_v7 = vpop.f32.mrf.mxu2  ;;  %v8324_v18 = vld [vmem:[%s15688_s1 + $0xe48] sm:$0xf]  ;;  %v10297_v52 = vld [vmem:[%s15688_s1 + $0x10d4] sm:$0xf0] }
 0x1fb   :  { %5662 = vmatpush.bf16.msrb.mxu3 %v8213_v60  ;;  %v5409_v60 = vpop.f32.mrf.mxu3  ;;  %v8772_v36 = vld [vmem:[%s15688_s1 + $0x11c8] sm:$0xf]  ;;  %v10329_v55 = vld [vmem:[%s15688_s1 + $0x11d4] sm:$0xf0]  ;;  %v8645_v59 = vor.u32 %v10297_v52, %v8644_v51 }
 0x1fc   :  { %5672 = vmatpush.bf16.msra.mxu0 %v8389_v8  ;;  %v8340_v8 = vld [vmem:[%s15688_s1 + $0xe68] sm:$0xf]  ;;  %v10293_v3 = vld [vmem:[%s15688_s1 + $0x10b4] sm:$0xf0] }
 0x1fd   :  { %5685 = vmatpush.bf16.msra.mxu1 %v8517_v39  ;;  %v8037_v39 = vor.u32 %v10145_v9, %v8036_v63  ;;  %v8341_v27 = vor.u32 %v10221_v10, %v8340_v8  ;;  %v8308_v2 = vld [vmem:[%s15688_s1 + $0xe28] sm:$0xf]  ;;  %v10325_v7 = vld [vmem:[%s15688_s1 + $0x11b4] sm:$0xf0] }
 0x1fe   :  { %5650 = vmatpush.bf16.msrb.mxu2 %v8069_v43  ;;  %v10217_v43 = vld [vmem:[%s15688_s1 + $0xe54] sm:$0xf0]  ;;  %v8436_v63 = vld [vmem:[%s15688_s1 + $0xf28] sm:$0xf] }
 0x1ff   :  { %5663 = vmatpush.bf16.msrb.mxu3 %v8197_v47  ;;  %v8452_v47 = vld [vmem:[%s15688_s1 + $0xf48] sm:$0xf]  ;;  %v8325_v57 = vor.u32 %v10217_v43, %v8324_v18  ;;  %v10209_v12 = vld [vmem:[%s15688_s1 + $0xe14] sm:$0xf0] }
 0x200   :  { %5673 = vmatpush.bf16.msra.mxu0 %v8373_v48  ;;  %v8789_v48 = vor.u32 %v10333_v24, %v8788_v34  ;;  %v8453_v58 = vor.u32 %v10249_v50, %v8452_v47  ;;  %v8628_v9 = vld [vmem:[%s15688_s1 + $0x10a8] sm:$0xf]  ;;  %v10241_v14 = vld [vmem:[%s15688_s1 + $0xf14] sm:$0xf0] }
 0x201   :  { %5686 = vmatpush.bf16.msra.mxu1 %v8501_v54  ;;  %v5422_v54 = vpop.f32.mrf.mxu0  ;;  %v8756_v5 = vld [vmem:[%s15688_s1 + $0x11a8] sm:$0xf]  ;;  %v8629_v10 = vor.u32 %v10293_v3, %v8628_v9  ;;  %v10289_v34 = vld [vmem:[%s15688_s1 + $0x1094] sm:$0xf0] }
 0x202   :  { %5651 = vmatpush.bf16.msrb.mxu2 %v8053_v62  ;;  %v10213_v62 = vld [vmem:[%s15688_s1 + $0xe34] sm:$0xf0]  ;;  %v8420_v13 = vld [vmem:[%s15688_s1 + $0xf08] sm:$0xf]  ;;  %v8757_v17 = vor.u32 %v10325_v7, %v8756_v5 }
 0x203   :  { %5664 = vmatpush.bf16.msrb.mxu3 %v8181_v0  ;;  %v8773_v0 = vor.u32 %v10329_v55, %v8772_v36  ;;  %v8309_v60 = vor.u32 %v10213_v62, %v8308_v2  ;;  %v8740_v24 = vld [vmem:[%s15688_s1 + $0x1188] sm:$0xf]  ;;  %v8421_v50 = vor.u32 %v10241_v14, %v8420_v13  ;;  %v10285_v36 = vld [vmem:[%s15688_s1 + $0x1074] sm:$0xf0] }
 0x204   :  { %5674 = vmatpush.bf16.msra.mxu0 %v8357_v1  ;;  %v10245_v1 = vld [vmem:[%s15688_s1 + $0xf34] sm:$0xf0]  ;;  %v9044_v47 = vld [vmem:[%s15688_s1 + $0x13e8] sm:$0xf] }
 0x205   :  { %5687 = vmatpush.bf16.msra.mxu1 %v8485_v22  ;;  %v8292_v22 = vld [vmem:[%s15688_s1 + $0xe08] sm:$0xf]  ;;  %v8437_v8 = vor.u32 %v10245_v1, %v8436_v63  ;;  %v10361_v2 = vld [vmem:[%s15688_s1 + $0x12d4] sm:$0xf0] }
 0x206   :  { %5652 = vmatpush.bf16.msrb.mxu2 %v8037_v39  ;;  %v8612_v39 = vld [vmem:[%s15688_s1 + $0x1088] sm:$0xf]  ;;  %v8293_v43 = vor.u32 %v10209_v12, %v8292_v22  ;;  %v10393_v63 = vld [vmem:[%s15688_s1 + $0x13d4] sm:$0xf0] }
 0x207   :  { %5665 = vmatpush.bf16.msrb.mxu3 %v8165_v26  ;;  %v5433_v26 = vpop.f32.mrf.mxu1  ;;  %v8613_v51 = vor.u32 %v10289_v34, %v8612_v39  ;;  %v8724_v55 = vld [vmem:[%s15688_s1 + $0x1168] sm:$0xf]  ;;  %v10313_v13 = vld [vmem:[%s15688_s1 + $0x1154] sm:$0xf0] }
 0x208   :  { %5675 = vmatpush.bf16.msra.mxu0 %v8341_v27  ;;  %v10321_v27 = vld [vmem:[%s15688_s1 + $0x1194] sm:$0xf0]  ;;  %v5434_v18 = vadd.f32 %v5433_v26, %v13866_v61  ;;  %v8596_v61 = vld [vmem:[%s15688_s1 + $0x1068] sm:$0xf] }
 0x209   :  { %5688 = vmatpush.bf16.msra.mxu1 %v8469_v32  ;;  %5653 = vmatmul.bf16.vlgmr.msrb.gmra.mxu2 %v11479_v23  ;;  %v8916_v32 = vld [vmem:[%s15688_s1 + $0x12e8] sm:$0xf]  ;;  %v8741_v52 = vor.u32 %v10321_v27, %v8740_v24  ;;  %v10389_v34 = vld [vmem:[%s15688_s1 + $0x13b4] sm:$0xf0] }
 0x20a   :  { %5697 = vmatpush.bf16.msra.mxu2 %v8661_v40  ;;  %5666 = vmatmul.bf16.vlgmr.msrb.gmra.mxu3 %v11492_v31  ;;  %v10365_v40 = vld [vmem:[%s15688_s1 + $0x12f4] sm:$0xf0]  ;;  %v9028_v62 = vld [vmem:[%s15688_s1 + $0x13c8] sm:$0xf] }
 0x20b   :  { %5710 = vmatpush.bf16.msra.mxu3 %v8789_v48  ;;  %v10397_v48 = vld [vmem:[%s15688_s1 + $0x13f4] sm:$0xf0]  ;;  %v8917_v54 = vor.u32 %v10365_v40, %v8916_v32  ;;  %v8580_v7 = vld [vmem:[%s15688_s1 + $0x1048] sm:$0xf] }
 0x20c   :  { %5676 = vmatpush.bf16.msra.mxu0 %v8325_v57  ;;  %v9045_v57 = vor.u32 %v10397_v48, %v9044_v47  ;;  %v5446_v9 = vpop.f32.mrf.mxu2  ;;  %v8708_v22 = vld [vmem:[%s15688_s1 + $0x1148] sm:$0xf]  ;;  %v10309_v48 = vld [vmem:[%s15688_s1 + $0x1134] sm:$0xf0] }
 0x20d   :  { %5689 = vmatpush.bf16.msra.mxu1 %v8453_v58  ;;  %v10317_v58 = vld [vmem:[%s15688_s1 + $0x1174] sm:$0xf0]  ;;  %v5459_v5 = vpop.f32.mrf.mxu3  ;;  %v8884_v14 = vld [vmem:[%s15688_s1 + $0x12a8] sm:$0xf]  ;;  %v8709_v27 = vor.u32 %v10313_v13, %v8708_v22 }
 0x20e   :  { %5698 = vmatpush.bf16.msra.mxu2 %v8645_v59  ;;  %v8900_v59 = vld [vmem:[%s15688_s1 + $0x12c8] sm:$0xf]  ;;  %v8725_v1 = vor.u32 %v10317_v58, %v8724_v55 }
 0x20f   :  { %5711 = vmatpush.bf16.msra.mxu3 %v8773_v0  ;;  %v8597_v0 = vor.u32 %v10285_v36, %v8596_v61  ;;  %v8901_v3 = vor.u32 %v10361_v2, %v8900_v59  ;;  %v5435_v12 = vpop.f32.mrf.mxu1  ;;  %v9012_v39 = vld [vmem:[%s15688_s1 + $0x13a8] sm:$0xf]  ;;  %v10385_v61 = vld [vmem:[%s15688_s1 + $0x1394] sm:$0xf0] }
 0x210   :  { %5677 = vmatpush.bf16.msra.mxu0 %v8309_v60  ;;  %v10281_v60 = vld [vmem:[%s15688_s1 + $0x1054] sm:$0xf0]  ;;  %v8564_v40 = vld [vmem:[%s15688_s1 + $0x1028] sm:$0xf]  ;;  %v9013_v47 = vor.u32 %v10389_v34, %v9012_v39 }
 0x211   :  { %5690 = vmatpush.bf16.msra.mxu1 %v8437_v8  ;;  %v5447_v8 = vadd.f32 %v5446_v9, %v5434_v18  ;;  %v8581_v26 = vor.u32 %v10281_v60, %v8580_v7  ;;  %v10277_v18 = vld [vmem:[%s15688_s1 + $0x1034] sm:$0xf0]  ;;  %v8980_v7 = vld [vmem:[%s15688_s1 + $0x1368] sm:$0xf] }
 0x212   :  { %5699 = vmatpush.bf16.msra.mxu2 %v8629_v10  ;;  %v9029_v10 = vor.u32 %v10393_v63, %v9028_v62  ;;  %v8565_v55 = vor.u32 %v10277_v18, %v8564_v40  ;;  %v10273_v2 = vld [vmem:[%s15688_s1 + $0x1014] sm:$0xf0]  ;;  %v8676_v62 = vld [vmem:[%s15688_s1 + $0x1108] sm:$0xf] }
 0x213   :  { %5712 = vmatpush.bf16.msra.mxu3 %v8757_v17  ;;  %v10357_v17 = vld [vmem:[%s15688_s1 + $0x12b4] sm:$0xf0]  ;;  %v5460_v24 = vadd.f32 %v5459_v5, %v5447_v8  ;;  %v9172_v22 = vld [vmem:[%s15688_s1 + $0x14e8] sm:$0xf] }
 0x214   :  { %5678 = vmatpush.bf16.msra.mxu0 %v8293_v43  ;;  %v8885_v32 = vor.u32 %v10357_v17, %v8884_v14  ;;  %v8692_v43 = vld [vmem:[%s15688_s1 + $0x1128] sm:$0xf]  ;;  %v10305_v63 = vld [vmem:[%s15688_s1 + $0x1114] sm:$0xf0] }
 0x215   :  { %5691 = vmatpush.bf16.msra.mxu1 %v8421_v50  ;;  %v8868_v50 = vld [vmem:[%s15688_s1 + $0x1288] sm:$0xf]  ;;  %v8693_v58 = vor.u32 %v10309_v48, %v8692_v43  ;;  %v10349_v5 = vld [vmem:[%s15688_s1 + $0x1274] sm:$0xf0]  ;;  %v8677_v39 = vor.u32 %v10305_v63, %v8676_v62 }
 0x216   :  { %5700 = vmatpush.bf16.msra.mxu2 %v8613_v51  ;;  %v10353_v51 = vld [vmem:[%s15688_s1 + $0x1294] sm:$0xf0]  ;;  %v9300_v13 = vld [vmem:[%s15688_s1 + $0x15e8] sm:$0xf] }
 0x217   :  { %5713 = vmatpush.bf16.msra.mxu3 %v8741_v52  ;;  %5679 = vmatmul.bf16.vlgmr.msra.gmra.mxu0 %v11490_v28  ;;  %v5472_v52 = vpop.f32.mrf.mxu0  ;;  %v8869_v59 = vor.u32 %v10353_v51, %v8868_v50  ;;  %v10381_v60 = vld [vmem:[%s15688_s1 + $0x1374] sm:$0xf0]  ;;  %v8964_v40 = vld [vmem:[%s15688_s1 + $0x1348] sm:$0xf] }
 0x218   :  { %5723 = vmatpush.bf16.msrb.mxu0 %v8917_v54  ;;  %5692 = vmatmul.bf16.vlgmr.msra.gmra.mxu1 %v11500_v35  ;;  %v8996_v54 = vld [vmem:[%s15688_s1 + $0x1388] sm:$0xf]  ;;  %v5473_v36 = vadd.f32 %v5472_v52, %v5460_v24  ;;  %v10429_v8 = vld [vmem:[%s15688_s1 + $0x14f4] sm:$0xf0]  ;;  %v8981_v24 = vor.u32 %v10381_v60, %v8980_v7 }
 0x219   :  { %5736 = vmatpush.bf16.msrb.mxu1 %v9045_v57  ;;  %v8548_v57 = vld [vmem:[%s15688_s1 + $0x1008] sm:$0xf]  ;;  %v8997_v9 = vor.u32 %v10385_v61, %v8996_v54  ;;  %v10461_v14 = vld [vmem:[%s15688_s1 + $0x15f4] sm:$0xf0] }
 0x21a   :  { %5701 = vmatpush.bf16.msra.mxu2 %v8597_v0  ;;  %v5461_v0 = vpop.f32.mrf.mxu3  ;;  %v8549_v12 = vor.u32 %v10273_v2, %v8548_v57  ;;  %v9301_v18 = vor.u32 %v10461_v14, %v9300_v13  ;;  %v10377_v43 = vld [vmem:[%s15688_s1 + $0x1354] sm:$0xf0]  ;;  %v9284_v51 = vld [vmem:[%s15688_s1 + $0x15c8] sm:$0xf] }
 0x21b   :  { %5714 = vmatpush.bf16.msra.mxu3 %v8725_v1  ;;  %v5448_v1 = vpop.f32.mrf.mxu2  ;;  %v10425_v48 = vld [vmem:[%s15688_s1 + $0x14d4] sm:$0xf0]  ;;  %v8965_v61 = vor.u32 %v10377_v43, %v8964_v40  ;;  %v9140_v62 = vld [vmem:[%s15688_s1 + $0x14a8] sm:$0xf] }
 0x21c   :  { %5724 = vmatpush.bf16.msrb.mxu0 %v8901_v3  ;;  %v8852_v3 = vld [vmem:[%s15688_s1 + $0x1268] sm:$0xf]  ;;  %v10457_v52 = vld [vmem:[%s15688_s1 + $0x15d4] sm:$0xf0] }
 0x21d   :  { %5737 = vmatpush.bf16.msrb.mxu1 %v9029_v10  ;;  %v5485_v10 = vpop.f32.mrf.mxu1  ;;  %v8853_v34 = vor.u32 %v10349_v5, %v8852_v3  ;;  %v10341_v57 = vld [vmem:[%s15688_s1 + $0x1234] sm:$0xf0]  ;;  %v9268_v0 = vld [vmem:[%s15688_s1 + $0x15a8] sm:$0xf] }
 0x21e   :  { %5702 = vmatpush.bf16.msra.mxu2 %v8581_v26  ;;  %v14101_v17 = vadd.f32 %v5485_v10, %v5473_v36  ;;  %v9173_v26 = vor.u32 %v10429_v8, %v9172_v22  ;;  %v10373_v2 = vld [vmem:[%s15688_s1 + $0x1334] sm:$0xf0]  ;;  %v8804_v5 = vld [vmem:[%s15688_s1 + $0x1208] sm:$0xf] }
 0x21f   :  { %5715 = vmatpush.bf16.msra.mxu3 %v8709_v27  ;;  %v8836_v27 = vld [vmem:[%s15688_s1 + $0x1248] sm:$0xf]  ;;  %v5474_v50 = vpop.f32.mrf.mxu0  ;;  %v10421_v63 = vld [vmem:[%s15688_s1 + $0x14b4] sm:$0xf0] }
 0x220   :  { %5725 = vmatpush.bf16.msrb.mxu0 %v8885_v32  ;;  %v10345_v32 = vld [vmem:[%s15688_s1 + $0x1254] sm:$0xf0]  ;;  %v9141_v60 = vor.u32 %v10421_v63, %v9140_v62  ;;  %v8932_v8 = vld [vmem:[%s15688_s1 + $0x1308] sm:$0xf] }
 0x221   :  { %5738 = vmatpush.bf16.msrb.mxu1 %v9013_v47  ;;  %v9156_v47 = vld [vmem:[%s15688_s1 + $0x14c8] sm:$0xf]  ;;  %v8837_v54 = vor.u32 %v10345_v32, %v8836_v27  ;;  %v10453_v1 = vld [vmem:[%s15688_s1 + $0x15b4] sm:$0xf0] }
 0x222   :  { %5703 = vmatpush.bf16.msra.mxu2 %v8565_v55  ;;  %v9157_v36 = vor.u32 %v10425_v48, %v9156_v47  ;;  %v8820_v55 = vld [vmem:[%s15688_s1 + $0x1228] sm:$0xf]  ;;  %v10337_v22 = vld [vmem:[%s15688_s1 + $0x1214] sm:$0xf0] }
 0x223   :  { %5716 = vmatpush.bf16.msra.mxu3 %v8693_v58  ;;  %v8948_v58 = vld [vmem:[%s15688_s1 + $0x1328] sm:$0xf]  ;;  %v8821_v3 = vor.u32 %v10341_v57, %v8820_v55  ;;  %v10369_v10 = vld [vmem:[%s15688_s1 + $0x1314] sm:$0xf0]  ;;  %v8805_v27 = vor.u32 %v10337_v22, %v8804_v5 }
 0x224   :  { %5726 = vmatpush.bf16.msrb.mxu0 %v8869_v59  ;;  %v9285_v59 = vor.u32 %v10457_v52, %v9284_v51  ;;  %v8949_v7 = vor.u32 %v10373_v2, %v8948_v58  ;;  %v9124_v13 = vld [vmem:[%s15688_s1 + $0x1488] sm:$0xf]  ;;  %v10417_v14 = vld [vmem:[%s15688_s1 + $0x1494] sm:$0xf0] }
 0x225   :  { %5739 = vmatpush.bf16.msrb.mxu1 %v8997_v9  ;;  %v5487_v9 = vpop.f32.mrf.mxu1  ;;  %v9556_v32 = vld [vmem:[%s15688_s1 + $0x17e8] sm:$0xf]  ;;  %v10525_v40 = vld [vmem:[%s15688_s1 + $0x17f4] sm:$0xf0]  ;;  %v9125_v43 = vor.u32 %v10417_v14, %v9124_v13 }
 0x226   :  { %5704 = vmatpush.bf16.msra.mxu2 %v8549_v12  ;;  %v9269_v12 = vor.u32 %v10453_v1, %v9268_v0  ;;  %v9108_v47 = vld [vmem:[%s15688_s1 + $0x1468] sm:$0xf]  ;;  %v10413_v51 = vld [vmem:[%s15688_s1 + $0x1474] sm:$0xf0] }
 0x227   :  { %5717 = vmatpush.bf16.msra.mxu3 %v8677_v39  ;;  %v9252_v39 = vld [vmem:[%s15688_s1 + $0x1588] sm:$0xf]  ;;  %v10445_v55 = vld [vmem:[%s15688_s1 + $0x1574] sm:$0xf0]  ;;  %v9109_v62 = vor.u32 %v10413_v51, %v9108_v47 }
 0x228   :  { %5727 = vmatpush.bf16.msrb.mxu0 %v8853_v34  ;;  %v10449_v34 = vld [vmem:[%s15688_s1 + $0x1594] sm:$0xf0]  ;;  %v9236_v52 = vld [vmem:[%s15688_s1 + $0x1568] sm:$0xf] }
 0x229   :  { %5740 = vmatpush.bf16.msrb.mxu1 %v8981_v24  ;;  %5705 = vmatmul.bf16.vlgmr.msra.gmra.mxu2 %v11689_v37  ;;  %v9428_v24 = vld [vmem:[%s15688_s1 + $0x16e8] sm:$0xf]  ;;  %v9253_v48 = vor.u32 %v10449_v34, %v9252_v39  ;;  %v10489_v58 = vld [vmem:[%s15688_s1 + $0x16d4] sm:$0xf0]  ;;  %v9237_v0 = vor.u32 %v10445_v55, %v9236_v52 }
 0x22a   :  { %5749 = vmatpush.bf16.msrb.mxu2 %v9173_v26  ;;  %5718 = vmatmul.bf16.vlgmr.msra.gmra.mxu3 %v11702_v46  ;;  %v10493_v26 = vld [vmem:[%s15688_s1 + $0x16f4] sm:$0xf0]  ;;  %v9412_v57 = vld [vmem:[%s15688_s1 + $0x16c8] sm:$0xf] }
 0x22b   :  { %5762 = vmatpush.bf16.msrb.mxu3 %v9301_v18  ;;  %v8933_v18 = vor.u32 %v10369_v10, %v8932_v8  ;;  %v9429_v50 = vor.u32 %v10493_v26, %v9428_v24  ;;  %v10521_v2 = vld [vmem:[%s15688_s1 + $0x17d4] sm:$0xf0]  ;;  %v9413_v1 = vor.u32 %v10489_v58, %v9412_v57  ;;  %v9092_v9 = vld [vmem:[%s15688_s1 + $0x1448] sm:$0xf] }
 0x22c   :  { %5728 = vmatpush.bf16.msrb.mxu0 %v8837_v54  ;;  %v10583_v54 = vld [vmem:[%s15690_s2] sm:$0xf]  ;;  %v5498_v63 = vpop.f32.mrf.mxu2  ;;  %v9220_v5 = vld [vmem:[%s15688_s1 + $0x1548] sm:$0xf]  ;;  %v10441_v8 = vld [vmem:[%s15688_s1 + $0x1554] sm:$0xf0] }
 0x22d   :  { %5741 = vmatpush.bf16.msrb.mxu1 %v8965_v61  ;;  %v822_v61 = vperm.slane %v10583_v54, 2  ;;  %v9396_v10 = vld [vmem:[%s15688_s1 + $0x16a8] sm:$0xf]  ;;  %v10517_v14 = vld [vmem:[%s15688_s1 + $0x17b4] sm:$0xf0]  ;;  %v9221_v24 = vor.u32 %v10441_v8, %v9220_v5 }
 0x22e   :  { %5750 = vmatpush.bf16.msrb.mxu2 %v9157_v36  ;;  %v9557_v36 = vor.u32 %v10525_v40, %v9556_v32  ;;  %v9524_v13 = vld [vmem:[%s15688_s1 + $0x17a8] sm:$0xf]  ;;  %v10405_v32 = vld [vmem:[%s15688_s1 + $0x1434] sm:$0xf0] }
 0x22f   :  { %5763 = vmatpush.bf16.msrb.mxu3 %v9285_v59  ;;  %v9540_v59 = vld [vmem:[%s15688_s1 + $0x17c8] sm:$0xf]  ;;  %v10513_v51 = vld [vmem:[%s15688_s1 + $0x1794] sm:$0xf0] }
 0x230   :  { %5729 = vmatpush.bf16.msrb.mxu0 %v8821_v3  ;;  %v10409_v3 = vld [vmem:[%s15688_s1 + $0x1454] sm:$0xf0]  ;;  %v9541_v22 = vor.u32 %v10521_v2, %v9540_v59  ;;  %v9204_v40 = vld [vmem:[%s15688_s1 + $0x1528] sm:$0xf] }
 0x231   :  { %5742 = vmatpush.bf16.msrb.mxu1 %v8949_v7  ;;  %v5499_v7 = vadd.f32 %v5498_v63, %v822_v61  ;;  %v9093_v34 = vor.u32 %v10409_v3, %v9092_v9  ;;  %v9380_v47 = vld [vmem:[%s15688_s1 + $0x1688] sm:$0xf]  ;;  %v10401_v2 = vld [vmem:[%s15688_s1 + $0x1414] sm:$0xf0] }
 0x232   :  { %5751 = vmatpush.bf16.msrb.mxu2 %v9141_v60  ;;  %v5511_v60 = vpop.f32.mrf.mxu3  ;;  %v9060_v61 = vld [vmem:[%s15688_s1 + $0x1408] sm:$0xf]  ;;  %v10433_v63 = vld [vmem:[%s15688_s1 + $0x1514] sm:$0xf0] }
 0x233   :  { %5764 = vmatpush.bf16.msrb.mxu3 %v9269_v12  ;;  %v10485_v12 = vld [vmem:[%s15688_s1 + $0x16b4] sm:$0xf0]  ;;  %v5512_v39 = vadd.f32 %v5511_v60, %v5499_v7  ;;  %v9364_v9 = vld [vmem:[%s15688_s1 + $0x1668] sm:$0xf] }
 0x234   :  { %5730 = vmatpush.bf16.msrb.mxu0 %v8805_v27  ;;  %v9397_v26 = vor.u32 %v10485_v12, %v9396_v10  ;;  %v9076_v27 = vld [vmem:[%s15688_s1 + $0x1428] sm:$0xf]  ;;  %v5524_v52 = vpop.f32.mrf.mxu0  ;;  %v5500_v57 = vpop.f32.mrf.mxu2  ;;  %v10477_v3 = vld [vmem:[%s15688_s1 + $0x1674] sm:$0xf0]  ;;  %v9061_v10 = vor.u32 %v10401_v2, %v9060_v61  ;;  %v9787_v12 = vld [vmem:[%s15688_s1 + $0xec] sm:$0xf] }
 0x235   :  { %5743 = vmatpush.bf16.msrb.mxu1 %v8933_v18  ;;  %v9525_v18 = vor.u32 %v10517_v14, %v9524_v13  ;;  %v9077_v54 = vor.u32 %v10405_v32, %v9076_v27  ;;  %v5537_v55 = vpop.f32.mrf.mxu1  ;;  %v9492_v5 = vld [vmem:[%s15688_s1 + $0x1768] sm:$0xf]  ;;  %v10509_v60 = vld [vmem:[%s15688_s1 + $0x1774] sm:$0xf0]  ;;  %v6614_v13 = vld [vmem:[%s15688_s1 + $0xf8] sm:$0xf0] }
 0x236   :  { %5752 = vmatpush.bf16.msrb.mxu2 %v9125_v43  ;;  %v10437_v43 = vld [vmem:[%s15688_s1 + $0x1534] sm:$0xf0]  ;;  %v9476_v32 = vld [vmem:[%s15688_s1 + $0x1748] sm:$0xf] }
 0x237   :  { %5765 = vmatpush.bf16.msrb.mxu3 %v9253_v48  ;;  %5731 = vmatmul.bf16.vlgmr.msrb.gmra.mxu0 %v11700_v45  ;;  %v10481_v48 = vld [vmem:[%s15688_s1 + $0x1694] sm:$0xf0]  ;;  %v9205_v58 = vor.u32 %v10437_v43, %v9204_v40  ;;  %v6617_v40 = vor.u32 %v9787_v12, %v6614_v13  ;;  %v9604_v43 = vld [vmem:[%s15688_s1 + $0x1848] sm:$0xf] }
 0x238   :  { %5775 = vmatpush.bf16.msra.mxu0 %v9429_v50  ;;  %5744 = vmatmul.bf16.vlgmr.msrb.gmra.mxu1 %v11710_v49  ;;  %v9508_v50 = vld [vmem:[%s15688_s1 + $0x1788] sm:$0xf]  ;;  %v9381_v59 = vor.u32 %v10481_v48, %v9380_v47  ;;  %v10541_v8 = vld [vmem:[%s15688_s1 + $0x1874] sm:$0xf0] }
 0x239   :  { %5788 = vmatpush.bf16.msra.mxu1 %v9557_v36  ;;  %v5525_v36 = vadd.f32 %v5524_v52, %v5512_v39  ;;  %v9365_v39 = vor.u32 %v10477_v3, %v9364_v9  ;;  %v10473_v27 = vld [vmem:[%s15688_s1 + $0x1654] sm:$0xf0]  ;;  %v9316_v3 = vld [vmem:[%s15688_s1 + $0x1608] sm:$0xf] }
 0x23a   :  { %5753 = vmatpush.bf16.msrb.mxu2 %v9109_v62  ;;  %v9188_v62 = vld [vmem:[%s15688_s1 + $0x1508] sm:$0xf]  ;;  %v10537_v47 = vld [vmem:[%s15688_s1 + $0x1854] sm:$0xf0] }
 0x23b   :  { %5766 = vmatpush.bf16.msrb.mxu3 %v9237_v0  ;;  %v5513_v0 = vpop.f32.mrf.mxu3  ;;  %v14287_v7 = vadd.f32 %v5537_v55, %v5525_v36  ;;  %v9189_v14 = vor.u32 %v10433_v63, %v9188_v62  ;;  %v9605_v36 = vor.u32 %v10537_v47, %v9604_v43  ;;  %v9332_v55 = vld [vmem:[%s15688_s1 + $0x1628] sm:$0xf]  ;;  %v10469_v57 = vld [vmem:[%s15688_s1 + $0x1634] sm:$0xf0]  ;;  %v6998_v43 = vld [vmem:[%s15688_s1 + $0x3f8] sm:$0xf0] }
 0x23c   :  { %5776 = vmatpush.bf16.msra.mxu0 %v9413_v1  ;;  %v9509_v1 = vor.u32 %v10513_v51, %v9508_v50  ;;  %v5526_v48 = vpop.f32.mrf.mxu0  ;;  %v9783_v50 = vld [vmem:[%s15688_s1 + $0xcc] sm:$0xf]  ;;  %v6598_v51 = vld [vmem:[%s15688_s1 + $0xd8] sm:$0xf0]  ;;  %v10501_v2 = vld [vmem:[%s15688_s1 + $0x1734] sm:$0xf0]  ;;  %v9333_v9 = vor.u32 %v10469_v57, %v9332_v55 }
 0x23d   :  { %5789 = vmatpush.bf16.msra.mxu1 %v9541_v22  ;;  %v9620_v22 = vld [vmem:[%s15688_s1 + $0x1868] sm:$0xf]  ;;  %v5539_v52 = vpop.f32.mrf.mxu1  ;;  %v10533_v63 = vld [vmem:[%s15688_s1 + $0x1834] sm:$0xf0]  ;;  %v9779_v0 = vld [vmem:[%s15688_s1 + $0xac] sm:$0xf] }
 0x23e   :  { %5754 = vmatpush.bf16.msrb.mxu2 %v9093_v34  ;;  %v9493_v34 = vor.u32 %v10509_v60, %v9492_v5  ;;  %v9588_v62 = vld [vmem:[%s15688_s1 + $0x1828] sm:$0xf]  ;;  %v10465_v5 = vld [vmem:[%s15688_s1 + $0x1614] sm:$0xf0]  ;;  %v9771_v52 = vld [vmem:[%s15688_s1 + $0x6c] sm:$0xf] }
 0x23f   :  { %5767 = vmatpush.bf16.msrb.mxu3 %v9221_v24  ;;  %v9621_v24 = vor.u32 %v10541_v8, %v9620_v22  ;;  %v9589_v22 = vor.u32 %v10533_v63, %v9588_v62  ;;  %v9444_v8 = vld [vmem:[%s15688_s1 + $0x1708] sm:$0xf]  ;;  %v9815_v55 = vld [vmem:[%s15688_s1 + $0x1cc] sm:$0xf]  ;;  %v6726_v57 = vld [vmem:[%s15688_s1 + $0x1d8] sm:$0xf0] }
 0x240   :  { %5777 = vmatpush.bf16.msra.mxu0 %v9397_v26  ;;  %v9348_v26 = vld [vmem:[%s15688_s1 + $0x1648] sm:$0xf]  ;;  %v6982_v62 = vld [vmem:[%s15688_s1 + $0x3d8] sm:$0xf0] }
 0x241   :  { %5790 = vmatpush.bf16.msra.mxu1 %v9525_v18  ;;  %v10505_v18 = vld [vmem:[%s15688_s1 + $0x1754] sm:$0xf0]  ;;  %v9572_v12 = vld [vmem:[%s15688_s1 + $0x1808] sm:$0xf] }
 0x242   :  { %5755 = vmatpush.bf16.msrb.mxu2 %v9077_v54  ;;  %v9349_v54 = vor.u32 %v10473_v27, %v9348_v26  ;;  %v9477_v61 = vor.u32 %v10505_v18, %v9476_v32  ;;  %v6742_v26 = vld [vmem:[%s15688_s1 + $0x1f8] sm:$0xf0]  ;;  %v9851_v27 = vld [vmem:[%s15688_s1 + $0x2ec] sm:$0xf]  ;;  %v9317_v32 = vor.u32 %v10465_v5, %v9316_v3 }
 0x243   :  { %5768 = vmatpush.bf16.msrb.mxu3 %v9205_v58  ;;  %v9460_v58 = vld [vmem:[%s15688_s1 + $0x1728] sm:$0xf]  ;;  %v9883_v18 = vld [vmem:[%s15688_s1 + $0x3ec] sm:$0xf]  ;;  %v6534_v3 = vld [vmem:[%s15688_s1 + $0x58] sm:$0xf0] }
 0x244   :  { %5778 = vmatpush.bf16.msra.mxu0 %v9381_v59  ;;  %v6601_v59 = vor.u32 %v9783_v50, %v6598_v51  ;;  %v9461_v60 = vor.u32 %v10501_v2, %v9460_v58  ;;  %v9847_v58 = vld [vmem:[%s15688_s1 + $0x2cc] sm:$0xf] }
 0x245   :  { %5791 = vmatpush.bf16.msra.mxu1 %v9509_v1  ;;  %v6582_v1 = vld [vmem:[%s15688_s1 + $0xb8] sm:$0xf0]  ;;  %v9879_v2 = vld [vmem:[%s15688_s1 + $0x3cc] sm:$0xf] }
 0x246   :  { %5756 = vmatpush.bf16.msrb.mxu2 %v9061_v10  ;;  %v10497_v10 = vld [vmem:[%s15688_s1 + $0x1714] sm:$0xf0]  ;;  %v6585_v13 = vor.u32 %v9779_v0, %v6582_v1  ;;  %v6729_v1 = vor.u32 %v9815_v55, %v6726_v57 }
 0x247   :  { %5769 = vmatpush.bf16.msrb.mxu3 %v9189_v14  ;;  %v10529_v14 = vld [vmem:[%s15688_s1 + $0x1814] sm:$0xf0]  ;;  %v9445_v47 = vor.u32 %v10497_v10, %v9444_v8  ;;  %v6985_v8 = vor.u32 %v9879_v2, %v6982_v62  ;;  %v9811_v10 = vld [vmem:[%s15688_s1 + $0x1ac] sm:$0xf]  ;;  %v6502_v2 = vld [vmem:[%s15688_s1 + $0x18] sm:$0xf0] }
 0x248   :  { %5779 = vmatpush.bf16.msra.mxu0 %v9365_v39  ;;  %v9775_v39 = vld [vmem:[%s15688_s1 + $0x8c] sm:$0xf]  ;;  %v9573_v48 = vor.u32 %v10529_v14, %v9572_v12  ;;  %v6710_v12 = vld [vmem:[%s15688_s1 + $0x1b8] sm:$0xf0] }
 0x249   :  { %5792 = vmatpush.bf16.msra.mxu1 %v9493_v34  ;;  %5757 = vmatmul.bf16.vlgmr.msrb.gmra.mxu2 %v11904_v11  ;;  %v6566_v34 = vld [vmem:[%s15688_s1 + $0x98] sm:$0xf0]  ;;  %v9875_v14 = vld [vmem:[%s15688_s1 + $0x3ac] sm:$0xf] }
 0x24a   :  { %5805 = vmatpush.bf16.msra.mxu2 %v9621_v24  ;;  %5770 = vmatmul.bf16.vlgmr.msrb.gmra.mxu3 %v11917_v16  ;;  %v9819_v24 = vld [vmem:[%s15688_s1 + $0x1ec] sm:$0xf]  ;;  %v6569_v50 = vor.u32 %v9775_v39, %v6566_v34  ;;  %v6966_v39 = vld [vmem:[%s15688_s1 + $0x3b8] sm:$0xf0] }
 0x24b   :  { %5814 = vmatpush.bf16.msra.mxu3 %v6617_v40  ;;  %v6870_v40 = vld [vmem:[%s15688_s1 + $0x2f8] sm:$0xf0]  ;;  %v6745_v51 = vor.u32 %v9819_v24, %v6742_v26  ;;  %v6713_v26 = vor.u32 %v9811_v10, %v6710_v12  ;;  %v9915_v10 = vld [vmem:[%s15688_s1 + $0x4ec] sm:$0xf] }
 0x24c   :  { %5780 = vmatpush.bf16.msra.mxu0 %v9349_v54  ;;  %v6550_v54 = vld [vmem:[%s15688_s1 + $0x78] sm:$0xf0]  ;;  %v5550_v63 = vpop.f32.mrf.mxu2 }
 0x24d   :  { %5793 = vmatpush.bf16.msra.mxu1 %v9477_v61  ;;  %v6873_v61 = vor.u32 %v9851_v27, %v6870_v40  ;;  %v6553_v0 = vor.u32 %v9771_v52, %v6550_v54  ;;  %v5551_v5 = vadd.f32 %v5550_v63, %v14287_v7  ;;  %v6838_v7 = vld [vmem:[%s15688_s1 + $0x2b8] sm:$0xf0]  ;;  %v9763_v27 = vld [vmem:[%s15688_s1 + $0x2c] sm:$0xf] }
 0x24e   :  { %5806 = vmatpush.bf16.msra.mxu2 %v9605_v36  ;;  %v7001_v36 = vor.u32 %v9883_v18, %v6998_v43  ;;  %v6969_v18 = vor.u32 %v9875_v14, %v6966_v39  ;;  %v9807_v43 = vld [vmem:[%s15688_s1 + $0x18c] sm:$0xf]  ;;  %v6950_v54 = vld [vmem:[%s15688_s1 + $0x398] sm:$0xf0] }
 0x24f   :  { %5815 = vmatpush.bf16.msra.mxu3 %v6601_v59  ;;  %v6854_v59 = vld [vmem:[%s15688_s1 + $0x2d8] sm:$0xf0]  ;;  %v9871_v52 = vld [vmem:[%s15688_s1 + $0x38c] sm:$0xf] }
 0x250   :  { %5781 = vmatpush.bf16.msra.mxu0 %v9333_v9  ;;  %v9767_v9 = vld [vmem:[%s15688_s1 + $0x4c] sm:$0xf]  ;;  %v7126_v12 = vld [vmem:[%s15688_s1 + $0x4f8] sm:$0xf0] }
 0x251   :  { %5794 = vmatpush.bf16.msra.mxu1 %v9461_v60  ;;  %v5563_v60 = vpop.f32.mrf.mxu3  ;;  %v6537_v24 = vor.u32 %v9767_v9, %v6534_v3  ;;  %v9803_v9 = vld [vmem:[%s15688_s1 + $0x16c] sm:$0xf]  ;;  %v6678_v3 = vld [vmem:[%s15688_s1 + $0x178] sm:$0xf0] }
 0x252   :  { %5807 = vmatpush.bf16.msra.mxu2 %v9589_v22  ;;  %v6857_v22 = vor.u32 %v9847_v58, %v6854_v59  ;;  %v5564_v34 = vadd.f32 %v5563_v60, %v5551_v5  ;;  %v9759_v59 = vld [vmem:[%s15688_s1 + $0xc] sm:$0xf]  ;;  %v6806_v60 = vld [vmem:[%s15688_s1 + $0x278] sm:$0xf0] }
 0x253   :  { %5816 = vmatpush.bf16.msra.mxu3 %v6585_v13  ;;  %v9843_v13 = vld [vmem:[%s15688_s1 + $0x2ac] sm:$0xf] }
 0x254   :  { %5782 = vmatpush.bf16.msra.mxu0 %v9317_v32  ;;  %v6518_v32 = vld [vmem:[%s15688_s1 + $0x38] sm:$0xf0]  ;;  %v6841_v40 = vor.u32 %v9843_v13, %v6838_v7  ;;  %v5552_v55 = vpop.f32.mrf.mxu2  ;;  %v9835_v5 = vld [vmem:[%s15688_s1 + $0x26c] sm:$0xf]  ;;  %v6505_v13 = vor.u32 %v9759_v59, %v6502_v2  ;;  %v6681_v7 = vor.u32 %v9803_v9, %v6678_v3 }
 0x255   :  { %5795 = vmatpush.bf16.msra.mxu1 %v9445_v47  ;;  %v6694_v47 = vld [vmem:[%s15688_s1 + $0x198] sm:$0xf0]  ;;  %v6521_v57 = vor.u32 %v9763_v27, %v6518_v32  ;;  %v6809_v14 = vor.u32 %v9835_v5, %v6806_v60  ;;  %v7129_v27 = vor.u32 %v9915_v10, %v7126_v12  ;;  %v9827_v55 = vld [vmem:[%s15688_s1 + $0x22c] sm:$0xf] }
 0x256   :  { %5808 = vmatpush.bf16.msra.mxu2 %v9573_v48  ;;  %v9839_v48 = vld [vmem:[%s15688_s1 + $0x28c] sm:$0xf]  ;;  %v6697_v58 = vor.u32 %v9807_v43, %v6694_v47  ;;  %v6790_v32 = vld [vmem:[%s15688_s1 + $0x258] sm:$0xf0] }
 0x257   :  { %5817 = vmatpush.bf16.msra.mxu3 %v6569_v50  ;;  %5783 = vmatmul.bf16.vlgmr.msra.gmra.mxu0 %v11915_v15  ;;  %v5576_v50 = vpop.f32.mrf.mxu0  ;;  %v9911_v47 = vld [vmem:[%s15688_s1 + $0x4cc] sm:$0xf]  ;;  %v6902_v2 = vld [vmem:[%s15688_s1 + $0x338] sm:$0xf0] }
 0x258   :  { %5827 = vmatpush.bf16.msrb.mxu0 %v6745_v51  ;;  %5796 = vmatmul.bf16.vlgmr.msra.gmra.mxu1 %v11925_v19  ;;  %v6822_v51 = vld [vmem:[%s15688_s1 + $0x298] sm:$0xf0]  ;;  %v9859_v59 = vld [vmem:[%s15688_s1 + $0x32c] sm:$0xf] }
 0x259   :  { %5840 = vmatpush.bf16.msrb.mxu1 %v6873_v61  ;;  %9628 = vmatmul.msk.bf16.vlgmr.msra.gmra.mxu2 %vm4835_vm0, %v12028_v56  ;;  %v5577_v61 = vadd.f32 %v5576_v50, %v5564_v34  ;;  %v5565_v62 = vpop.f32.mrf.mxu3  ;;  %v6825_v63 = vor.u32 %v9839_v48, %v6822_v51  ;;  %v9799_v34 = vld [vmem:[%s15688_s1 + $0x14c] sm:$0xf]  ;;  %v7110_v48 = vld [vmem:[%s15688_s1 + $0x4d8] sm:$0xf0]  ;;  %v6905_v60 = vor.u32 %v9859_v59, %v6902_v2 }
 0x25a   :  { %5853 = vmatpush.bf16.msrb.mxu2 %v7001_v36  ;;  %v5589_v36 = vpop.f32.mrf.mxu1  ;;  %v9907_v62 = vld [vmem:[%s15688_s1 + $0x4ac] sm:$0xf]  ;;  %v6630_v3 = vld [vmem:[%s15688_s1 + $0x118] sm:$0xf0] }
 0x25b   :  { %5818 = vmatpush.bf16.msra.mxu3 %v6553_v0  ;;  %v6953_v0 = vor.u32 %v9871_v52, %v6950_v54  ;;  %v9791_v9 = vld [vmem:[%s15688_s1 + $0x10c] sm:$0xf]  ;;  %v6886_v12 = vld [vmem:[%s15688_s1 + $0x318] sm:$0xf0] }
 0x25c   :  { %5828 = vmatpush.bf16.msrb.mxu0 %v6729_v1  ;;  %v14479_v1 = vadd.f32 %v5589_v36, %v5577_v61  ;;  %v9795_v61 = vld [vmem:[%s15688_s1 + $0x12c] sm:$0xf]  ;;  %v6646_v36 = vld [vmem:[%s15688_s1 + $0x138] sm:$0xf0] }
 0x25d   :  { %5841 = vmatpush.bf16.msrb.mxu1 %v6857_v22  ;;  %v9867_v22 = vld [vmem:[%s15688_s1 + $0x36c] sm:$0xf] }
 0x25e   :  { %5854 = vmatpush.bf16.msrb.mxu2 %v6985_v8  ;;  %v6934_v8 = vld [vmem:[%s15688_s1 + $0x378] sm:$0xf0] }
 0x25f   :  { %5819 = vmatpush.bf16.msra.mxu3 %v6537_v24  ;;  %v6937_v39 = vor.u32 %v9867_v22, %v6934_v8  ;;  %v6662_v24 = vld [vmem:[%s15688_s1 + $0x158] sm:$0xf0]  ;;  %v5578_v43 = vpop.f32.mrf.mxu0  ;;  %v9823_v22 = vld [vmem:[%s15688_s1 + $0x20c] sm:$0xf] }
 0x260   :  { %5829 = vmatpush.bf16.msrb.mxu0 %v6713_v26  ;;  %v9831_v26 = vld [vmem:[%s15688_s1 + $0x24c] sm:$0xf]  ;;  %v6665_v51 = vor.u32 %v9799_v34, %v6662_v24  ;;  %v6633_v24 = vor.u32 %v9791_v9, %v6630_v3  ;;  %v7046_v3 = vld [vmem:[%s15688_s1 + $0x458] sm:$0xf0] }
 0x261   :  { %5842 = vmatpush.bf16.msrb.mxu1 %v6841_v40  ;;  %v9863_v40 = vld [vmem:[%s15688_s1 + $0x34c] sm:$0xf]  ;;  %v6793_v52 = vor.u32 %v9831_v26, %v6790_v32  ;;  %v7382_v26 = vld [vmem:[%s15688_s1 + $0x6f8] sm:$0xf0] }
 0x262   :  { %5855 = vmatpush.bf16.msrb.mxu2 %v6969_v18  ;;  %v6918_v18 = vld [vmem:[%s15688_s1 + $0x358] sm:$0xf0]  ;;  %v5591_v50 = vpop.f32.mrf.mxu1  ;;  %v9855_v8 = vld [vmem:[%s15688_s1 + $0x30c] sm:$0xf] }
 0x263   :  { %5820 = vmatpush.bf16.msra.mxu3 %v6521_v57  ;;  %v6921_v54 = vor.u32 %v9863_v40, %v6918_v18  ;;  %v7113_v57 = vor.u32 %v9911_v47, %v7110_v48  ;;  %v9979_v34 = vld [vmem:[%s15688_s1 + $0x6ec] sm:$0xf]  ;;  %v7510_v32 = vld [vmem:[%s15688_s1 + $0x7f8] sm:$0xf0]  ;;  %v6889_v18 = vor.u32 %v9855_v8, %v6886_v12 }
 0x264   :  { %5830 = vmatpush.bf16.msrb.mxu0 %v6697_v58  ;;  %v6774_v58 = vld [vmem:[%s15688_s1 + $0x238] sm:$0xf0]  ;;  %v9899_v48 = vld [vmem:[%s15688_s1 + $0x46c] sm:$0xf] }
 0x265   :  { %5843 = vmatpush.bf16.msrb.mxu1 %v6825_v63  ;;  %v7094_v63 = vld [vmem:[%s15688_s1 + $0x4b8] sm:$0xf0]  ;;  %v6777_v5 = vor.u32 %v9827_v55, %v6774_v58  ;;  %v9895_v9 = vld [vmem:[%s15688_s1 + $0x44c] sm:$0xf] }
 0x266   :  { %5856 = vmatpush.bf16.msrb.mxu2 %v6953_v0  ;;  %v6649_v0 = vor.u32 %v9795_v61, %v6646_v36  ;;  %v7097_v10 = vor.u32 %v9907_v62, %v7094_v63  ;;  %v7062_v50 = vld [vmem:[%s15688_s1 + $0x478] sm:$0xf0]  ;;  %v9975_v36 = vld [vmem:[%s15688_s1 + $0x6cc] sm:$0xf] }
 0x267   :  { %5821 = vmatpush.bf16.msra.mxu3 %v6505_v13  ;;  %v9903_v13 = vld [vmem:[%s15688_s1 + $0x48c] sm:$0xf]  ;;  %v7238_v61 = vld [vmem:[%s15688_s1 + $0x5d8] sm:$0xf0]  ;;  %v7065_v2 = vor.u32 %v9899_v48, %v7062_v50 }
 0x268   :  { %5831 = vmatpush.bf16.msrb.mxu0 %v6681_v7  ;;  %v7078_v7 = vld [vmem:[%s15688_s1 + $0x498] sm:$0xf0]  ;;  %v10003_v12 = vld [vmem:[%s15688_s1 + $0x7ac] sm:$0xf] }
 0x269   :  { %5844 = vmatpush.bf16.msrb.mxu1 %v6809_v14  ;;  %v9947_v14 = vld [vmem:[%s15688_s1 + $0x5ec] sm:$0xf]  ;;  %v7081_v43 = vor.u32 %v9903_v13, %v7078_v7  ;;  %v7366_v55 = vld [vmem:[%s15688_s1 + $0x6d8] sm:$0xf0]  ;;  %v7049_v7 = vor.u32 %v9895_v9, %v7046_v3 }
 0x26a   :  { %5857 = vmatpush.bf16.msrb.mxu2 %v6937_v39  ;;  %5822 = vmatmul.bf16.vlgmr.msra.gmra.mxu3 %v10917_v20  ;;  %v6758_v20 = vld [vmem:[%s15688_s1 + $0x218] sm:$0xf0]  ;;  %v10043_v9 = vld [vmem:[%s15688_s1 + $0x8ec] sm:$0xf] }
 0x26b   :  { %5866 = vmatpush.bf16.msrb.mxu3 %v7129_v27  ;;  %v7254_v39 = vld [vmem:[%s15688_s1 + $0x5f8] sm:$0xf0]  ;;  %v10011_v27 = vld [vmem:[%s15688_s1 + $0x7ec] sm:$0xf]  ;;  %v6761_v40 = vor.u32 %v9823_v22, %v6758_v20 }
 0x26c   :  { %5832 = vmatpush.bf16.msrb.mxu0 %v6665_v51  ;;  %v7257_v47 = vor.u32 %v9947_v14, %v7254_v39  ;;  %v7385_v51 = vor.u32 %v9979_v34, %v7382_v26  ;;  %v7494_v58 = vld [vmem:[%s15688_s1 + $0x7d8] sm:$0xf0]  ;;  %v5602_v59 = vpop.f32.mrf.mxu2  ;;  %v9939_v22 = vld [vmem:[%s15688_s1 + $0x5ac] sm:$0xf] }
 0x26d   :  { %5845 = vmatpush.bf16.msrb.mxu1 %v6793_v52  ;;  %v7513_v52 = vor.u32 %v10011_v27, %v7510_v32  ;;  %v5603_v62 = vadd.f32 %v5602_v59, %v14479_v1  ;;  %v7222_v1 = vld [vmem:[%s15688_s1 + $0x5b8] sm:$0xf0]  ;;  %v9971_v20 = vld [vmem:[%s15688_s1 + $0x6ac] sm:$0xf] }
 0x26e   :  { %5858 = vmatpush.bf16.msrb.mxu2 %v6921_v54  ;;  %v9943_v54 = vld [vmem:[%s15688_s1 + $0x5cc] sm:$0xf]  ;;  %v7478_v13 = vld [vmem:[%s15688_s1 + $0x7b8] sm:$0xf0]  ;;  %v7225_v14 = vor.u32 %v9939_v22, %v7222_v1 }
 0x26f   :  { %5867 = vmatpush.bf16.msrb.mxu3 %v7113_v57  ;;  %v10007_v57 = vld [vmem:[%s15688_s1 + $0x7cc] sm:$0xf]  ;;  %v7241_v63 = vor.u32 %v9943_v54, %v7238_v61  ;;  %v7030_v34 = vld [vmem:[%s15688_s1 + $0x438] sm:$0xf0] }
 0x270   :  { %5833 = vmatpush.bf16.msrb.mxu0 %v6649_v0  ;;  %v5615_v0 = vpop.f32.mrf.mxu3  ;;  %v9891_v39 = vld [vmem:[%s15688_s1 + $0x42c] sm:$0xf]  ;;  %v7334_v32 = vld [vmem:[%s15688_s1 + $0x698] sm:$0xf0] }
 0x271   :  { %5846 = vmatpush.bf16.msrb.mxu1 %v6777_v5  ;;  %v7369_v5 = vor.u32 %v9975_v36, %v7366_v55  ;;  %v5616_v8 = vadd.f32 %v5615_v0, %v5603_v62  ;;  %v9967_v26 = vld [vmem:[%s15688_s1 + $0x68c] sm:$0xf]  ;;  %v7033_v50 = vor.u32 %v9891_v39, %v7030_v34  ;;  %v7014_v54 = vld [vmem:[%s15688_s1 + $0x418] sm:$0xf0] }
 0x272   :  { %5859 = vmatpush.bf16.msrb.mxu2 %v6905_v60  ;;  %v7497_v60 = vor.u32 %v10007_v57, %v7494_v58  ;;  %v7337_v36 = vor.u32 %v9967_v26, %v7334_v32  ;;  %v9931_v58 = vld [vmem:[%s15688_s1 + $0x56c] sm:$0xf]  ;;  %v7190_v59 = vld [vmem:[%s15688_s1 + $0x578] sm:$0xf0] }
 0x273   :  { %5868 = vmatpush.bf16.msrb.mxu3 %v7097_v10  ;;  %v7350_v10 = vld [vmem:[%s15688_s1 + $0x6b8] sm:$0xf0]  ;;  %v10039_v34 = vld [vmem:[%s15688_s1 + $0x8cc] sm:$0xf] }
 0x274   :  { %5834 = vmatpush.bf16.msrb.mxu0 %v6633_v24  ;;  %v7353_v24 = vor.u32 %v9971_v20, %v7350_v10  ;;  %v5628_v27 = vpop.f32.mrf.mxu0  ;;  %v5604_v48 = vpop.f32.mrf.mxu2  ;;  %v7318_v62 = vld [vmem:[%s15688_s1 + $0x678] sm:$0xf0]  ;;  %v9927_v20 = vld [vmem:[%s15688_s1 + $0x54c] sm:$0xf] }
 0x275   :  { %5847 = vmatpush.bf16.msrb.mxu1 %v6761_v40  ;;  %v9999_v40 = vld [vmem:[%s15688_s1 + $0x78c] sm:$0xf]  ;;  %v7446_v0 = vld [vmem:[%s15688_s1 + $0x778] sm:$0xf0] }
 0x276   :  { %5860 = vmatpush.bf16.msrb.mxu2 %v6889_v18  ;;  %v7462_v18 = vld [vmem:[%s15688_s1 + $0x798] sm:$0xf0]  ;;  %v9959_v10 = vld [vmem:[%s15688_s1 + $0x64c] sm:$0xf] }
 0x277   :  { %5869 = vmatpush.bf16.msrb.mxu3 %v7081_v43  ;;  %5835 = vmatmul.bf16.vlgmr.msrb.gmra.mxu0 %v10920_v21  ;;  %v7206_v21 = vld [vmem:[%s15688_s1 + $0x598] sm:$0xf0]  ;;  %v5629_v43 = vadd.f32 %v5628_v27, %v5616_v8  ;;  %v7465_v55 = vor.u32 %v9999_v40, %v7462_v18  ;;  %v9923_v27 = vld [vmem:[%s15688_s1 + $0x52c] sm:$0xf] }
 0x278   :  { %5879 = vmatpush.bf16.msra.mxu0 %v7257_v47  ;;  %5848 = vmatmul.bf16.vlgmr.msrb.gmra.mxu1 %v10885_v4  ;;  %v9935_v4 = vld [vmem:[%s15688_s1 + $0x58c] sm:$0xf]  ;;  %v5641_v47 = vpop.f32.mrf.mxu1  ;;  %v5617_v61 = vpop.f32.mrf.mxu3  ;;  %v7638_v3 = vld [vmem:[%s15688_s1 + $0x8f8] sm:$0xf0] }
 0x279   :  { %5892 = vmatpush.bf16.msra.mxu1 %v7385_v51  ;;  %5861 = vmatmul.bf16.vlgmr.msrb.gmra.mxu2 %v10890_v6  ;;  %v7481_v6 = vor.u32 %v10003_v12, %v7478_v13  ;;  %v7209_v51 = vor.u32 %v9935_v4, %v7206_v21  ;;  %v14678_v57 = vadd.f32 %v5641_v47, %v5629_v43  ;;  %v7174_v8 = vld [vmem:[%s15688_s1 + $0x558] sm:$0xf0]  ;;  %v9955_v40 = vld [vmem:[%s15688_s1 + $0x62c] sm:$0xf] }
 0x27a   :  { %5905 = vmatpush.bf16.msra.mxu2 %v7513_v52  ;;  %v9887_v52 = vld [vmem:[%s15688_s1 + $0x40c] sm:$0xf]  ;;  %v7641_v12 = vor.u32 %v10043_v9, %v7638_v3  ;;  %v7302_v13 = vld [vmem:[%s15688_s1 + $0x658] sm:$0xf0]  ;;  %v7177_v4 = vor.u32 %v9927_v20, %v7174_v8 }
 0x27b   :  { %5870 = vmatpush.bf16.msrb.mxu3 %v7065_v2  ;;  %v9963_v2 = vld [vmem:[%s15688_s1 + $0x66c] sm:$0xf]  ;;  %v7305_v21 = vor.u32 %v9959_v10, %v7302_v13  ;;  %v7158_v32 = vld [vmem:[%s15688_s1 + $0x538] sm:$0xf0] }
 0x27c   :  { %5880 = vmatpush.bf16.msra.mxu0 %v7241_v63  ;;  %v9995_v63 = vld [vmem:[%s15688_s1 + $0x76c] sm:$0xf]  ;;  %v7321_v22 = vor.u32 %v9963_v2, %v7318_v62  ;;  %v5630_v39 = vpop.f32.mrf.mxu0  ;;  %v7286_v43 = vld [vmem:[%s15688_s1 + $0x638] sm:$0xf0] }
 0x27d   :  { %5893 = vmatpush.bf16.msra.mxu1 %v7369_v5  ;;  %v7017_v5 = vor.u32 %v9887_v52, %v7014_v54  ;;  %v7449_v1 = vor.u32 %v9995_v63, %v7446_v0  ;;  %v9987_v47 = vld [vmem:[%s15688_s1 + $0x72c] sm:$0xf]  ;;  %v7414_v48 = vld [vmem:[%s15688_s1 + $0x738] sm:$0xf0]  ;;  %v7161_v52 = vor.u32 %v9923_v27, %v7158_v32 }
 0x27e   :  { %5906 = vmatpush.bf16.msra.mxu2 %v7497_v60  ;;  %v7193_v60 = vor.u32 %v9931_v58, %v7190_v59  ;;  %v9919_v54 = vld [vmem:[%s15688_s1 + $0x50c] sm:$0xf]  ;;  %v7142_v61 = vld [vmem:[%s15688_s1 + $0x518] sm:$0xf0] }
 0x27f   :  { %5871 = vmatpush.bf16.msrb.mxu3 %v7049_v7  ;;  %v9991_v7 = vld [vmem:[%s15688_s1 + $0x74c] sm:$0xf]  ;;  %v7270_v58 = vld [vmem:[%s15688_s1 + $0x618] sm:$0xf0] }
 0x280   :  { %5881 = vmatpush.bf16.msra.mxu0 %v7225_v14  ;;  %v7430_v14 = vld [vmem:[%s15688_s1 + $0x758] sm:$0xf0]  ;;  %v9983_v59 = vld [vmem:[%s15688_s1 + $0x70c] sm:$0xf] }
 0x281   :  { %5894 = vmatpush.bf16.msra.mxu1 %v7353_v24  ;;  %v7622_v24 = vld [vmem:[%s15688_s1 + $0x8d8] sm:$0xf0]  ;;  %v7433_v26 = vor.u32 %v9991_v7, %v7430_v14  ;;  %v10031_v63 = vld [vmem:[%s15688_s1 + $0x88c] sm:$0xf] }
 0x282   :  { %5907 = vmatpush.bf16.msra.mxu2 %v7481_v6  ;;  %v5643_v6 = vpop.f32.mrf.mxu1  ;;  %v7625_v18 = vor.u32 %v10039_v34, %v7622_v24  ;;  %v7398_v62 = vld [vmem:[%s15688_s1 + $0x718] sm:$0xf0]  ;;  %v10075_v9 = vld [vmem:[%s15688_s1 + $0x9ec] sm:$0xf] }
 0x283   :  { %5872 = vmatpush.bf16.msrb.mxu3 %v7033_v50  ;;  %v10035_v50 = vld [vmem:[%s15688_s1 + $0x8ac] sm:$0xf]  ;;  %v7590_v0 = vld [vmem:[%s15688_s1 + $0x898] sm:$0xf0]  ;;  %v7401_v10 = vor.u32 %v9983_v59, %v7398_v62 }
 0x284   :  { %5882 = vmatpush.bf16.msra.mxu0 %v7209_v51  ;;  %v7606_v51 = vld [vmem:[%s15688_s1 + $0x8b8] sm:$0xf0]  ;;  %v10027_v7 = vld [vmem:[%s15688_s1 + $0x86c] sm:$0xf] }
 0x285   :  { %5895 = vmatpush.bf16.msra.mxu1 %v7337_v36  ;;  %v7417_v36 = vor.u32 %v9987_v47, %v7414_v48  ;;  %v7609_v2 = vor.u32 %v10035_v50, %v7606_v51  ;;  %v7766_v3 = vld [vmem:[%s15688_s1 + $0x9f8] sm:$0xf0]  ;;  %v10071_v24 = vld [vmem:[%s15688_s1 + $0x9cc] sm:$0xf] }
 0x286   :  { %5908 = vmatpush.bf16.msra.mxu2 %v7465_v55  ;;  %v9951_v55 = vld [vmem:[%s15688_s1 + $0x60c] sm:$0xf]  ;;  %v8022_v20 = vld [vmem:[%s15688_s1 + $0xbf8] sm:$0xf0]  ;;  %v7769_v13 = vor.u32 %v10075_v9, %v7766_v3 }
 0x287   :  { %5873 = vmatpush.bf16.msrb.mxu3 %v7017_v5  ;;  %v10107_v5 = vld [vmem:[%s15688_s1 + $0xaec] sm:$0xf]  ;;  %v7273_v8 = vor.u32 %v9951_v55, %v7270_v58  ;;  %v7574_v14 = vld [vmem:[%s15688_s1 + $0x878] sm:$0xf0] }
 0x288   :  { %5883 = vmatpush.bf16.msra.mxu0 %v7193_v60  ;;  %v7145_v60 = vor.u32 %v9919_v54, %v7142_v61  ;;  %v7750_v6 = vld [vmem:[%s15688_s1 + $0x9d8] sm:$0xf0]  ;;  %v10023_v48 = vld [vmem:[%s15688_s1 + $0x84c] sm:$0xf] }
 0x289   :  { %5896 = vmatpush.bf16.msra.mxu1 %v7321_v22  ;;  %v7894_v22 = vld [vmem:[%s15688_s1 + $0xaf8] sm:$0xf0]  ;;  %v10067_v54 = vld [vmem:[%s15688_s1 + $0x9ac] sm:$0xf] }
 0x28a   :  { %5909 = vmatpush.bf16.msra.mxu2 %v7449_v1  ;;  %5874 = vmatmul.bf16.vlgmr.msrb.gmra.mxu3 %v11076_v41  ;;  %v7289_v41 = vor.u32 %v9955_v40, %v7286_v43  ;;  %v10139_v1 = vld [vmem:[%s15688_s1 + $0xbec] sm:$0xf]  ;;  %v7897_v39 = vor.u32 %v10107_v5, %v7894_v22  ;;  %v8006_v27 = vld [vmem:[%s15688_s1 + $0xbd8] sm:$0xf0]  ;;  %v7577_v40 = vor.u32 %v10027_v7, %v7574_v14 }
 0x28b   :  { %5918 = vmatpush.bf16.msra.mxu3 %v7641_v12  ;;  %v7593_v12 = vor.u32 %v10031_v63, %v7590_v0  ;;  %v8025_v34 = vor.u32 %v10139_v1, %v8022_v20  ;;  %v7753_v43 = vor.u32 %v10071_v24, %v7750_v6  ;;  %v7558_v50 = vld [vmem:[%s15688_s1 + $0x858] sm:$0xf0]  ;;  %v10099_v61 = vld [vmem:[%s15688_s1 + $0xaac] sm:$0xf] }
 0x28c   :  { %5884 = vmatpush.bf16.msra.mxu0 %v7177_v4  ;;  %v10103_v4 = vld [vmem:[%s15688_s1 + $0xacc] sm:$0xf]  ;;  %v5654_v32 = vpop.f32.mrf.mxu2  ;;  %v7990_v58 = vld [vmem:[%s15688_s1 + $0xbb8] sm:$0xf0] }
 0x28d   :  { %5897 = vmatpush.bf16.msra.mxu1 %v7305_v21  ;;  %v7878_v21 = vld [vmem:[%s15688_s1 + $0xad8] sm:$0xf0]  ;;  %v5667_v47 = vpop.f32.mrf.mxu3  ;;  %v10131_v55 = vld [vmem:[%s15688_s1 + $0xbac] sm:$0xf] }
 0x28e   :  { %5910 = vmatpush.bf16.msra.mxu2 %v7433_v26  ;;  %v10135_v26 = vld [vmem:[%s15688_s1 + $0xbcc] sm:$0xf]  ;;  %v7881_v51 = vor.u32 %v10103_v4, %v7878_v21  ;;  %v7993_v63 = vor.u32 %v10131_v55, %v7990_v58  ;;  %v7718_v0 = vld [vmem:[%s15688_s1 + $0x998] sm:$0xf0] }
 0x28f   :  { %5919 = vmatpush.bf16.msra.mxu3 %v7625_v18  ;;  %v5655_v18 = vadd.f32 %v5654_v32, %v14678_v57  ;;  %v7734_v57 = vld [vmem:[%s15688_s1 + $0x9b8] sm:$0xf0]  ;;  %v10095_v9 = vld [vmem:[%s15688_s1 + $0xa8c] sm:$0xf] }
 0x290   :  { %5885 = vmatpush.bf16.msra.mxu0 %v7161_v52  ;;  %v8009_v52 = vor.u32 %v10135_v26, %v8006_v27  ;;  %v7737_v59 = vor.u32 %v10067_v54, %v7734_v57  ;;  %v7846_v5 = vld [vmem:[%s15688_s1 + $0xa98] sm:$0xf0]  ;;  %v10059_v6 = vld [vmem:[%s15688_s1 + $0x96c] sm:$0xf] }
 0x291   :  { %5898 = vmatpush.bf16.msra.mxu1 %v7289_v41  ;;  %v5668_v41 = vadd.f32 %v5667_v47, %v5655_v18  ;;  %v7974_v22 = vld [vmem:[%s15688_s1 + $0xb98] sm:$0xf0]  ;;  %v10091_v21 = vld [vmem:[%s15688_s1 + $0xa6c] sm:$0xf] }
 0x292   :  { %5911 = vmatpush.bf16.msra.mxu2 %v7417_v36  ;;  %v7862_v36 = vld [vmem:[%s15688_s1 + $0xab8] sm:$0xf0]  ;;  %v10123_v27 = vld [vmem:[%s15688_s1 + $0xb6c] sm:$0xf] }
 0x293   :  { %5920 = vmatpush.bf16.msra.mxu3 %v7609_v2  ;;  %v7542_v2 = vld [vmem:[%s15688_s1 + $0x838] sm:$0xf0]  ;;  %v7865_v62 = vor.u32 %v10099_v61, %v7862_v36  ;;  %v10087_v54 = vld [vmem:[%s15688_s1 + $0xa4c] sm:$0xf] }
 0x294   :  { %5886 = vmatpush.bf16.msra.mxu0 %v7145_v60  ;;  %v5680_v3 = vpop.f32.mrf.mxu0  ;;  %v10127_v60 = vld [vmem:[%s15688_s1 + $0xb8c] sm:$0xf]  ;;  %v7526_v7 = vld [vmem:[%s15688_s1 + $0x818] sm:$0xf0] }
 0x295   :  { %5899 = vmatpush.bf16.msra.mxu1 %v7273_v8  ;;  %v5681_v1 = vadd.f32 %v5680_v3, %v5668_v41  ;;  %v5693_v20 = vpop.f32.mrf.mxu1  ;;  %v5656_v8 = vpop.f32.mrf.mxu2  ;;  %v7702_v4 = vld [vmem:[%s15688_s1 + $0x978] sm:$0xf0]  ;;  %v10119_v41 = vld [vmem:[%s15688_s1 + $0xb4c] sm:$0xf] }
 0x296   :  { %5912 = vmatpush.bf16.msra.mxu2 %v7401_v10  ;;  %v5669_v14 = vpop.f32.mrf.mxu3  ;;  %v7830_v26 = vld [vmem:[%s15688_s1 + $0xa78] sm:$0xf0]  ;;  %v7705_v47 = vor.u32 %v10059_v6, %v7702_v4  ;;  %v10167_v58 = vld [vmem:[%s15688_s1 + $0xccc] sm:$0xf] }
 0x297   :  { %5921 = vmatpush.bf16.msra.mxu3 %v7593_v12  ;;  %5887 = vmatmul.bf16.vlgmr.msra.gmra.mxu0 %v11080_v44  ;;  %v10019_v44 = vld [vmem:[%s15688_s1 + $0x82c] sm:$0xf]  ;;  %v14877_v24 = vadd.f32 %v5693_v20, %v5681_v1  ;;  %v7958_v32 = vld [vmem:[%s15688_s1 + $0xb78] sm:$0xf0] }
 0x298   :  { %5931 = vmatpush.bf16.msrb.mxu0 %v7769_v13  ;;  %5900 = vmatmul.bf16.vlgmr.msra.gmra.mxu1 %v11068_v38  ;;  %v10063_v38 = vld [vmem:[%s15688_s1 + $0x98c] sm:$0xf]  ;;  %v7545_v10 = vor.u32 %v10019_v44, %v7542_v2  ;;  %v8150_v18 = vld [vmem:[%s15688_s1 + $0xcf8] sm:$0xf0] }
 0x299   :  { %5944 = vmatpush.bf16.msrb.mxu1 %v7897_v39  ;;  %5913 = vmatmul.bf16.vlgmr.msra.gmra.mxu2 %v11078_v42  ;;  %v7561_v42 = vor.u32 %v10023_v48, %v7558_v50  ;;  %v7721_v12 = vor.u32 %v10063_v38, %v7718_v0  ;;  %v10015_v13 = vld [vmem:[%s15688_s1 + $0x80c] sm:$0xf]  ;;  %v7849_v39 = vor.u32 %v10095_v9, %v7846_v5  ;;  %v7814_v61 = vld [vmem:[%s15688_s1 + $0xa58] sm:$0xf0] }
 0x29a   :  { %5957 = vmatpush.bf16.msrb.mxu2 %v8025_v34  ;;  %v7977_v34 = vor.u32 %v10127_v60, %v7974_v22  ;;  %v7833_v48 = vor.u32 %v10091_v21, %v7830_v26  ;;  %v7961_v50 = vor.u32 %v10123_v27, %v7958_v32  ;;  %v7942_v36 = vld [vmem:[%s15688_s1 + $0xb58] sm:$0xf0]  ;;  %v7817_v2 = vor.u32 %v10087_v54, %v7814_v61  ;;  %v10083_v0 = vld [vmem:[%s15688_s1 + $0xa2c] sm:$0xf] }
 0x29b   :  { %5922 = vmatpush.bf16.msra.mxu3 %v7577_v40  ;;  %v10171_v40 = vld [vmem:[%s15688_s1 + $0xcec] sm:$0xf]  ;;  %v7670_v38 = vld [vmem:[%s15688_s1 + $0x938] sm:$0xf0] }
 0x29c   :  { %5932 = vmatpush.bf16.msrb.mxu0 %v7753_v43  ;;  %v7529_v43 = vor.u32 %v10015_v13, %v7526_v7  ;;  %v8153_v57 = vor.u32 %v10171_v40, %v8150_v18  ;;  %v5682_v55 = vpop.f32.mrf.mxu0  ;;  %v7798_v3 = vld [vmem:[%s15688_s1 + $0xa38] sm:$0xf0]  ;;  %v10115_v5 = vld [vmem:[%s15688_s1 + $0xb2c] sm:$0xf] }
 0x29d   :  { %5945 = vmatpush.bf16.msrb.mxu1 %v7881_v51  ;;  %v10055_v51 = vld [vmem:[%s15688_s1 + $0x94c] sm:$0xf]  ;;  %v7926_v60 = vld [vmem:[%s15688_s1 + $0xb38] sm:$0xf0] }
 0x29e   :  { %5958 = vmatpush.bf16.msrb.mxu2 %v8009_v52  ;;  %v7686_v52 = vld [vmem:[%s15688_s1 + $0x958] sm:$0xf0]  ;;  %v10163_v22 = vld [vmem:[%s15688_s1 + $0xcac] sm:$0xf] }
 0x29f   :  { %5923 = vmatpush.bf16.msra.mxu3 %v7561_v42  ;;  %v8134_v42 = vld [vmem:[%s15688_s1 + $0xcd8] sm:$0xf0]  ;;  %v7689_v44 = vor.u32 %v10055_v51, %v7686_v52  ;;  %v10047_v8 = vld [vmem:[%s15688_s1 + $0x90c] sm:$0xf] }
 0x2a0   :  { %5933 = vmatpush.bf16.msrb.mxu0 %v7737_v59  ;;  %v5695_v59 = vpop.f32.mrf.mxu1  ;;  %v8137_v9 = vor.u32 %v10167_v58, %v8134_v42  ;;  %v8118_v1 = vld [vmem:[%s15688_s1 + $0xcb8] sm:$0xf0]  ;;  %v10079_v13 = vld [vmem:[%s15688_s1 + $0xa0c] sm:$0xf] }
 0x2a1   :  { %5946 = vmatpush.bf16.msrb.mxu1 %v7865_v62  ;;  %v7945_v62 = vor.u32 %v10119_v41, %v7942_v36  ;;  %v7782_v7 = vld [vmem:[%s15688_s1 + $0xa18] sm:$0xf0]  ;;  %v10111_v14 = vld [vmem:[%s15688_s1 + $0xb0c] sm:$0xf] }
 0x2a2   :  { %5959 = vmatpush.bf16.msrb.mxu2 %v7993_v63  ;;  %v10051_v63 = vld [vmem:[%s15688_s1 + $0x92c] sm:$0xf]  ;;  %v8102_v4 = vld [vmem:[%s15688_s1 + $0xc98] sm:$0xf0] }
 0x2a3   :  { %5924 = vmatpush.bf16.msra.mxu3 %v7545_v10  ;;  %v7673_v20 = vor.u32 %v10051_v63, %v7670_v38  ;;  %v7654_v10 = vld [vmem:[%s15688_s1 + $0x918] sm:$0xf0]  ;;  %v10159_v6 = vld [vmem:[%s15688_s1 + $0xc8c] sm:$0xf] }
 0x2a4   :  { %5934 = vmatpush.bf16.msrb.mxu0 %v7721_v12  ;;  %v7929_v12 = vor.u32 %v10115_v5, %v7926_v60  ;;  %v10203_v21 = vld [vmem:[%s15688_s1 + $0xdec] sm:$0xf]  ;;  %v8278_v26 = vld [vmem:[%s15688_s1 + $0xdf8] sm:$0xf0]  ;;  %v7657_v32 = vor.u32 %v10047_v8, %v7654_v10 }
 0x2a5   :  { %5947 = vmatpush.bf16.msrb.mxu1 %v7849_v39  ;;  %v8121_v39 = vor.u32 %v10163_v22, %v8118_v1  ;;  %v10235_v27 = vld [vmem:[%s15688_s1 + $0xeec] sm:$0xf]  ;;  %v8406_v40 = vld [vmem:[%s15688_s1 + $0xef8] sm:$0xf0]  ;;  %v8281_v51 = vor.u32 %v10203_v21, %v8278_v26 }
 0x2a6   :  { %5960 = vmatpush.bf16.msrb.mxu2 %v7977_v34  ;;  %v7910_v34 = vld [vmem:[%s15688_s1 + $0xb18] sm:$0xf0]  ;;  %v10267_v18 = vld [vmem:[%s15688_s1 + $0xfec] sm:$0xf] }
 0x2a7   :  { %5925 = vmatpush.bf16.msra.mxu3 %v7529_v43  ;;  %v8534_v43 = vld [vmem:[%s15688_s1 + $0xff8] sm:$0xf0]  ;;  %v10155_v52 = vld [vmem:[%s15688_s1 + $0xc6c] sm:$0xf] }
 0x2a8   :  { %5935 = vmatpush.bf16.msrb.mxu0 %v7705_v47  ;;  %v7785_v47 = vor.u32 %v10079_v13, %v7782_v7  ;;  %v8086_v54 = vld [vmem:[%s15688_s1 + $0xc78] sm:$0xf0]  ;;  %v8537_v61 = vor.u32 %v10267_v18, %v8534_v43  ;;  %v10199_v41 = vld [vmem:[%s15688_s1 + $0xdcc] sm:$0xf] }
 0x2a9   :  { %5948 = vmatpush.bf16.msrb.mxu1 %v7833_v48  ;;  %v7913_v48 = vor.u32 %v10111_v14, %v7910_v34  ;;  %v8262_v36 = vld [vmem:[%s15688_s1 + $0xdd8] sm:$0xf0]  ;;  %v10231_v55 = vld [vmem:[%s15688_s1 + $0xecc] sm:$0xf] }
 0x2aa   :  { %5961 = vmatpush.bf16.msrb.mxu2 %v7961_v50  ;;  %5926 = vmatmul.bf16.vlgmr.msra.gmra.mxu3 %v11269_v25  ;;  %v7801_v25 = vor.u32 %v10083_v0, %v7798_v3  ;;  %v8105_v50 = vor.u32 %v10159_v6, %v8102_v4  ;;  %v8390_v58 = vld [vmem:[%s15688_s1 + $0xed8] sm:$0xf0]  ;;  %v10263_v42 = vld [vmem:[%s15688_s1 + $0xfcc] sm:$0xf]  ;;  %v8265_v63 = vor.u32 %v10199_v41, %v8262_v36 }
 0x2ab   :  { %5970 = vmatpush.bf16.msrb.mxu3 %v8153_v57  ;;  %v8409_v57 = vor.u32 %v10235_v27, %v8406_v40  ;;  %v8518_v59 = vld [vmem:[%s15688_s1 + $0xfd8] sm:$0xf0]  ;;  %v10151_v0 = vld [vmem:[%s15688_s1 + $0xc4c] sm:$0xf]  ;;  %v8393_v3 = vor.u32 %v10231_v55, %v8390_v58 }
 0x2ac   :  { %5936 = vmatpush.bf16.msrb.mxu0 %v7689_v44  ;;  %v5706_v44 = vpop.f32.mrf.mxu2  ;;  %v8521_v5 = vor.u32 %v10263_v42, %v8518_v59  ;;  %v10195_v60 = vld [vmem:[%s15688_s1 + $0xdac] sm:$0xf]  ;;  %v8502_v10 = vld [vmem:[%s15688_s1 + $0xfb8] sm:$0xf0] }
 0x2ad   :  { %5949 = vmatpush.bf16.msrb.mxu1 %v7817_v2  ;;  %v8089_v2 = vor.u32 %v10155_v52, %v8086_v54  ;;  %v5719_v38 = vpop.f32.mrf.mxu3  ;;  %v10227_v22 = vld [vmem:[%s15688_s1 + $0xeac] sm:$0xf]  ;;  %v8230_v14 = vld [vmem:[%s15688_s1 + $0xd98] sm:$0xf0] }
 0x2ae   :  { %5962 = vmatpush.bf16.msrb.mxu2 %v7945_v62  ;;  %v5707_v62 = vadd.f32 %v5706_v44, %v14877_v24  ;;  %v8246_v24 = vld [vmem:[%s15688_s1 + $0xdb8] sm:$0xf0]  ;;  %v10259_v8 = vld [vmem:[%s15688_s1 + $0xfac] sm:$0xf] }
 0x2af   :  { %5971 = vmatpush.bf16.msrb.mxu3 %v8137_v9  ;;  %v8070_v9 = vld [vmem:[%s15688_s1 + $0xc58] sm:$0xf0]  ;;  %v8505_v7 = vor.u32 %v10259_v8, %v8502_v10  ;;  %v10255_v4 = vld [vmem:[%s15688_s1 + $0xf8c] sm:$0xf] }
 0x2b0   :  { %5937 = vmatpush.bf16.msrb.mxu0 %v7673_v20  ;;  %v5720_v1 = vadd.f32 %v5719_v38, %v5707_v62  ;;  %v8374_v20 = vld [vmem:[%s15688_s1 + $0xeb8] sm:$0xf0]  ;;  %v10143_v43 = vld [vmem:[%s15688_s1 + $0xc0c] sm:$0xf] }
 0x2b1   :  { %5950 = vmatpush.bf16.msrb.mxu1 %v7801_v25  ;;  %v8249_v25 = vor.u32 %v10195_v60, %v8246_v24  ;;  %v8377_v13 = vor.u32 %v10227_v22, %v8374_v20  ;;  %v8358_v6 = vld [vmem:[%s15688_s1 + $0xe98] sm:$0xf0]  ;;  %v10187_v54 = vld [vmem:[%s15688_s1 + $0xd6c] sm:$0xf] }
 0x2b2   :  { %5963 = vmatpush.bf16.msrb.mxu2 %v7929_v12  ;;  %v8054_v12 = vld [vmem:[%s15688_s1 + $0xc38] sm:$0xf0]  ;;  %v10251_v36 = vld [vmem:[%s15688_s1 + $0xf6c] sm:$0xf] }
 0x2b3   :  { %5972 = vmatpush.bf16.msrb.mxu3 %v8121_v39  ;;  %v10223_v39 = vld [vmem:[%s15688_s1 + $0xe8c] sm:$0xf]  ;;  %v8486_v21 = vld [vmem:[%s15688_s1 + $0xf98] sm:$0xf0] }
 0x2b4   :  { %5938 = vmatpush.bf16.msrb.mxu0 %v7657_v32  ;;  %v5732_v34 = vpop.f32.mrf.mxu0  ;;  %v5708_v32 = vpop.f32.mrf.mxu2  ;;  %v8342_v41 = vld [vmem:[%s15688_s1 + $0xe78] sm:$0xf0]  ;;  %v10299_v58 = vld [vmem:[%s15688_s1 + $0x10ec] sm:$0xf] }
 0x2b5   :  { %5951 = vmatpush.bf16.msrb.mxu1 %v7785_v47  ;;  %v5733_v26 = vadd.f32 %v5732_v34, %v5720_v1  ;;  %v5745_v27 = vpop.f32.mrf.mxu1  ;;  %v8038_v47 = vld [vmem:[%s15688_s1 + $0xc18] sm:$0xf0]  ;;  %v10295_v22 = vld [vmem:[%s15688_s1 + $0x10cc] sm:$0xf] }
 0x2b6   :  { %5964 = vmatpush.bf16.msrb.mxu2 %v7913_v48  ;;  %v5721_v48 = vpop.f32.mrf.mxu3  ;;  %v8470_v55 = vld [vmem:[%s15688_s1 + $0xf78] sm:$0xf0]  ;;  %v8041_v59 = vor.u32 %v10143_v43, %v8038_v47  ;;  %v10287_v47 = vld [vmem:[%s15688_s1 + $0x108c] sm:$0xf] }
 0x2b7   :  { %5973 = vmatpush.bf16.msrb.mxu3 %v8105_v50  ;;  %5939 = vmatmul.bf16.vlgmr.msrb.gmra.mxu0 %v11282_v30  ;;  %v8073_v30 = vor.u32 %v10151_v0, %v8070_v9  ;;  %v8361_v50 = vor.u32 %v10223_v39, %v8358_v6  ;;  %v15076_v52 = vadd.f32 %v5745_v27, %v5733_v26  ;;  %v8662_v42 = vld [vmem:[%s15688_s1 + $0x10f8] sm:$0xf0]  ;;  %v10215_v0 = vld [vmem:[%s15688_s1 + $0xe4c] sm:$0xf] }
 0x2b8   :  { %5983 = vmatpush.bf16.msra.mxu0 %v8281_v51  ;;  %5952 = vmatmul.bf16.vlgmr.msrb.gmra.mxu1 %v11280_v29  ;;  %v10191_v29 = vld [vmem:[%s15688_s1 + $0xd8c] sm:$0xf]  ;;  %v8489_v51 = vor.u32 %v10255_v4, %v8486_v21  ;;  %v8473_v62 = vor.u32 %v10251_v36, %v8470_v55  ;;  %v8198_v38 = vld [vmem:[%s15688_s1 + $0xd58] sm:$0xf0]  ;;  %v8665_v9 = vor.u32 %v10299_v58, %v8662_v42 }
 0x2b9   :  { %5996 = vmatpush.bf16.msra.mxu1 %v8409_v57  ;;  %5965 = vmatmul.bf16.vlgmr.msrb.gmra.mxu2 %v11290_v33  ;;  %v10147_v33 = vld [vmem:[%s15688_s1 + $0xc2c] sm:$0xf]  ;;  %v8233_v18 = vor.u32 %v10191_v29, %v8230_v14  ;;  %v8214_v57 = vld [vmem:[%s15688_s1 + $0xd78] sm:$0xf0] }
 0x2ba   :  { %6009 = vmatpush.bf16.msra.mxu2 %v8537_v61  ;;  %v8057_v40 = vor.u32 %v10147_v33, %v8054_v12  ;;  %v10219_v61 = vld [vmem:[%s15688_s1 + $0xe6c] sm:$0xf]  ;;  %v8217_v44 = vor.u32 %v10187_v54, %v8214_v57  ;;  %v8454_v60 = vld [vmem:[%s15688_s1 + $0xf58] sm:$0xf0] }
 0x2bb   :  { %5974 = vmatpush.bf16.msrb.mxu3 %v8089_v2  ;;  %v8345_v2 = vor.u32 %v10219_v61, %v8342_v41  ;;  %v8646_v1 = vld [vmem:[%s15688_s1 + $0x10d8] sm:$0xf0]  ;;  %v10211_v12 = vld [vmem:[%s15688_s1 + $0xe2c] sm:$0xf] }
 0x2bc   :  { %5984 = vmatpush.bf16.msra.mxu0 %v8265_v63  ;;  %v10183_v63 = vld [vmem:[%s15688_s1 + $0xd4c] sm:$0xf]  ;;  %v5734_v24 = vpop.f32.mrf.mxu0  ;;  %v8182_v33 = vld [vmem:[%s15688_s1 + $0xd38] sm:$0xf0] }
 0x2bd   :  { %5997 = vmatpush.bf16.msra.mxu1 %v8393_v3  ;;  %v8326_v3 = vld [vmem:[%s15688_s1 + $0xe58] sm:$0xf0]  ;;  %v5747_v20 = vpop.f32.mrf.mxu1  ;;  %v8201_v8 = vor.u32 %v10183_v63, %v8198_v38  ;;  %v10243_v29 = vld [vmem:[%s15688_s1 + $0xf2c] sm:$0xf] }
 0x2be   :  { %6010 = vmatpush.bf16.msra.mxu2 %v8521_v5  ;;  %v10247_v5 = vld [vmem:[%s15688_s1 + $0xf4c] sm:$0xf]  ;;  %v8329_v10 = vor.u32 %v10215_v0, %v8326_v3  ;;  %v8438_v14 = vld [vmem:[%s15688_s1 + $0xf38] sm:$0xf0] }
 0x2bf   :  { %5975 = vmatpush.bf16.msrb.mxu3 %v8073_v30  ;;  %v8457_v30 = vor.u32 %v10247_v5, %v8454_v60  ;;  %v10291_v39 = vld [vmem:[%s15688_s1 + $0x10ac] sm:$0xf]  ;;  %v8630_v34 = vld [vmem:[%s15688_s1 + $0x10b8] sm:$0xf0]  ;;  %v8441_v26 = vor.u32 %v10243_v29, %v8438_v14 }
 0x2c0   :  { %5985 = vmatpush.bf16.msra.mxu0 %v8249_v25  ;;  %v10179_v25 = vld [vmem:[%s15688_s1 + $0xd2c] sm:$0xf]  ;;  %v8166_v21 = vld [vmem:[%s15688_s1 + $0xd18] sm:$0xf0] }
 0x2c1   :  { %5998 = vmatpush.bf16.msra.mxu1 %v8377_v13  ;;  %v8649_v13 = vor.u32 %v10295_v22, %v8646_v1  ;;  %v8185_v6 = vor.u32 %v10179_v25, %v8182_v33  ;;  %v10175_v4 = vld [vmem:[%s15688_s1 + $0xd0c] sm:$0xf]  ;;  %v8294_v32 = vld [vmem:[%s15688_s1 + $0xe18] sm:$0xf0] }
 0x2c2   :  { %6011 = vmatpush.bf16.msra.mxu2 %v8505_v7  ;;  %v8310_v7 = vld [vmem:[%s15688_s1 + $0xe38] sm:$0xf0]  ;;  %v10207_v27 = vld [vmem:[%s15688_s1 + $0xe0c] sm:$0xf]  ;;  %v8169_v57 = vor.u32 %v10175_v4, %v8166_v21 }
 0x2c3   :  { %5976 = vmatpush.bf16.msrb.mxu3 %v8057_v40  ;;  %v10239_v40 = vld [vmem:[%s15688_s1 + $0xf0c] sm:$0xf]  ;;  %v8422_v43 = vld [vmem:[%s15688_s1 + $0xf18] sm:$0xf0]  ;;  %v8297_v55 = vor.u32 %v10207_v27, %v8294_v32 }
 0x2c4   :  { %5986 = vmatpush.bf16.msra.mxu0 %v8233_v18  ;;  %v8633_v18 = vor.u32 %v10291_v39, %v8630_v34  ;;  %v8614_v48 = vld [vmem:[%s15688_s1 + $0x1098] sm:$0xf0]  ;;  %v10363_v54 = vld [vmem:[%s15688_s1 + $0x12ec] sm:$0xf]  ;;  %v8425_v58 = vor.u32 %v10239_v40, %v8422_v43 }
 0x2c5   :  { %5999 = vmatpush.bf16.msra.mxu1 %v8361_v50  ;;  %v10331_v50 = vld [vmem:[%s15688_s1 + $0x11ec] sm:$0xf]  ;;  %v8918_v61 = vld [vmem:[%s15688_s1 + $0x12f8] sm:$0xf0]  ;;  %v8617_v42 = vor.u32 %v10287_v47, %v8614_v48 }
 0x2c6   :  { %6012 = vmatpush.bf16.msra.mxu2 %v8489_v51  ;;  %v8790_v51 = vld [vmem:[%s15688_s1 + $0x11f8] sm:$0xf0]  ;;  %v10395_v41 = vld [vmem:[%s15688_s1 + $0x13ec] sm:$0xf] }
 0x2c7   :  { %5977 = vmatpush.bf16.msrb.mxu3 %v8041_v59  ;;  %v9046_v36 = vld [vmem:[%s15688_s1 + $0x13f8] sm:$0xf0]  ;;  %v8793_v59 = vor.u32 %v10331_v50, %v8790_v51  ;;  %v10327_v38 = vld [vmem:[%s15688_s1 + $0x11cc] sm:$0xf] }
 0x2c8   :  { %5987 = vmatpush.bf16.msra.mxu0 %v8217_v44  ;;  %v10283_v44 = vld [vmem:[%s15688_s1 + $0x106c] sm:$0xf]  ;;  %v9049_v63 = vor.u32 %v10395_v41, %v9046_v36  ;;  %v8774_v0 = vld [vmem:[%s15688_s1 + $0x11d8] sm:$0xf0] }
 0x2c9   :  { %6000 = vmatpush.bf16.msra.mxu1 %v8345_v2  ;;  %v8598_v2 = vld [vmem:[%s15688_s1 + $0x1078] sm:$0xf0]  ;;  %v10391_v5 = vld [vmem:[%s15688_s1 + $0x13cc] sm:$0xf]  ;;  %v8777_v20 = vor.u32 %v10327_v38, %v8774_v0 }
 0x2ca   :  { %6013 = vmatpush.bf16.msra.mxu2 %v8473_v62  ;;  %5978 = vmatmul.bf16.vlgmr.msrb.gmra.mxu3 %v11479_v23  ;;  %v8313_v23 = vor.u32 %v10211_v12, %v8310_v7  ;;  %v8921_v62 = vor.u32 %v10363_v54, %v8918_v61  ;;  %v8902_v3 = vld [vmem:[%s15688_s1 + $0x12d8] sm:$0xf0]  ;;  %v8601_v22 = vor.u32 %v10283_v44, %v8598_v2  ;;  %v10323_v12 = vld [vmem:[%s15688_s1 + $0x11ac] sm:$0xf] }
 0x2cb   :  { %6022 = vmatpush.bf16.msra.mxu3 %v8665_v9  ;;  %v10359_v9 = vld [vmem:[%s15688_s1 + $0x12cc] sm:$0xf]  ;;  %v9030_v60 = vld [vmem:[%s15688_s1 + $0x13d8] sm:$0xf0] }
 0x2cc   :  { %5988 = vmatpush.bf16.msra.mxu0 %v8201_v8  ;;  %v5758_v24 = vpop.f32.mrf.mxu2  ;;  %v8905_v25 = vor.u32 %v10359_v9, %v8902_v3  ;;  %v9033_v33 = vor.u32 %v10391_v5, %v9030_v60  ;;  %v8886_v29 = vld [vmem:[%s15688_s1 + $0x12b8] sm:$0xf0]  ;;  %v10387_v14 = vld [vmem:[%s15688_s1 + $0x13ac] sm:$0xf] }
 0x2cd   :  { %6001 = vmatpush.bf16.msra.mxu1 %v8329_v10  ;;  %v5759_v1 = vadd.f32 %v5758_v24, %v15076_v52  ;;  %v5771_v8 = vpop.f32.mrf.mxu3  ;;  %v10279_v10 = vld [vmem:[%s15688_s1 + $0x104c] sm:$0xf]  ;;  %v8758_v52 = vld [vmem:[%s15688_s1 + $0x11b8] sm:$0xf0] }
 0x2ce   :  { %6014 = vmatpush.bf16.msra.mxu2 %v8457_v30  ;;  %v8582_v30 = vld [vmem:[%s15688_s1 + $0x1058] sm:$0xf0]  ;;  %v8761_v34 = vor.u32 %v10323_v12, %v8758_v52  ;;  %v10383_v32 = vld [vmem:[%s15688_s1 + $0x138c] sm:$0xf] }
 0x2cf   :  { %6023 = vmatpush.bf16.msra.mxu3 %v8649_v13  ;;  %v10355_v13 = vld [vmem:[%s15688_s1 + $0x12ac] sm:$0xf]  ;;  %v5772_v7 = vadd.f32 %v5771_v8, %v5759_v1  ;;  %v9014_v39 = vld [vmem:[%s15688_s1 + $0x13b8] sm:$0xf0] }
 0x2d0   :  { %5989 = vmatpush.bf16.msra.mxu0 %v8185_v6  ;;  %v8566_v6 = vld [vmem:[%s15688_s1 + $0x1038] sm:$0xf0]  ;;  %v8889_v4 = vor.u32 %v10355_v13, %v8886_v29  ;;  %v9017_v21 = vor.u32 %v10387_v14, %v9014_v39  ;;  %v10271_v54 = vld [vmem:[%s15688_s1 + $0x100c] sm:$0xf] }
 0x2d1   :  { %6002 = vmatpush.bf16.msra.mxu1 %v8313_v23  ;;  %v8742_v23 = vld [vmem:[%s15688_s1 + $0x1198] sm:$0xf0]  ;;  %v10379_v2 = vld [vmem:[%s15688_s1 + $0x136c] sm:$0xf] }
 0x2d2   :  { %6015 = vmatpush.bf16.msra.mxu2 %v8441_v26  ;;  %v10351_v26 = vld [vmem:[%s15688_s1 + $0x128c] sm:$0xf]  ;;  %v8870_v27 = vld [vmem:[%s15688_s1 + $0x1298] sm:$0xf0] }
 0x2d3   :  { %6024 = vmatpush.bf16.msra.mxu3 %v8633_v18  ;;  %v8998_v40 = vld [vmem:[%s15688_s1 + $0x1398] sm:$0xf0]  ;;  %v8873_v41 = vor.u32 %v10351_v26, %v8870_v27  ;;  %v10311_v60 = vld [vmem:[%s15688_s1 + $0x114c] sm:$0xf] }
 0x2d4   :  { %5990 = vmatpush.bf16.msra.mxu0 %v8169_v57  ;;  %v5784_v18 = vpop.f32.mrf.mxu0  ;;  %v5760_v43 = vpop.f32.mrf.mxu2  ;;  %v8550_v57 = vld [vmem:[%s15688_s1 + $0x1018] sm:$0xf0]  ;;  %v9001_v36 = vor.u32 %v10383_v32, %v8998_v40  ;;  %v10375_v8 = vld [vmem:[%s15688_s1 + $0x134c] sm:$0xf] }
 0x2d5   :  { %6003 = vmatpush.bf16.msra.mxu1 %v8297_v55  ;;  %v5785_v47 = vadd.f32 %v5784_v18, %v5772_v7  ;;  %v5797_v51 = vpop.f32.mrf.mxu1  ;;  %v5773_v61 = vpop.f32.mrf.mxu3  ;;  %v10315_v55 = vld [vmem:[%s15688_s1 + $0x116c] sm:$0xf]  ;;  %v8854_v44 = vld [vmem:[%s15688_s1 + $0x1278] sm:$0xf0]  ;;  %v8553_v0 = vor.u32 %v10271_v54, %v8550_v57 }
 0x2d6   :  { %6016 = vmatpush.bf16.msra.mxu2 %v8425_v58  ;;  %v8726_v58 = vld [vmem:[%s15688_s1 + $0x1178] sm:$0xf0]  ;;  %v10307_v14 = vld [vmem:[%s15688_s1 + $0x112c] sm:$0xf] }
 0x2d7   :  { %6025 = vmatpush.bf16.msra.mxu3 %v8617_v42  ;;  %5991 = vmatmul.bf16.vlgmr.msra.gmra.mxu0 %v11492_v31  ;;  %v8585_v31 = vor.u32 %v10279_v10, %v8582_v30  ;;  %v10347_v42 = vld [vmem:[%s15688_s1 + $0x126c] sm:$0xf]  ;;  %v9174_v38 = vld [vmem:[%s15688_s1 + $0x14f8] sm:$0xf0]  ;;  %v8729_v9 = vor.u32 %v10315_v55, %v8726_v58 }
 0x2d8   :  { %6035 = vmatpush.bf16.msrb.mxu0 %v8793_v59  ;;  %6004 = vmatmul.bf16.vlgmr.msra.gmra.mxu1 %v11490_v28  ;;  %v10319_v28 = vld [vmem:[%s15688_s1 + $0x118c] sm:$0xf]  ;;  %v5798_v59 = vadd.f32 %v5797_v51, %v5785_v47  ;;  %v8857_v3 = vor.u32 %v10347_v42, %v8854_v44  ;;  %v8710_v24 = vld [vmem:[%s15688_s1 + $0x1158] sm:$0xf0] }
 0x2d9   :  { %6048 = vmatpush.bf16.msrb.mxu1 %v8921_v62  ;;  %6017 = vmatmul.bf16.vlgmr.msra.gmra.mxu2 %v11500_v35  ;;  %v10275_v35 = vld [vmem:[%s15688_s1 + $0x102c] sm:$0xf]  ;;  %v8745_v50 = vor.u32 %v10319_v28, %v8742_v23  ;;  %v8982_v62 = vld [vmem:[%s15688_s1 + $0x1378] sm:$0xf0]  ;;  %v8713_v12 = vor.u32 %v10311_v60, %v8710_v24 }
 0x2da   :  { %6061 = vmatpush.bf16.msrb.mxu2 %v9049_v63  ;;  %v8569_v48 = vor.u32 %v10275_v35, %v8566_v6  ;;  %v10427_v63 = vld [vmem:[%s15688_s1 + $0x14ec] sm:$0xf]  ;;  %v8985_v5 = vor.u32 %v10379_v2, %v8982_v62  ;;  %v8966_v10 = vld [vmem:[%s15688_s1 + $0x1358] sm:$0xf0] }
 0x2db   :  { %6026 = vmatpush.bf16.msra.mxu3 %v8601_v22  ;;  %v10343_v22 = vld [vmem:[%s15688_s1 + $0x124c] sm:$0xf]  ;;  %v9177_v1 = vor.u32 %v10427_v63, %v9174_v38  ;;  %v8969_v29 = vor.u32 %v10375_v8, %v8966_v10  ;;  %v8694_v39 = vld [vmem:[%s15688_s1 + $0x1138] sm:$0xf0] }
 0x2dc   :  { %6036 = vmatpush.bf16.msrb.mxu0 %v8777_v20  ;;  %v8838_v20 = vld [vmem:[%s15688_s1 + $0x1258] sm:$0xf0]  ;;  %v10423_v30 = vld [vmem:[%s15688_s1 + $0x14cc] sm:$0xf]  ;;  %v5810_v13 = vpop.f32.mrf.mxu2  ;;  %v8697_v26 = vor.u32 %v10307_v14, %v8694_v39 }
 0x2dd   :  { %6049 = vmatpush.bf16.msrb.mxu1 %v8905_v25  ;;  %v9158_v25 = vld [vmem:[%s15688_s1 + $0x14d8] sm:$0xf0]  ;;  %v5799_v52 = vpop.f32.mrf.mxu1  ;;  %v8841_v7 = vor.u32 %v10343_v22, %v8838_v20  ;;  %v10419_v28 = vld [vmem:[%s15688_s1 + $0x14ac] sm:$0xf] }
 0x2de   :  { %6062 = vmatpush.bf16.msrb.mxu2 %v9033_v33  ;;  %v5786_v33 = vpop.f32.mrf.mxu0  ;;  %v9161_v35 = vor.u32 %v10423_v30, %v9158_v25  ;;  %v8822_v6 = vld [vmem:[%s15688_s1 + $0x1238] sm:$0xf0]  ;;  %v10303_v27 = vld [vmem:[%s15688_s1 + $0x110c] sm:$0xf] }
 0x2df   :  { %6027 = vmatpush.bf16.msra.mxu3 %v8585_v31  ;;  %v10339_v31 = vld [vmem:[%s15688_s1 + $0x122c] sm:$0xf]  ;;  %v9142_v23 = vld [vmem:[%s15688_s1 + $0x14b8] sm:$0xf0]  ;;  %v10584_v33 = vld [vmem:[%s15690_s2] sm:$0xf] }
 0x2e0   :  { %6037 = vmatpush.bf16.msrb.mxu0 %v8761_v34  ;;  %v15332_v34 = vadd.f32 %v5810_v13, %v5798_v59  ;;  %v8678_v32 = vld [vmem:[%s15688_s1 + $0x1118] sm:$0xf0]  ;;  %v10335_v18 = vld [vmem:[%s15688_s1 + $0x120c] sm:$0xf] }
 0x2e1   :  { %6050 = vmatpush.bf16.msrb.mxu1 %v8889_v4  ;;  %v10371_v4 = vld [vmem:[%s15688_s1 + $0x132c] sm:$0xf]  ;;  %v8806_v43 = vld [vmem:[%s15688_s1 + $0x1218] sm:$0xf0] }
 0x2e2   :  { %6063 = vmatpush.bf16.msrb.mxu2 %v9017_v21  ;;  %v8950_v21 = vld [vmem:[%s15688_s1 + $0x1338] sm:$0xf0]  ;;  %v10367_v47 = vld [vmem:[%s15688_s1 + $0x130c] sm:$0xf]  ;;  %v8809_v59 = vor.u32 %v10335_v18, %v8806_v43 }
 0x2e3   :  { %6028 = vmatpush.bf16.msra.mxu3 %v8569_v48  ;;  %v8953_v40 = vor.u32 %v10371_v4, %v8950_v21  ;;  %v9145_v48 = vor.u32 %v10419_v28, %v9142_v23  ;;  %v10415_v51 = vld [vmem:[%s15688_s1 + $0x148c] sm:$0xf]  ;;  %v9126_v54 = vld [vmem:[%s15688_s1 + $0x1498] sm:$0xf0] }
 0x2e4   :  { %6038 = vmatpush.bf16.msrb.mxu0 %v8745_v50  ;;  %v8934_v50 = vld [vmem:[%s15688_s1 + $0x1318] sm:$0xf0]  ;;  %v10459_v57 = vld [vmem:[%s15688_s1 + $0x15ec] sm:$0xf]  ;;  %v5812_v2 = vpop.f32.mrf.mxu2  ;;  %v9129_v62 = vor.u32 %v10415_v51, %v9126_v54 }
 0x2e5   :  { %6051 = vmatpush.bf16.msrb.mxu1 %v8873_v41  ;;  %v9302_v61 = vld [vmem:[%s15688_s1 + $0x15f8] sm:$0xf0]  ;;  %v10491_v41 = vld [vmem:[%s15688_s1 + $0x16ec] sm:$0xf]  ;;  %v8937_v44 = vor.u32 %v10367_v47, %v8934_v50 }
 0x2e6   :  { %6064 = vmatpush.bf16.msrb.mxu2 %v9001_v36  ;;  %v8681_v36 = vor.u32 %v10303_v27, %v8678_v32  ;;  %v9430_v55 = vld [vmem:[%s15688_s1 + $0x16f8] sm:$0xf0]  ;;  %v10523_v58 = vld [vmem:[%s15688_s1 + $0x17ec] sm:$0xf]  ;;  %v9305_v63 = vor.u32 %v10459_v57, %v9302_v61 }
 0x2e7   :  { %6029 = vmatpush.bf16.msra.mxu3 %v8553_v0  ;;  %v9558_v42 = vld [vmem:[%s15688_s1 + $0x17f8] sm:$0xf0]  ;;  %v10411_v38 = vld [vmem:[%s15688_s1 + $0x146c] sm:$0xf] }
 0x2e8   :  { %6039 = vmatpush.bf16.msrb.mxu0 %v8729_v9  ;;  %v9110_v0 = vld [vmem:[%s15688_s1 + $0x1478] sm:$0xf0]  ;;  %v9433_v9 = vor.u32 %v10491_v41, %v9430_v55  ;;  %v10487_v24 = vld [vmem:[%s15688_s1 + $0x16cc] sm:$0xf] }
 0x2e9   :  { %6052 = vmatpush.bf16.msrb.mxu1 %v8857_v3  ;;  %v9561_v3 = vor.u32 %v10523_v58, %v9558_v42  ;;  %v9286_v60 = vld [vmem:[%s15688_s1 + $0x15d8] sm:$0xf0]  ;;  %v9113_v8 = vor.u32 %v10411_v38, %v9110_v0  ;;  %v10407_v30 = vld [vmem:[%s15688_s1 + $0x144c] sm:$0xf] }
 0x2ea   :  { %6065 = vmatpush.bf16.msrb.mxu2 %v8985_v5  ;;  %6030 = vmatmul.bf16.vlgmr.msra.gmra.mxu3 %v11689_v37  ;;  %v8825_v37 = vor.u32 %v10339_v31, %v8822_v6  ;;  %v10455_v5 = vld [vmem:[%s15688_s1 + $0x15cc] sm:$0xf]  ;;  %v9414_v22 = vld [vmem:[%s15688_s1 + $0x16d8] sm:$0xf0] }
 0x2eb   :  { %6074 = vmatpush.bf16.msrb.mxu3 %v9177_v1  ;;  %v10519_v1 = vld [vmem:[%s15688_s1 + $0x17cc] sm:$0xf]  ;;  %v9542_v20 = vld [vmem:[%s15688_s1 + $0x17d8] sm:$0xf0]  ;;  %v9289_v10 = vor.u32 %v10455_v5, %v9286_v60  ;;  %v9417_v13 = vor.u32 %v10487_v24, %v9414_v22 }
 0x2ec   :  { %6040 = vmatpush.bf16.msrb.mxu0 %v8713_v12  ;;  %v9094_v25 = vld [vmem:[%s15688_s1 + $0x1458] sm:$0xf0]  ;;  %v823_v12 = vperm.slane %v10584_v33, 3  ;;  %v10483_v39 = vld [vmem:[%s15688_s1 + $0x16ac] sm:$0xf] }
 0x2ed   :  { %6053 = vmatpush.bf16.msrb.mxu1 %v8841_v7  ;;  %v5823_v52 = vpop.f32.mrf.mxu3  ;;  %v9545_v7 = vor.u32 %v10519_v1, %v9542_v20  ;;  %v9270_v14 = vld [vmem:[%s15688_s1 + $0x15b8] sm:$0xf0]  ;;  %v9097_v4 = vor.u32 %v10407_v30, %v9094_v25  ;;  %v10479_v32 = vld [vmem:[%s15688_s1 + $0x168c] sm:$0xf] }
 0x2ee   :  { %6066 = vmatpush.bf16.msrb.mxu2 %v8969_v29  ;;  %v10451_v29 = vld [vmem:[%s15688_s1 + $0x15ac] sm:$0xf]  ;;  %v9398_v31 = vld [vmem:[%s15688_s1 + $0x16b8] sm:$0xf0]  ;;  %v5824_v28 = vadd.f32 %v5823_v52, %v823_v12 }
 0x2ef   :  { %6075 = vmatpush.bf16.msrb.mxu3 %v9161_v35  ;;  %v10515_v35 = vld [vmem:[%s15688_s1 + $0x17ac] sm:$0xf]  ;;  %v9526_v6 = vld [vmem:[%s15688_s1 + $0x17b8] sm:$0xf0]  ;;  %v9401_v23 = vor.u32 %v10483_v39, %v9398_v31 }
 0x2f0   :  { %6041 = vmatpush.bf16.msrb.mxu0 %v8697_v26  ;;  %v9078_v21 = vld [vmem:[%s15688_s1 + $0x1438] sm:$0xf0]  ;;  %v9529_v26 = vor.u32 %v10515_v35, %v9526_v6  ;;  %v10399_v50 = vld [vmem:[%s15688_s1 + $0x140c] sm:$0xf] }
 0x2f1   :  { %6054 = vmatpush.bf16.msrb.mxu1 %v8825_v37  ;;  %v9254_v27 = vld [vmem:[%s15688_s1 + $0x1598] sm:$0xf0]  ;;  %v10443_v55 = vld [vmem:[%s15688_s1 + $0x156c] sm:$0xf] }
 0x2f2   :  { %6067 = vmatpush.bf16.msrb.mxu2 %v8953_v40  ;;  %v9382_v37 = vld [vmem:[%s15688_s1 + $0x1698] sm:$0xf0]  ;;  %v10511_v40 = vld [vmem:[%s15688_s1 + $0x178c] sm:$0xf] }
 0x2f3   :  { %6076 = vmatpush.bf16.msrb.mxu3 %v9145_v48  ;;  %v9510_v18 = vld [vmem:[%s15688_s1 + $0x1798] sm:$0xf0]  ;;  %v9385_v41 = vor.u32 %v10479_v32, %v9382_v37  ;;  %v10475_v42 = vld [vmem:[%s15688_s1 + $0x166c] sm:$0xf] }
 0x2f4   :  { %6042 = vmatpush.bf16.msrb.mxu0 %v8681_v36  ;;  %v5836_v43 = vpop.f32.mrf.mxu0  ;;  %v9062_v51 = vld [vmem:[%s15688_s1 + $0x1418] sm:$0xf0]  ;;  %v9513_v36 = vor.u32 %v10511_v40, %v9510_v18  ;;  %v10439_v60 = vld [vmem:[%s15688_s1 + $0x154c] sm:$0xf] }
 0x2f5   :  { %6055 = vmatpush.bf16.msrb.mxu1 %v8809_v59  ;;  %v5837_v54 = vadd.f32 %v5836_v43, %v5824_v28  ;;  %v5849_v57 = vpop.f32.mrf.mxu1  ;;  %v5825_v61 = vpop.f32.mrf.mxu3  ;;  %v9238_v58 = vld [vmem:[%s15688_s1 + $0x1578] sm:$0xf0]  ;;  %v9065_v0 = vor.u32 %v10399_v50, %v9062_v51  ;;  %v10471_v22 = vld [vmem:[%s15688_s1 + $0x164c] sm:$0xf] }
 0x2f6   :  { %6068 = vmatpush.bf16.msrb.mxu2 %v8937_v44  ;;  %v9366_v59 = vld [vmem:[%s15688_s1 + $0x1678] sm:$0xf0]  ;;  %v10507_v44 = vld [vmem:[%s15688_s1 + $0x176c] sm:$0xf] }
 0x2f7   :  { %6077 = vmatpush.bf16.msrb.mxu3 %v9129_v62  ;;  %6043 = vmatmul.bf16.vlgmr.msrb.gmra.mxu0 %v11702_v46  ;;  %v9273_v46 = vor.u32 %v10451_v29, %v9270_v14  ;;  %v9494_v2 = vld [vmem:[%s15688_s1 + $0x1778] sm:$0xf0]  ;;  %v5850_v62 = vadd.f32 %v5849_v57, %v5837_v54  ;;  %v10535_v33 = vld [vmem:[%s15688_s1 + $0x184c] sm:$0xf] }
 0x2f8   :  { %6087 = vmatpush.bf16.msra.mxu0 %v9305_v63  ;;  %6056 = vmatmul.bf16.vlgmr.msrb.gmra.mxu1 %v11700_v45  ;;  %v10447_v45 = vld [vmem:[%s15688_s1 + $0x158c] sm:$0xf]  ;;  %v9622_v38 = vld [vmem:[%s15688_s1 + $0x1878] sm:$0xf0]  ;;  %v9497_v5 = vor.u32 %v10507_v44, %v9494_v2  ;;  %v10564_v44 = vld [vmem:[%s15691_s3 + $0xb0] sm:$0xff] }
 0x2f9   :  { %6100 = vmatpush.bf16.msra.mxu1 %v9433_v9  ;;  %6069 = vmatmul.bf16.vlgmr.msrb.gmra.mxu2 %v11710_v49  ;;  %v10403_v49 = vld [vmem:[%s15688_s1 + $0x142c] sm:$0xf]  ;;  %v9257_v48 = vor.u32 %v10447_v45, %v9254_v27  ;;  %v9241_v9 = vor.u32 %v10443_v55, %v9238_v58  ;;  %v9222_v24 = vld [vmem:[%s15688_s1 + $0x1558] sm:$0xf0]  ;;  %v10548_v58 = vld [vmem:[%s15691_s3 + $0x30] sm:$0xff] }
 0x2fa   :  { %6113 = vmatpush.bf16.msra.mxu2 %v9561_v3  ;;  %v9081_v47 = vor.u32 %v10403_v49, %v9078_v21  ;;  %v10539_v63 = vld [vmem:[%s15688_s1 + $0x186c] sm:$0xf]  ;;  %v9369_v3 = vor.u32 %v10475_v42, %v9366_v59  ;;  %v9478_v30 = vld [vmem:[%s15688_s1 + $0x1758] sm:$0xf0]  ;;  %v10556_v42 = vld [vmem:[%s15691_s3 + $0x70] sm:$0xff] }
 0x2fb   :  { %6078 = vmatpush.bf16.msrb.mxu3 %v9113_v8  ;;  %v9625_v20 = vor.u32 %v10539_v63, %v9622_v38  ;;  %v9350_v8 = vld [vmem:[%s15688_s1 + $0x1658] sm:$0xf0]  ;;  %v10435_v39 = vld [vmem:[%s15688_s1 + $0x152c] sm:$0xf]  ;;  %v10546_v38 = vld [vmem:[%s15691_s3 + $0x20] sm:$0xff] }
 0x2fc   :  { %6088 = vmatpush.bf16.msra.mxu0 %v9289_v10  ;;  %v5862_v1 = vpop.f32.mrf.mxu2  ;;  %v10503_v10 = vld [vmem:[%s15688_s1 + $0x174c] sm:$0xf]  ;;  %v9606_v12 = vld [vmem:[%s15688_s1 + $0x1858] sm:$0xf0]  ;;  %v5838_v52 = vpop.f32.mrf.mxu0  ;;  %v9353_v29 = vor.u32 %v10471_v22, %v9350_v8 }
 0x2fd   :  { %6101 = vmatpush.bf16.msra.mxu1 %v9417_v13  ;;  %v15518_v25 = vadd.f32 %v5862_v1, %v5850_v62  ;;  %v9225_v13 = vor.u32 %v10439_v60, %v9222_v24  ;;  %v9481_v14 = vor.u32 %v10503_v10, %v9478_v30  ;;  %v9206_v31 = vld [vmem:[%s15688_s1 + $0x1538] sm:$0xf0]  ;;  %v10467_v35 = vld [vmem:[%s15688_s1 + $0x162c] sm:$0xf]  ;;  %v9609_v6 = vor.u32 %v10535_v33, %v9606_v12  ;;  %v10544_v10 = vld [vmem:[%s15691_s3 + $0x10] sm:$0xff] }
 0x2fe   :  { %6114 = vmatpush.bf16.msra.mxu2 %v9545_v7  ;;  %v5851_v7 = vpop.f32.mrf.mxu1  ;;  %v9462_v49 = vld [vmem:[%s15688_s1 + $0x1738] sm:$0xf0]  ;;  %v10531_v21 = vld [vmem:[%s15688_s1 + $0x182c] sm:$0xf]  ;;  %v10552_v30 = vld [vmem:[%s15691_s3 + $0x50] sm:$0xff] }
 0x2ff   :  { %6079 = vmatpush.bf16.msrb.mxu3 %v9097_v4  ;;  %v9334_v4 = vld [vmem:[%s15688_s1 + $0x1638] sm:$0xf0]  ;;  %v10431_v27 = vld [vmem:[%s15688_s1 + $0x150c] sm:$0xf]  ;;  %v10560_v33 = vld [vmem:[%s15691_s3 + $0x90] sm:$0xff] }
 0x300   :  { %6089 = vmatpush.bf16.msra.mxu0 %v9273_v46  ;;  %v10499_v46 = vld [vmem:[%s15688_s1 + $0x172c] sm:$0xf]  ;;  %v9590_v28 = vld [vmem:[%s15688_s1 + $0x1838] sm:$0xf0] }
 0x301   :  { %6102 = vmatpush.bf16.msra.mxu1 %v9401_v23  ;;  %v9209_v23 = vor.u32 %v10435_v39, %v9206_v31  ;;  %v9465_v45 = vor.u32 %v10499_v46, %v9462_v49  ;;  %v10463_v32 = vld [vmem:[%s15688_s1 + $0x160c] sm:$0xf]  ;;  %v9593_v40 = vor.u32 %v10531_v21, %v9590_v28  ;;  %v9318_v18 = vld [vmem:[%s15688_s1 + $0x1618] sm:$0xf0]  ;;  %v6139_v39 = vmax.f32 %v12897_v53, 0.0 }
 0x302   :  { %6115 = vmatpush.bf16.msra.mxu2 %v9529_v26  ;;  %v9337_v26 = vor.u32 %v10467_v35, %v9334_v4  ;;  %v10495_v43 = vld [vmem:[%s15688_s1 + $0x170c] sm:$0xf]  ;;  %v9574_v51 = vld [vmem:[%s15688_s1 + $0x1818] sm:$0xf0]  ;;  %v9321_v54 = vor.u32 %v10463_v32, %v9318_v18  ;;  %v6140_v31 = vmax.f32 %v14101_v17, 0.0  ;;  %v10558_v35 = vld [vmem:[%s15691_s3 + $0x80] sm:$0xff] }
 0x303   :  { %6080 = vmatpush.bf16.msrb.mxu3 %v9081_v47  ;;  %v9446_v47 = vld [vmem:[%s15688_s1 + $0x1718] sm:$0xf0]  ;;  %v10527_v50 = vld [vmem:[%s15688_s1 + $0x180c] sm:$0xf]  ;;  %v6143_v4 = vpack.c.bf16 %v6139_v39, %v6139_v39 }
 0x304   :  { %6090 = vmatpush.bf16.msra.mxu0 %v9257_v48  ;;  %v5864_v37 = vpop.f32.mrf.mxu2  ;;  %v9449_v57 = vor.u32 %v10495_v43, %v9446_v47  ;;  %v10549_v61 = vld [vmem:[%s15691_s3 + $0x38] sm:$0xff]  ;;  %v9577_v55 = vor.u32 %v10527_v50, %v9574_v51  ;;  %v10547_v62 = vld [vmem:[%s15691_s3 + $0x28] sm:$0xff]  ;;  %v6144_v46 = vpack.c.bf16 %v6140_v31, %v6140_v31  ;;  %v10572_v51 = vld [vmem:[%s15691_s3 + $0xf0] sm:$0xff] }
 0x305   :  { %6103 = vmatpush.bf16.msra.mxu1 %v9385_v41  ;;  %v10557_v41 = vld [vmem:[%s15691_s3 + $0x78] sm:$0xff]  ;;  %v10555_v63 = vld [vmem:[%s15691_s3 + $0x68] sm:$0xff] }
 0x306   :  { %6116 = vmatpush.bf16.msra.mxu2 %v9513_v36  ;;  %v10565_v36 = vld [vmem:[%s15691_s3 + $0xb8] sm:$0xff]  ;;  %v10543_v12 = vld [vmem:[%s15691_s3 + $0x8] sm:$0xff] }
 0x307   :  { %6081 = vmatpush.bf16.msrb.mxu3 %v9065_v0  ;;  %v10554_v0 = vld [vmem:[%s15691_s3 + $0x60] sm:$0xff]  ;;  %v10545_v60 = vld [vmem:[%s15691_s3 + $0x18] sm:$0xff]  ;;  %v10551_v52 = vld [vmem:[%s15691_s3 + $0x48] sm:$0xff] }
 0x308   :  { %6091 = vmatpush.bf16.msra.mxu0 %v9241_v9  ;;  %v10553_v24 = vld [vmem:[%s15691_s3 + $0x58] sm:$0xff] }
 0x309   :  { %6104 = vmatpush.bf16.msra.mxu1 %v9369_v3  ;;  %v10561_v22 = vld [vmem:[%s15691_s3 + $0x98] sm:$0xff] }
 0x30a   :  { %6117 = vmatpush.bf16.msra.mxu2 %v9497_v5  ;;  %6082 = vmatmul.bf16.vlgmr.msrb.gmra.mxu3 %v11904_v11  ;;  %v9190_v11 = vld [vmem:[%s15688_s1 + $0x1518] sm:$0xf0] }
 0x30b   :  { %6130 = vmatpush.bf16.msra.mxu3 %v9625_v20  ;;  %v9193_v48 = vor.u32 %v10431_v27, %v9190_v11 }
 0x30c   :  { %6092 = vmatpush.bf16.msra.mxu0 %v9225_v13  ;;  %v10559_v13 = vld [vmem:[%s15691_s3 + $0x88] sm:$0xff] }
 0x30d   :  { %6105 = vmatpush.bf16.msra.mxu1 %v9353_v29  ;;  %v5875_v59 = vpop.f32.mrf.mxu3  ;;  %v10542_v29 = vld [vmem:[%s15691_s3] sm:$0xff] }
 0x30e   :  { %6118 = vmatpush.bf16.msra.mxu2 %v9481_v14  ;;  %v5876_v2 = vadd.f32 %v5875_v59, %v15518_v25  ;;  %v10550_v14 = vld [vmem:[%s15691_s3 + $0x40] sm:$0xff] }
 0x30f   :  { %6131 = vmatpush.bf16.msra.mxu3 %v9609_v6  ;;  %v6141_v6 = vmax.f32 %v15332_v34, 0.0 }
 0x310   :  { %6093 = vmatpush.bf16.msra.mxu0 %v9209_v23 }
 0x311   :  { %6106 = vmatpush.bf16.msra.mxu1 %v9337_v26  ;;  %v6145_v49 = vpack.c.bf16 %v6141_v6, %v6141_v6 }
 0x312   :  { %6119 = vmatpush.bf16.msra.mxu2 %v9465_v45 }
 0x313   :  { %6132 = vmatpush.bf16.msra.mxu3 %v9593_v40 }
 0x314   :  { %6094 = vmatpush.bf16.msra.mxu0 %v9193_v48  ;;  %v10573_v48 = vld [vmem:[%s15691_s3 + $0xf8] sm:$0xff] }
 0x315   :  { %6107 = vmatpush.bf16.msra.mxu1 %v9321_v54  ;;  %v5901_v9 = vpop.f32.mrf.mxu1  ;;  %v5877_v3 = vpop.f32.mrf.mxu3 }
 0x316   :  { %6120 = vmatpush.bf16.msra.mxu2 %v9449_v57 }
 0x317   :  { %6133 = vmatpush.bf16.msra.mxu3 %v9577_v55  ;;  %6095 = vmatmul.bf16.vlgmr.msra.gmra.mxu0 %v11917_v16  ;;  %v5888_v16 = vpop.f32.mrf.mxu0 }
 0x318   :  { %6407 = vmatpush.bf16.msrb.mxu0 %v10549_v61  ;;  %6108 = vmatmul.bf16.vlgmr.msra.gmra.mxu1 %v11915_v15  ;;  %v10563_v15 = vld [vmem:[%s15691_s3 + $0xa8] sm:$0xff] }
 0x319   :  { %6420 = vmatpush.bf16.msrb.mxu1 %v10557_v41  ;;  %6121 = vmatmul.bf16.vlgmr.msra.gmra.mxu2 %v11925_v19  ;;  %v5889_v19 = vadd.f32 %v5888_v16, %v5876_v2  ;;  %v10571_v41 = vld [vmem:[%s15691_s3 + $0xe8] sm:$0xff]  ;;  %v10568_v2 = vld [vmem:[%s15691_s3 + $0xd0] sm:$0xff] }
 0x31a   :  { %6433 = vmatpush.bf16.msrb.mxu2 %v10565_v36  ;;  %9629 = vmatmul.msk.bf16.vlgmr.msra.gmra.mxu3 %vm4835_vm0, %v12028_v56  ;;  %v10562_v56 = vld [vmem:[%s15691_s3 + $0xa0] sm:$0xff] }
 0x31b   :  { %v5902_v5 = vadd.f32 %v5901_v9, %v5889_v19  ;;  %6446 = vmatpush.bf16.msrb.mxu3 %v10573_v48  ;;  %v10570_v36 = vld [vmem:[%s15691_s3 + $0xe0] sm:$0xff] }
 0x31c   :  { %6408 = vmatpush.bf16.msrb.mxu0 %v10548_v58  ;;  %v5914_v1 = vpop.f32.mrf.mxu2  ;;  %v10569_v58 = vld [vmem:[%s15691_s3 + $0xd8] sm:$0xff] }
 0x31d   :  { %6421 = vmatpush.bf16.msrb.mxu1 %v10556_v42  ;;  %v5915_v20 = vadd.f32 %v5914_v1, %v5902_v5  ;;  %v5903_v25 = vpop.f32.mrf.mxu1 }
 0x31e   :  { %6434 = vmatpush.bf16.msrb.mxu2 %v10564_v44 }
 0x31f   :  { %v5890_v8 = vpop.f32.mrf.mxu0  ;;  %6447 = vmatpush.bf16.msrb.mxu3 %v10572_v51 }
 0x320   :  { %6409 = vmatpush.bf16.msrb.mxu0 %v10547_v62 }
 0x321   :  { %6422 = vmatpush.bf16.msrb.mxu1 %v10555_v63  ;;  %v10567_v63 = vld [vmem:[%s15691_s3 + $0xc8] sm:$0xff] }
 0x322   :  { %6435 = vmatpush.bf16.msrb.mxu2 %v10563_v15 }
 0x323   :  { %6448 = vmatpush.bf16.msrb.mxu3 %v10571_v41 }
 0x324   :  { %6410 = vmatpush.bf16.msrb.mxu0 %v10546_v38  ;;  %v5916_v7 = vpop.f32.mrf.mxu2  ;;  %v10566_v38 = vld [vmem:[%s15691_s3 + $0xc0] sm:$0xff] }
 0x325   :  { %6423 = vmatpush.bf16.msrb.mxu1 %v10554_v0 }
 0x326   :  { %6436 = vmatpush.bf16.msrb.mxu2 %v10562_v56 }
 0x327   :  { %6449 = vmatpush.bf16.msrb.mxu3 %v10570_v36 }
 0x328   :  { %6411 = vmatpush.bf16.msrb.mxu0 %v10545_v60 }
 0x329   :  { %6424 = vmatpush.bf16.msrb.mxu1 %v10553_v24 }
 0x32a   :  { %6437 = vmatpush.bf16.msrb.mxu2 %v10561_v22 }
 0x32b   :  { %6450 = vmatpush.bf16.msrb.mxu3 %v10569_v58 }
 0x32c   :  { %6412 = vmatpush.bf16.msrb.mxu0 %v10544_v10 }
 0x32d   :  { %6425 = vmatpush.bf16.msrb.mxu1 %v10552_v30  ;;  %v5927_v21 = vpop.f32.mrf.mxu3 }
 0x32e   :  { %6438 = vmatpush.bf16.msrb.mxu2 %v10560_v33  ;;  %v5928_v28 = vadd.f32 %v5927_v21, %v5915_v20 }
 0x32f   :  { %6451 = vmatpush.bf16.msrb.mxu3 %v10568_v2 }
 0x330   :  { %6413 = vmatpush.bf16.msrb.mxu0 %v10543_v12 }
 0x331   :  { %6426 = vmatpush.bf16.msrb.mxu1 %v10551_v52 }
 0x332   :  { %6439 = vmatpush.bf16.msrb.mxu2 %v10559_v13 }
 0x333   :  { %6452 = vmatpush.bf16.msrb.mxu3 %v10567_v63 }
 0x334   :  { %6414 = vmatpush.bf16.msrb.mxu0 %v10542_v29  ;;  %v5940_v53 = vpop.f32.mrf.mxu0 }
 0x335   :  { %6427 = vmatpush.bf16.msrb.mxu1 %v10550_v14  ;;  %v5941_v17 = vadd.f32 %v5940_v53, %v5928_v28  ;;  %v5953_v23 = vpop.f32.mrf.mxu1  ;;  %v5929_v26 = vpop.f32.mrf.mxu3 }
 0x336   :  { %6440 = vmatpush.bf16.msrb.mxu2 %v10558_v35 }
 0x337   :  { %6415 = vmatmul.bf16.vlgmr.msrb.gmra.mxu0 %v6143_v4  ;;  %v5954_v45 = vadd.f32 %v5953_v23, %v5941_v17  ;;  %6453 = vmatpush.bf16.msrb.mxu3 %v10566_v38  ;;  %v10579_v4 = vld [vmem:[%s15692_s4] ss:$0 sm:$0xff] }
 0x338   :  { %6428 = vmatmul.bf16.vlgmr.msrb.gmra.mxu1 %v6144_v46 }
 0x339   :  { %6441 = vmatmul.bf16.vlgmr.msrb.gmra.mxu2 %v6145_v49 }
 0x33c   :  { %v5966_v27 = vpop.f32.mrf.mxu2  ;;  %v5942_v32 = vpop.f32.mrf.mxu0 }
 0x33d   :  { %v5967_v11 = vadd.f32 %v5966_v27, %v5954_v45  ;;  %v5955_v34 = vpop.f32.mrf.mxu1  ;;  %v10585_v27 = vmov 0  }
 0x33e   :  { %10577 = vset.pattern.permute.xlu1 %v10585_v27  ;;  %10578 = vset.pattern.permute.xlu0 %v10585_v27 }
 0x344   :  { %v5968_v37 = vpop.f32.mrf.mxu2 }
 0x34d   :  { %v5979_v40 = vpop.f32.mrf.mxu3 }
 0x34e   :  { %v5980_v19 = vadd.f32 %v5979_v40, %v5967_v11 }
 0x354   :  { %v5992_v18 = vpop.f32.mrf.mxu0 }
 0x355   :  { %v6005_v43 = vpop.f32.mrf.mxu1  ;;  %v5981_v47 = vpop.f32.mrf.mxu3  ;;  %v5993_v0 = vadd.f32 %v5992_v18, %v5980_v19  ;;  %v10587_v18 = vmov 6.0  }
 0x356   :  { %10580 = vrcp.f32 %v10587_v18 }
 0x357   :  { %v6006_v3 = vadd.f32 %v6005_v43, %v5993_v0 }
 0x35c   :  { %v6018_v50 = vpop.f32.mrf.mxu2  ;;  %v5994_v54 = vpop.f32.mrf.mxu0 }
 0x35d   :  { %v6007_v57 = vpop.f32.mrf.mxu1  ;;  %v6019_v56 = vadd.f32 %v6018_v50, %v6006_v3  ;;  %v10581_v43 = vpop.eup %10580 }
 0x35e   :  { %v6468_v47 = vmul.f32 6.0, %v10581_v43  ;;  %vm6472_vm2 = vweird.f32 %v10581_v43 }
 0x360   :  { %v6469_v48 = vsub.f32 1.0, %v6468_v47 }
 0x362   :  { %v6470_v50 = vmul.f32 %v10581_v43, %v6469_v48 }
 0x364   :  { %v6020_v61 = vpop.f32.mrf.mxu2  ;;  %v6471_v51 = vadd.f32 %v10581_v43, %v6470_v50 }
 0x366   :  { %v6473_v54 = vsel %vm6472_vm2, %v10581_v43, %v6471_v51 }
 0x36d   :  { %v6031_v55 = vpop.f32.mrf.mxu3 }
 0x36e   :  { %v6032_v5 = vadd.f32 %v6031_v55, %v6019_v56 }
 0x374   :  { %v6044_v42 = vpop.f32.mrf.mxu0 }
 0x375   :  { %v6057_v59 = vpop.f32.mrf.mxu1  ;;  %v6033_v44 = vpop.f32.mrf.mxu3  ;;  %v6045_v60 = vadd.f32 %v6044_v42, %v6032_v5 }
 0x377   :  { %v6058_v22 = vadd.f32 %v6057_v59, %v6045_v60 }
 0x37c   :  { %v6070_v62 = vpop.f32.mrf.mxu2  ;;  %v6046_v15 = vpop.f32.mrf.mxu0 }
 0x37d   :  { %v6059_v16 = vpop.f32.mrf.mxu1  ;;  %v6071_v1 = vadd.f32 %v6070_v62, %v6058_v22 }
 0x384   :  { %v6072_v9 = vpop.f32.mrf.mxu2 }
 0x38d   :  { %v6083_v24 = vpop.f32.mrf.mxu3 }
 0x38e   :  { %v6084_v20 = vadd.f32 %v6083_v24, %v6071_v1 }
 0x394   :  { %v6096_v8 = vpop.f32.mrf.mxu0 }
 0x395   :  { %v6109_v10 = vpop.f32.mrf.mxu1  ;;  %v6085_v30 = vpop.f32.mrf.mxu3  ;;  %v6097_v25 = vadd.f32 %v6096_v8, %v6084_v20 }
 0x397   :  { %v6110_v33 = vadd.f32 %v6109_v10, %v6097_v25 }
 0x39c   :  { %v6122_v12 = vpop.f32.mrf.mxu2  ;;  %v6098_v13 = vpop.f32.mrf.mxu0 }
 0x39d   :  { %v6123_v52 = vadd.f32 %v6122_v12, %v6110_v33  ;;  %v6111_v7 = vpop.f32.mrf.mxu1  ;;  %v6135_v29 = vpop.f32.mrf.mxu3 }
 0x39f   :  { %v6136_v14 = vadd.f32 %v6135_v29, %v6123_v52 }
 0x3a1   :  { %v6142_v39 = vmax.f32 %v6136_v14, 0.0 }
 0x3a3   :  { %v6146_v31 = vpack.c.bf16 %v6142_v39, %v6142_v39 }
 0x3a4   :  { %v6124_v35 = vpop.f32.mrf.mxu2 }
 0x3a5   :  { %6454 = vmatmul.bf16.vlgmr.msrb.gmra.mxu3 %v6146_v31  ;;  %v6137_v6 = vpop.f32.mrf.mxu3 }
 0x3b4   :  { %v6416_v46 = vpop.f32.mrf.mxu0 }
 0x3b5   :  { %v6429_v49 = vpop.f32.mrf.mxu1  ;;  %v6417_v21 = vadd.f32 %v10579_v4, %v6416_v46 }
 0x3b7   :  { %v6430_v28 = vadd.f32 %v6429_v49, %v6417_v21 }
 0x3bc   :  { %v6442_v53 = vpop.f32.mrf.mxu2  ;;  %v6418_v23 = vpop.f32.mrf.mxu0 }
 0x3bd   :  { %v6443_v17 = vadd.f32 %v6442_v53, %v6430_v28  ;;  %v6431_v26 = vpop.f32.mrf.mxu1 }
 0x3c4   :  { %v6444_v45 = vpop.f32.mrf.mxu2 }
 0x428   :  { %v6455_v11 = vpop.f32.mrf.mxu3 }
 0x429   :  { %v6456_v32 = vadd.f32 %v6455_v11, %v6443_v17 }
 0x42b   :  { %6477 = vperm.xlu1 %10577, %v6456_v32   ;;  %6460 = vrot.lane.b32.xlu0 %v6456_v32, %s10586_s28 }
 0x430   :  { %v6457_v34 = vpop.f32.mrf.mxu3 }
 0x49d   :  { %v6461_v37 = vpop.permute.xlu0 %6460  ;;  %v6478_v36 = vpop.permute.xlu1 %6477 }
 0x49e   :  { %v6464_v40 = vsel %vm6463_vm1, %v6461_v37, 0.0 }
 0x49f   :  { %6465 = vadd.xlane.f32.xlu0 %v6464_v40 }
 0x512   :  { %v6466_v57 = vpop.xlane.xlu0 %6465 }
 0x513   :  { %v6474_v61 = vmul.f32 %v6473_v54, %v6466_v57 }
 0x515   :  { %v6475_v41 = vsub.f32 %v6456_v32, %v6474_v61 }
 0x517   :  { %v6480_v55 = vadd.f32 %v6478_v36, %v6475_v41 }
 0x519   :  { %6482 = vrot.lane.b32.xlu1 %v6480_v55, %s10586_s28 }
 0x58b   :  { %v6483_v58 = vpop.permute.xlu1 %6482 }
 0x58c   :  { %6485 = vst.msk [vmem:[%s15693_s5] sm:$0xff] %vm6463_vm1, %v6483_v58 }

</bundles_post_ra>
